<compile_context>
chip_gen: v7x
topology: tpu7x:2x2x1
jax: 0.10.0
libtpu: 0.0.40
codegen_flags: <defaults>
</compile_context>

<pallas_src>
import jax
import jax.numpy as jnp
from jax import lax
from jax.experimental import pallas as pl
from jax.experimental.pallas import tpu as pltpu

_K = 5              # conv kernel size
_CP = 128           # padded channel width (lane-dense)
_NUM_CLASSES = 10
_VMEM_LIMIT = 32 * 1024 * 1024


def _round_up(a, b):
    return ((a + b - 1) // b) * b


# ---------------------------------------------------------------------------
# Kernel 1: fused 5x5 "same" conv + bias + ReLU + 2x2/2 max-pool (per image)
# ---------------------------------------------------------------------------
def _conv_relu_pool_kernel(x_ref, w_ref, b_ref, o_ref):
    """x_ref: (1, H+4, W+4, Cin) padded NHWC block (Cin == 1 or 128)
    w_ref: (25, Cin, 128)  per-tap weight matrices (Cout zero-padded to 128)
    b_ref: (1, 128)        f32 bias (zero-padded)
    o_ref: (1, H//2, W//2, 128) pooled bf16 output
    """
    _, _, _, cin = x_ref.shape
    _, h_out, w_out, cp = o_ref.shape
    w_conv = 2 * w_out

    def conv_row(r):
        # One conv output row (w_conv, 128), f32 accumulation over the 25 taps.
        acc = jnp.zeros((w_conv, cp), jnp.float32)
        for kh in range(_K):
            for kw in range(_K):
                xs = x_ref[0, r + kh, pl.ds(kw, w_conv), :]       # (W, Cin)
                wt = w_ref[kh * _K + kw, :, :]                    # (Cin, 128)
                if cin == 1:
                    # rank-1 tap: broadcast outer product on the VPU
                    acc = acc + xs.astype(jnp.float32) * wt.astype(jnp.float32)
                else:
                    # MXU tap: (W, 128) @ (128, 128), f32 accumulation
                    acc = acc + jnp.dot(xs, wt,
                                        preferred_element_type=jnp.float32)
        return jnp.maximum(acc + b_ref[...], 0.0)                 # bias + ReLU

    def body(ho, carry):
        # pool over H: elementwise max of the two conv rows of this pooled row
        rm = jnp.maximum(conv_row(2 * ho), conv_row(2 * ho + 1))  # (W, 128)
        # pool over W: max of even/odd sublane rows (static slices + concat)
        even = jnp.concatenate([rm[2 * i:2 * i + 1, :] for i in range(w_out)],
                               axis=0)
        odd = jnp.concatenate([rm[2 * i + 1:2 * i + 2, :] for i in range(w_out)],
                              axis=0)
        o_ref[0, ho, :, :] = jnp.maximum(even, odd).astype(o_ref.dtype)
        return carry

    lax.fori_loop(0, h_out, body, 0)


def conv_relu_pool(x_pad, w_taps, bias):
    """x_pad: (N, H+4, W+4, Cin); w_taps: (25, Cin, 128); bias: (1, 128)."""
    n, hp, wp, cin = x_pad.shape
    taps, cin_w, cp = w_taps.shape
    assert taps == _K * _K and cin_w == cin and cp == _CP
    h_out = (hp - (_K - 1)) // 2
    w_out = (wp - (_K - 1)) // 2

    flops = 2 * n * (2 * h_out) * (2 * w_out) * taps * cin * cp
    bytes_accessed = (x_pad.size * x_pad.dtype.itemsize
                      + w_taps.size * w_taps.dtype.itemsize
                      + bias.size * 4
                      + n * h_out * w_out * cp * 2)

    return pl.pallas_call(
        _conv_relu_pool_kernel,
        out_shape=jax.ShapeDtypeStruct((n, h_out, w_out, cp), jnp.bfloat16),
        grid=(n,),
        in_specs=[
            pl.BlockSpec((1, hp, wp, cin), lambda i: (i, 0, 0, 0)),
            pl.BlockSpec((taps, cin, cp), lambda i: (0, 0, 0)),
            pl.BlockSpec((1, cp), lambda i: (0, 0)),
        ],
        out_specs=pl.BlockSpec((1, h_out, w_out, cp), lambda i: (i, 0, 0, 0)),
        compiler_params=pltpu.CompilerParams(
            dimension_semantics=("parallel",),
            vmem_limit_bytes=_VMEM_LIMIT),
        cost_estimate=pl.CostEstimate(flops=flops, transcendentals=0,
                                      bytes_accessed=bytes_accessed),
    )(x_pad, w_taps, bias)


# ---------------------------------------------------------------------------
# Kernel 2: fused fc1 + ReLU + fc2 + softmax, tiled over batch rows
# ---------------------------------------------------------------------------
def _fc_head_kernel(x_ref, w1_ref, b1_ref, w2_ref, b2_ref, o_ref):
    h = jnp.dot(x_ref[...], w1_ref[...], preferred_element_type=jnp.float32)
    h = jnp.maximum(h + b1_ref[...], 0.0)
    logits = jnp.dot(h.astype(jnp.bfloat16), w2_ref[...],
                     preferred_element_type=jnp.float32) + b2_ref[...]
    # mask the zero-padded class lanes so they vanish under softmax
    lane = lax.broadcasted_iota(jnp.int32, logits.shape, 1)
    logits = jnp.where(lane < _NUM_CLASSES, logits, -1e30)
    m = jnp.max(logits, axis=-1, keepdims=True)
    e = jnp.exp(logits - m)
    s = jnp.sum(e, axis=-1, keepdims=True)
    o_ref[...] = (e * pl.reciprocal(s, approx=True)).astype(o_ref.dtype)


def fc_head(feats, w1, b1, w2, b2):
    n, k1 = feats.shape
    tm = min(128, _round_up(n, 8))
    n_pad = _round_up(n, tm)
    x = feats
    if n_pad != n:
        x = jnp.pad(x, ((0, n_pad - n), (0, 0)))
    x = x.astype(jnp.bfloat16)

    flops = 2 * n_pad * k1 * _CP + 2 * n_pad * _CP * _CP
    bytes_accessed = (n_pad * k1 * 2 + k1 * _CP * 2 + _CP * _CP * 2
                      + 2 * _CP * 4 + n_pad * _CP * 4)

    return pl.pallas_call(
        _fc_head_kernel,
        out_shape=jax.ShapeDtypeStruct((n_pad, _CP), jnp.float32),
        grid=(n_pad // tm,),
        in_specs=[
            pl.BlockSpec((tm, k1), lambda i: (i, 0)),
            pl.BlockSpec((k1, _CP), lambda i: (0, 0)),
            pl.BlockSpec((1, _CP), lambda i: (0, 0)),
            pl.BlockSpec((_CP, _CP), lambda i: (0, 0)),
            pl.BlockSpec((1, _CP), lambda i: (0, 0)),
        ],
        out_specs=pl.BlockSpec((tm, _CP), lambda i: (i, 0)),
        compiler_params=pltpu.CompilerParams(
            dimension_semantics=("parallel",),
            vmem_limit_bytes=_VMEM_LIMIT),
        cost_estimate=pl.CostEstimate(flops=flops, transcendentals=n_pad * _CP,
                                      bytes_accessed=bytes_accessed),
    )(x, w1, b1, w2, b2)


# ---------------------------------------------------------------------------
# Full forward (matches PyTorch `classifier.forward`)
# ---------------------------------------------------------------------------
@jax.jit
def classifier_forward(x_nchw, kp):
    n = x_nchw.shape[0]
    # NCHW (N,1,28,28) -> NHWC is a free reshape because C == 1.
    x = x_nchw.reshape(n, 28, 28, 1).astype(jnp.float32)
    x = jnp.pad(x, ((0, 0), (2, 2), (2, 2), (0, 0)))            # (N,32,32,1)
    y = conv_relu_pool(x, kp["w1"], kp["b1"])                   # (N,14,14,128)
    y = jnp.pad(y, ((0, 0), (2, 2), (2, 2), (0, 0)))            # (N,18,18,128)
    y = conv_relu_pool(y, kp["w2"], kp["b2"])                   # (N,7,7,128)
    feats = y.reshape(n, 7 * 7 * _CP)                           # free flatten (h,w,c)
    probs = fc_head(feats, kp["wfc1"], kp["bfc1"], kp["wfc2"], kp["bfc2"])
    return probs[:n, :_NUM_CLASSES]


# ---------------------------------------------------------------------------
# Parameters: PyTorch layout -> kernel layout (one-time preprocessing)
# ---------------------------------------------------------------------------
def init_torch_params(key):
    ks = jax.random.split(key, 8)

    def rnd(k, shape, fan_in):
        return jax.random.normal(k, shape, jnp.float32) / jnp.sqrt(fan_in)

    return {
        "conv1_w": rnd(ks[0], (32, 1, 5, 5), 25.0),
        "conv1_b": rnd(ks[1], (32,), 25.0),
        "conv2_w": rnd(ks[2], (64, 32, 5, 5), 800.0),
        "conv2_b": rnd(ks[3], (64,), 800.0),
        "fc1_w": rnd(ks[4], (128, 7 * 7 * 64), 3136.0),
        "fc1_b": rnd(ks[5], (128,), 3136.0),
        "fc2_w": rnd(ks[6], (10, 128), 128.0),
        "fc2_b": rnd(ks[7], (10,), 128.0),
    }


def prepare_params(p):
    """Convert PyTorch-layout weights into the padded kernel layout (one-time)."""
    def conv_taps(w, cin_pad, dtype):
        cout, cin, kh, kw = w.shape
        t = jnp.transpose(w, (2, 3, 1, 0)).reshape(kh * kw, cin, cout)
        t = jnp.pad(t, ((0, 0), (0, cin_pad - cin), (0, _CP - cout)))
        return t.astype(dtype)

    def pad_bias(b):
        return jnp.pad(b, (0, _CP - b.shape[0])).reshape(1, _CP).astype(jnp.float32)

    # fc1: PyTorch rows are ordered (c, h, w); permute to (h, w, c_padded) so
    # the NHWC conv output can be flattened with a plain reshape (no transpose).
    wfc1 = p["fc1_w"].reshape(128, 64, 7, 7)          # (out, c, h, w)
    wfc1 = jnp.transpose(wfc1, (2, 3, 1, 0))          # (h, w, c, out)
    wfc1 = jnp.pad(wfc1, ((0, 0), (0, 0), (0, _CP - 64), (0, 0)))
    wfc1 = wfc1.reshape(7 * 7 * _CP, 128).astype(jnp.bfloat16)

    wfc2 = jnp.pad(p["fc2_w"].T, ((0, 0), (0, _CP - _NUM_CLASSES))).astype(jnp.bfloat16)
    bfc2 = jnp.pad(p["fc2_b"], (0, _CP - _NUM_CLASSES)).reshape(1, _CP).astype(jnp.float32)

    return {
        "w1": conv_taps(p["conv1_w"], 1, jnp.float32),      # (25, 1, 128)
        "b1": pad_bias(p["conv1_b"]),                       # (1, 128)
        "w2": conv_taps(p["conv2_w"], _CP, jnp.bfloat16),   # (25, 128, 128)
        "b2": pad_bias(p["conv2_b"]),                       # (1, 128)
        "wfc1": wfc1,                                       # (6272, 128)
        "bfc1": p["fc1_b"].reshape(1, 128).astype(jnp.float32),
        "wfc2": wfc2,                                       # (128, 128)
        "bfc2": bfc2,                                       # (1, 128)
    }


# ---------------------------------------------------------------------------
# Pure-JAX reference (f32) for correctness checking
# ---------------------------------------------------------------------------
def reference_forward(x_nchw, p):
    x = jnp.transpose(x_nchw, (0, 2, 3, 1)).astype(jnp.float32)

    def conv(xh, w, b):
        wh = jnp.transpose(w, (2, 3, 1, 0))   # HWIO
        y = lax.conv_general_dilated(
            xh, wh, window_strides=(1, 1), padding=((2, 2), (2, 2)),
            dimension_numbers=("NHWC", "HWIO", "NHWC"))
        return jnp.maximum(y + b, 0.0)

    def pool(y):
        return lax.reduce_window(y, -jnp.inf, lax.max,
                                 (1, 2, 2, 1), (1, 2, 2, 1), "VALID")

    y = pool(conv(x, p["conv1_w"], p["conv1_b"]))
    y = pool(conv(y, p["conv2_w"], p["conv2_b"]))
    n = y.shape[0]
    feats = jnp.transpose(y, (0, 3, 1, 2)).reshape(n, -1)   # PyTorch NCHW flatten
    h = jnp.maximum(feats @ p["fc1_w"].T + p["fc1_b"], 0.0)
    logits = h @ p["fc2_w"].T + p["fc2_b"]
    m = jnp.max(logits, axis=-1, keepdims=True)
    e = jnp.exp(logits - m)
    return e / jnp.sum(e, axis=-1, keepdims=True)


if __name__ == "__main__":
    key = jax.random.PRNGKey(0)
    k_x, k_p = jax.random.split(key)
    # fc expects 7*7*64 features -> spatial must be 28 (28 -> 14 -> 7); batch=2.
    x = jax.random.normal(k_x, (2, 1, 28, 28), jnp.float32)
    torch_params = init_torch_params(k_p)
    kparams = prepare_params(torch_params)

    out = classifier_forward(x, kparams)
    out = jax.block_until_ready(out)

    assert out.shape == (2, _NUM_CLASSES), out.shape
    ref = reference_forward(x, torch_params)
    err = float(jnp.max(jnp.abs(out - ref)))
    row_err = float(jnp.max(jnp.abs(jnp.sum(out, axis=-1) - 1.0)))
    assert err < 5e-2, f"max abs diff vs reference: {err}"
    assert row_err < 5e-3, f"softmax rows do not sum to 1: {row_err}"
    print("KERNEL_OK")
</pallas_src>

<mosaic_0001>
module attributes {stable_mosaic.version = 11 : i64} {
  func.func @_conv_relu_pool_kernel(%arg0: i32, %arg1: memref<1x32x32x1xf32, #tpu.memory_space<vmem>>, %arg2: memref<25x1x128xf32, #tpu.memory_space<vmem>>, %arg3: memref<1x128xf32, #tpu.memory_space<vmem>>, %arg4: memref<1x14x14x128xbf16, #tpu.memory_space<vmem>>) attributes {dimension_semantics = [#tpu.dimension_semantics<parallel>], iteration_bounds = array<i64: 2>, scalar_prefetch = 0 : i64, scratch_operands = 0 : i64, tpu.core_type = #tpu.core_type<tc>, window_params = [{transform_indices = @transform_0, window_bounds = array<i64: 1, 32, 32, 1>}, {pipeline_mode = #tpu.pipeline_mode<synchronous>, transform_indices = @transform_1, window_bounds = array<i64: 25, 1, 128>}, {pipeline_mode = #tpu.pipeline_mode<synchronous>, transform_indices = @transform_2, window_bounds = array<i64: 1, 128>}, {transform_indices = @transform_3, window_bounds = array<i64: 1, 14, 14, 128>}]} {
    %c0_i32 = arith.constant 0 : i32
    %c14_i32 = arith.constant 14 : i32
    %0 = arith.addi %c0_i32, %c14_i32 : i32
    %c1_i32 = arith.constant 1 : i32
    scf.for %arg5 = %c0_i32 to %0 step %c1_i32  : i32 {
      %c2_i32 = arith.constant 2 : i32
      %1 = arith.muli %c2_i32, %arg5 : i32
      %cst = arith.constant 0.000000e+00 : f32
      %2 = vector.broadcast %cst : f32 to vector<28x128xf32>
      %c0_i32_1 = arith.constant 0 : i32
      %3 = arith.addi %1, %c0_i32_1 : i32
      %c0 = arith.constant 0 : index
      %4 = arith.index_cast %3 : i32 to index
      %c0_2 = arith.constant 0 : index
      %c0_3 = arith.constant 0 : index
      %5 = vector.load %arg1[%c0, %4, %c0_2, %c0_3] : memref<1x32x32x1xf32, #tpu.memory_space<vmem>>, vector<1x1x28x1xf32>
      %6 = vector.shape_cast %5 : vector<1x1x28x1xf32> to vector<28x1xf32>
      %c0_4 = arith.constant 0 : index
      %c0_5 = arith.constant 0 : index
      %c0_6 = arith.constant 0 : index
      %7 = vector.load %arg2[%c0_4, %c0_5, %c0_6] : memref<25x1x128xf32, #tpu.memory_space<vmem>>, vector<1x1x128xf32>
      %8 = vector.shape_cast %7 : vector<1x1x128xf32> to vector<1x128xf32>
      %9 = vector.broadcast %6 : vector<28x1xf32> to vector<28x128xf32>
      %10 = vector.broadcast %8 : vector<1x128xf32> to vector<28x128xf32>
      %11 = arith.mulf %9, %10 : vector<28x128xf32>
      %12 = arith.addf %2, %11 : vector<28x128xf32>
      %c0_i32_7 = arith.constant 0 : i32
      %13 = arith.addi %1, %c0_i32_7 : i32
      %c0_8 = arith.constant 0 : index
      %14 = arith.index_cast %13 : i32 to index
      %c1 = arith.constant 1 : index
      %c0_9 = arith.constant 0 : index
      %15 = vector.load %arg1[%c0_8, %14, %c1, %c0_9] : memref<1x32x32x1xf32, #tpu.memory_space<vmem>>, vector<1x1x28x1xf32>
      %16 = vector.shape_cast %15 : vector<1x1x28x1xf32> to vector<28x1xf32>
      %c1_10 = arith.constant 1 : index
      %c0_11 = arith.constant 0 : index
      %c0_12 = arith.constant 0 : index
      %17 = vector.load %arg2[%c1_10, %c0_11, %c0_12] : memref<25x1x128xf32, #tpu.memory_space<vmem>>, vector<1x1x128xf32>
      %18 = vector.shape_cast %17 : vector<1x1x128xf32> to vector<1x128xf32>
      %19 = vector.broadcast %16 : vector<28x1xf32> to vector<28x128xf32>
      %20 = vector.broadcast %18 : vector<1x128xf32> to vector<28x128xf32>
      %21 = arith.mulf %19, %20 : vector<28x128xf32>
      %22 = arith.addf %12, %21 : vector<28x128xf32>
      %c0_i32_13 = arith.constant 0 : i32
      %23 = arith.addi %1, %c0_i32_13 : i32
      %c0_14 = arith.constant 0 : index
      %24 = arith.index_cast %23 : i32 to index
      %c2 = arith.constant 2 : index
      %c0_15 = arith.constant 0 : index
      %25 = vector.load %arg1[%c0_14, %24, %c2, %c0_15] : memref<1x32x32x1xf32, #tpu.memory_space<vmem>>, vector<1x1x28x1xf32>
      %26 = vector.shape_cast %25 : vector<1x1x28x1xf32> to vector<28x1xf32>
      %c2_16 = arith.constant 2 : index
      %c0_17 = arith.constant 0 : index
      %c0_18 = arith.constant 0 : index
      %27 = vector.load %arg2[%c2_16, %c0_17, %c0_18] : memref<25x1x128xf32, #tpu.memory_space<vmem>>, vector<1x1x128xf32>
      %28 = vector.shape_cast %27 : vector<1x1x128xf32> to vector<1x128xf32>
      %29 = vector.broadcast %26 : vector<28x1xf32> to vector<28x128xf32>
      %30 = vector.broadcast %28 : vector<1x128xf32> to vector<28x128xf32>
      %31 = arith.mulf %29, %30 : vector<28x128xf32>
      %32 = arith.addf %22, %31 : vector<28x128xf32>
      %c0_i32_19 = arith.constant 0 : i32
      %33 = arith.addi %1, %c0_i32_19 : i32
      %c0_20 = arith.constant 0 : index
      %34 = arith.index_cast %33 : i32 to index
      %c3 = arith.constant 3 : index
      %c0_21 = arith.constant 0 : index
      %35 = vector.load %arg1[%c0_20, %34, %c3, %c0_21] : memref<1x32x32x1xf32, #tpu.memory_space<vmem>>, vector<1x1x28x1xf32>
      %36 = vector.shape_cast %35 : vector<1x1x28x1xf32> to vector<28x1xf32>
      %c3_22 = arith.constant 3 : index
      %c0_23 = arith.constant 0 : index
      %c0_24 = arith.constant 0 : index
      %37 = vector.load %arg2[%c3_22, %c0_23, %c0_24] : memref<25x1x128xf32, #tpu.memory_space<vmem>>, vector<1x1x128xf32>
      %38 = vector.shape_cast %37 : vector<1x1x128xf32> to vector<1x128xf32>
      %39 = vector.broadcast %36 : vector<28x1xf32> to vector<28x128xf32>
      %40 = vector.broadcast %38 : vector<1x128xf32> to vector<28x128xf32>
      %41 = arith.mulf %39, %40 : vector<28x128xf32>
      %42 = arith.addf %32, %41 : vector<28x128xf32>
      %c0_i32_25 = arith.constant 0 : i32
      %43 = arith.addi %1, %c0_i32_25 : i32
      %c0_26 = arith.constant 0 : index
      %44 = arith.index_cast %43 : i32 to index
      %c4 = arith.constant 4 : index
      %c0_27 = arith.constant 0 : index
      %45 = vector.load %arg1[%c0_26, %44, %c4, %c0_27] : memref<1x32x32x1xf32, #tpu.memory_space<vmem>>, vector<1x1x28x1xf32>
      %46 = vector.shape_cast %45 : vector<1x1x28x1xf32> to vector<28x1xf32>
      %c4_28 = arith.constant 4 : index
      %c0_29 = arith.constant 0 : index
      %c0_30 = arith.constant 0 : index
      %47 = vector.load %arg2[%c4_28, %c0_29, %c0_30] : memref<25x1x128xf32, #tpu.memory_space<vmem>>, vector<1x1x128xf32>
      %48 = vector.shape_cast %47 : vector<1x1x128xf32> to vector<1x128xf32>
      %49 = vector.broadcast %46 : vector<28x1xf32> to vector<28x128xf32>
      %50 = vector.broadcast %48 : vector<1x128xf32> to vector<28x128xf32>
      %51 = arith.mulf %49, %50 : vector<28x128xf32>
      %52 = arith.addf %42, %51 : vector<28x128xf32>
      %c1_i32_31 = arith.constant 1 : i32
      %53 = arith.addi %1, %c1_i32_31 : i32
      %c0_32 = arith.constant 0 : index
      %54 = arith.index_cast %53 : i32 to index
      %c0_33 = arith.constant 0 : index
      %c0_34 = arith.constant 0 : index
      %55 = vector.load %arg1[%c0_32, %54, %c0_33, %c0_34] : memref<1x32x32x1xf32, #tpu.memory_space<vmem>>, vector<1x1x28x1xf32>
      %56 = vector.shape_cast %55 : vector<1x1x28x1xf32> to vector<28x1xf32>
      %c5 = arith.constant 5 : index
      %c0_35 = arith.constant 0 : index
      %c0_36 = arith.constant 0 : index
      %57 = vector.load %arg2[%c5, %c0_35, %c0_36] : memref<25x1x128xf32, #tpu.memory_space<vmem>>, vector<1x1x128xf32>
      %58 = vector.shape_cast %57 : vector<1x1x128xf32> to vector<1x128xf32>
      %59 = vector.broadcast %56 : vector<28x1xf32> to vector<28x128xf32>
      %60 = vector.broadcast %58 : vector<1x128xf32> to vector<28x128xf32>
      %61 = arith.mulf %59, %60 : vector<28x128xf32>
      %62 = arith.addf %52, %61 : vector<28x128xf32>
      %c1_i32_37 = arith.constant 1 : i32
      %63 = arith.addi %1, %c1_i32_37 : i32
      %c0_38 = arith.constant 0 : index
      %64 = arith.index_cast %63 : i32 to index
      %c1_39 = arith.constant 1 : index
      %c0_40 = arith.constant 0 : index
      %65 = vector.load %arg1[%c0_38, %64, %c1_39, %c0_40] : memref<1x32x32x1xf32, #tpu.memory_space<vmem>>, vector<1x1x28x1xf32>
      %66 = vector.shape_cast %65 : vector<1x1x28x1xf32> to vector<28x1xf32>
      %c6 = arith.constant 6 : index
      %c0_41 = arith.constant 0 : index
      %c0_42 = arith.constant 0 : index
      %67 = vector.load %arg2[%c6, %c0_41, %c0_42] : memref<25x1x128xf32, #tpu.memory_space<vmem>>, vector<1x1x128xf32>
      %68 = vector.shape_cast %67 : vector<1x1x128xf32> to vector<1x128xf32>
      %69 = vector.broadcast %66 : vector<28x1xf32> to vector<28x128xf32>
      %70 = vector.broadcast %68 : vector<1x128xf32> to vector<28x128xf32>
      %71 = arith.mulf %69, %70 : vector<28x128xf32>
      %72 = arith.addf %62, %71 : vector<28x128xf32>
      %c1_i32_43 = arith.constant 1 : i32
      %73 = arith.addi %1, %c1_i32_43 : i32
      %c0_44 = arith.constant 0 : index
      %74 = arith.index_cast %73 : i32 to index
      %c2_45 = arith.constant 2 : index
      %c0_46 = arith.constant 0 : index
      %75 = vector.load %arg1[%c0_44, %74, %c2_45, %c0_46] : memref<1x32x32x1xf32, #tpu.memory_space<vmem>>, vector<1x1x28x1xf32>
      %76 = vector.shape_cast %75 : vector<1x1x28x1xf32> to vector<28x1xf32>
      %c7 = arith.constant 7 : index
      %c0_47 = arith.constant 0 : index
      %c0_48 = arith.constant 0 : index
      %77 = vector.load %arg2[%c7, %c0_47, %c0_48] : memref<25x1x128xf32, #tpu.memory_space<vmem>>, vector<1x1x128xf32>
      %78 = vector.shape_cast %77 : vector<1x1x128xf32> to vector<1x128xf32>
      %79 = vector.broadcast %76 : vector<28x1xf32> to vector<28x128xf32>
      %80 = vector.broadcast %78 : vector<1x128xf32> to vector<28x128xf32>
      %81 = arith.mulf %79, %80 : vector<28x128xf32>
      %82 = arith.addf %72, %81 : vector<28x128xf32>
      %c1_i32_49 = arith.constant 1 : i32
      %83 = arith.addi %1, %c1_i32_49 : i32
      %c0_50 = arith.constant 0 : index
      %84 = arith.index_cast %83 : i32 to index
      %c3_51 = arith.constant 3 : index
      %c0_52 = arith.constant 0 : index
      %85 = vector.load %arg1[%c0_50, %84, %c3_51, %c0_52] : memref<1x32x32x1xf32, #tpu.memory_space<vmem>>, vector<1x1x28x1xf32>
      %86 = vector.shape_cast %85 : vector<1x1x28x1xf32> to vector<28x1xf32>
      %c8 = arith.constant 8 : index
      %c0_53 = arith.constant 0 : index
      %c0_54 = arith.constant 0 : index
      %87 = vector.load %arg2[%c8, %c0_53, %c0_54] : memref<25x1x128xf32, #tpu.memory_space<vmem>>, vector<1x1x128xf32>
      %88 = vector.shape_cast %87 : vector<1x1x128xf32> to vector<1x128xf32>
      %89 = vector.broadcast %86 : vector<28x1xf32> to vector<28x128xf32>
      %90 = vector.broadcast %88 : vector<1x128xf32> to vector<28x128xf32>
      %91 = arith.mulf %89, %90 : vector<28x128xf32>
      %92 = arith.addf %82, %91 : vector<28x128xf32>
      %c1_i32_55 = arith.constant 1 : i32
      %93 = arith.addi %1, %c1_i32_55 : i32
      %c0_56 = arith.constant 0 : index
      %94 = arith.index_cast %93 : i32 to index
      %c4_57 = arith.constant 4 : index
      %c0_58 = arith.constant 0 : index
      %95 = vector.load %arg1[%c0_56, %94, %c4_57, %c0_58] : memref<1x32x32x1xf32, #tpu.memory_space<vmem>>, vector<1x1x28x1xf32>
      %96 = vector.shape_cast %95 : vector<1x1x28x1xf32> to vector<28x1xf32>
      %c9 = arith.constant 9 : index
      %c0_59 = arith.constant 0 : index
      %c0_60 = arith.constant 0 : index
      %97 = vector.load %arg2[%c9, %c0_59, %c0_60] : memref<25x1x128xf32, #tpu.memory_space<vmem>>, vector<1x1x128xf32>
      %98 = vector.shape_cast %97 : vector<1x1x128xf32> to vector<1x128xf32>
      %99 = vector.broadcast %96 : vector<28x1xf32> to vector<28x128xf32>
      %100 = vector.broadcast %98 : vector<1x128xf32> to vector<28x128xf32>
      %101 = arith.mulf %99, %100 : vector<28x128xf32>
      %102 = arith.addf %92, %101 : vector<28x128xf32>
      %c2_i32_61 = arith.constant 2 : i32
      %103 = arith.addi %1, %c2_i32_61 : i32
      %c0_62 = arith.constant 0 : index
      %104 = arith.index_cast %103 : i32 to index
      %c0_63 = arith.constant 0 : index
      %c0_64 = arith.constant 0 : index
      %105 = vector.load %arg1[%c0_62, %104, %c0_63, %c0_64] : memref<1x32x32x1xf32, #tpu.memory_space<vmem>>, vector<1x1x28x1xf32>
      %106 = vector.shape_cast %105 : vector<1x1x28x1xf32> to vector<28x1xf32>
      %c10 = arith.constant 10 : index
      %c0_65 = arith.constant 0 : index
      %c0_66 = arith.constant 0 : index
      %107 = vector.load %arg2[%c10, %c0_65, %c0_66] : memref<25x1x128xf32, #tpu.memory_space<vmem>>, vector<1x1x128xf32>
      %108 = vector.shape_cast %107 : vector<1x1x128xf32> to vector<1x128xf32>
      %109 = vector.broadcast %106 : vector<28x1xf32> to vector<28x128xf32>
      %110 = vector.broadcast %108 : vector<1x128xf32> to vector<28x128xf32>
      %111 = arith.mulf %109, %110 : vector<28x128xf32>
      %112 = arith.addf %102, %111 : vector<28x128xf32>
      %c2_i32_67 = arith.constant 2 : i32
      %113 = arith.addi %1, %c2_i32_67 : i32
      %c0_68 = arith.constant 0 : index
      %114 = arith.index_cast %113 : i32 to index
      %c1_69 = arith.constant 1 : index
      %c0_70 = arith.constant 0 : index
      %115 = vector.load %arg1[%c0_68, %114, %c1_69, %c0_70] : memref<1x32x32x1xf32, #tpu.memory_space<vmem>>, vector<1x1x28x1xf32>
      %116 = vector.shape_cast %115 : vector<1x1x28x1xf32> to vector<28x1xf32>
      %c11 = arith.constant 11 : index
      %c0_71 = arith.constant 0 : index
      %c0_72 = arith.constant 0 : index
      %117 = vector.load %arg2[%c11, %c0_71, %c0_72] : memref<25x1x128xf32, #tpu.memory_space<vmem>>, vector<1x1x128xf32>
      %118 = vector.shape_cast %117 : vector<1x1x128xf32> to vector<1x128xf32>
      %119 = vector.broadcast %116 : vector<28x1xf32> to vector<28x128xf32>
      %120 = vector.broadcast %118 : vector<1x128xf32> to vector<28x128xf32>
      %121 = arith.mulf %119, %120 : vector<28x128xf32>
      %122 = arith.addf %112, %121 : vector<28x128xf32>
      %c2_i32_73 = arith.constant 2 : i32
      %123 = arith.addi %1, %c2_i32_73 : i32
      %c0_74 = arith.constant 0 : index
      %124 = arith.index_cast %123 : i32 to index
      %c2_75 = arith.constant 2 : index
      %c0_76 = arith.constant 0 : index
      %125 = vector.load %arg1[%c0_74, %124, %c2_75, %c0_76] : memref<1x32x32x1xf32, #tpu.memory_space<vmem>>, vector<1x1x28x1xf32>
      %126 = vector.shape_cast %125 : vector<1x1x28x1xf32> to vector<28x1xf32>
      %c12 = arith.constant 12 : index
      %c0_77 = arith.constant 0 : index
      %c0_78 = arith.constant 0 : index
      %127 = vector.load %arg2[%c12, %c0_77, %c0_78] : memref<25x1x128xf32, #tpu.memory_space<vmem>>, vector<1x1x128xf32>
      %128 = vector.shape_cast %127 : vector<1x1x128xf32> to vector<1x128xf32>
      %129 = vector.broadcast %126 : vector<28x1xf32> to vector<28x128xf32>
      %130 = vector.broadcast %128 : vector<1x128xf32> to vector<28x128xf32>
      %131 = arith.mulf %129, %130 : vector<28x128xf32>
      %132 = arith.addf %122, %131 : vector<28x128xf32>
      %c2_i32_79 = arith.constant 2 : i32
      %133 = arith.addi %1, %c2_i32_79 : i32
      %c0_80 = arith.constant 0 : index
      %134 = arith.index_cast %133 : i32 to index
      %c3_81 = arith.constant 3 : index
      %c0_82 = arith.constant 0 : index
      %135 = vector.load %arg1[%c0_80, %134, %c3_81, %c0_82] : memref<1x32x32x1xf32, #tpu.memory_space<vmem>>, vector<1x1x28x1xf32>
      %136 = vector.shape_cast %135 : vector<1x1x28x1xf32> to vector<28x1xf32>
      %c13 = arith.constant 13 : index
      %c0_83 = arith.constant 0 : index
      %c0_84 = arith.constant 0 : index
      %137 = vector.load %arg2[%c13, %c0_83, %c0_84] : memref<25x1x128xf32, #tpu.memory_space<vmem>>, vector<1x1x128xf32>
      %138 = vector.shape_cast %137 : vector<1x1x128xf32> to vector<1x128xf32>
      %139 = vector.broadcast %136 : vector<28x1xf32> to vector<28x128xf32>
      %140 = vector.broadcast %138 : vector<1x128xf32> to vector<28x128xf32>
      %141 = arith.mulf %139, %140 : vector<28x128xf32>
      %142 = arith.addf %132, %141 : vector<28x128xf32>
      %c2_i32_85 = arith.constant 2 : i32
      %143 = arith.addi %1, %c2_i32_85 : i32
      %c0_86 = arith.constant 0 : index
      %144 = arith.index_cast %143 : i32 to index
      %c4_87 = arith.constant 4 : index
      %c0_88 = arith.constant 0 : index
      %145 = vector.load %arg1[%c0_86, %144, %c4_87, %c0_88] : memref<1x32x32x1xf32, #tpu.memory_space<vmem>>, vector<1x1x28x1xf32>
      %146 = vector.shape_cast %145 : vector<1x1x28x1xf32> to vector<28x1xf32>
      %c14 = arith.constant 14 : index
      %c0_89 = arith.constant 0 : index
      %c0_90 = arith.constant 0 : index
      %147 = vector.load %arg2[%c14, %c0_89, %c0_90] : memref<25x1x128xf32, #tpu.memory_space<vmem>>, vector<1x1x128xf32>
      %148 = vector.shape_cast %147 : vector<1x1x128xf32> to vector<1x128xf32>
      %149 = vector.broadcast %146 : vector<28x1xf32> to vector<28x128xf32>
      %150 = vector.broadcast %148 : vector<1x128xf32> to vector<28x128xf32>
      %151 = arith.mulf %149, %150 : vector<28x128xf32>
      %152 = arith.addf %142, %151 : vector<28x128xf32>
      %c3_i32 = arith.constant 3 : i32
      %153 = arith.addi %1, %c3_i32 : i32
      %c0_91 = arith.constant 0 : index
      %154 = arith.index_cast %153 : i32 to index
      %c0_92 = arith.constant 0 : index
      %c0_93 = arith.constant 0 : index
      %155 = vector.load %arg1[%c0_91, %154, %c0_92, %c0_93] : memref<1x32x32x1xf32, #tpu.memory_space<vmem>>, vector<1x1x28x1xf32>
      %156 = vector.shape_cast %155 : vector<1x1x28x1xf32> to vector<28x1xf32>
      %c15 = arith.constant 15 : index
      %c0_94 = arith.constant 0 : index
      %c0_95 = arith.constant 0 : index
      %157 = vector.load %arg2[%c15, %c0_94, %c0_95] : memref<25x1x128xf32, #tpu.memory_space<vmem>>, vector<1x1x128xf32>
      %158 = vector.shape_cast %157 : vector<1x1x128xf32> to vector<1x128xf32>
      %159 = vector.broadcast %156 : vector<28x1xf32> to vector<28x128xf32>
      %160 = vector.broadcast %158 : vector<1x128xf32> to vector<28x128xf32>
      %161 = arith.mulf %159, %160 : vector<28x128xf32>
      %162 = arith.addf %152, %161 : vector<28x128xf32>
      %c3_i32_96 = arith.constant 3 : i32
      %163 = arith.addi %1, %c3_i32_96 : i32
      %c0_97 = arith.constant 0 : index
      %164 = arith.index_cast %163 : i32 to index
      %c1_98 = arith.constant 1 : index
      %c0_99 = arith.constant 0 : index
      %165 = vector.load %arg1[%c0_97, %164, %c1_98, %c0_99] : memref<1x32x32x1xf32, #tpu.memory_space<vmem>>, vector<1x1x28x1xf32>
      %166 = vector.shape_cast %165 : vector<1x1x28x1xf32> to vector<28x1xf32>
      %c16 = arith.constant 16 : index
      %c0_100 = arith.constant 0 : index
      %c0_101 = arith.constant 0 : index
      %167 = vector.load %arg2[%c16, %c0_100, %c0_101] : memref<25x1x128xf32, #tpu.memory_space<vmem>>, vector<1x1x128xf32>
      %168 = vector.shape_cast %167 : vector<1x1x128xf32> to vector<1x128xf32>
      %169 = vector.broadcast %166 : vector<28x1xf32> to vector<28x128xf32>
      %170 = vector.broadcast %168 : vector<1x128xf32> to vector<28x128xf32>
      %171 = arith.mulf %169, %170 : vector<28x128xf32>
      %172 = arith.addf %162, %171 : vector<28x128xf32>
      %c3_i32_102 = arith.constant 3 : i32
      %173 = arith.addi %1, %c3_i32_102 : i32
      %c0_103 = arith.constant 0 : index
      %174 = arith.index_cast %173 : i32 to index
      %c2_104 = arith.constant 2 : index
      %c0_105 = arith.constant 0 : index
      %175 = vector.load %arg1[%c0_103, %174, %c2_104, %c0_105] : memref<1x32x32x1xf32, #tpu.memory_space<vmem>>, vector<1x1x28x1xf32>
      %176 = vector.shape_cast %175 : vector<1x1x28x1xf32> to vector<28x1xf32>
      %c17 = arith.constant 17 : index
      %c0_106 = arith.constant 0 : index
      %c0_107 = arith.constant 0 : index
      %177 = vector.load %arg2[%c17, %c0_106, %c0_107] : memref<25x1x128xf32, #tpu.memory_space<vmem>>, vector<1x1x128xf32>
      %178 = vector.shape_cast %177 : vector<1x1x128xf32> to vector<1x128xf32>
      %179 = vector.broadcast %176 : vector<28x1xf32> to vector<28x128xf32>
      %180 = vector.broadcast %178 : vector<1x128xf32> to vector<28x128xf32>
      %181 = arith.mulf %179, %180 : vector<28x128xf32>
      %182 = arith.addf %172, %181 : vector<28x128xf32>
      %c3_i32_108 = arith.constant 3 : i32
      %183 = arith.addi %1, %c3_i32_108 : i32
      %c0_109 = arith.constant 0 : index
      %184 = arith.index_cast %183 : i32 to index
      %c3_110 = arith.constant 3 : index
      %c0_111 = arith.constant 0 : index
      %185 = vector.load %arg1[%c0_109, %184, %c3_110, %c0_111] : memref<1x32x32x1xf32, #tpu.memory_space<vmem>>, vector<1x1x28x1xf32>
      %186 = vector.shape_cast %185 : vector<1x1x28x1xf32> to vector<28x1xf32>
      %c18 = arith.constant 18 : index
      %c0_112 = arith.constant 0 : index
      %c0_113 = arith.constant 0 : index
      %187 = vector.load %arg2[%c18, %c0_112, %c0_113] : memref<25x1x128xf32, #tpu.memory_space<vmem>>, vector<1x1x128xf32>
      %188 = vector.shape_cast %187 : vector<1x1x128xf32> to vector<1x128xf32>
      %189 = vector.broadcast %186 : vector<28x1xf32> to vector<28x128xf32>
      %190 = vector.broadcast %188 : vector<1x128xf32> to vector<28x128xf32>
      %191 = arith.mulf %189, %190 : vector<28x128xf32>
      %192 = arith.addf %182, %191 : vector<28x128xf32>
      %c3_i32_114 = arith.constant 3 : i32
      %193 = arith.addi %1, %c3_i32_114 : i32
      %c0_115 = arith.constant 0 : index
      %194 = arith.index_cast %193 : i32 to index
      %c4_116 = arith.constant 4 : index
      %c0_117 = arith.constant 0 : index
      %195 = vector.load %arg1[%c0_115, %194, %c4_116, %c0_117] : memref<1x32x32x1xf32, #tpu.memory_space<vmem>>, vector<1x1x28x1xf32>
      %196 = vector.shape_cast %195 : vector<1x1x28x1xf32> to vector<28x1xf32>
      %c19 = arith.constant 19 : index
      %c0_118 = arith.constant 0 : index
      %c0_119 = arith.constant 0 : index
      %197 = vector.load %arg2[%c19, %c0_118, %c0_119] : memref<25x1x128xf32, #tpu.memory_space<vmem>>, vector<1x1x128xf32>
      %198 = vector.shape_cast %197 : vector<1x1x128xf32> to vector<1x128xf32>
      %199 = vector.broadcast %196 : vector<28x1xf32> to vector<28x128xf32>
      %200 = vector.broadcast %198 : vector<1x128xf32> to vector<28x128xf32>
      %201 = arith.mulf %199, %200 : vector<28x128xf32>
      %202 = arith.addf %192, %201 : vector<28x128xf32>
      %c4_i32 = arith.constant 4 : i32
      %203 = arith.addi %1, %c4_i32 : i32
      %c0_120 = arith.constant 0 : index
      %204 = arith.index_cast %203 : i32 to index
      %c0_121 = arith.constant 0 : index
      %c0_122 = arith.constant 0 : index
      %205 = vector.load %arg1[%c0_120, %204, %c0_121, %c0_122] : memref<1x32x32x1xf32, #tpu.memory_space<vmem>>, vector<1x1x28x1xf32>
      %206 = vector.shape_cast %205 : vector<1x1x28x1xf32> to vector<28x1xf32>
      %c20 = arith.constant 20 : index
      %c0_123 = arith.constant 0 : index
      %c0_124 = arith.constant 0 : index
      %207 = vector.load %arg2[%c20, %c0_123, %c0_124] : memref<25x1x128xf32, #tpu.memory_space<vmem>>, vector<1x1x128xf32>
      %208 = vector.shape_cast %207 : vector<1x1x128xf32> to vector<1x128xf32>
      %209 = vector.broadcast %206 : vector<28x1xf32> to vector<28x128xf32>
      %210 = vector.broadcast %208 : vector<1x128xf32> to vector<28x128xf32>
      %211 = arith.mulf %209, %210 : vector<28x128xf32>
      %212 = arith.addf %202, %211 : vector<28x128xf32>
      %c4_i32_125 = arith.constant 4 : i32
      %213 = arith.addi %1, %c4_i32_125 : i32
      %c0_126 = arith.constant 0 : index
      %214 = arith.index_cast %213 : i32 to index
      %c1_127 = arith.constant 1 : index
      %c0_128 = arith.constant 0 : index
      %215 = vector.load %arg1[%c0_126, %214, %c1_127, %c0_128] : memref<1x32x32x1xf32, #tpu.memory_space<vmem>>, vector<1x1x28x1xf32>
      %216 = vector.shape_cast %215 : vector<1x1x28x1xf32> to vector<28x1xf32>
      %c21 = arith.constant 21 : index
      %c0_129 = arith.constant 0 : index
      %c0_130 = arith.constant 0 : index
      %217 = vector.load %arg2[%c21, %c0_129, %c0_130] : memref<25x1x128xf32, #tpu.memory_space<vmem>>, vector<1x1x128xf32>
      %218 = vector.shape_cast %217 : vector<1x1x128xf32> to vector<1x128xf32>
      %219 = vector.broadcast %216 : vector<28x1xf32> to vector<28x128xf32>
      %220 = vector.broadcast %218 : vector<1x128xf32> to vector<28x128xf32>
      %221 = arith.mulf %219, %220 : vector<28x128xf32>
      %222 = arith.addf %212, %221 : vector<28x128xf32>
      %c4_i32_131 = arith.constant 4 : i32
      %223 = arith.addi %1, %c4_i32_131 : i32
      %c0_132 = arith.constant 0 : index
      %224 = arith.index_cast %223 : i32 to index
      %c2_133 = arith.constant 2 : index
      %c0_134 = arith.constant 0 : index
      %225 = vector.load %arg1[%c0_132, %224, %c2_133, %c0_134] : memref<1x32x32x1xf32, #tpu.memory_space<vmem>>, vector<1x1x28x1xf32>
      %226 = vector.shape_cast %225 : vector<1x1x28x1xf32> to vector<28x1xf32>
      %c22 = arith.constant 22 : index
      %c0_135 = arith.constant 0 : index
      %c0_136 = arith.constant 0 : index
      %227 = vector.load %arg2[%c22, %c0_135, %c0_136] : memref<25x1x128xf32, #tpu.memory_space<vmem>>, vector<1x1x128xf32>
      %228 = vector.shape_cast %227 : vector<1x1x128xf32> to vector<1x128xf32>
      %229 = vector.broadcast %226 : vector<28x1xf32> to vector<28x128xf32>
      %230 = vector.broadcast %228 : vector<1x128xf32> to vector<28x128xf32>
      %231 = arith.mulf %229, %230 : vector<28x128xf32>
      %232 = arith.addf %222, %231 : vector<28x128xf32>
      %c4_i32_137 = arith.constant 4 : i32
      %233 = arith.addi %1, %c4_i32_137 : i32
      %c0_138 = arith.constant 0 : index
      %234 = arith.index_cast %233 : i32 to index
      %c3_139 = arith.constant 3 : index
      %c0_140 = arith.constant 0 : index
      %235 = vector.load %arg1[%c0_138, %234, %c3_139, %c0_140] : memref<1x32x32x1xf32, #tpu.memory_space<vmem>>, vector<1x1x28x1xf32>
      %236 = vector.shape_cast %235 : vector<1x1x28x1xf32> to vector<28x1xf32>
      %c23 = arith.constant 23 : index
      %c0_141 = arith.constant 0 : index
      %c0_142 = arith.constant 0 : index
      %237 = vector.load %arg2[%c23, %c0_141, %c0_142] : memref<25x1x128xf32, #tpu.memory_space<vmem>>, vector<1x1x128xf32>
      %238 = vector.shape_cast %237 : vector<1x1x128xf32> to vector<1x128xf32>
      %239 = vector.broadcast %236 : vector<28x1xf32> to vector<28x128xf32>
      %240 = vector.broadcast %238 : vector<1x128xf32> to vector<28x128xf32>
      %241 = arith.mulf %239, %240 : vector<28x128xf32>
      %242 = arith.addf %232, %241 : vector<28x128xf32>
      %c4_i32_143 = arith.constant 4 : i32
      %243 = arith.addi %1, %c4_i32_143 : i32
      %c0_144 = arith.constant 0 : index
      %244 = arith.index_cast %243 : i32 to index
      %c4_145 = arith.constant 4 : index
      %c0_146 = arith.constant 0 : index
      %245 = vector.load %arg1[%c0_144, %244, %c4_145, %c0_146] : memref<1x32x32x1xf32, #tpu.memory_space<vmem>>, vector<1x1x28x1xf32>
      %246 = vector.shape_cast %245 : vector<1x1x28x1xf32> to vector<28x1xf32>
      %c24 = arith.constant 24 : index
      %c0_147 = arith.constant 0 : index
      %c0_148 = arith.constant 0 : index
      %247 = vector.load %arg2[%c24, %c0_147, %c0_148] : memref<25x1x128xf32, #tpu.memory_space<vmem>>, vector<1x1x128xf32>
      %248 = vector.shape_cast %247 : vector<1x1x128xf32> to vector<1x128xf32>
      %249 = vector.broadcast %246 : vector<28x1xf32> to vector<28x128xf32>
      %250 = vector.broadcast %248 : vector<1x128xf32> to vector<28x128xf32>
      %251 = arith.mulf %249, %250 : vector<28x128xf32>
      %252 = arith.addf %242, %251 : vector<28x128xf32>
      %c0_149 = arith.constant 0 : index
      %c0_150 = arith.constant 0 : index
      %253 = vector.load %arg3[%c0_149, %c0_150] : memref<1x128xf32, #tpu.memory_space<vmem>>, vector<1x128xf32>
      %254 = vector.broadcast %253 : vector<1x128xf32> to vector<28x128xf32>
      %255 = arith.addf %252, %254 : vector<28x128xf32>
      %cst_151 = arith.constant 0.000000e+00 : f32
      %256 = vector.broadcast %cst_151 : f32 to vector<28x128xf32>
      %257 = arith.maximumf %255, %256 : vector<28x128xf32>
      %c2_i32_152 = arith.constant 2 : i32
      %258 = arith.muli %c2_i32_152, %arg5 : i32
      %c1_i32_153 = arith.constant 1 : i32
      %259 = arith.addi %258, %c1_i32_153 : i32
      %cst_154 = arith.constant 0.000000e+00 : f32
      %260 = vector.broadcast %cst_154 : f32 to vector<28x128xf32>
      %c0_i32_155 = arith.constant 0 : i32
      %261 = arith.addi %259, %c0_i32_155 : i32
      %c0_156 = arith.constant 0 : index
      %262 = arith.index_cast %261 : i32 to index
      %c0_157 = arith.constant 0 : index
      %c0_158 = arith.constant 0 : index
      %263 = vector.load %arg1[%c0_156, %262, %c0_157, %c0_158] : memref<1x32x32x1xf32, #tpu.memory_space<vmem>>, vector<1x1x28x1xf32>
      %264 = vector.shape_cast %263 : vector<1x1x28x1xf32> to vector<28x1xf32>
      %c0_159 = arith.constant 0 : index
      %c0_160 = arith.constant 0 : index
      %c0_161 = arith.constant 0 : index
      %265 = vector.load %arg2[%c0_159, %c0_160, %c0_161] : memref<25x1x128xf32, #tpu.memory_space<vmem>>, vector<1x1x128xf32>
      %266 = vector.shape_cast %265 : vector<1x1x128xf32> to vector<1x128xf32>
      %267 = vector.broadcast %264 : vector<28x1xf32> to vector<28x128xf32>
      %268 = vector.broadcast %266 : vector<1x128xf32> to vector<28x128xf32>
      %269 = arith.mulf %267, %268 : vector<28x128xf32>
      %270 = arith.addf %260, %269 : vector<28x128xf32>
      %c0_i32_162 = arith.constant 0 : i32
      %271 = arith.addi %259, %c0_i32_162 : i32
      %c0_163 = arith.constant 0 : index
      %272 = arith.index_cast %271 : i32 to index
      %c1_164 = arith.constant 1 : index
      %c0_165 = arith.constant 0 : index
      %273 = vector.load %arg1[%c0_163, %272, %c1_164, %c0_165] : memref<1x32x32x1xf32, #tpu.memory_space<vmem>>, vector<1x1x28x1xf32>
      %274 = vector.shape_cast %273 : vector<1x1x28x1xf32> to vector<28x1xf32>
      %c1_166 = arith.constant 1 : index
      %c0_167 = arith.constant 0 : index
      %c0_168 = arith.constant 0 : index
      %275 = vector.load %arg2[%c1_166, %c0_167, %c0_168] : memref<25x1x128xf32, #tpu.memory_space<vmem>>, vector<1x1x128xf32>
      %276 = vector.shape_cast %275 : vector<1x1x128xf32> to vector<1x128xf32>
      %277 = vector.broadcast %274 : vector<28x1xf32> to vector<28x128xf32>
      %278 = vector.broadcast %276 : vector<1x128xf32> to vector<28x128xf32>
      %279 = arith.mulf %277, %278 : vector<28x128xf32>
      %280 = arith.addf %270, %279 : vector<28x128xf32>
      %c0_i32_169 = arith.constant 0 : i32
      %281 = arith.addi %259, %c0_i32_169 : i32
      %c0_170 = arith.constant 0 : index
      %282 = arith.index_cast %281 : i32 to index
      %c2_171 = arith.constant 2 : index
      %c0_172 = arith.constant 0 : index
      %283 = vector.load %arg1[%c0_170, %282, %c2_171, %c0_172] : memref<1x32x32x1xf32, #tpu.memory_space<vmem>>, vector<1x1x28x1xf32>
      %284 = vector.shape_cast %283 : vector<1x1x28x1xf32> to vector<28x1xf32>
      %c2_173 = arith.constant 2 : index
      %c0_174 = arith.constant 0 : index
      %c0_175 = arith.constant 0 : index
      %285 = vector.load %arg2[%c2_173, %c0_174, %c0_175] : memref<25x1x128xf32, #tpu.memory_space<vmem>>, vector<1x1x128xf32>
      %286 = vector.shape_cast %285 : vector<1x1x128xf32> to vector<1x128xf32>
      %287 = vector.broadcast %284 : vector<28x1xf32> to vector<28x128xf32>
      %288 = vector.broadcast %286 : vector<1x128xf32> to vector<28x128xf32>
      %289 = arith.mulf %287, %288 : vector<28x128xf32>
      %290 = arith.addf %280, %289 : vector<28x128xf32>
      %c0_i32_176 = arith.constant 0 : i32
      %291 = arith.addi %259, %c0_i32_176 : i32
      %c0_177 = arith.constant 0 : index
      %292 = arith.index_cast %291 : i32 to index
      %c3_178 = arith.constant 3 : index
      %c0_179 = arith.constant 0 : index
      %293 = vector.load %arg1[%c0_177, %292, %c3_178, %c0_179] : memref<1x32x32x1xf32, #tpu.memory_space<vmem>>, vector<1x1x28x1xf32>
      %294 = vector.shape_cast %293 : vector<1x1x28x1xf32> to vector<28x1xf32>
      %c3_180 = arith.constant 3 : index
      %c0_181 = arith.constant 0 : index
      %c0_182 = arith.constant 0 : index
      %295 = vector.load %arg2[%c3_180, %c0_181, %c0_182] : memref<25x1x128xf32, #tpu.memory_space<vmem>>, vector<1x1x128xf32>
      %296 = vector.shape_cast %295 : vector<1x1x128xf32> to vector<1x128xf32>
      %297 = vector.broadcast %294 : vector<28x1xf32> to vector<28x128xf32>
      %298 = vector.broadcast %296 : vector<1x128xf32> to vector<28x128xf32>
      %299 = arith.mulf %297, %298 : vector<28x128xf32>
      %300 = arith.addf %290, %299 : vector<28x128xf32>
      %c0_i32_183 = arith.constant 0 : i32
      %301 = arith.addi %259, %c0_i32_183 : i32
      %c0_184 = arith.constant 0 : index
      %302 = arith.index_cast %301 : i32 to index
      %c4_185 = arith.constant 4 : index
      %c0_186 = arith.constant 0 : index
      %303 = vector.load %arg1[%c0_184, %302, %c4_185, %c0_186] : memref<1x32x32x1xf32, #tpu.memory_space<vmem>>, vector<1x1x28x1xf32>
      %304 = vector.shape_cast %303 : vector<1x1x28x1xf32> to vector<28x1xf32>
      %c4_187 = arith.constant 4 : index
      %c0_188 = arith.constant 0 : index
      %c0_189 = arith.constant 0 : index
      %305 = vector.load %arg2[%c4_187, %c0_188, %c0_189] : memref<25x1x128xf32, #tpu.memory_space<vmem>>, vector<1x1x128xf32>
      %306 = vector.shape_cast %305 : vector<1x1x128xf32> to vector<1x128xf32>
      %307 = vector.broadcast %304 : vector<28x1xf32> to vector<28x128xf32>
      %308 = vector.broadcast %306 : vector<1x128xf32> to vector<28x128xf32>
      %309 = arith.mulf %307, %308 : vector<28x128xf32>
      %310 = arith.addf %300, %309 : vector<28x128xf32>
      %c1_i32_190 = arith.constant 1 : i32
      %311 = arith.addi %259, %c1_i32_190 : i32
      %c0_191 = arith.constant 0 : index
      %312 = arith.index_cast %311 : i32 to index
      %c0_192 = arith.constant 0 : index
      %c0_193 = arith.constant 0 : index
      %313 = vector.load %arg1[%c0_191, %312, %c0_192, %c0_193] : memref<1x32x32x1xf32, #tpu.memory_space<vmem>>, vector<1x1x28x1xf32>
      %314 = vector.shape_cast %313 : vector<1x1x28x1xf32> to vector<28x1xf32>
      %c5_194 = arith.constant 5 : index
      %c0_195 = arith.constant 0 : index
      %c0_196 = arith.constant 0 : index
      %315 = vector.load %arg2[%c5_194, %c0_195, %c0_196] : memref<25x1x128xf32, #tpu.memory_space<vmem>>, vector<1x1x128xf32>
      %316 = vector.shape_cast %315 : vector<1x1x128xf32> to vector<1x128xf32>
      %317 = vector.broadcast %314 : vector<28x1xf32> to vector<28x128xf32>
      %318 = vector.broadcast %316 : vector<1x128xf32> to vector<28x128xf32>
      %319 = arith.mulf %317, %318 : vector<28x128xf32>
      %320 = arith.addf %310, %319 : vector<28x128xf32>
      %c1_i32_197 = arith.constant 1 : i32
      %321 = arith.addi %259, %c1_i32_197 : i32
      %c0_198 = arith.constant 0 : index
      %322 = arith.index_cast %321 : i32 to index
      %c1_199 = arith.constant 1 : index
      %c0_200 = arith.constant 0 : index
      %323 = vector.load %arg1[%c0_198, %322, %c1_199, %c0_200] : memref<1x32x32x1xf32, #tpu.memory_space<vmem>>, vector<1x1x28x1xf32>
      %324 = vector.shape_cast %323 : vector<1x1x28x1xf32> to vector<28x1xf32>
      %c6_201 = arith.constant 6 : index
      %c0_202 = arith.constant 0 : index
      %c0_203 = arith.constant 0 : index
      %325 = vector.load %arg2[%c6_201, %c0_202, %c0_203] : memref<25x1x128xf32, #tpu.memory_space<vmem>>, vector<1x1x128xf32>
      %326 = vector.shape_cast %325 : vector<1x1x128xf32> to vector<1x128xf32>
      %327 = vector.broadcast %324 : vector<28x1xf32> to vector<28x128xf32>
      %328 = vector.broadcast %326 : vector<1x128xf32> to vector<28x128xf32>
      %329 = arith.mulf %327, %328 : vector<28x128xf32>
      %330 = arith.addf %320, %329 : vector<28x128xf32>
      %c1_i32_204 = arith.constant 1 : i32
      %331 = arith.addi %259, %c1_i32_204 : i32
      %c0_205 = arith.constant 0 : index
      %332 = arith.index_cast %331 : i32 to index
      %c2_206 = arith.constant 2 : index
      %c0_207 = arith.constant 0 : index
      %333 = vector.load %arg1[%c0_205, %332, %c2_206, %c0_207] : memref<1x32x32x1xf32, #tpu.memory_space<vmem>>, vector<1x1x28x1xf32>
      %334 = vector.shape_cast %333 : vector<1x1x28x1xf32> to vector<28x1xf32>
      %c7_208 = arith.constant 7 : index
      %c0_209 = arith.constant 0 : index
      %c0_210 = arith.constant 0 : index
      %335 = vector.load %arg2[%c7_208, %c0_209, %c0_210] : memref<25x1x128xf32, #tpu.memory_space<vmem>>, vector<1x1x128xf32>
      %336 = vector.shape_cast %335 : vector<1x1x128xf32> to vector<1x128xf32>
      %337 = vector.broadcast %334 : vector<28x1xf32> to vector<28x128xf32>
      %338 = vector.broadcast %336 : vector<1x128xf32> to vector<28x128xf32>
      %339 = arith.mulf %337, %338 : vector<28x128xf32>
      %340 = arith.addf %330, %339 : vector<28x128xf32>
      %c1_i32_211 = arith.constant 1 : i32
      %341 = arith.addi %259, %c1_i32_211 : i32
      %c0_212 = arith.constant 0 : index
      %342 = arith.index_cast %341 : i32 to index
      %c3_213 = arith.constant 3 : index
      %c0_214 = arith.constant 0 : index
      %343 = vector.load %arg1[%c0_212, %342, %c3_213, %c0_214] : memref<1x32x32x1xf32, #tpu.memory_space<vmem>>, vector<1x1x28x1xf32>
      %344 = vector.shape_cast %343 : vector<1x1x28x1xf32> to vector<28x1xf32>
      %c8_215 = arith.constant 8 : index
      %c0_216 = arith.constant 0 : index
      %c0_217 = arith.constant 0 : index
      %345 = vector.load %arg2[%c8_215, %c0_216, %c0_217] : memref<25x1x128xf32, #tpu.memory_space<vmem>>, vector<1x1x128xf32>
      %346 = vector.shape_cast %345 : vector<1x1x128xf32> to vector<1x128xf32>
      %347 = vector.broadcast %344 : vector<28x1xf32> to vector<28x128xf32>
      %348 = vector.broadcast %346 : vector<1x128xf32> to vector<28x128xf32>
      %349 = arith.mulf %347, %348 : vector<28x128xf32>
      %350 = arith.addf %340, %349 : vector<28x128xf32>
      %c1_i32_218 = arith.constant 1 : i32
      %351 = arith.addi %259, %c1_i32_218 : i32
      %c0_219 = arith.constant 0 : index
      %352 = arith.index_cast %351 : i32 to index
      %c4_220 = arith.constant 4 : index
      %c0_221 = arith.constant 0 : index
      %353 = vector.load %arg1[%c0_219, %352, %c4_220, %c0_221] : memref<1x32x32x1xf32, #tpu.memory_space<vmem>>, vector<1x1x28x1xf32>
      %354 = vector.shape_cast %353 : vector<1x1x28x1xf32> to vector<28x1xf32>
      %c9_222 = arith.constant 9 : index
      %c0_223 = arith.constant 0 : index
      %c0_224 = arith.constant 0 : index
      %355 = vector.load %arg2[%c9_222, %c0_223, %c0_224] : memref<25x1x128xf32, #tpu.memory_space<vmem>>, vector<1x1x128xf32>
      %356 = vector.shape_cast %355 : vector<1x1x128xf32> to vector<1x128xf32>
      %357 = vector.broadcast %354 : vector<28x1xf32> to vector<28x128xf32>
      %358 = vector.broadcast %356 : vector<1x128xf32> to vector<28x128xf32>
      %359 = arith.mulf %357, %358 : vector<28x128xf32>
      %360 = arith.addf %350, %359 : vector<28x128xf32>
      %c2_i32_225 = arith.constant 2 : i32
      %361 = arith.addi %259, %c2_i32_225 : i32
      %c0_226 = arith.constant 0 : index
      %362 = arith.index_cast %361 : i32 to index
      %c0_227 = arith.constant 0 : index
      %c0_228 = arith.constant 0 : index
      %363 = vector.load %arg1[%c0_226, %362, %c0_227, %c0_228] : memref<1x32x32x1xf32, #tpu.memory_space<vmem>>, vector<1x1x28x1xf32>
      %364 = vector.shape_cast %363 : vector<1x1x28x1xf32> to vector<28x1xf32>
      %c10_229 = arith.constant 10 : index
      %c0_230 = arith.constant 0 : index
      %c0_231 = arith.constant 0 : index
      %365 = vector.load %arg2[%c10_229, %c0_230, %c0_231] : memref<25x1x128xf32, #tpu.memory_space<vmem>>, vector<1x1x128xf32>
      %366 = vector.shape_cast %365 : vector<1x1x128xf32> to vector<1x128xf32>
      %367 = vector.broadcast %364 : vector<28x1xf32> to vector<28x128xf32>
      %368 = vector.broadcast %366 : vector<1x128xf32> to vector<28x128xf32>
      %369 = arith.mulf %367, %368 : vector<28x128xf32>
      %370 = arith.addf %360, %369 : vector<28x128xf32>
      %c2_i32_232 = arith.constant 2 : i32
      %371 = arith.addi %259, %c2_i32_232 : i32
      %c0_233 = arith.constant 0 : index
      %372 = arith.index_cast %371 : i32 to index
      %c1_234 = arith.constant 1 : index
      %c0_235 = arith.constant 0 : index
      %373 = vector.load %arg1[%c0_233, %372, %c1_234, %c0_235] : memref<1x32x32x1xf32, #tpu.memory_space<vmem>>, vector<1x1x28x1xf32>
      %374 = vector.shape_cast %373 : vector<1x1x28x1xf32> to vector<28x1xf32>
      %c11_236 = arith.constant 11 : index
      %c0_237 = arith.constant 0 : index
      %c0_238 = arith.constant 0 : index
      %375 = vector.load %arg2[%c11_236, %c0_237, %c0_238] : memref<25x1x128xf32, #tpu.memory_space<vmem>>, vector<1x1x128xf32>
      %376 = vector.shape_cast %375 : vector<1x1x128xf32> to vector<1x128xf32>
      %377 = vector.broadcast %374 : vector<28x1xf32> to vector<28x128xf32>
      %378 = vector.broadcast %376 : vector<1x128xf32> to vector<28x128xf32>
      %379 = arith.mulf %377, %378 : vector<28x128xf32>
      %380 = arith.addf %370, %379 : vector<28x128xf32>
      %c2_i32_239 = arith.constant 2 : i32
      %381 = arith.addi %259, %c2_i32_239 : i32
      %c0_240 = arith.constant 0 : index
      %382 = arith.index_cast %381 : i32 to index
      %c2_241 = arith.constant 2 : index
      %c0_242 = arith.constant 0 : index
      %383 = vector.load %arg1[%c0_240, %382, %c2_241, %c0_242] : memref<1x32x32x1xf32, #tpu.memory_space<vmem>>, vector<1x1x28x1xf32>
      %384 = vector.shape_cast %383 : vector<1x1x28x1xf32> to vector<28x1xf32>
      %c12_243 = arith.constant 12 : index
      %c0_244 = arith.constant 0 : index
      %c0_245 = arith.constant 0 : index
      %385 = vector.load %arg2[%c12_243, %c0_244, %c0_245] : memref<25x1x128xf32, #tpu.memory_space<vmem>>, vector<1x1x128xf32>
      %386 = vector.shape_cast %385 : vector<1x1x128xf32> to vector<1x128xf32>
      %387 = vector.broadcast %384 : vector<28x1xf32> to vector<28x128xf32>
      %388 = vector.broadcast %386 : vector<1x128xf32> to vector<28x128xf32>
      %389 = arith.mulf %387, %388 : vector<28x128xf32>
      %390 = arith.addf %380, %389 : vector<28x128xf32>
      %c2_i32_246 = arith.constant 2 : i32
      %391 = arith.addi %259, %c2_i32_246 : i32
      %c0_247 = arith.constant 0 : index
      %392 = arith.index_cast %391 : i32 to index
      %c3_248 = arith.constant 3 : index
      %c0_249 = arith.constant 0 : index
      %393 = vector.load %arg1[%c0_247, %392, %c3_248, %c0_249] : memref<1x32x32x1xf32, #tpu.memory_space<vmem>>, vector<1x1x28x1xf32>
      %394 = vector.shape_cast %393 : vector<1x1x28x1xf32> to vector<28x1xf32>
      %c13_250 = arith.constant 13 : index
      %c0_251 = arith.constant 0 : index
      %c0_252 = arith.constant 0 : index
      %395 = vector.load %arg2[%c13_250, %c0_251, %c0_252] : memref<25x1x128xf32, #tpu.memory_space<vmem>>, vector<1x1x128xf32>
      %396 = vector.shape_cast %395 : vector<1x1x128xf32> to vector<1x128xf32>
      %397 = vector.broadcast %394 : vector<28x1xf32> to vector<28x128xf32>
      %398 = vector.broadcast %396 : vector<1x128xf32> to vector<28x128xf32>
      %399 = arith.mulf %397, %398 : vector<28x128xf32>
      %400 = arith.addf %390, %399 : vector<28x128xf32>
      %c2_i32_253 = arith.constant 2 : i32
      %401 = arith.addi %259, %c2_i32_253 : i32
      %c0_254 = arith.constant 0 : index
      %402 = arith.index_cast %401 : i32 to index
      %c4_255 = arith.constant 4 : index
      %c0_256 = arith.constant 0 : index
      %403 = vector.load %arg1[%c0_254, %402, %c4_255, %c0_256] : memref<1x32x32x1xf32, #tpu.memory_space<vmem>>, vector<1x1x28x1xf32>
      %404 = vector.shape_cast %403 : vector<1x1x28x1xf32> to vector<28x1xf32>
      %c14_257 = arith.constant 14 : index
      %c0_258 = arith.constant 0 : index
      %c0_259 = arith.constant 0 : index
      %405 = vector.load %arg2[%c14_257, %c0_258, %c0_259] : memref<25x1x128xf32, #tpu.memory_space<vmem>>, vector<1x1x128xf32>
      %406 = vector.shape_cast %405 : vector<1x1x128xf32> to vector<1x128xf32>
      %407 = vector.broadcast %404 : vector<28x1xf32> to vector<28x128xf32>
      %408 = vector.broadcast %406 : vector<1x128xf32> to vector<28x128xf32>
      %409 = arith.mulf %407, %408 : vector<28x128xf32>
      %410 = arith.addf %400, %409 : vector<28x128xf32>
      %c3_i32_260 = arith.constant 3 : i32
      %411 = arith.addi %259, %c3_i32_260 : i32
      %c0_261 = arith.constant 0 : index
      %412 = arith.index_cast %411 : i32 to index
      %c0_262 = arith.constant 0 : index
      %c0_263 = arith.constant 0 : index
      %413 = vector.load %arg1[%c0_261, %412, %c0_262, %c0_263] : memref<1x32x32x1xf32, #tpu.memory_space<vmem>>, vector<1x1x28x1xf32>
      %414 = vector.shape_cast %413 : vector<1x1x28x1xf32> to vector<28x1xf32>
      %c15_264 = arith.constant 15 : index
      %c0_265 = arith.constant 0 : index
      %c0_266 = arith.constant 0 : index
      %415 = vector.load %arg2[%c15_264, %c0_265, %c0_266] : memref<25x1x128xf32, #tpu.memory_space<vmem>>, vector<1x1x128xf32>
      %416 = vector.shape_cast %415 : vector<1x1x128xf32> to vector<1x128xf32>
      %417 = vector.broadcast %414 : vector<28x1xf32> to vector<28x128xf32>
      %418 = vector.broadcast %416 : vector<1x128xf32> to vector<28x128xf32>
      %419 = arith.mulf %417, %418 : vector<28x128xf32>
      %420 = arith.addf %410, %419 : vector<28x128xf32>
      %c3_i32_267 = arith.constant 3 : i32
      %421 = arith.addi %259, %c3_i32_267 : i32
      %c0_268 = arith.constant 0 : index
      %422 = arith.index_cast %421 : i32 to index
      %c1_269 = arith.constant 1 : index
      %c0_270 = arith.constant 0 : index
      %423 = vector.load %arg1[%c0_268, %422, %c1_269, %c0_270] : memref<1x32x32x1xf32, #tpu.memory_space<vmem>>, vector<1x1x28x1xf32>
      %424 = vector.shape_cast %423 : vector<1x1x28x1xf32> to vector<28x1xf32>
      %c16_271 = arith.constant 16 : index
      %c0_272 = arith.constant 0 : index
      %c0_273 = arith.constant 0 : index
      %425 = vector.load %arg2[%c16_271, %c0_272, %c0_273] : memref<25x1x128xf32, #tpu.memory_space<vmem>>, vector<1x1x128xf32>
      %426 = vector.shape_cast %425 : vector<1x1x128xf32> to vector<1x128xf32>
      %427 = vector.broadcast %424 : vector<28x1xf32> to vector<28x128xf32>
      %428 = vector.broadcast %426 : vector<1x128xf32> to vector<28x128xf32>
      %429 = arith.mulf %427, %428 : vector<28x128xf32>
      %430 = arith.addf %420, %429 : vector<28x128xf32>
      %c3_i32_274 = arith.constant 3 : i32
      %431 = arith.addi %259, %c3_i32_274 : i32
      %c0_275 = arith.constant 0 : index
      %432 = arith.index_cast %431 : i32 to index
      %c2_276 = arith.constant 2 : index
      %c0_277 = arith.constant 0 : index
      %433 = vector.load %arg1[%c0_275, %432, %c2_276, %c0_277] : memref<1x32x32x1xf32, #tpu.memory_space<vmem>>, vector<1x1x28x1xf32>
      %434 = vector.shape_cast %433 : vector<1x1x28x1xf32> to vector<28x1xf32>
      %c17_278 = arith.constant 17 : index
      %c0_279 = arith.constant 0 : index
      %c0_280 = arith.constant 0 : index
      %435 = vector.load %arg2[%c17_278, %c0_279, %c0_280] : memref<25x1x128xf32, #tpu.memory_space<vmem>>, vector<1x1x128xf32>
      %436 = vector.shape_cast %435 : vector<1x1x128xf32> to vector<1x128xf32>
      %437 = vector.broadcast %434 : vector<28x1xf32> to vector<28x128xf32>
      %438 = vector.broadcast %436 : vector<1x128xf32> to vector<28x128xf32>
      %439 = arith.mulf %437, %438 : vector<28x128xf32>
      %440 = arith.addf %430, %439 : vector<28x128xf32>
      %c3_i32_281 = arith.constant 3 : i32
      %441 = arith.addi %259, %c3_i32_281 : i32
      %c0_282 = arith.constant 0 : index
      %442 = arith.index_cast %441 : i32 to index
      %c3_283 = arith.constant 3 : index
      %c0_284 = arith.constant 0 : index
      %443 = vector.load %arg1[%c0_282, %442, %c3_283, %c0_284] : memref<1x32x32x1xf32, #tpu.memory_space<vmem>>, vector<1x1x28x1xf32>
      %444 = vector.shape_cast %443 : vector<1x1x28x1xf32> to vector<28x1xf32>
      %c18_285 = arith.constant 18 : index
      %c0_286 = arith.constant 0 : index
      %c0_287 = arith.constant 0 : index
      %445 = vector.load %arg2[%c18_285, %c0_286, %c0_287] : memref<25x1x128xf32, #tpu.memory_space<vmem>>, vector<1x1x128xf32>
      %446 = vector.shape_cast %445 : vector<1x1x128xf32> to vector<1x128xf32>
      %447 = vector.broadcast %444 : vector<28x1xf32> to vector<28x128xf32>
      %448 = vector.broadcast %446 : vector<1x128xf32> to vector<28x128xf32>
      %449 = arith.mulf %447, %448 : vector<28x128xf32>
      %450 = arith.addf %440, %449 : vector<28x128xf32>
      %c3_i32_288 = arith.constant 3 : i32
      %451 = arith.addi %259, %c3_i32_288 : i32
      %c0_289 = arith.constant 0 : index
      %452 = arith.index_cast %451 : i32 to index
      %c4_290 = arith.constant 4 : index
      %c0_291 = arith.constant 0 : index
      %453 = vector.load %arg1[%c0_289, %452, %c4_290, %c0_291] : memref<1x32x32x1xf32, #tpu.memory_space<vmem>>, vector<1x1x28x1xf32>
      %454 = vector.shape_cast %453 : vector<1x1x28x1xf32> to vector<28x1xf32>
      %c19_292 = arith.constant 19 : index
      %c0_293 = arith.constant 0 : index
      %c0_294 = arith.constant 0 : index
      %455 = vector.load %arg2[%c19_292, %c0_293, %c0_294] : memref<25x1x128xf32, #tpu.memory_space<vmem>>, vector<1x1x128xf32>
      %456 = vector.shape_cast %455 : vector<1x1x128xf32> to vector<1x128xf32>
      %457 = vector.broadcast %454 : vector<28x1xf32> to vector<28x128xf32>
      %458 = vector.broadcast %456 : vector<1x128xf32> to vector<28x128xf32>
      %459 = arith.mulf %457, %458 : vector<28x128xf32>
      %460 = arith.addf %450, %459 : vector<28x128xf32>
      %c4_i32_295 = arith.constant 4 : i32
      %461 = arith.addi %259, %c4_i32_295 : i32
      %c0_296 = arith.constant 0 : index
      %462 = arith.index_cast %461 : i32 to index
      %c0_297 = arith.constant 0 : index
      %c0_298 = arith.constant 0 : index
      %463 = vector.load %arg1[%c0_296, %462, %c0_297, %c0_298] : memref<1x32x32x1xf32, #tpu.memory_space<vmem>>, vector<1x1x28x1xf32>
      %464 = vector.shape_cast %463 : vector<1x1x28x1xf32> to vector<28x1xf32>
      %c20_299 = arith.constant 20 : index
      %c0_300 = arith.constant 0 : index
      %c0_301 = arith.constant 0 : index
      %465 = vector.load %arg2[%c20_299, %c0_300, %c0_301] : memref<25x1x128xf32, #tpu.memory_space<vmem>>, vector<1x1x128xf32>
      %466 = vector.shape_cast %465 : vector<1x1x128xf32> to vector<1x128xf32>
      %467 = vector.broadcast %464 : vector<28x1xf32> to vector<28x128xf32>
      %468 = vector.broadcast %466 : vector<1x128xf32> to vector<28x128xf32>
      %469 = arith.mulf %467, %468 : vector<28x128xf32>
      %470 = arith.addf %460, %469 : vector<28x128xf32>
      %c4_i32_302 = arith.constant 4 : i32
      %471 = arith.addi %259, %c4_i32_302 : i32
      %c0_303 = arith.constant 0 : index
      %472 = arith.index_cast %471 : i32 to index
      %c1_304 = arith.constant 1 : index
      %c0_305 = arith.constant 0 : index
      %473 = vector.load %arg1[%c0_303, %472, %c1_304, %c0_305] : memref<1x32x32x1xf32, #tpu.memory_space<vmem>>, vector<1x1x28x1xf32>
      %474 = vector.shape_cast %473 : vector<1x1x28x1xf32> to vector<28x1xf32>
      %c21_306 = arith.constant 21 : index
      %c0_307 = arith.constant 0 : index
      %c0_308 = arith.constant 0 : index
      %475 = vector.load %arg2[%c21_306, %c0_307, %c0_308] : memref<25x1x128xf32, #tpu.memory_space<vmem>>, vector<1x1x128xf32>
      %476 = vector.shape_cast %475 : vector<1x1x128xf32> to vector<1x128xf32>
      %477 = vector.broadcast %474 : vector<28x1xf32> to vector<28x128xf32>
      %478 = vector.broadcast %476 : vector<1x128xf32> to vector<28x128xf32>
      %479 = arith.mulf %477, %478 : vector<28x128xf32>
      %480 = arith.addf %470, %479 : vector<28x128xf32>
      %c4_i32_309 = arith.constant 4 : i32
      %481 = arith.addi %259, %c4_i32_309 : i32
      %c0_310 = arith.constant 0 : index
      %482 = arith.index_cast %481 : i32 to index
      %c2_311 = arith.constant 2 : index
      %c0_312 = arith.constant 0 : index
      %483 = vector.load %arg1[%c0_310, %482, %c2_311, %c0_312] : memref<1x32x32x1xf32, #tpu.memory_space<vmem>>, vector<1x1x28x1xf32>
      %484 = vector.shape_cast %483 : vector<1x1x28x1xf32> to vector<28x1xf32>
      %c22_313 = arith.constant 22 : index
      %c0_314 = arith.constant 0 : index
      %c0_315 = arith.constant 0 : index
      %485 = vector.load %arg2[%c22_313, %c0_314, %c0_315] : memref<25x1x128xf32, #tpu.memory_space<vmem>>, vector<1x1x128xf32>
      %486 = vector.shape_cast %485 : vector<1x1x128xf32> to vector<1x128xf32>
      %487 = vector.broadcast %484 : vector<28x1xf32> to vector<28x128xf32>
      %488 = vector.broadcast %486 : vector<1x128xf32> to vector<28x128xf32>
      %489 = arith.mulf %487, %488 : vector<28x128xf32>
      %490 = arith.addf %480, %489 : vector<28x128xf32>
      %c4_i32_316 = arith.constant 4 : i32
      %491 = arith.addi %259, %c4_i32_316 : i32
      %c0_317 = arith.constant 0 : index
      %492 = arith.index_cast %491 : i32 to index
      %c3_318 = arith.constant 3 : index
      %c0_319 = arith.constant 0 : index
      %493 = vector.load %arg1[%c0_317, %492, %c3_318, %c0_319] : memref<1x32x32x1xf32, #tpu.memory_space<vmem>>, vector<1x1x28x1xf32>
      %494 = vector.shape_cast %493 : vector<1x1x28x1xf32> to vector<28x1xf32>
      %c23_320 = arith.constant 23 : index
      %c0_321 = arith.constant 0 : index
      %c0_322 = arith.constant 0 : index
      %495 = vector.load %arg2[%c23_320, %c0_321, %c0_322] : memref<25x1x128xf32, #tpu.memory_space<vmem>>, vector<1x1x128xf32>
      %496 = vector.shape_cast %495 : vector<1x1x128xf32> to vector<1x128xf32>
      %497 = vector.broadcast %494 : vector<28x1xf32> to vector<28x128xf32>
      %498 = vector.broadcast %496 : vector<1x128xf32> to vector<28x128xf32>
      %499 = arith.mulf %497, %498 : vector<28x128xf32>
      %500 = arith.addf %490, %499 : vector<28x128xf32>
      %c4_i32_323 = arith.constant 4 : i32
      %501 = arith.addi %259, %c4_i32_323 : i32
      %c0_324 = arith.constant 0 : index
      %502 = arith.index_cast %501 : i32 to index
      %c4_325 = arith.constant 4 : index
      %c0_326 = arith.constant 0 : index
      %503 = vector.load %arg1[%c0_324, %502, %c4_325, %c0_326] : memref<1x32x32x1xf32, #tpu.memory_space<vmem>>, vector<1x1x28x1xf32>
      %504 = vector.shape_cast %503 : vector<1x1x28x1xf32> to vector<28x1xf32>
      %c24_327 = arith.constant 24 : index
      %c0_328 = arith.constant 0 : index
      %c0_329 = arith.constant 0 : index
      %505 = vector.load %arg2[%c24_327, %c0_328, %c0_329] : memref<25x1x128xf32, #tpu.memory_space<vmem>>, vector<1x1x128xf32>
      %506 = vector.shape_cast %505 : vector<1x1x128xf32> to vector<1x128xf32>
      %507 = vector.broadcast %504 : vector<28x1xf32> to vector<28x128xf32>
      %508 = vector.broadcast %506 : vector<1x128xf32> to vector<28x128xf32>
      %509 = arith.mulf %507, %508 : vector<28x128xf32>
      %510 = arith.addf %500, %509 : vector<28x128xf32>
      %c0_330 = arith.constant 0 : index
      %c0_331 = arith.constant 0 : index
      %511 = vector.load %arg3[%c0_330, %c0_331] : memref<1x128xf32, #tpu.memory_space<vmem>>, vector<1x128xf32>
      %512 = vector.broadcast %511 : vector<1x128xf32> to vector<28x128xf32>
      %513 = arith.addf %510, %512 : vector<28x128xf32>
      %cst_332 = arith.constant 0.000000e+00 : f32
      %514 = vector.broadcast %cst_332 : f32 to vector<28x128xf32>
      %515 = arith.maximumf %513, %514 : vector<28x128xf32>
      %516 = arith.maximumf %257, %515 : vector<28x128xf32>
      %517 = vector.extract_strided_slice %516 {offsets = [0, 0], sizes = [1, 128], strides = [1, 1]} : vector<28x128xf32> to vector<1x128xf32>
      %518 = vector.extract_strided_slice %516 {offsets = [2, 0], sizes = [1, 128], strides = [1, 1]} : vector<28x128xf32> to vector<1x128xf32>
      %519 = vector.extract_strided_slice %516 {offsets = [4, 0], sizes = [1, 128], strides = [1, 1]} : vector<28x128xf32> to vector<1x128xf32>
      %520 = vector.extract_strided_slice %516 {offsets = [6, 0], sizes = [1, 128], strides = [1, 1]} : vector<28x128xf32> to vector<1x128xf32>
      %521 = vector.extract_strided_slice %516 {offsets = [8, 0], sizes = [1, 128], strides = [1, 1]} : vector<28x128xf32> to vector<1x128xf32>
      %522 = vector.extract_strided_slice %516 {offsets = [10, 0], sizes = [1, 128], strides = [1, 1]} : vector<28x128xf32> to vector<1x128xf32>
      %523 = vector.extract_strided_slice %516 {offsets = [12, 0], sizes = [1, 128], strides = [1, 1]} : vector<28x128xf32> to vector<1x128xf32>
      %524 = vector.extract_strided_slice %516 {offsets = [14, 0], sizes = [1, 128], strides = [1, 1]} : vector<28x128xf32> to vector<1x128xf32>
      %525 = vector.extract_strided_slice %516 {offsets = [16, 0], sizes = [1, 128], strides = [1, 1]} : vector<28x128xf32> to vector<1x128xf32>
      %526 = vector.extract_strided_slice %516 {offsets = [18, 0], sizes = [1, 128], strides = [1, 1]} : vector<28x128xf32> to vector<1x128xf32>
      %527 = vector.extract_strided_slice %516 {offsets = [20, 0], sizes = [1, 128], strides = [1, 1]} : vector<28x128xf32> to vector<1x128xf32>
      %528 = vector.extract_strided_slice %516 {offsets = [22, 0], sizes = [1, 128], strides = [1, 1]} : vector<28x128xf32> to vector<1x128xf32>
      %529 = vector.extract_strided_slice %516 {offsets = [24, 0], sizes = [1, 128], strides = [1, 1]} : vector<28x128xf32> to vector<1x128xf32>
      %530 = vector.extract_strided_slice %516 {offsets = [26, 0], sizes = [1, 128], strides = [1, 1]} : vector<28x128xf32> to vector<1x128xf32>
      %531 = tpu.concatenate %517, %518, %519, %520, %521, %522, %523, %524, %525, %526, %527, %528, %529, %530 in 0 : vector<1x128xf32>, vector<1x128xf32>, vector<1x128xf32>, vector<1x128xf32>, vector<1x128xf32>, vector<1x128xf32>, vector<1x128xf32>, vector<1x128xf32>, vector<1x128xf32>, vector<1x128xf32>, vector<1x128xf32>, vector<1x128xf32>, vector<1x128xf32>, vector<1x128xf32> -> vector<14x128xf32>
      %532 = vector.extract_strided_slice %516 {offsets = [1, 0], sizes = [1, 128], strides = [1, 1]} : vector<28x128xf32> to vector<1x128xf32>
      %533 = vector.extract_strided_slice %516 {offsets = [3, 0], sizes = [1, 128], strides = [1, 1]} : vector<28x128xf32> to vector<1x128xf32>
      %534 = vector.extract_strided_slice %516 {offsets = [5, 0], sizes = [1, 128], strides = [1, 1]} : vector<28x128xf32> to vector<1x128xf32>
      %535 = vector.extract_strided_slice %516 {offsets = [7, 0], sizes = [1, 128], strides = [1, 1]} : vector<28x128xf32> to vector<1x128xf32>
      %536 = vector.extract_strided_slice %516 {offsets = [9, 0], sizes = [1, 128], strides = [1, 1]} : vector<28x128xf32> to vector<1x128xf32>
      %537 = vector.extract_strided_slice %516 {offsets = [11, 0], sizes = [1, 128], strides = [1, 1]} : vector<28x128xf32> to vector<1x128xf32>
      %538 = vector.extract_strided_slice %516 {offsets = [13, 0], sizes = [1, 128], strides = [1, 1]} : vector<28x128xf32> to vector<1x128xf32>
      %539 = vector.extract_strided_slice %516 {offsets = [15, 0], sizes = [1, 128], strides = [1, 1]} : vector<28x128xf32> to vector<1x128xf32>
      %540 = vector.extract_strided_slice %516 {offsets = [17, 0], sizes = [1, 128], strides = [1, 1]} : vector<28x128xf32> to vector<1x128xf32>
      %541 = vector.extract_strided_slice %516 {offsets = [19, 0], sizes = [1, 128], strides = [1, 1]} : vector<28x128xf32> to vector<1x128xf32>
      %542 = vector.extract_strided_slice %516 {offsets = [21, 0], sizes = [1, 128], strides = [1, 1]} : vector<28x128xf32> to vector<1x128xf32>
      %543 = vector.extract_strided_slice %516 {offsets = [23, 0], sizes = [1, 128], strides = [1, 1]} : vector<28x128xf32> to vector<1x128xf32>
      %544 = vector.extract_strided_slice %516 {offsets = [25, 0], sizes = [1, 128], strides = [1, 1]} : vector<28x128xf32> to vector<1x128xf32>
      %545 = vector.extract_strided_slice %516 {offsets = [27, 0], sizes = [1, 128], strides = [1, 1]} : vector<28x128xf32> to vector<1x128xf32>
      %546 = tpu.concatenate %532, %533, %534, %535, %536, %537, %538, %539, %540, %541, %542, %543, %544, %545 in 0 : vector<1x128xf32>, vector<1x128xf32>, vector<1x128xf32>, vector<1x128xf32>, vector<1x128xf32>, vector<1x128xf32>, vector<1x128xf32>, vector<1x128xf32>, vector<1x128xf32>, vector<1x128xf32>, vector<1x128xf32>, vector<1x128xf32>, vector<1x128xf32>, vector<1x128xf32> -> vector<14x128xf32>
      %547 = arith.maximumf %531, %546 : vector<14x128xf32>
      %548 = arith.truncf %547 : vector<14x128xf32> to vector<14x128xbf16>
      %c0_333 = arith.constant 0 : index
      %549 = arith.index_cast %arg5 : i32 to index
      %c0_334 = arith.constant 0 : index
      %c0_335 = arith.constant 0 : index
      %550 = vector.load %arg4[%c0_333, %549, %c0_334, %c0_335] : memref<1x14x14x128xbf16, #tpu.memory_space<vmem>>, vector<1x1x14x128xbf16>
      %551 = vector.shape_cast %550 : vector<1x1x14x128xbf16> to vector<14x128xbf16>
      %552 = vector.shape_cast %548 : vector<14x128xbf16> to vector<1x1x14x128xbf16>
      tpu.vector_store %arg4[%c0_333, %549, %c0_334, %c0_335], %552 {strides = array<i32>} : memref<1x14x14x128xbf16, #tpu.memory_space<vmem>>, vector<1x1x14x128xbf16>,
    }
    %c14_i32_0 = arith.constant 14 : i32
    return
  }
  func.func @transform_0(%arg0: i32) -> (i32, i32, i32, i32) {
    %c0_i32 = arith.constant 0 : i32
    %c0_i32_0 = arith.constant 0 : i32
    %c0_i32_1 = arith.constant 0 : i32
    %c0_i32_2 = arith.constant 0 : i32
    return %arg0, %c0_i32, %c0_i32_0, %c0_i32_1 : i32, i32, i32, i32
  }
  func.func @transform_1(%arg0: i32) -> (i32, i32, i32) {
    %c0_i32 = arith.constant 0 : i32
    %c0_i32_0 = arith.constant 0 : i32
    %c0_i32_1 = arith.constant 0 : i32
    %c0_i32_2 = arith.constant 0 : i32
    return %c0_i32, %c0_i32_0, %c0_i32_1 : i32, i32, i32
  }
  func.func @transform_2(%arg0: i32) -> (i32, i32) {
    %c0_i32 = arith.constant 0 : i32
    %c0_i32_0 = arith.constant 0 : i32
    %c0_i32_1 = arith.constant 0 : i32
    return %c0_i32, %c0_i32_0 : i32, i32
  }
  func.func @transform_3(%arg0: i32) -> (i32, i32, i32, i32) {
    %c0_i32 = arith.constant 0 : i32
    %c0_i32_0 = arith.constant 0 : i32
    %c0_i32_1 = arith.constant 0 : i32
    %c0_i32_2 = arith.constant 0 : i32
    return %arg0, %c0_i32, %c0_i32_0, %c0_i32_1 : i32, i32, i32, i32
  }
}

module attributes {stable_mosaic.version = 11 : i64} {
  func.func @_conv_relu_pool_kernel(%arg0: i32, %arg1: memref<1x18x18x128xbf16, #tpu.memory_space<vmem>>, %arg2: memref<25x128x128xbf16, #tpu.memory_space<vmem>>, %arg3: memref<1x128xf32, #tpu.memory_space<vmem>>, %arg4: memref<1x7x7x128xbf16, #tpu.memory_space<vmem>>) attributes {dimension_semantics = [#tpu.dimension_semantics<parallel>], iteration_bounds = array<i64: 2>, scalar_prefetch = 0 : i64, scratch_operands = 0 : i64, tpu.core_type = #tpu.core_type<tc>, window_params = [{transform_indices = @transform_0, window_bounds = array<i64: 1, 18, 18, 128>}, {pipeline_mode = #tpu.pipeline_mode<synchronous>, transform_indices = @transform_1, window_bounds = array<i64: 25, 128, 128>}, {pipeline_mode = #tpu.pipeline_mode<synchronous>, transform_indices = @transform_2, window_bounds = array<i64: 1, 128>}, {transform_indices = @transform_3, window_bounds = array<i64: 1, 7, 7, 128>}]} {
    %c0_i32 = arith.constant 0 : i32
    %c7_i32 = arith.constant 7 : i32
    %0 = arith.addi %c0_i32, %c7_i32 : i32
    %c1_i32 = arith.constant 1 : i32
    scf.for %arg5 = %c0_i32 to %0 step %c1_i32  : i32 {
      %c2_i32 = arith.constant 2 : i32
      %1 = arith.muli %c2_i32, %arg5 : i32
      %cst = arith.constant 0.000000e+00 : f32
      %2 = vector.broadcast %cst : f32 to vector<14x128xf32>
      %c0_i32_1 = arith.constant 0 : i32
      %3 = arith.addi %1, %c0_i32_1 : i32
      %c0 = arith.constant 0 : index
      %4 = arith.index_cast %3 : i32 to index
      %c0_2 = arith.constant 0 : index
      %c0_3 = arith.constant 0 : index
      %5 = vector.load %arg1[%c0, %4, %c0_2, %c0_3] : memref<1x18x18x128xbf16, #tpu.memory_space<vmem>>, vector<1x1x14x128xbf16>
      %6 = vector.shape_cast %5 : vector<1x1x14x128xbf16> to vector<14x128xbf16>
      %c0_4 = arith.constant 0 : index
      %c0_5 = arith.constant 0 : index
      %c0_6 = arith.constant 0 : index
      %7 = vector.load %arg2[%c0_4, %c0_5, %c0_6] : memref<25x128x128xbf16, #tpu.memory_space<vmem>>, vector<1x128x128xbf16>
      %8 = vector.shape_cast %7 : vector<1x128x128xbf16> to vector<128x128xbf16>
      %cst_7 = arith.constant dense<0.000000e+00> : vector<14x128xf32>
      %9 = tpu.matmul %6, %8, %cst_7 {dimension_numbers = #tpu.dot_dimension_numbers<[1], [0], [0], [1], [0, 0, 1, 1], [], []>} : vector<14x128xbf16>, vector<128x128xbf16>, vector<14x128xf32> -> vector<14x128xf32>
      %10 = arith.addf %2, %9 : vector<14x128xf32>
      %c0_i32_8 = arith.constant 0 : i32
      %11 = arith.addi %1, %c0_i32_8 : i32
      %c0_9 = arith.constant 0 : index
      %12 = arith.index_cast %11 : i32 to index
      %c1 = arith.constant 1 : index
      %c0_10 = arith.constant 0 : index
      %13 = vector.load %arg1[%c0_9, %12, %c1, %c0_10] : memref<1x18x18x128xbf16, #tpu.memory_space<vmem>>, vector<1x1x14x128xbf16>
      %14 = vector.shape_cast %13 : vector<1x1x14x128xbf16> to vector<14x128xbf16>
      %c1_11 = arith.constant 1 : index
      %c0_12 = arith.constant 0 : index
      %c0_13 = arith.constant 0 : index
      %15 = vector.load %arg2[%c1_11, %c0_12, %c0_13] : memref<25x128x128xbf16, #tpu.memory_space<vmem>>, vector<1x128x128xbf16>
      %16 = vector.shape_cast %15 : vector<1x128x128xbf16> to vector<128x128xbf16>
      %cst_14 = arith.constant dense<0.000000e+00> : vector<14x128xf32>
      %17 = tpu.matmul %14, %16, %cst_14 {dimension_numbers = #tpu.dot_dimension_numbers<[1], [0], [0], [1], [0, 0, 1, 1], [], []>} : vector<14x128xbf16>, vector<128x128xbf16>, vector<14x128xf32> -> vector<14x128xf32>
      %18 = arith.addf %10, %17 : vector<14x128xf32>
      %c0_i32_15 = arith.constant 0 : i32
      %19 = arith.addi %1, %c0_i32_15 : i32
      %c0_16 = arith.constant 0 : index
      %20 = arith.index_cast %19 : i32 to index
      %c2 = arith.constant 2 : index
      %c0_17 = arith.constant 0 : index
      %21 = vector.load %arg1[%c0_16, %20, %c2, %c0_17] : memref<1x18x18x128xbf16, #tpu.memory_space<vmem>>, vector<1x1x14x128xbf16>
      %22 = vector.shape_cast %21 : vector<1x1x14x128xbf16> to vector<14x128xbf16>
      %c2_18 = arith.constant 2 : index
      %c0_19 = arith.constant 0 : index
      %c0_20 = arith.constant 0 : index
      %23 = vector.load %arg2[%c2_18, %c0_19, %c0_20] : memref<25x128x128xbf16, #tpu.memory_space<vmem>>, vector<1x128x128xbf16>
      %24 = vector.shape_cast %23 : vector<1x128x128xbf16> to vector<128x128xbf16>
      %cst_21 = arith.constant dense<0.000000e+00> : vector<14x128xf32>
      %25 = tpu.matmul %22, %24, %cst_21 {dimension_numbers = #tpu.dot_dimension_numbers<[1], [0], [0], [1], [0, 0, 1, 1], [], []>} : vector<14x128xbf16>, vector<128x128xbf16>, vector<14x128xf32> -> vector<14x128xf32>
      %26 = arith.addf %18, %25 : vector<14x128xf32>
      %c0_i32_22 = arith.constant 0 : i32
      %27 = arith.addi %1, %c0_i32_22 : i32
      %c0_23 = arith.constant 0 : index
      %28 = arith.index_cast %27 : i32 to index
      %c3 = arith.constant 3 : index
      %c0_24 = arith.constant 0 : index
      %29 = vector.load %arg1[%c0_23, %28, %c3, %c0_24] : memref<1x18x18x128xbf16, #tpu.memory_space<vmem>>, vector<1x1x14x128xbf16>
      %30 = vector.shape_cast %29 : vector<1x1x14x128xbf16> to vector<14x128xbf16>
      %c3_25 = arith.constant 3 : index
      %c0_26 = arith.constant 0 : index
      %c0_27 = arith.constant 0 : index
      %31 = vector.load %arg2[%c3_25, %c0_26, %c0_27] : memref<25x128x128xbf16, #tpu.memory_space<vmem>>, vector<1x128x128xbf16>
      %32 = vector.shape_cast %31 : vector<1x128x128xbf16> to vector<128x128xbf16>
      %cst_28 = arith.constant dense<0.000000e+00> : vector<14x128xf32>
      %33 = tpu.matmul %30, %32, %cst_28 {dimension_numbers = #tpu.dot_dimension_numbers<[1], [0], [0], [1], [0, 0, 1, 1], [], []>} : vector<14x128xbf16>, vector<128x128xbf16>, vector<14x128xf32> -> vector<14x128xf32>
      %34 = arith.addf %26, %33 : vector<14x128xf32>
      %c0_i32_29 = arith.constant 0 : i32
      %35 = arith.addi %1, %c0_i32_29 : i32
      %c0_30 = arith.constant 0 : index
      %36 = arith.index_cast %35 : i32 to index
      %c4 = arith.constant 4 : index
      %c0_31 = arith.constant 0 : index
      %37 = vector.load %arg1[%c0_30, %36, %c4, %c0_31] : memref<1x18x18x128xbf16, #tpu.memory_space<vmem>>, vector<1x1x14x128xbf16>
      %38 = vector.shape_cast %37 : vector<1x1x14x128xbf16> to vector<14x128xbf16>
      %c4_32 = arith.constant 4 : index
      %c0_33 = arith.constant 0 : index
      %c0_34 = arith.constant 0 : index
      %39 = vector.load %arg2[%c4_32, %c0_33, %c0_34] : memref<25x128x128xbf16, #tpu.memory_space<vmem>>, vector<1x128x128xbf16>
      %40 = vector.shape_cast %39 : vector<1x128x128xbf16> to vector<128x128xbf16>
      %cst_35 = arith.constant dense<0.000000e+00> : vector<14x128xf32>
      %41 = tpu.matmul %38, %40, %cst_35 {dimension_numbers = #tpu.dot_dimension_numbers<[1], [0], [0], [1], [0, 0, 1, 1], [], []>} : vector<14x128xbf16>, vector<128x128xbf16>, vector<14x128xf32> -> vector<14x128xf32>
      %42 = arith.addf %34, %41 : vector<14x128xf32>
      %c1_i32_36 = arith.constant 1 : i32
      %43 = arith.addi %1, %c1_i32_36 : i32
      %c0_37 = arith.constant 0 : index
      %44 = arith.index_cast %43 : i32 to index
      %c0_38 = arith.constant 0 : index
      %c0_39 = arith.constant 0 : index
      %45 = vector.load %arg1[%c0_37, %44, %c0_38, %c0_39] : memref<1x18x18x128xbf16, #tpu.memory_space<vmem>>, vector<1x1x14x128xbf16>
      %46 = vector.shape_cast %45 : vector<1x1x14x128xbf16> to vector<14x128xbf16>
      %c5 = arith.constant 5 : index
      %c0_40 = arith.constant 0 : index
      %c0_41 = arith.constant 0 : index
      %47 = vector.load %arg2[%c5, %c0_40, %c0_41] : memref<25x128x128xbf16, #tpu.memory_space<vmem>>, vector<1x128x128xbf16>
      %48 = vector.shape_cast %47 : vector<1x128x128xbf16> to vector<128x128xbf16>
      %cst_42 = arith.constant dense<0.000000e+00> : vector<14x128xf32>
      %49 = tpu.matmul %46, %48, %cst_42 {dimension_numbers = #tpu.dot_dimension_numbers<[1], [0], [0], [1], [0, 0, 1, 1], [], []>} : vector<14x128xbf16>, vector<128x128xbf16>, vector<14x128xf32> -> vector<14x128xf32>
      %50 = arith.addf %42, %49 : vector<14x128xf32>
      %c1_i32_43 = arith.constant 1 : i32
      %51 = arith.addi %1, %c1_i32_43 : i32
      %c0_44 = arith.constant 0 : index
      %52 = arith.index_cast %51 : i32 to index
      %c1_45 = arith.constant 1 : index
      %c0_46 = arith.constant 0 : index
      %53 = vector.load %arg1[%c0_44, %52, %c1_45, %c0_46] : memref<1x18x18x128xbf16, #tpu.memory_space<vmem>>, vector<1x1x14x128xbf16>
      %54 = vector.shape_cast %53 : vector<1x1x14x128xbf16> to vector<14x128xbf16>
      %c6 = arith.constant 6 : index
      %c0_47 = arith.constant 0 : index
      %c0_48 = arith.constant 0 : index
      %55 = vector.load %arg2[%c6, %c0_47, %c0_48] : memref<25x128x128xbf16, #tpu.memory_space<vmem>>, vector<1x128x128xbf16>
      %56 = vector.shape_cast %55 : vector<1x128x128xbf16> to vector<128x128xbf16>
      %cst_49 = arith.constant dense<0.000000e+00> : vector<14x128xf32>
      %57 = tpu.matmul %54, %56, %cst_49 {dimension_numbers = #tpu.dot_dimension_numbers<[1], [0], [0], [1], [0, 0, 1, 1], [], []>} : vector<14x128xbf16>, vector<128x128xbf16>, vector<14x128xf32> -> vector<14x128xf32>
      %58 = arith.addf %50, %57 : vector<14x128xf32>
      %c1_i32_50 = arith.constant 1 : i32
      %59 = arith.addi %1, %c1_i32_50 : i32
      %c0_51 = arith.constant 0 : index
      %60 = arith.index_cast %59 : i32 to index
      %c2_52 = arith.constant 2 : index
      %c0_53 = arith.constant 0 : index
      %61 = vector.load %arg1[%c0_51, %60, %c2_52, %c0_53] : memref<1x18x18x128xbf16, #tpu.memory_space<vmem>>, vector<1x1x14x128xbf16>
      %62 = vector.shape_cast %61 : vector<1x1x14x128xbf16> to vector<14x128xbf16>
      %c7 = arith.constant 7 : index
      %c0_54 = arith.constant 0 : index
      %c0_55 = arith.constant 0 : index
      %63 = vector.load %arg2[%c7, %c0_54, %c0_55] : memref<25x128x128xbf16, #tpu.memory_space<vmem>>, vector<1x128x128xbf16>
      %64 = vector.shape_cast %63 : vector<1x128x128xbf16> to vector<128x128xbf16>
      %cst_56 = arith.constant dense<0.000000e+00> : vector<14x128xf32>
      %65 = tpu.matmul %62, %64, %cst_56 {dimension_numbers = #tpu.dot_dimension_numbers<[1], [0], [0], [1], [0, 0, 1, 1], [], []>} : vector<14x128xbf16>, vector<128x128xbf16>, vector<14x128xf32> -> vector<14x128xf32>
      %66 = arith.addf %58, %65 : vector<14x128xf32>
      %c1_i32_57 = arith.constant 1 : i32
      %67 = arith.addi %1, %c1_i32_57 : i32
      %c0_58 = arith.constant 0 : index
      %68 = arith.index_cast %67 : i32 to index
      %c3_59 = arith.constant 3 : index
      %c0_60 = arith.constant 0 : index
      %69 = vector.load %arg1[%c0_58, %68, %c3_59, %c0_60] : memref<1x18x18x128xbf16, #tpu.memory_space<vmem>>, vector<1x1x14x128xbf16>
      %70 = vector.shape_cast %69 : vector<1x1x14x128xbf16> to vector<14x128xbf16>
      %c8 = arith.constant 8 : index
      %c0_61 = arith.constant 0 : index
      %c0_62 = arith.constant 0 : index
      %71 = vector.load %arg2[%c8, %c0_61, %c0_62] : memref<25x128x128xbf16, #tpu.memory_space<vmem>>, vector<1x128x128xbf16>
      %72 = vector.shape_cast %71 : vector<1x128x128xbf16> to vector<128x128xbf16>
      %cst_63 = arith.constant dense<0.000000e+00> : vector<14x128xf32>
      %73 = tpu.matmul %70, %72, %cst_63 {dimension_numbers = #tpu.dot_dimension_numbers<[1], [0], [0], [1], [0, 0, 1, 1], [], []>} : vector<14x128xbf16>, vector<128x128xbf16>, vector<14x128xf32> -> vector<14x128xf32>
      %74 = arith.addf %66, %73 : vector<14x128xf32>
      %c1_i32_64 = arith.constant 1 : i32
      %75 = arith.addi %1, %c1_i32_64 : i32
      %c0_65 = arith.constant 0 : index
      %76 = arith.index_cast %75 : i32 to index
      %c4_66 = arith.constant 4 : index
      %c0_67 = arith.constant 0 : index
      %77 = vector.load %arg1[%c0_65, %76, %c4_66, %c0_67] : memref<1x18x18x128xbf16, #tpu.memory_space<vmem>>, vector<1x1x14x128xbf16>
      %78 = vector.shape_cast %77 : vector<1x1x14x128xbf16> to vector<14x128xbf16>
      %c9 = arith.constant 9 : index
      %c0_68 = arith.constant 0 : index
      %c0_69 = arith.constant 0 : index
      %79 = vector.load %arg2[%c9, %c0_68, %c0_69] : memref<25x128x128xbf16, #tpu.memory_space<vmem>>, vector<1x128x128xbf16>
      %80 = vector.shape_cast %79 : vector<1x128x128xbf16> to vector<128x128xbf16>
      %cst_70 = arith.constant dense<0.000000e+00> : vector<14x128xf32>
      %81 = tpu.matmul %78, %80, %cst_70 {dimension_numbers = #tpu.dot_dimension_numbers<[1], [0], [0], [1], [0, 0, 1, 1], [], []>} : vector<14x128xbf16>, vector<128x128xbf16>, vector<14x128xf32> -> vector<14x128xf32>
      %82 = arith.addf %74, %81 : vector<14x128xf32>
      %c2_i32_71 = arith.constant 2 : i32
      %83 = arith.addi %1, %c2_i32_71 : i32
      %c0_72 = arith.constant 0 : index
      %84 = arith.index_cast %83 : i32 to index
      %c0_73 = arith.constant 0 : index
      %c0_74 = arith.constant 0 : index
      %85 = vector.load %arg1[%c0_72, %84, %c0_73, %c0_74] : memref<1x18x18x128xbf16, #tpu.memory_space<vmem>>, vector<1x1x14x128xbf16>
      %86 = vector.shape_cast %85 : vector<1x1x14x128xbf16> to vector<14x128xbf16>
      %c10 = arith.constant 10 : index
      %c0_75 = arith.constant 0 : index
      %c0_76 = arith.constant 0 : index
      %87 = vector.load %arg2[%c10, %c0_75, %c0_76] : memref<25x128x128xbf16, #tpu.memory_space<vmem>>, vector<1x128x128xbf16>
      %88 = vector.shape_cast %87 : vector<1x128x128xbf16> to vector<128x128xbf16>
      %cst_77 = arith.constant dense<0.000000e+00> : vector<14x128xf32>
      %89 = tpu.matmul %86, %88, %cst_77 {dimension_numbers = #tpu.dot_dimension_numbers<[1], [0], [0], [1], [0, 0, 1, 1], [], []>} : vector<14x128xbf16>, vector<128x128xbf16>, vector<14x128xf32> -> vector<14x128xf32>
      %90 = arith.addf %82, %89 : vector<14x128xf32>
      %c2_i32_78 = arith.constant 2 : i32
      %91 = arith.addi %1, %c2_i32_78 : i32
      %c0_79 = arith.constant 0 : index
      %92 = arith.index_cast %91 : i32 to index
      %c1_80 = arith.constant 1 : index
      %c0_81 = arith.constant 0 : index
      %93 = vector.load %arg1[%c0_79, %92, %c1_80, %c0_81] : memref<1x18x18x128xbf16, #tpu.memory_space<vmem>>, vector<1x1x14x128xbf16>
      %94 = vector.shape_cast %93 : vector<1x1x14x128xbf16> to vector<14x128xbf16>
      %c11 = arith.constant 11 : index
      %c0_82 = arith.constant 0 : index
      %c0_83 = arith.constant 0 : index
      %95 = vector.load %arg2[%c11, %c0_82, %c0_83] : memref<25x128x128xbf16, #tpu.memory_space<vmem>>, vector<1x128x128xbf16>
      %96 = vector.shape_cast %95 : vector<1x128x128xbf16> to vector<128x128xbf16>
      %cst_84 = arith.constant dense<0.000000e+00> : vector<14x128xf32>
      %97 = tpu.matmul %94, %96, %cst_84 {dimension_numbers = #tpu.dot_dimension_numbers<[1], [0], [0], [1], [0, 0, 1, 1], [], []>} : vector<14x128xbf16>, vector<128x128xbf16>, vector<14x128xf32> -> vector<14x128xf32>
      %98 = arith.addf %90, %97 : vector<14x128xf32>
      %c2_i32_85 = arith.constant 2 : i32
      %99 = arith.addi %1, %c2_i32_85 : i32
      %c0_86 = arith.constant 0 : index
      %100 = arith.index_cast %99 : i32 to index
      %c2_87 = arith.constant 2 : index
      %c0_88 = arith.constant 0 : index
      %101 = vector.load %arg1[%c0_86, %100, %c2_87, %c0_88] : memref<1x18x18x128xbf16, #tpu.memory_space<vmem>>, vector<1x1x14x128xbf16>
      %102 = vector.shape_cast %101 : vector<1x1x14x128xbf16> to vector<14x128xbf16>
      %c12 = arith.constant 12 : index
      %c0_89 = arith.constant 0 : index
      %c0_90 = arith.constant 0 : index
      %103 = vector.load %arg2[%c12, %c0_89, %c0_90] : memref<25x128x128xbf16, #tpu.memory_space<vmem>>, vector<1x128x128xbf16>
      %104 = vector.shape_cast %103 : vector<1x128x128xbf16> to vector<128x128xbf16>
      %cst_91 = arith.constant dense<0.000000e+00> : vector<14x128xf32>
      %105 = tpu.matmul %102, %104, %cst_91 {dimension_numbers = #tpu.dot_dimension_numbers<[1], [0], [0], [1], [0, 0, 1, 1], [], []>} : vector<14x128xbf16>, vector<128x128xbf16>, vector<14x128xf32> -> vector<14x128xf32>
      %106 = arith.addf %98, %105 : vector<14x128xf32>
      %c2_i32_92 = arith.constant 2 : i32
      %107 = arith.addi %1, %c2_i32_92 : i32
      %c0_93 = arith.constant 0 : index
      %108 = arith.index_cast %107 : i32 to index
      %c3_94 = arith.constant 3 : index
      %c0_95 = arith.constant 0 : index
      %109 = vector.load %arg1[%c0_93, %108, %c3_94, %c0_95] : memref<1x18x18x128xbf16, #tpu.memory_space<vmem>>, vector<1x1x14x128xbf16>
      %110 = vector.shape_cast %109 : vector<1x1x14x128xbf16> to vector<14x128xbf16>
      %c13 = arith.constant 13 : index
      %c0_96 = arith.constant 0 : index
      %c0_97 = arith.constant 0 : index
      %111 = vector.load %arg2[%c13, %c0_96, %c0_97] : memref<25x128x128xbf16, #tpu.memory_space<vmem>>, vector<1x128x128xbf16>
      %112 = vector.shape_cast %111 : vector<1x128x128xbf16> to vector<128x128xbf16>
      %cst_98 = arith.constant dense<0.000000e+00> : vector<14x128xf32>
      %113 = tpu.matmul %110, %112, %cst_98 {dimension_numbers = #tpu.dot_dimension_numbers<[1], [0], [0], [1], [0, 0, 1, 1], [], []>} : vector<14x128xbf16>, vector<128x128xbf16>, vector<14x128xf32> -> vector<14x128xf32>
      %114 = arith.addf %106, %113 : vector<14x128xf32>
      %c2_i32_99 = arith.constant 2 : i32
      %115 = arith.addi %1, %c2_i32_99 : i32
      %c0_100 = arith.constant 0 : index
      %116 = arith.index_cast %115 : i32 to index
      %c4_101 = arith.constant 4 : index
      %c0_102 = arith.constant 0 : index
      %117 = vector.load %arg1[%c0_100, %116, %c4_101, %c0_102] : memref<1x18x18x128xbf16, #tpu.memory_space<vmem>>, vector<1x1x14x128xbf16>
      %118 = vector.shape_cast %117 : vector<1x1x14x128xbf16> to vector<14x128xbf16>
      %c14 = arith.constant 14 : index
      %c0_103 = arith.constant 0 : index
      %c0_104 = arith.constant 0 : index
      %119 = vector.load %arg2[%c14, %c0_103, %c0_104] : memref<25x128x128xbf16, #tpu.memory_space<vmem>>, vector<1x128x128xbf16>
      %120 = vector.shape_cast %119 : vector<1x128x128xbf16> to vector<128x128xbf16>
      %cst_105 = arith.constant dense<0.000000e+00> : vector<14x128xf32>
      %121 = tpu.matmul %118, %120, %cst_105 {dimension_numbers = #tpu.dot_dimension_numbers<[1], [0], [0], [1], [0, 0, 1, 1], [], []>} : vector<14x128xbf16>, vector<128x128xbf16>, vector<14x128xf32> -> vector<14x128xf32>
      %122 = arith.addf %114, %121 : vector<14x128xf32>
      %c3_i32 = arith.constant 3 : i32
      %123 = arith.addi %1, %c3_i32 : i32
      %c0_106 = arith.constant 0 : index
      %124 = arith.index_cast %123 : i32 to index
      %c0_107 = arith.constant 0 : index
      %c0_108 = arith.constant 0 : index
      %125 = vector.load %arg1[%c0_106, %124, %c0_107, %c0_108] : memref<1x18x18x128xbf16, #tpu.memory_space<vmem>>, vector<1x1x14x128xbf16>
      %126 = vector.shape_cast %125 : vector<1x1x14x128xbf16> to vector<14x128xbf16>
      %c15 = arith.constant 15 : index
      %c0_109 = arith.constant 0 : index
      %c0_110 = arith.constant 0 : index
      %127 = vector.load %arg2[%c15, %c0_109, %c0_110] : memref<25x128x128xbf16, #tpu.memory_space<vmem>>, vector<1x128x128xbf16>
      %128 = vector.shape_cast %127 : vector<1x128x128xbf16> to vector<128x128xbf16>
      %cst_111 = arith.constant dense<0.000000e+00> : vector<14x128xf32>
      %129 = tpu.matmul %126, %128, %cst_111 {dimension_numbers = #tpu.dot_dimension_numbers<[1], [0], [0], [1], [0, 0, 1, 1], [], []>} : vector<14x128xbf16>, vector<128x128xbf16>, vector<14x128xf32> -> vector<14x128xf32>
      %130 = arith.addf %122, %129 : vector<14x128xf32>
      %c3_i32_112 = arith.constant 3 : i32
      %131 = arith.addi %1, %c3_i32_112 : i32
      %c0_113 = arith.constant 0 : index
      %132 = arith.index_cast %131 : i32 to index
      %c1_114 = arith.constant 1 : index
      %c0_115 = arith.constant 0 : index
      %133 = vector.load %arg1[%c0_113, %132, %c1_114, %c0_115] : memref<1x18x18x128xbf16, #tpu.memory_space<vmem>>, vector<1x1x14x128xbf16>
      %134 = vector.shape_cast %133 : vector<1x1x14x128xbf16> to vector<14x128xbf16>
      %c16 = arith.constant 16 : index
      %c0_116 = arith.constant 0 : index
      %c0_117 = arith.constant 0 : index
      %135 = vector.load %arg2[%c16, %c0_116, %c0_117] : memref<25x128x128xbf16, #tpu.memory_space<vmem>>, vector<1x128x128xbf16>
      %136 = vector.shape_cast %135 : vector<1x128x128xbf16> to vector<128x128xbf16>
      %cst_118 = arith.constant dense<0.000000e+00> : vector<14x128xf32>
      %137 = tpu.matmul %134, %136, %cst_118 {dimension_numbers = #tpu.dot_dimension_numbers<[1], [0], [0], [1], [0, 0, 1, 1], [], []>} : vector<14x128xbf16>, vector<128x128xbf16>, vector<14x128xf32> -> vector<14x128xf32>
      %138 = arith.addf %130, %137 : vector<14x128xf32>
      %c3_i32_119 = arith.constant 3 : i32
      %139 = arith.addi %1, %c3_i32_119 : i32
      %c0_120 = arith.constant 0 : index
      %140 = arith.index_cast %139 : i32 to index
      %c2_121 = arith.constant 2 : index
      %c0_122 = arith.constant 0 : index
      %141 = vector.load %arg1[%c0_120, %140, %c2_121, %c0_122] : memref<1x18x18x128xbf16, #tpu.memory_space<vmem>>, vector<1x1x14x128xbf16>
      %142 = vector.shape_cast %141 : vector<1x1x14x128xbf16> to vector<14x128xbf16>
      %c17 = arith.constant 17 : index
      %c0_123 = arith.constant 0 : index
      %c0_124 = arith.constant 0 : index
      %143 = vector.load %arg2[%c17, %c0_123, %c0_124] : memref<25x128x128xbf16, #tpu.memory_space<vmem>>, vector<1x128x128xbf16>
      %144 = vector.shape_cast %143 : vector<1x128x128xbf16> to vector<128x128xbf16>
      %cst_125 = arith.constant dense<0.000000e+00> : vector<14x128xf32>
      %145 = tpu.matmul %142, %144, %cst_125 {dimension_numbers = #tpu.dot_dimension_numbers<[1], [0], [0], [1], [0, 0, 1, 1], [], []>} : vector<14x128xbf16>, vector<128x128xbf16>, vector<14x128xf32> -> vector<14x128xf32>
      %146 = arith.addf %138, %145 : vector<14x128xf32>
      %c3_i32_126 = arith.constant 3 : i32
      %147 = arith.addi %1, %c3_i32_126 : i32
      %c0_127 = arith.constant 0 : index
      %148 = arith.index_cast %147 : i32 to index
      %c3_128 = arith.constant 3 : index
      %c0_129 = arith.constant 0 : index
      %149 = vector.load %arg1[%c0_127, %148, %c3_128, %c0_129] : memref<1x18x18x128xbf16, #tpu.memory_space<vmem>>, vector<1x1x14x128xbf16>
      %150 = vector.shape_cast %149 : vector<1x1x14x128xbf16> to vector<14x128xbf16>
      %c18 = arith.constant 18 : index
      %c0_130 = arith.constant 0 : index
      %c0_131 = arith.constant 0 : index
      %151 = vector.load %arg2[%c18, %c0_130, %c0_131] : memref<25x128x128xbf16, #tpu.memory_space<vmem>>, vector<1x128x128xbf16>
      %152 = vector.shape_cast %151 : vector<1x128x128xbf16> to vector<128x128xbf16>
      %cst_132 = arith.constant dense<0.000000e+00> : vector<14x128xf32>
      %153 = tpu.matmul %150, %152, %cst_132 {dimension_numbers = #tpu.dot_dimension_numbers<[1], [0], [0], [1], [0, 0, 1, 1], [], []>} : vector<14x128xbf16>, vector<128x128xbf16>, vector<14x128xf32> -> vector<14x128xf32>
      %154 = arith.addf %146, %153 : vector<14x128xf32>
      %c3_i32_133 = arith.constant 3 : i32
      %155 = arith.addi %1, %c3_i32_133 : i32
      %c0_134 = arith.constant 0 : index
      %156 = arith.index_cast %155 : i32 to index
      %c4_135 = arith.constant 4 : index
      %c0_136 = arith.constant 0 : index
      %157 = vector.load %arg1[%c0_134, %156, %c4_135, %c0_136] : memref<1x18x18x128xbf16, #tpu.memory_space<vmem>>, vector<1x1x14x128xbf16>
      %158 = vector.shape_cast %157 : vector<1x1x14x128xbf16> to vector<14x128xbf16>
      %c19 = arith.constant 19 : index
      %c0_137 = arith.constant 0 : index
      %c0_138 = arith.constant 0 : index
      %159 = vector.load %arg2[%c19, %c0_137, %c0_138] : memref<25x128x128xbf16, #tpu.memory_space<vmem>>, vector<1x128x128xbf16>
      %160 = vector.shape_cast %159 : vector<1x128x128xbf16> to vector<128x128xbf16>
      %cst_139 = arith.constant dense<0.000000e+00> : vector<14x128xf32>
      %161 = tpu.matmul %158, %160, %cst_139 {dimension_numbers = #tpu.dot_dimension_numbers<[1], [0], [0], [1], [0, 0, 1, 1], [], []>} : vector<14x128xbf16>, vector<128x128xbf16>, vector<14x128xf32> -> vector<14x128xf32>
      %162 = arith.addf %154, %161 : vector<14x128xf32>
      %c4_i32 = arith.constant 4 : i32
      %163 = arith.addi %1, %c4_i32 : i32
      %c0_140 = arith.constant 0 : index
      %164 = arith.index_cast %163 : i32 to index
      %c0_141 = arith.constant 0 : index
      %c0_142 = arith.constant 0 : index
      %165 = vector.load %arg1[%c0_140, %164, %c0_141, %c0_142] : memref<1x18x18x128xbf16, #tpu.memory_space<vmem>>, vector<1x1x14x128xbf16>
      %166 = vector.shape_cast %165 : vector<1x1x14x128xbf16> to vector<14x128xbf16>
      %c20 = arith.constant 20 : index
      %c0_143 = arith.constant 0 : index
      %c0_144 = arith.constant 0 : index
      %167 = vector.load %arg2[%c20, %c0_143, %c0_144] : memref<25x128x128xbf16, #tpu.memory_space<vmem>>, vector<1x128x128xbf16>
      %168 = vector.shape_cast %167 : vector<1x128x128xbf16> to vector<128x128xbf16>
      %cst_145 = arith.constant dense<0.000000e+00> : vector<14x128xf32>
      %169 = tpu.matmul %166, %168, %cst_145 {dimension_numbers = #tpu.dot_dimension_numbers<[1], [0], [0], [1], [0, 0, 1, 1], [], []>} : vector<14x128xbf16>, vector<128x128xbf16>, vector<14x128xf32> -> vector<14x128xf32>
      %170 = arith.addf %162, %169 : vector<14x128xf32>
      %c4_i32_146 = arith.constant 4 : i32
      %171 = arith.addi %1, %c4_i32_146 : i32
      %c0_147 = arith.constant 0 : index
      %172 = arith.index_cast %171 : i32 to index
      %c1_148 = arith.constant 1 : index
      %c0_149 = arith.constant 0 : index
      %173 = vector.load %arg1[%c0_147, %172, %c1_148, %c0_149] : memref<1x18x18x128xbf16, #tpu.memory_space<vmem>>, vector<1x1x14x128xbf16>
      %174 = vector.shape_cast %173 : vector<1x1x14x128xbf16> to vector<14x128xbf16>
      %c21 = arith.constant 21 : index
      %c0_150 = arith.constant 0 : index
      %c0_151 = arith.constant 0 : index
      %175 = vector.load %arg2[%c21, %c0_150, %c0_151] : memref<25x128x128xbf16, #tpu.memory_space<vmem>>, vector<1x128x128xbf16>
      %176 = vector.shape_cast %175 : vector<1x128x128xbf16> to vector<128x128xbf16>
      %cst_152 = arith.constant dense<0.000000e+00> : vector<14x128xf32>
      %177 = tpu.matmul %174, %176, %cst_152 {dimension_numbers = #tpu.dot_dimension_numbers<[1], [0], [0], [1], [0, 0, 1, 1], [], []>} : vector<14x128xbf16>, vector<128x128xbf16>, vector<14x128xf32> -> vector<14x128xf32>
      %178 = arith.addf %170, %177 : vector<14x128xf32>
      %c4_i32_153 = arith.constant 4 : i32
      %179 = arith.addi %1, %c4_i32_153 : i32
      %c0_154 = arith.constant 0 : index
      %180 = arith.index_cast %179 : i32 to index
      %c2_155 = arith.constant 2 : index
      %c0_156 = arith.constant 0 : index
      %181 = vector.load %arg1[%c0_154, %180, %c2_155, %c0_156] : memref<1x18x18x128xbf16, #tpu.memory_space<vmem>>, vector<1x1x14x128xbf16>
      %182 = vector.shape_cast %181 : vector<1x1x14x128xbf16> to vector<14x128xbf16>
      %c22 = arith.constant 22 : index
      %c0_157 = arith.constant 0 : index
      %c0_158 = arith.constant 0 : index
      %183 = vector.load %arg2[%c22, %c0_157, %c0_158] : memref<25x128x128xbf16, #tpu.memory_space<vmem>>, vector<1x128x128xbf16>
      %184 = vector.shape_cast %183 : vector<1x128x128xbf16> to vector<128x128xbf16>
      %cst_159 = arith.constant dense<0.000000e+00> : vector<14x128xf32>
      %185 = tpu.matmul %182, %184, %cst_159 {dimension_numbers = #tpu.dot_dimension_numbers<[1], [0], [0], [1], [0, 0, 1, 1], [], []>} : vector<14x128xbf16>, vector<128x128xbf16>, vector<14x128xf32> -> vector<14x128xf32>
      %186 = arith.addf %178, %185 : vector<14x128xf32>
      %c4_i32_160 = arith.constant 4 : i32
      %187 = arith.addi %1, %c4_i32_160 : i32
      %c0_161 = arith.constant 0 : index
      %188 = arith.index_cast %187 : i32 to index
      %c3_162 = arith.constant 3 : index
      %c0_163 = arith.constant 0 : index
      %189 = vector.load %arg1[%c0_161, %188, %c3_162, %c0_163] : memref<1x18x18x128xbf16, #tpu.memory_space<vmem>>, vector<1x1x14x128xbf16>
      %190 = vector.shape_cast %189 : vector<1x1x14x128xbf16> to vector<14x128xbf16>
      %c23 = arith.constant 23 : index
      %c0_164 = arith.constant 0 : index
      %c0_165 = arith.constant 0 : index
      %191 = vector.load %arg2[%c23, %c0_164, %c0_165] : memref<25x128x128xbf16, #tpu.memory_space<vmem>>, vector<1x128x128xbf16>
      %192 = vector.shape_cast %191 : vector<1x128x128xbf16> to vector<128x128xbf16>
      %cst_166 = arith.constant dense<0.000000e+00> : vector<14x128xf32>
      %193 = tpu.matmul %190, %192, %cst_166 {dimension_numbers = #tpu.dot_dimension_numbers<[1], [0], [0], [1], [0, 0, 1, 1], [], []>} : vector<14x128xbf16>, vector<128x128xbf16>, vector<14x128xf32> -> vector<14x128xf32>
      %194 = arith.addf %186, %193 : vector<14x128xf32>
      %c4_i32_167 = arith.constant 4 : i32
      %195 = arith.addi %1, %c4_i32_167 : i32
      %c0_168 = arith.constant 0 : index
      %196 = arith.index_cast %195 : i32 to index
      %c4_169 = arith.constant 4 : index
      %c0_170 = arith.constant 0 : index
      %197 = vector.load %arg1[%c0_168, %196, %c4_169, %c0_170] : memref<1x18x18x128xbf16, #tpu.memory_space<vmem>>, vector<1x1x14x128xbf16>
      %198 = vector.shape_cast %197 : vector<1x1x14x128xbf16> to vector<14x128xbf16>
      %c24 = arith.constant 24 : index
      %c0_171 = arith.constant 0 : index
      %c0_172 = arith.constant 0 : index
      %199 = vector.load %arg2[%c24, %c0_171, %c0_172] : memref<25x128x128xbf16, #tpu.memory_space<vmem>>, vector<1x128x128xbf16>
      %200 = vector.shape_cast %199 : vector<1x128x128xbf16> to vector<128x128xbf16>
      %cst_173 = arith.constant dense<0.000000e+00> : vector<14x128xf32>
      %201 = tpu.matmul %198, %200, %cst_173 {dimension_numbers = #tpu.dot_dimension_numbers<[1], [0], [0], [1], [0, 0, 1, 1], [], []>} : vector<14x128xbf16>, vector<128x128xbf16>, vector<14x128xf32> -> vector<14x128xf32>
      %202 = arith.addf %194, %201 : vector<14x128xf32>
      %c0_174 = arith.constant 0 : index
      %c0_175 = arith.constant 0 : index
      %203 = vector.load %arg3[%c0_174, %c0_175] : memref<1x128xf32, #tpu.memory_space<vmem>>, vector<1x128xf32>
      %204 = vector.broadcast %203 : vector<1x128xf32> to vector<14x128xf32>
      %205 = arith.addf %202, %204 : vector<14x128xf32>
      %cst_176 = arith.constant 0.000000e+00 : f32
      %206 = vector.broadcast %cst_176 : f32 to vector<14x128xf32>
      %207 = arith.maximumf %205, %206 : vector<14x128xf32>
      %c2_i32_177 = arith.constant 2 : i32
      %208 = arith.muli %c2_i32_177, %arg5 : i32
      %c1_i32_178 = arith.constant 1 : i32
      %209 = arith.addi %208, %c1_i32_178 : i32
      %cst_179 = arith.constant 0.000000e+00 : f32
      %210 = vector.broadcast %cst_179 : f32 to vector<14x128xf32>
      %c0_i32_180 = arith.constant 0 : i32
      %211 = arith.addi %209, %c0_i32_180 : i32
      %c0_181 = arith.constant 0 : index
      %212 = arith.index_cast %211 : i32 to index
      %c0_182 = arith.constant 0 : index
      %c0_183 = arith.constant 0 : index
      %213 = vector.load %arg1[%c0_181, %212, %c0_182, %c0_183] : memref<1x18x18x128xbf16, #tpu.memory_space<vmem>>, vector<1x1x14x128xbf16>
      %214 = vector.shape_cast %213 : vector<1x1x14x128xbf16> to vector<14x128xbf16>
      %c0_184 = arith.constant 0 : index
      %c0_185 = arith.constant 0 : index
      %c0_186 = arith.constant 0 : index
      %215 = vector.load %arg2[%c0_184, %c0_185, %c0_186] : memref<25x128x128xbf16, #tpu.memory_space<vmem>>, vector<1x128x128xbf16>
      %216 = vector.shape_cast %215 : vector<1x128x128xbf16> to vector<128x128xbf16>
      %cst_187 = arith.constant dense<0.000000e+00> : vector<14x128xf32>
      %217 = tpu.matmul %214, %216, %cst_187 {dimension_numbers = #tpu.dot_dimension_numbers<[1], [0], [0], [1], [0, 0, 1, 1], [], []>} : vector<14x128xbf16>, vector<128x128xbf16>, vector<14x128xf32> -> vector<14x128xf32>
      %218 = arith.addf %210, %217 : vector<14x128xf32>
      %c0_i32_188 = arith.constant 0 : i32
      %219 = arith.addi %209, %c0_i32_188 : i32
      %c0_189 = arith.constant 0 : index
      %220 = arith.index_cast %219 : i32 to index
      %c1_190 = arith.constant 1 : index
      %c0_191 = arith.constant 0 : index
      %221 = vector.load %arg1[%c0_189, %220, %c1_190, %c0_191] : memref<1x18x18x128xbf16, #tpu.memory_space<vmem>>, vector<1x1x14x128xbf16>
      %222 = vector.shape_cast %221 : vector<1x1x14x128xbf16> to vector<14x128xbf16>
      %c1_192 = arith.constant 1 : index
      %c0_193 = arith.constant 0 : index
      %c0_194 = arith.constant 0 : index
      %223 = vector.load %arg2[%c1_192, %c0_193, %c0_194] : memref<25x128x128xbf16, #tpu.memory_space<vmem>>, vector<1x128x128xbf16>
      %224 = vector.shape_cast %223 : vector<1x128x128xbf16> to vector<128x128xbf16>
      %cst_195 = arith.constant dense<0.000000e+00> : vector<14x128xf32>
      %225 = tpu.matmul %222, %224, %cst_195 {dimension_numbers = #tpu.dot_dimension_numbers<[1], [0], [0], [1], [0, 0, 1, 1], [], []>} : vector<14x128xbf16>, vector<128x128xbf16>, vector<14x128xf32> -> vector<14x128xf32>
      %226 = arith.addf %218, %225 : vector<14x128xf32>
      %c0_i32_196 = arith.constant 0 : i32
      %227 = arith.addi %209, %c0_i32_196 : i32
      %c0_197 = arith.constant 0 : index
      %228 = arith.index_cast %227 : i32 to index
      %c2_198 = arith.constant 2 : index
      %c0_199 = arith.constant 0 : index
      %229 = vector.load %arg1[%c0_197, %228, %c2_198, %c0_199] : memref<1x18x18x128xbf16, #tpu.memory_space<vmem>>, vector<1x1x14x128xbf16>
      %230 = vector.shape_cast %229 : vector<1x1x14x128xbf16> to vector<14x128xbf16>
      %c2_200 = arith.constant 2 : index
      %c0_201 = arith.constant 0 : index
      %c0_202 = arith.constant 0 : index
      %231 = vector.load %arg2[%c2_200, %c0_201, %c0_202] : memref<25x128x128xbf16, #tpu.memory_space<vmem>>, vector<1x128x128xbf16>
      %232 = vector.shape_cast %231 : vector<1x128x128xbf16> to vector<128x128xbf16>
      %cst_203 = arith.constant dense<0.000000e+00> : vector<14x128xf32>
      %233 = tpu.matmul %230, %232, %cst_203 {dimension_numbers = #tpu.dot_dimension_numbers<[1], [0], [0], [1], [0, 0, 1, 1], [], []>} : vector<14x128xbf16>, vector<128x128xbf16>, vector<14x128xf32> -> vector<14x128xf32>
      %234 = arith.addf %226, %233 : vector<14x128xf32>
      %c0_i32_204 = arith.constant 0 : i32
      %235 = arith.addi %209, %c0_i32_204 : i32
      %c0_205 = arith.constant 0 : index
      %236 = arith.index_cast %235 : i32 to index
      %c3_206 = arith.constant 3 : index
      %c0_207 = arith.constant 0 : index
      %237 = vector.load %arg1[%c0_205, %236, %c3_206, %c0_207] : memref<1x18x18x128xbf16, #tpu.memory_space<vmem>>, vector<1x1x14x128xbf16>
      %238 = vector.shape_cast %237 : vector<1x1x14x128xbf16> to vector<14x128xbf16>
      %c3_208 = arith.constant 3 : index
      %c0_209 = arith.constant 0 : index
      %c0_210 = arith.constant 0 : index
      %239 = vector.load %arg2[%c3_208, %c0_209, %c0_210] : memref<25x128x128xbf16, #tpu.memory_space<vmem>>, vector<1x128x128xbf16>
      %240 = vector.shape_cast %239 : vector<1x128x128xbf16> to vector<128x128xbf16>
      %cst_211 = arith.constant dense<0.000000e+00> : vector<14x128xf32>
      %241 = tpu.matmul %238, %240, %cst_211 {dimension_numbers = #tpu.dot_dimension_numbers<[1], [0], [0], [1], [0, 0, 1, 1], [], []>} : vector<14x128xbf16>, vector<128x128xbf16>, vector<14x128xf32> -> vector<14x128xf32>
      %242 = arith.addf %234, %241 : vector<14x128xf32>
      %c0_i32_212 = arith.constant 0 : i32
      %243 = arith.addi %209, %c0_i32_212 : i32
      %c0_213 = arith.constant 0 : index
      %244 = arith.index_cast %243 : i32 to index
      %c4_214 = arith.constant 4 : index
      %c0_215 = arith.constant 0 : index
      %245 = vector.load %arg1[%c0_213, %244, %c4_214, %c0_215] : memref<1x18x18x128xbf16, #tpu.memory_space<vmem>>, vector<1x1x14x128xbf16>
      %246 = vector.shape_cast %245 : vector<1x1x14x128xbf16> to vector<14x128xbf16>
      %c4_216 = arith.constant 4 : index
      %c0_217 = arith.constant 0 : index
      %c0_218 = arith.constant 0 : index
      %247 = vector.load %arg2[%c4_216, %c0_217, %c0_218] : memref<25x128x128xbf16, #tpu.memory_space<vmem>>, vector<1x128x128xbf16>
      %248 = vector.shape_cast %247 : vector<1x128x128xbf16> to vector<128x128xbf16>
      %cst_219 = arith.constant dense<0.000000e+00> : vector<14x128xf32>
      %249 = tpu.matmul %246, %248, %cst_219 {dimension_numbers = #tpu.dot_dimension_numbers<[1], [0], [0], [1], [0, 0, 1, 1], [], []>} : vector<14x128xbf16>, vector<128x128xbf16>, vector<14x128xf32> -> vector<14x128xf32>
      %250 = arith.addf %242, %249 : vector<14x128xf32>
      %c1_i32_220 = arith.constant 1 : i32
      %251 = arith.addi %209, %c1_i32_220 : i32
      %c0_221 = arith.constant 0 : index
      %252 = arith.index_cast %251 : i32 to index
      %c0_222 = arith.constant 0 : index
      %c0_223 = arith.constant 0 : index
      %253 = vector.load %arg1[%c0_221, %252, %c0_222, %c0_223] : memref<1x18x18x128xbf16, #tpu.memory_space<vmem>>, vector<1x1x14x128xbf16>
      %254 = vector.shape_cast %253 : vector<1x1x14x128xbf16> to vector<14x128xbf16>
      %c5_224 = arith.constant 5 : index
      %c0_225 = arith.constant 0 : index
      %c0_226 = arith.constant 0 : index
      %255 = vector.load %arg2[%c5_224, %c0_225, %c0_226] : memref<25x128x128xbf16, #tpu.memory_space<vmem>>, vector<1x128x128xbf16>
      %256 = vector.shape_cast %255 : vector<1x128x128xbf16> to vector<128x128xbf16>
      %cst_227 = arith.constant dense<0.000000e+00> : vector<14x128xf32>
      %257 = tpu.matmul %254, %256, %cst_227 {dimension_numbers = #tpu.dot_dimension_numbers<[1], [0], [0], [1], [0, 0, 1, 1], [], []>} : vector<14x128xbf16>, vector<128x128xbf16>, vector<14x128xf32> -> vector<14x128xf32>
      %258 = arith.addf %250, %257 : vector<14x128xf32>
      %c1_i32_228 = arith.constant 1 : i32
      %259 = arith.addi %209, %c1_i32_228 : i32
      %c0_229 = arith.constant 0 : index
      %260 = arith.index_cast %259 : i32 to index
      %c1_230 = arith.constant 1 : index
      %c0_231 = arith.constant 0 : index
      %261 = vector.load %arg1[%c0_229, %260, %c1_230, %c0_231] : memref<1x18x18x128xbf16, #tpu.memory_space<vmem>>, vector<1x1x14x128xbf16>
      %262 = vector.shape_cast %261 : vector<1x1x14x128xbf16> to vector<14x128xbf16>
      %c6_232 = arith.constant 6 : index
      %c0_233 = arith.constant 0 : index
      %c0_234 = arith.constant 0 : index
      %263 = vector.load %arg2[%c6_232, %c0_233, %c0_234] : memref<25x128x128xbf16, #tpu.memory_space<vmem>>, vector<1x128x128xbf16>
      %264 = vector.shape_cast %263 : vector<1x128x128xbf16> to vector<128x128xbf16>
      %cst_235 = arith.constant dense<0.000000e+00> : vector<14x128xf32>
      %265 = tpu.matmul %262, %264, %cst_235 {dimension_numbers = #tpu.dot_dimension_numbers<[1], [0], [0], [1], [0, 0, 1, 1], [], []>} : vector<14x128xbf16>, vector<128x128xbf16>, vector<14x128xf32> -> vector<14x128xf32>
      %266 = arith.addf %258, %265 : vector<14x128xf32>
      %c1_i32_236 = arith.constant 1 : i32
      %267 = arith.addi %209, %c1_i32_236 : i32
      %c0_237 = arith.constant 0 : index
      %268 = arith.index_cast %267 : i32 to index
      %c2_238 = arith.constant 2 : index
      %c0_239 = arith.constant 0 : index
      %269 = vector.load %arg1[%c0_237, %268, %c2_238, %c0_239] : memref<1x18x18x128xbf16, #tpu.memory_space<vmem>>, vector<1x1x14x128xbf16>
      %270 = vector.shape_cast %269 : vector<1x1x14x128xbf16> to vector<14x128xbf16>
      %c7_240 = arith.constant 7 : index
      %c0_241 = arith.constant 0 : index
      %c0_242 = arith.constant 0 : index
      %271 = vector.load %arg2[%c7_240, %c0_241, %c0_242] : memref<25x128x128xbf16, #tpu.memory_space<vmem>>, vector<1x128x128xbf16>
      %272 = vector.shape_cast %271 : vector<1x128x128xbf16> to vector<128x128xbf16>
      %cst_243 = arith.constant dense<0.000000e+00> : vector<14x128xf32>
      %273 = tpu.matmul %270, %272, %cst_243 {dimension_numbers = #tpu.dot_dimension_numbers<[1], [0], [0], [1], [0, 0, 1, 1], [], []>} : vector<14x128xbf16>, vector<128x128xbf16>, vector<14x128xf32> -> vector<14x128xf32>
      %274 = arith.addf %266, %273 : vector<14x128xf32>
      %c1_i32_244 = arith.constant 1 : i32
      %275 = arith.addi %209, %c1_i32_244 : i32
      %c0_245 = arith.constant 0 : index
      %276 = arith.index_cast %275 : i32 to index
      %c3_246 = arith.constant 3 : index
      %c0_247 = arith.constant 0 : index
      %277 = vector.load %arg1[%c0_245, %276, %c3_246, %c0_247] : memref<1x18x18x128xbf16, #tpu.memory_space<vmem>>, vector<1x1x14x128xbf16>
      %278 = vector.shape_cast %277 : vector<1x1x14x128xbf16> to vector<14x128xbf16>
      %c8_248 = arith.constant 8 : index
      %c0_249 = arith.constant 0 : index
      %c0_250 = arith.constant 0 : index
      %279 = vector.load %arg2[%c8_248, %c0_249, %c0_250] : memref<25x128x128xbf16, #tpu.memory_space<vmem>>, vector<1x128x128xbf16>
      %280 = vector.shape_cast %279 : vector<1x128x128xbf16> to vector<128x128xbf16>
      %cst_251 = arith.constant dense<0.000000e+00> : vector<14x128xf32>
      %281 = tpu.matmul %278, %280, %cst_251 {dimension_numbers = #tpu.dot_dimension_numbers<[1], [0], [0], [1], [0, 0, 1, 1], [], []>} : vector<14x128xbf16>, vector<128x128xbf16>, vector<14x128xf32> -> vector<14x128xf32>
      %282 = arith.addf %274, %281 : vector<14x128xf32>
      %c1_i32_252 = arith.constant 1 : i32
      %283 = arith.addi %209, %c1_i32_252 : i32
      %c0_253 = arith.constant 0 : index
      %284 = arith.index_cast %283 : i32 to index
      %c4_254 = arith.constant 4 : index
      %c0_255 = arith.constant 0 : index
      %285 = vector.load %arg1[%c0_253, %284, %c4_254, %c0_255] : memref<1x18x18x128xbf16, #tpu.memory_space<vmem>>, vector<1x1x14x128xbf16>
      %286 = vector.shape_cast %285 : vector<1x1x14x128xbf16> to vector<14x128xbf16>
      %c9_256 = arith.constant 9 : index
      %c0_257 = arith.constant 0 : index
      %c0_258 = arith.constant 0 : index
      %287 = vector.load %arg2[%c9_256, %c0_257, %c0_258] : memref<25x128x128xbf16, #tpu.memory_space<vmem>>, vector<1x128x128xbf16>
      %288 = vector.shape_cast %287 : vector<1x128x128xbf16> to vector<128x128xbf16>
      %cst_259 = arith.constant dense<0.000000e+00> : vector<14x128xf32>
      %289 = tpu.matmul %286, %288, %cst_259 {dimension_numbers = #tpu.dot_dimension_numbers<[1], [0], [0], [1], [0, 0, 1, 1], [], []>} : vector<14x128xbf16>, vector<128x128xbf16>, vector<14x128xf32> -> vector<14x128xf32>
      %290 = arith.addf %282, %289 : vector<14x128xf32>
      %c2_i32_260 = arith.constant 2 : i32
      %291 = arith.addi %209, %c2_i32_260 : i32
      %c0_261 = arith.constant 0 : index
      %292 = arith.index_cast %291 : i32 to index
      %c0_262 = arith.constant 0 : index
      %c0_263 = arith.constant 0 : index
      %293 = vector.load %arg1[%c0_261, %292, %c0_262, %c0_263] : memref<1x18x18x128xbf16, #tpu.memory_space<vmem>>, vector<1x1x14x128xbf16>
      %294 = vector.shape_cast %293 : vector<1x1x14x128xbf16> to vector<14x128xbf16>
      %c10_264 = arith.constant 10 : index
      %c0_265 = arith.constant 0 : index
      %c0_266 = arith.constant 0 : index
      %295 = vector.load %arg2[%c10_264, %c0_265, %c0_266] : memref<25x128x128xbf16, #tpu.memory_space<vmem>>, vector<1x128x128xbf16>
      %296 = vector.shape_cast %295 : vector<1x128x128xbf16> to vector<128x128xbf16>
      %cst_267 = arith.constant dense<0.000000e+00> : vector<14x128xf32>
      %297 = tpu.matmul %294, %296, %cst_267 {dimension_numbers = #tpu.dot_dimension_numbers<[1], [0], [0], [1], [0, 0, 1, 1], [], []>} : vector<14x128xbf16>, vector<128x128xbf16>, vector<14x128xf32> -> vector<14x128xf32>
      %298 = arith.addf %290, %297 : vector<14x128xf32>
      %c2_i32_268 = arith.constant 2 : i32
      %299 = arith.addi %209, %c2_i32_268 : i32
      %c0_269 = arith.constant 0 : index
      %300 = arith.index_cast %299 : i32 to index
      %c1_270 = arith.constant 1 : index
      %c0_271 = arith.constant 0 : index
      %301 = vector.load %arg1[%c0_269, %300, %c1_270, %c0_271] : memref<1x18x18x128xbf16, #tpu.memory_space<vmem>>, vector<1x1x14x128xbf16>
      %302 = vector.shape_cast %301 : vector<1x1x14x128xbf16> to vector<14x128xbf16>
      %c11_272 = arith.constant 11 : index
      %c0_273 = arith.constant 0 : index
      %c0_274 = arith.constant 0 : index
      %303 = vector.load %arg2[%c11_272, %c0_273, %c0_274] : memref<25x128x128xbf16, #tpu.memory_space<vmem>>, vector<1x128x128xbf16>
      %304 = vector.shape_cast %303 : vector<1x128x128xbf16> to vector<128x128xbf16>
      %cst_275 = arith.constant dense<0.000000e+00> : vector<14x128xf32>
      %305 = tpu.matmul %302, %304, %cst_275 {dimension_numbers = #tpu.dot_dimension_numbers<[1], [0], [0], [1], [0, 0, 1, 1], [], []>} : vector<14x128xbf16>, vector<128x128xbf16>, vector<14x128xf32> -> vector<14x128xf32>
      %306 = arith.addf %298, %305 : vector<14x128xf32>
      %c2_i32_276 = arith.constant 2 : i32
      %307 = arith.addi %209, %c2_i32_276 : i32
      %c0_277 = arith.constant 0 : index
      %308 = arith.index_cast %307 : i32 to index
      %c2_278 = arith.constant 2 : index
      %c0_279 = arith.constant 0 : index
      %309 = vector.load %arg1[%c0_277, %308, %c2_278, %c0_279] : memref<1x18x18x128xbf16, #tpu.memory_space<vmem>>, vector<1x1x14x128xbf16>
      %310 = vector.shape_cast %309 : vector<1x1x14x128xbf16> to vector<14x128xbf16>
      %c12_280 = arith.constant 12 : index
      %c0_281 = arith.constant 0 : index
      %c0_282 = arith.constant 0 : index
      %311 = vector.load %arg2[%c12_280, %c0_281, %c0_282] : memref<25x128x128xbf16, #tpu.memory_space<vmem>>, vector<1x128x128xbf16>
      %312 = vector.shape_cast %311 : vector<1x128x128xbf16> to vector<128x128xbf16>
      %cst_283 = arith.constant dense<0.000000e+00> : vector<14x128xf32>
      %313 = tpu.matmul %310, %312, %cst_283 {dimension_numbers = #tpu.dot_dimension_numbers<[1], [0], [0], [1], [0, 0, 1, 1], [], []>} : vector<14x128xbf16>, vector<128x128xbf16>, vector<14x128xf32> -> vector<14x128xf32>
      %314 = arith.addf %306, %313 : vector<14x128xf32>
      %c2_i32_284 = arith.constant 2 : i32
      %315 = arith.addi %209, %c2_i32_284 : i32
      %c0_285 = arith.constant 0 : index
      %316 = arith.index_cast %315 : i32 to index
      %c3_286 = arith.constant 3 : index
      %c0_287 = arith.constant 0 : index
      %317 = vector.load %arg1[%c0_285, %316, %c3_286, %c0_287] : memref<1x18x18x128xbf16, #tpu.memory_space<vmem>>, vector<1x1x14x128xbf16>
      %318 = vector.shape_cast %317 : vector<1x1x14x128xbf16> to vector<14x128xbf16>
      %c13_288 = arith.constant 13 : index
      %c0_289 = arith.constant 0 : index
      %c0_290 = arith.constant 0 : index
      %319 = vector.load %arg2[%c13_288, %c0_289, %c0_290] : memref<25x128x128xbf16, #tpu.memory_space<vmem>>, vector<1x128x128xbf16>
      %320 = vector.shape_cast %319 : vector<1x128x128xbf16> to vector<128x128xbf16>
      %cst_291 = arith.constant dense<0.000000e+00> : vector<14x128xf32>
      %321 = tpu.matmul %318, %320, %cst_291 {dimension_numbers = #tpu.dot_dimension_numbers<[1], [0], [0], [1], [0, 0, 1, 1], [], []>} : vector<14x128xbf16>, vector<128x128xbf16>, vector<14x128xf32> -> vector<14x128xf32>
      %322 = arith.addf %314, %321 : vector<14x128xf32>
      %c2_i32_292 = arith.constant 2 : i32
      %323 = arith.addi %209, %c2_i32_292 : i32
      %c0_293 = arith.constant 0 : index
      %324 = arith.index_cast %323 : i32 to index
      %c4_294 = arith.constant 4 : index
      %c0_295 = arith.constant 0 : index
      %325 = vector.load %arg1[%c0_293, %324, %c4_294, %c0_295] : memref<1x18x18x128xbf16, #tpu.memory_space<vmem>>, vector<1x1x14x128xbf16>
      %326 = vector.shape_cast %325 : vector<1x1x14x128xbf16> to vector<14x128xbf16>
      %c14_296 = arith.constant 14 : index
      %c0_297 = arith.constant 0 : index
      %c0_298 = arith.constant 0 : index
      %327 = vector.load %arg2[%c14_296, %c0_297, %c0_298] : memref<25x128x128xbf16, #tpu.memory_space<vmem>>, vector<1x128x128xbf16>
      %328 = vector.shape_cast %327 : vector<1x128x128xbf16> to vector<128x128xbf16>
      %cst_299 = arith.constant dense<0.000000e+00> : vector<14x128xf32>
      %329 = tpu.matmul %326, %328, %cst_299 {dimension_numbers = #tpu.dot_dimension_numbers<[1], [0], [0], [1], [0, 0, 1, 1], [], []>} : vector<14x128xbf16>, vector<128x128xbf16>, vector<14x128xf32> -> vector<14x128xf32>
      %330 = arith.addf %322, %329 : vector<14x128xf32>
      %c3_i32_300 = arith.constant 3 : i32
      %331 = arith.addi %209, %c3_i32_300 : i32
      %c0_301 = arith.constant 0 : index
      %332 = arith.index_cast %331 : i32 to index
      %c0_302 = arith.constant 0 : index
      %c0_303 = arith.constant 0 : index
      %333 = vector.load %arg1[%c0_301, %332, %c0_302, %c0_303] : memref<1x18x18x128xbf16, #tpu.memory_space<vmem>>, vector<1x1x14x128xbf16>
      %334 = vector.shape_cast %333 : vector<1x1x14x128xbf16> to vector<14x128xbf16>
      %c15_304 = arith.constant 15 : index
      %c0_305 = arith.constant 0 : index
      %c0_306 = arith.constant 0 : index
      %335 = vector.load %arg2[%c15_304, %c0_305, %c0_306] : memref<25x128x128xbf16, #tpu.memory_space<vmem>>, vector<1x128x128xbf16>
      %336 = vector.shape_cast %335 : vector<1x128x128xbf16> to vector<128x128xbf16>
      %cst_307 = arith.constant dense<0.000000e+00> : vector<14x128xf32>
      %337 = tpu.matmul %334, %336, %cst_307 {dimension_numbers = #tpu.dot_dimension_numbers<[1], [0], [0], [1], [0, 0, 1, 1], [], []>} : vector<14x128xbf16>, vector<128x128xbf16>, vector<14x128xf32> -> vector<14x128xf32>
      %338 = arith.addf %330, %337 : vector<14x128xf32>
      %c3_i32_308 = arith.constant 3 : i32
      %339 = arith.addi %209, %c3_i32_308 : i32
      %c0_309 = arith.constant 0 : index
      %340 = arith.index_cast %339 : i32 to index
      %c1_310 = arith.constant 1 : index
      %c0_311 = arith.constant 0 : index
      %341 = vector.load %arg1[%c0_309, %340, %c1_310, %c0_311] : memref<1x18x18x128xbf16, #tpu.memory_space<vmem>>, vector<1x1x14x128xbf16>
      %342 = vector.shape_cast %341 : vector<1x1x14x128xbf16> to vector<14x128xbf16>
      %c16_312 = arith.constant 16 : index
      %c0_313 = arith.constant 0 : index
      %c0_314 = arith.constant 0 : index
      %343 = vector.load %arg2[%c16_312, %c0_313, %c0_314] : memref<25x128x128xbf16, #tpu.memory_space<vmem>>, vector<1x128x128xbf16>
      %344 = vector.shape_cast %343 : vector<1x128x128xbf16> to vector<128x128xbf16>
      %cst_315 = arith.constant dense<0.000000e+00> : vector<14x128xf32>
      %345 = tpu.matmul %342, %344, %cst_315 {dimension_numbers = #tpu.dot_dimension_numbers<[1], [0], [0], [1], [0, 0, 1, 1], [], []>} : vector<14x128xbf16>, vector<128x128xbf16>, vector<14x128xf32> -> vector<14x128xf32>
      %346 = arith.addf %338, %345 : vector<14x128xf32>
      %c3_i32_316 = arith.constant 3 : i32
      %347 = arith.addi %209, %c3_i32_316 : i32
      %c0_317 = arith.constant 0 : index
      %348 = arith.index_cast %347 : i32 to index
      %c2_318 = arith.constant 2 : index
      %c0_319 = arith.constant 0 : index
      %349 = vector.load %arg1[%c0_317, %348, %c2_318, %c0_319] : memref<1x18x18x128xbf16, #tpu.memory_space<vmem>>, vector<1x1x14x128xbf16>
      %350 = vector.shape_cast %349 : vector<1x1x14x128xbf16> to vector<14x128xbf16>
      %c17_320 = arith.constant 17 : index
      %c0_321 = arith.constant 0 : index
      %c0_322 = arith.constant 0 : index
      %351 = vector.load %arg2[%c17_320, %c0_321, %c0_322] : memref<25x128x128xbf16, #tpu.memory_space<vmem>>, vector<1x128x128xbf16>
      %352 = vector.shape_cast %351 : vector<1x128x128xbf16> to vector<128x128xbf16>
      %cst_323 = arith.constant dense<0.000000e+00> : vector<14x128xf32>
      %353 = tpu.matmul %350, %352, %cst_323 {dimension_numbers = #tpu.dot_dimension_numbers<[1], [0], [0], [1], [0, 0, 1, 1], [], []>} : vector<14x128xbf16>, vector<128x128xbf16>, vector<14x128xf32> -> vector<14x128xf32>
      %354 = arith.addf %346, %353 : vector<14x128xf32>
      %c3_i32_324 = arith.constant 3 : i32
      %355 = arith.addi %209, %c3_i32_324 : i32
      %c0_325 = arith.constant 0 : index
      %356 = arith.index_cast %355 : i32 to index
      %c3_326 = arith.constant 3 : index
      %c0_327 = arith.constant 0 : index
      %357 = vector.load %arg1[%c0_325, %356, %c3_326, %c0_327] : memref<1x18x18x128xbf16, #tpu.memory_space<vmem>>, vector<1x1x14x128xbf16>
      %358 = vector.shape_cast %357 : vector<1x1x14x128xbf16> to vector<14x128xbf16>
      %c18_328 = arith.constant 18 : index
      %c0_329 = arith.constant 0 : index
      %c0_330 = arith.constant 0 : index
      %359 = vector.load %arg2[%c18_328, %c0_329, %c0_330] : memref<25x128x128xbf16, #tpu.memory_space<vmem>>, vector<1x128x128xbf16>
      %360 = vector.shape_cast %359 : vector<1x128x128xbf16> to vector<128x128xbf16>
      %cst_331 = arith.constant dense<0.000000e+00> : vector<14x128xf32>
      %361 = tpu.matmul %358, %360, %cst_331 {dimension_numbers = #tpu.dot_dimension_numbers<[1], [0], [0], [1], [0, 0, 1, 1], [], []>} : vector<14x128xbf16>, vector<128x128xbf16>, vector<14x128xf32> -> vector<14x128xf32>
      %362 = arith.addf %354, %361 : vector<14x128xf32>
      %c3_i32_332 = arith.constant 3 : i32
      %363 = arith.addi %209, %c3_i32_332 : i32
      %c0_333 = arith.constant 0 : index
      %364 = arith.index_cast %363 : i32 to index
      %c4_334 = arith.constant 4 : index
      %c0_335 = arith.constant 0 : index
      %365 = vector.load %arg1[%c0_333, %364, %c4_334, %c0_335] : memref<1x18x18x128xbf16, #tpu.memory_space<vmem>>, vector<1x1x14x128xbf16>
      %366 = vector.shape_cast %365 : vector<1x1x14x128xbf16> to vector<14x128xbf16>
      %c19_336 = arith.constant 19 : index
      %c0_337 = arith.constant 0 : index
      %c0_338 = arith.constant 0 : index
      %367 = vector.load %arg2[%c19_336, %c0_337, %c0_338] : memref<25x128x128xbf16, #tpu.memory_space<vmem>>, vector<1x128x128xbf16>
      %368 = vector.shape_cast %367 : vector<1x128x128xbf16> to vector<128x128xbf16>
      %cst_339 = arith.constant dense<0.000000e+00> : vector<14x128xf32>
      %369 = tpu.matmul %366, %368, %cst_339 {dimension_numbers = #tpu.dot_dimension_numbers<[1], [0], [0], [1], [0, 0, 1, 1], [], []>} : vector<14x128xbf16>, vector<128x128xbf16>, vector<14x128xf32> -> vector<14x128xf32>
      %370 = arith.addf %362, %369 : vector<14x128xf32>
      %c4_i32_340 = arith.constant 4 : i32
      %371 = arith.addi %209, %c4_i32_340 : i32
      %c0_341 = arith.constant 0 : index
      %372 = arith.index_cast %371 : i32 to index
      %c0_342 = arith.constant 0 : index
      %c0_343 = arith.constant 0 : index
      %373 = vector.load %arg1[%c0_341, %372, %c0_342, %c0_343] : memref<1x18x18x128xbf16, #tpu.memory_space<vmem>>, vector<1x1x14x128xbf16>
      %374 = vector.shape_cast %373 : vector<1x1x14x128xbf16> to vector<14x128xbf16>
      %c20_344 = arith.constant 20 : index
      %c0_345 = arith.constant 0 : index
      %c0_346 = arith.constant 0 : index
      %375 = vector.load %arg2[%c20_344, %c0_345, %c0_346] : memref<25x128x128xbf16, #tpu.memory_space<vmem>>, vector<1x128x128xbf16>
      %376 = vector.shape_cast %375 : vector<1x128x128xbf16> to vector<128x128xbf16>
      %cst_347 = arith.constant dense<0.000000e+00> : vector<14x128xf32>
      %377 = tpu.matmul %374, %376, %cst_347 {dimension_numbers = #tpu.dot_dimension_numbers<[1], [0], [0], [1], [0, 0, 1, 1], [], []>} : vector<14x128xbf16>, vector<128x128xbf16>, vector<14x128xf32> -> vector<14x128xf32>
      %378 = arith.addf %370, %377 : vector<14x128xf32>
      %c4_i32_348 = arith.constant 4 : i32
      %379 = arith.addi %209, %c4_i32_348 : i32
      %c0_349 = arith.constant 0 : index
      %380 = arith.index_cast %379 : i32 to index
      %c1_350 = arith.constant 1 : index
      %c0_351 = arith.constant 0 : index
      %381 = vector.load %arg1[%c0_349, %380, %c1_350, %c0_351] : memref<1x18x18x128xbf16, #tpu.memory_space<vmem>>, vector<1x1x14x128xbf16>
      %382 = vector.shape_cast %381 : vector<1x1x14x128xbf16> to vector<14x128xbf16>
      %c21_352 = arith.constant 21 : index
      %c0_353 = arith.constant 0 : index
      %c0_354 = arith.constant 0 : index
      %383 = vector.load %arg2[%c21_352, %c0_353, %c0_354] : memref<25x128x128xbf16, #tpu.memory_space<vmem>>, vector<1x128x128xbf16>
      %384 = vector.shape_cast %383 : vector<1x128x128xbf16> to vector<128x128xbf16>
      %cst_355 = arith.constant dense<0.000000e+00> : vector<14x128xf32>
      %385 = tpu.matmul %382, %384, %cst_355 {dimension_numbers = #tpu.dot_dimension_numbers<[1], [0], [0], [1], [0, 0, 1, 1], [], []>} : vector<14x128xbf16>, vector<128x128xbf16>, vector<14x128xf32> -> vector<14x128xf32>
      %386 = arith.addf %378, %385 : vector<14x128xf32>
      %c4_i32_356 = arith.constant 4 : i32
      %387 = arith.addi %209, %c4_i32_356 : i32
      %c0_357 = arith.constant 0 : index
      %388 = arith.index_cast %387 : i32 to index
      %c2_358 = arith.constant 2 : index
      %c0_359 = arith.constant 0 : index
      %389 = vector.load %arg1[%c0_357, %388, %c2_358, %c0_359] : memref<1x18x18x128xbf16, #tpu.memory_space<vmem>>, vector<1x1x14x128xbf16>
      %390 = vector.shape_cast %389 : vector<1x1x14x128xbf16> to vector<14x128xbf16>
      %c22_360 = arith.constant 22 : index
      %c0_361 = arith.constant 0 : index
      %c0_362 = arith.constant 0 : index
      %391 = vector.load %arg2[%c22_360, %c0_361, %c0_362] : memref<25x128x128xbf16, #tpu.memory_space<vmem>>, vector<1x128x128xbf16>
      %392 = vector.shape_cast %391 : vector<1x128x128xbf16> to vector<128x128xbf16>
      %cst_363 = arith.constant dense<0.000000e+00> : vector<14x128xf32>
      %393 = tpu.matmul %390, %392, %cst_363 {dimension_numbers = #tpu.dot_dimension_numbers<[1], [0], [0], [1], [0, 0, 1, 1], [], []>} : vector<14x128xbf16>, vector<128x128xbf16>, vector<14x128xf32> -> vector<14x128xf32>
      %394 = arith.addf %386, %393 : vector<14x128xf32>
      %c4_i32_364 = arith.constant 4 : i32
      %395 = arith.addi %209, %c4_i32_364 : i32
      %c0_365 = arith.constant 0 : index
      %396 = arith.index_cast %395 : i32 to index
      %c3_366 = arith.constant 3 : index
      %c0_367 = arith.constant 0 : index
      %397 = vector.load %arg1[%c0_365, %396, %c3_366, %c0_367] : memref<1x18x18x128xbf16, #tpu.memory_space<vmem>>, vector<1x1x14x128xbf16>
      %398 = vector.shape_cast %397 : vector<1x1x14x128xbf16> to vector<14x128xbf16>
      %c23_368 = arith.constant 23 : index
      %c0_369 = arith.constant 0 : index
      %c0_370 = arith.constant 0 : index
      %399 = vector.load %arg2[%c23_368, %c0_369, %c0_370] : memref<25x128x128xbf16, #tpu.memory_space<vmem>>, vector<1x128x128xbf16>
      %400 = vector.shape_cast %399 : vector<1x128x128xbf16> to vector<128x128xbf16>
      %cst_371 = arith.constant dense<0.000000e+00> : vector<14x128xf32>
      %401 = tpu.matmul %398, %400, %cst_371 {dimension_numbers = #tpu.dot_dimension_numbers<[1], [0], [0], [1], [0, 0, 1, 1], [], []>} : vector<14x128xbf16>, vector<128x128xbf16>, vector<14x128xf32> -> vector<14x128xf32>
      %402 = arith.addf %394, %401 : vector<14x128xf32>
      %c4_i32_372 = arith.constant 4 : i32
      %403 = arith.addi %209, %c4_i32_372 : i32
      %c0_373 = arith.constant 0 : index
      %404 = arith.index_cast %403 : i32 to index
      %c4_374 = arith.constant 4 : index
      %c0_375 = arith.constant 0 : index
      %405 = vector.load %arg1[%c0_373, %404, %c4_374, %c0_375] : memref<1x18x18x128xbf16, #tpu.memory_space<vmem>>, vector<1x1x14x128xbf16>
      %406 = vector.shape_cast %405 : vector<1x1x14x128xbf16> to vector<14x128xbf16>
      %c24_376 = arith.constant 24 : index
      %c0_377 = arith.constant 0 : index
      %c0_378 = arith.constant 0 : index
      %407 = vector.load %arg2[%c24_376, %c0_377, %c0_378] : memref<25x128x128xbf16, #tpu.memory_space<vmem>>, vector<1x128x128xbf16>
      %408 = vector.shape_cast %407 : vector<1x128x128xbf16> to vector<128x128xbf16>
      %cst_379 = arith.constant dense<0.000000e+00> : vector<14x128xf32>
      %409 = tpu.matmul %406, %408, %cst_379 {dimension_numbers = #tpu.dot_dimension_numbers<[1], [0], [0], [1], [0, 0, 1, 1], [], []>} : vector<14x128xbf16>, vector<128x128xbf16>, vector<14x128xf32> -> vector<14x128xf32>
      %410 = arith.addf %402, %409 : vector<14x128xf32>
      %c0_380 = arith.constant 0 : index
      %c0_381 = arith.constant 0 : index
      %411 = vector.load %arg3[%c0_380, %c0_381] : memref<1x128xf32, #tpu.memory_space<vmem>>, vector<1x128xf32>
      %412 = vector.broadcast %411 : vector<1x128xf32> to vector<14x128xf32>
      %413 = arith.addf %410, %412 : vector<14x128xf32>
      %cst_382 = arith.constant 0.000000e+00 : f32
      %414 = vector.broadcast %cst_382 : f32 to vector<14x128xf32>
      %415 = arith.maximumf %413, %414 : vector<14x128xf32>
      %416 = arith.maximumf %207, %415 : vector<14x128xf32>
      %417 = vector.extract_strided_slice %416 {offsets = [0, 0], sizes = [1, 128], strides = [1, 1]} : vector<14x128xf32> to vector<1x128xf32>
      %418 = vector.extract_strided_slice %416 {offsets = [2, 0], sizes = [1, 128], strides = [1, 1]} : vector<14x128xf32> to vector<1x128xf32>
      %419 = vector.extract_strided_slice %416 {offsets = [4, 0], sizes = [1, 128], strides = [1, 1]} : vector<14x128xf32> to vector<1x128xf32>
      %420 = vector.extract_strided_slice %416 {offsets = [6, 0], sizes = [1, 128], strides = [1, 1]} : vector<14x128xf32> to vector<1x128xf32>
      %421 = vector.extract_strided_slice %416 {offsets = [8, 0], sizes = [1, 128], strides = [1, 1]} : vector<14x128xf32> to vector<1x128xf32>
      %422 = vector.extract_strided_slice %416 {offsets = [10, 0], sizes = [1, 128], strides = [1, 1]} : vector<14x128xf32> to vector<1x128xf32>
      %423 = vector.extract_strided_slice %416 {offsets = [12, 0], sizes = [1, 128], strides = [1, 1]} : vector<14x128xf32> to vector<1x128xf32>
      %424 = tpu.concatenate %417, %418, %419, %420, %421, %422, %423 in 0 : vector<1x128xf32>, vector<1x128xf32>, vector<1x128xf32>, vector<1x128xf32>, vector<1x128xf32>, vector<1x128xf32>, vector<1x128xf32> -> vector<7x128xf32>
      %425 = vector.extract_strided_slice %416 {offsets = [1, 0], sizes = [1, 128], strides = [1, 1]} : vector<14x128xf32> to vector<1x128xf32>
      %426 = vector.extract_strided_slice %416 {offsets = [3, 0], sizes = [1, 128], strides = [1, 1]} : vector<14x128xf32> to vector<1x128xf32>
      %427 = vector.extract_strided_slice %416 {offsets = [5, 0], sizes = [1, 128], strides = [1, 1]} : vector<14x128xf32> to vector<1x128xf32>
      %428 = vector.extract_strided_slice %416 {offsets = [7, 0], sizes = [1, 128], strides = [1, 1]} : vector<14x128xf32> to vector<1x128xf32>
      %429 = vector.extract_strided_slice %416 {offsets = [9, 0], sizes = [1, 128], strides = [1, 1]} : vector<14x128xf32> to vector<1x128xf32>
      %430 = vector.extract_strided_slice %416 {offsets = [11, 0], sizes = [1, 128], strides = [1, 1]} : vector<14x128xf32> to vector<1x128xf32>
      %431 = vector.extract_strided_slice %416 {offsets = [13, 0], sizes = [1, 128], strides = [1, 1]} : vector<14x128xf32> to vector<1x128xf32>
      %432 = tpu.concatenate %425, %426, %427, %428, %429, %430, %431 in 0 : vector<1x128xf32>, vector<1x128xf32>, vector<1x128xf32>, vector<1x128xf32>, vector<1x128xf32>, vector<1x128xf32>, vector<1x128xf32> -> vector<7x128xf32>
      %433 = arith.maximumf %424, %432 : vector<7x128xf32>
      %434 = arith.truncf %433 : vector<7x128xf32> to vector<7x128xbf16>
      %c0_383 = arith.constant 0 : index
      %435 = arith.index_cast %arg5 : i32 to index
      %c0_384 = arith.constant 0 : index
      %c0_385 = arith.constant 0 : index
      %436 = vector.load %arg4[%c0_383, %435, %c0_384, %c0_385] : memref<1x7x7x128xbf16, #tpu.memory_space<vmem>>, vector<1x1x7x128xbf16>
      %437 = vector.shape_cast %436 : vector<1x1x7x128xbf16> to vector<7x128xbf16>
      %438 = vector.shape_cast %434 : vector<7x128xbf16> to vector<1x1x7x128xbf16>
      tpu.vector_store %arg4[%c0_383, %435, %c0_384, %c0_385], %438 {strides = array<i32>} : memref<1x7x7x128xbf16, #tpu.memory_space<vmem>>, vector<1x1x7x128xbf16>,
    }
    %c7_i32_0 = arith.constant 7 : i32
    return
  }
  func.func @transform_0(%arg0: i32) -> (i32, i32, i32, i32) {
    %c0_i32 = arith.constant 0 : i32
    %c0_i32_0 = arith.constant 0 : i32
    %c0_i32_1 = arith.constant 0 : i32
    %c0_i32_2 = arith.constant 0 : i32
    return %arg0, %c0_i32, %c0_i32_0, %c0_i32_1 : i32, i32, i32, i32
  }
  func.func @transform_1(%arg0: i32) -> (i32, i32, i32) {
    %c0_i32 = arith.constant 0 : i32
    %c0_i32_0 = arith.constant 0 : i32
    %c0_i32_1 = arith.constant 0 : i32
    %c0_i32_2 = arith.constant 0 : i32
    return %c0_i32, %c0_i32_0, %c0_i32_1 : i32, i32, i32
  }
  func.func @transform_2(%arg0: i32) -> (i32, i32) {
    %c0_i32 = arith.constant 0 : i32
    %c0_i32_0 = arith.constant 0 : i32
    %c0_i32_1 = arith.constant 0 : i32
    return %c0_i32, %c0_i32_0 : i32, i32
  }
  func.func @transform_3(%arg0: i32) -> (i32, i32, i32, i32) {
    %c0_i32 = arith.constant 0 : i32
    %c0_i32_0 = arith.constant 0 : i32
    %c0_i32_1 = arith.constant 0 : i32
    %c0_i32_2 = arith.constant 0 : i32
    return %arg0, %c0_i32, %c0_i32_0, %c0_i32_1 : i32, i32, i32, i32
  }
}

module attributes {stable_mosaic.version = 11 : i64} {
  func.func @_fc_head_kernel(%arg0: i32, %arg1: memref<8x6272xbf16, #tpu.memory_space<vmem>>, %arg2: memref<6272x128xbf16, #tpu.memory_space<vmem>>, %arg3: memref<1x128xf32, #tpu.memory_space<vmem>>, %arg4: memref<128x128xbf16, #tpu.memory_space<vmem>>, %arg5: memref<1x128xf32, #tpu.memory_space<vmem>>, %arg6: memref<8x128xf32, #tpu.memory_space<vmem>>) attributes {dimension_semantics = [#tpu.dimension_semantics<parallel>], iteration_bounds = array<i64: 1>, scalar_prefetch = 0 : i64, scratch_operands = 0 : i64, tpu.core_type = #tpu.core_type<tc>, window_params = [{transform_indices = @transform_0, window_bounds = array<i64: 8, 6272>}, {pipeline_mode = #tpu.pipeline_mode<synchronous>, transform_indices = @transform_1, window_bounds = array<i64: 6272, 128>}, {pipeline_mode = #tpu.pipeline_mode<synchronous>, transform_indices = @transform_2, window_bounds = array<i64: 1, 128>}, {pipeline_mode = #tpu.pipeline_mode<synchronous>, transform_indices = @transform_3, window_bounds = array<i64: 128, 128>}, {pipeline_mode = #tpu.pipeline_mode<synchronous>, transform_indices = @transform_4, window_bounds = array<i64: 1, 128>}, {transform_indices = @transform_5, window_bounds = array<i64: 8, 128>}]} {
    %c0 = arith.constant 0 : index
    %c0_0 = arith.constant 0 : index
    %0 = vector.load %arg1[%c0, %c0_0] : memref<8x6272xbf16, #tpu.memory_space<vmem>>, vector<8x6272xbf16>
    %c0_1 = arith.constant 0 : index
    %c0_2 = arith.constant 0 : index
    %1 = vector.load %arg2[%c0_1, %c0_2] : memref<6272x128xbf16, #tpu.memory_space<vmem>>, vector<6272x128xbf16>
    %cst = arith.constant dense<0.000000e+00> : vector<8x128xf32>
    %2 = tpu.matmul %0, %1, %cst {dimension_numbers = #tpu.dot_dimension_numbers<[1], [0], [0], [1], [0, 0, 1, 1], [], []>} : vector<8x6272xbf16>, vector<6272x128xbf16>, vector<8x128xf32> -> vector<8x128xf32>
    %c0_3 = arith.constant 0 : index
    %c0_4 = arith.constant 0 : index
    %3 = vector.load %arg3[%c0_3, %c0_4] : memref<1x128xf32, #tpu.memory_space<vmem>>, vector<1x128xf32>
    %4 = vector.broadcast %3 : vector<1x128xf32> to vector<8x128xf32>
    %5 = arith.addf %2, %4 : vector<8x128xf32>
    %cst_5 = arith.constant 0.000000e+00 : f32
    %6 = vector.broadcast %cst_5 : f32 to vector<8x128xf32>
    %7 = arith.maximumf %5, %6 : vector<8x128xf32>
    %8 = arith.truncf %7 : vector<8x128xf32> to vector<8x128xbf16>
    %c0_6 = arith.constant 0 : index
    %c0_7 = arith.constant 0 : index
    %9 = vector.load %arg4[%c0_6, %c0_7] : memref<128x128xbf16, #tpu.memory_space<vmem>>, vector<128x128xbf16>
    %cst_8 = arith.constant dense<0.000000e+00> : vector<8x128xf32>
    %10 = tpu.matmul %8, %9, %cst_8 {dimension_numbers = #tpu.dot_dimension_numbers<[1], [0], [0], [1], [0, 0, 1, 1], [], []>} : vector<8x128xbf16>, vector<128x128xbf16>, vector<8x128xf32> -> vector<8x128xf32>
    %c0_9 = arith.constant 0 : index
    %c0_10 = arith.constant 0 : index
    %11 = vector.load %arg5[%c0_9, %c0_10] : memref<1x128xf32, #tpu.memory_space<vmem>>, vector<1x128xf32>
    %12 = vector.broadcast %11 : vector<1x128xf32> to vector<8x128xf32>
    %13 = arith.addf %10, %12 : vector<8x128xf32>
    %14 = tpu.iota {dimensions = array<i32: 1>} : vector<8x128xi32>
    %c10_i32 = arith.constant 10 : i32
    %15 = vector.broadcast %c10_i32 : i32 to vector<8x128xi32>
    %16 = arith.cmpi slt, %14, %15 : vector<8x128xi32>
    %cst_11 = arith.constant -1.000000e+30 : f32
    %17 = vector.broadcast %cst_11 : f32 to vector<8x128xf32>
    %18 = arith.select %16, %13, %17 : vector<8x128xi1>, vector<8x128xf32>
    %cst_12 = arith.constant dense<0xFF800000> : vector<8xf32>
    %19 = vector.multi_reduction <maximumf>, %18, %cst_12 [1] : vector<8x128xf32> to vector<8xf32>
    %20 = vector.shape_cast %19 : vector<8xf32> to vector<8x1xf32>
    %21 = vector.broadcast %20 : vector<8x1xf32> to vector<8x128xf32>
    %22 = arith.subf %18, %21 : vector<8x128xf32>
    %23 = math.exp %22 : vector<8x128xf32>
    %cst_13 = arith.constant dense<0.000000e+00> : vector<8xf32>
    %24 = vector.multi_reduction <add>, %23, %cst_13 [1] : vector<8x128xf32> to vector<8xf32>
    %25 = vector.shape_cast %24 : vector<8xf32> to vector<8x1xf32>
    %26 = tpu.reciprocal %25 {approx = true} : vector<8x1xf32> -> vector<8x1xf32>
    %27 = vector.broadcast %26 : vector<8x1xf32> to vector<8x128xf32>
    %28 = arith.mulf %23, %27 : vector<8x128xf32>
    %c0_14 = arith.constant 0 : index
    %c0_15 = arith.constant 0 : index
    %29 = vector.load %arg6[%c0_14, %c0_15] : memref<8x128xf32, #tpu.memory_space<vmem>>, vector<8x128xf32>
    tpu.vector_store %arg6[%c0_14, %c0_15], %28 {strides = array<i32>} : memref<8x128xf32, #tpu.memory_space<vmem>>, vector<8x128xf32>,
    return
  }
  func.func @transform_0(%arg0: i32) -> (i32, i32) {
    %c0_i32 = arith.constant 0 : i32
    %c0_i32_0 = arith.constant 0 : i32
    return %arg0, %c0_i32 : i32, i32
  }
  func.func @transform_1(%arg0: i32) -> (i32, i32) {
    %c0_i32 = arith.constant 0 : i32
    %c0_i32_0 = arith.constant 0 : i32
    %c0_i32_1 = arith.constant 0 : i32
    return %c0_i32, %c0_i32_0 : i32, i32
  }
  func.func @transform_2(%arg0: i32) -> (i32, i32) {
    %c0_i32 = arith.constant 0 : i32
    %c0_i32_0 = arith.constant 0 : i32
    %c0_i32_1 = arith.constant 0 : i32
    return %c0_i32, %c0_i32_0 : i32, i32
  }
  func.func @transform_3(%arg0: i32) -> (i32, i32) {
    %c0_i32 = arith.constant 0 : i32
    %c0_i32_0 = arith.constant 0 : i32
    %c0_i32_1 = arith.constant 0 : i32
    return %c0_i32, %c0_i32_0 : i32, i32
  }
  func.func @transform_4(%arg0: i32) -> (i32, i32) {
    %c0_i32 = arith.constant 0 : i32
    %c0_i32_0 = arith.constant 0 : i32
    %c0_i32_1 = arith.constant 0 : i32
    return %c0_i32, %c0_i32_0 : i32, i32
  }
  func.func @transform_5(%arg0: i32) -> (i32, i32) {
    %c0_i32 = arith.constant 0 : i32
    %c0_i32_0 = arith.constant 0 : i32
    return %arg0, %c0_i32 : i32, i32
  }
}

</mosaic_0001>

<bundles_post_ra>
// kernel: classifier_forward.3
= control target key start
LH: loop header
LB: loop body
LE: loop exit
PB: predicated region body
PF: predicated region fallthrough
CT: control target
= control target key end

     0   :  { %s1946_s12 = smov 0   ;;  %s2562_s0 = inlined_call_operand.vmem [shape: f32[2,32,32,1], index: 0, kind: input, shape index: {}]   ;;  %s2563_s1 = inlined_call_operand.vmem [shape: f32[25,1,128], index: 1, kind: input, shape index: {}]   ;;  %s2564_s2 = inlined_call_operand.vmem [shape: f32[1,128], index: 2, kind: input, shape index: {}]   ;;  %s2565_s3 = inlined_call_operand.vmem [shape: bf16[2,14,14,128], index: 3, kind: output, shape index: {}]  }
   0x1 LB: > { %s1704_s13 = sadd.s32 4294967295, %s1919_s12   ;;  %p1708_p0 = scmp.ge.s32.totalorder %s1919_s12, 1  ;;  %s1919_s12 = sphi %s1946_s12, %s13_s12  }
   0x2   : > { %p137_p1 = scmp.lt.s32.totalorder %s1919_s12, 3 }
   0x4   : > { %p138_p2 = pnand %p1708_p0, %p137_p1 }
   0x5   : > { %p161_p3 = scmp.lt.s32.totalorder (!%p138_p2), %s1704_s13, 1  ;;  %s1964_s22 = smov (!%p138_p2), 0  }
   0x6   : > { %141 = sbr.rel (%p138_p2) target bundleno = 406 (0x196), region = 32 }
   0xd   : > { %s2567_s13 = smov (!%p161_p3, %s1704_s13), 1 }
   0xe   : > { %s1879_s14 = sshll.u32 %s2567_s13, 10  ;;  %s1889_s15 = smul.u32 112, %s2567_s13 }
   0xf   : > { %s1957_s18 = scalar_lea.vmem %s2562_s0, %s1879_s14 }
  0x10   : > { %s1962_s21 = scalar_lea.vmem %s2565_s3, %s1889_s15 }
  0x11 LB: >> { %v1925_v0 = vmov 0   ;;  %s1880_s23 = sshll.u32 %s1923_s22, 6  ;;  %vm1569_vm0 = vcmask 1040384   ;;  %vm1571_vm1 = vcmask 1041408   ;;  %vm1573_vm2 = vcmask 1042432   ;;  %s1888_s5 = sshll.u32 %s1923_s22, 3  ;;  %s1923_s22 = sphi %s1964_s22, %s176_s22  }
  0x12   : >> { %1908 = vset.pattern.permute.xlu1 %v1925_v0  ;;  %1907 = vset.pattern.permute.xlu0 %v1925_v0  ;;  %s1971_s24 = scalar_lea.vmem %s1957_s18, %s1880_s23  ;;  %vm1575_vm3 = vcmask 1043456   ;;  %vm1577_vm4 = vcmask 1044480   ;;  %vm1579_vm5 = vcmask 1045504   ;;  %vm1581_vm6 = vcmask 1046528   ;;  %s176_s22 = sadd.s32 1, %s1923_s22  }
  0x13   : >> { %v182_v1 = vld [vmem:[%s1971_s24 + $0x10] sm:$0xff]  ;;  %v180_v2 = vld [vmem:[%s1971_s24] sm:$0xff]  ;;  %v183_v3 = vld [vmem:[%s1971_s24 + $0x18] sm:$0xf]  ;;  %p173_p4 = scmp.ge.s32.totalorder %s176_s22, 14  }
  0x14   : >> { %197 = vperm.xlu1 %1908, %v182_v1   ;;  %187 = vperm.xlu0 %1907, %v180_v2   ;;  %v181_v4 = vld [vmem:[%s1971_s24 + $0x8] sm:$0xff]  ;;  %v222_v7 = vld [vmem:[%s1971_s24 + $0x19] sm:$0xf]  ;;  %v221_v8 = vld [vmem:[%s1971_s24 + $0x11] sm:$0xff] }
  0x15   : >> { %v220_v5 = vld [vmem:[%s1971_s24 + $0x9] sm:$0xff]  ;;  %v219_v6 = vld [vmem:[%s1971_s24 + $0x1] sm:$0xff]  ;;  %v262_v11 = vld [vmem:[%s1971_s24 + $0x1a] sm:$0xf] }
  0x16   : >> { %v260_v9 = vld [vmem:[%s1971_s24 + $0xa] sm:$0xff]  ;;  %v259_v10 = vld [vmem:[%s1971_s24 + $0x2] sm:$0xff]  ;;  %v261_v12 = vld [vmem:[%s1971_s24 + $0x12] sm:$0xff] }
  0x17   : >> { %v300_v13 = vld [vmem:[%s1971_s24 + $0xb] sm:$0xff]  ;;  %v299_v14 = vld [vmem:[%s1971_s24 + $0x3] sm:$0xff]  ;;  %v302_v15 = vld [vmem:[%s1971_s24 + $0x1b] sm:$0xf] }
  0x18   : >> { %202 = vperm.xlu1 %1908, %v183_v3   ;;  %192 = vperm.xlu0 %1907, %v181_v4   ;;  %v301_v16 = vld [vmem:[%s1971_s24 + $0x13] sm:$0xff]  ;;  %v339_v18 = vld [vmem:[%s1971_s24 + $0x4] sm:$0xff]  ;;  %v342_v19 = vld [vmem:[%s1971_s24 + $0x1c] sm:$0xf] }
  0x19   : >> { %v340_v17 = vld [vmem:[%s1971_s24 + $0xc] sm:$0xff]  ;;  %v341_v20 = vld [vmem:[%s1971_s24 + $0x14] sm:$0xff]  ;;  %v1725_v22 = vld [vmem:[%s1971_s24 + $0x20] sm:$0xff] }
  0x1a   : >> { %v1726_v21 = vld [vmem:[%s1971_s24 + $0x28] sm:$0xff]  ;;  %v1728_v23 = vld [vmem:[%s1971_s24 + $0x38] sm:$0xf]  ;;  %v1727_v24 = vld [vmem:[%s1971_s24 + $0x30] sm:$0xff] }
  0x1b   : >> { %v1732_v25 = vld [vmem:[%s1971_s24 + $0x29] sm:$0xff]  ;;  %v1731_v26 = vld [vmem:[%s1971_s24 + $0x21] sm:$0xff]  ;;  %v1734_v27 = vld [vmem:[%s1971_s24 + $0x39] sm:$0xf] }
  0x1c   : >> { %232 = vperm.xlu1 %1908, %v220_v5   ;;  %227 = vperm.xlu0 %1907, %v219_v6   ;;  %v1733_v28 = vld [vmem:[%s1971_s24 + $0x31] sm:$0xff]  ;;  %v1737_v30 = vld [vmem:[%s1971_s24 + $0x22] sm:$0xff]  ;;  %v1740_v31 = vld [vmem:[%s1971_s24 + $0x3a] sm:$0xf] }
  0x1d   : >> { %v1738_v29 = vld [vmem:[%s1971_s24 + $0x2a] sm:$0xff]  ;;  %v1739_v32 = vld [vmem:[%s1971_s24 + $0x32] sm:$0xff]  ;;  %v1746_v35 = vld [vmem:[%s1971_s24 + $0x3b] sm:$0xf] }
  0x1e   : >> { %v1744_v33 = vld [vmem:[%s1971_s24 + $0x2b] sm:$0xff]  ;;  %v1743_v34 = vld [vmem:[%s1971_s24 + $0x23] sm:$0xff]  ;;  %v1745_v36 = vld [vmem:[%s1971_s24 + $0x33] sm:$0xff] }
  0x1f   : >> { %v1750_v37 = vld [vmem:[%s1971_s24 + $0x2c] sm:$0xff]  ;;  %v1749_v38 = vld [vmem:[%s1971_s24 + $0x24] sm:$0xff]  ;;  %v1752_v39 = vld [vmem:[%s1971_s24 + $0x3c] sm:$0xf] }
  0x20   : >> { %242 = vperm.xlu1 %1908, %v222_v7   ;;  %237 = vperm.xlu0 %1907, %v221_v8   ;;  %v1751_v40 = vld [vmem:[%s1971_s24 + $0x34] sm:$0xff]  ;;  %v1758_v41 = vld [vmem:[%s1971_s24 + $0x48] sm:$0xff]  ;;  %v1757_v42 = vld [vmem:[%s1971_s24 + $0x40] sm:$0xff] }
  0x21   : >> { %v1760_v43 = vld [vmem:[%s1971_s24 + $0x58] sm:$0xf]  ;;  %v1759_v44 = vld [vmem:[%s1971_s24 + $0x50] sm:$0xff]  ;;  %v1763_v46 = vld [vmem:[%s1971_s24 + $0x41] sm:$0xff] }
  0x22   : >> { %v1764_v45 = vld [vmem:[%s1971_s24 + $0x49] sm:$0xff]  ;;  %v1766_v47 = vld [vmem:[%s1971_s24 + $0x59] sm:$0xf]  ;;  %v1765_v48 = vld [vmem:[%s1971_s24 + $0x51] sm:$0xff] }
  0x23   : >> { %v1770_v49 = vld [vmem:[%s1971_s24 + $0x4a] sm:$0xff]  ;;  %v1769_v50 = vld [vmem:[%s1971_s24 + $0x42] sm:$0xff]  ;;  %v1772_v51 = vld [vmem:[%s1971_s24 + $0x5a] sm:$0xf] }
  0x24   : >> { %272 = vperm.xlu1 %1908, %v260_v9   ;;  %267 = vperm.xlu0 %1907, %v259_v10   ;;  %v1771_v52 = vld [vmem:[%s1971_s24 + $0x52] sm:$0xff]  ;;  %v1775_v54 = vld [vmem:[%s1971_s24 + $0x43] sm:$0xff]  ;;  %v1778_v55 = vld [vmem:[%s1971_s24 + $0x5b] sm:$0xf] }
  0x25   : >> { %v1776_v53 = vld [vmem:[%s1971_s24 + $0x4b] sm:$0xff]  ;;  %v1777_v56 = vld [vmem:[%s1971_s24 + $0x53] sm:$0xff]  ;;  %v1784_v59 = vld [vmem:[%s1971_s24 + $0x5c] sm:$0xf] }
  0x26   : >> { %v1782_v57 = vld [vmem:[%s1971_s24 + $0x4c] sm:$0xff]  ;;  %v1781_v58 = vld [vmem:[%s1971_s24 + $0x44] sm:$0xff]  ;;  %v1783_v60 = vld [vmem:[%s1971_s24 + $0x54] sm:$0xff] }
  0x27   : >> { %v1790_v61 = vld [vmem:[%s1971_s24 + $0x68] sm:$0xff]  ;;  %v1789_v62 = vld [vmem:[%s1971_s24 + $0x60] sm:$0xff]  ;;  %v1792_v63 = vld [vmem:[%s1971_s24 + $0x78] sm:$0xf] }
  0x28   : >> { %282 = vperm.xlu1 %1908, %v262_v11   ;;  %277 = vperm.xlu0 %1907, %v261_v12   ;;  %v1791_v0 = vld [vmem:[%s1971_s24 + $0x70] sm:$0xff]  ;;  %v1795_v2 = vld [vmem:[%s1971_s24 + $0x61] sm:$0xff]  ;;  %v1798_v5 = vld [vmem:[%s1971_s24 + $0x79] sm:$0xf] }
  0x29   : >> { %v1796_v1 = vld [vmem:[%s1971_s24 + $0x69] sm:$0xff]  ;;  %v1797_v6 = vld [vmem:[%s1971_s24 + $0x71] sm:$0xff] }
  0x2a   : >> { %v1802_v9 = vld [vmem:[%s1971_s24 + $0x6a] sm:$0xff]  ;;  %v1801_v10 = vld [vmem:[%s1971_s24 + $0x62] sm:$0xff] }
  0x2c   : >> { %312 = vperm.xlu1 %1908, %v300_v13   ;;  %307 = vperm.xlu0 %1907, %v299_v14   ;;  %v1804_v13 = vld [vmem:[%s1971_s24 + $0x7a] sm:$0xf]  ;;  %v1803_v14 = vld [vmem:[%s1971_s24 + $0x72] sm:$0xff] }
  0x30   : >> { %322 = vperm.xlu1 %1908, %v302_v15   ;;  %317 = vperm.xlu0 %1907, %v301_v16  }
  0x34   : >> { %352 = vperm.xlu1 %1908, %v340_v17   ;;  %347 = vperm.xlu0 %1907, %v339_v18   ;;  %v1808_v17 = vld [vmem:[%s1971_s24 + $0x6b] sm:$0xff]  ;;  %v1807_v18 = vld [vmem:[%s1971_s24 + $0x63] sm:$0xff] }
  0x38   : >> { %362 = vperm.xlu1 %1908, %v342_v19   ;;  %357 = vperm.xlu0 %1907, %v341_v20  }
  0x3c   : >> { %395 = vperm.xlu1 %1908, %v1726_v21   ;;  %390 = vperm.xlu0 %1907, %v1725_v22   ;;  %v1810_v21 = vld [vmem:[%s1971_s24 + $0x7b] sm:$0xf]  ;;  %v1809_v22 = vld [vmem:[%s1971_s24 + $0x73] sm:$0xff] }
  0x40   : >> { %405 = vperm.xlu1 %1908, %v1728_v23   ;;  %400 = vperm.xlu0 %1907, %v1727_v24  }
  0x44   : >> { %435 = vperm.xlu1 %1908, %v1732_v25   ;;  %430 = vperm.xlu0 %1907, %v1731_v26   ;;  %v1814_v25 = vld [vmem:[%s1971_s24 + $0x6c] sm:$0xff]  ;;  %v1813_v26 = vld [vmem:[%s1971_s24 + $0x64] sm:$0xff] }
  0x48   : >> { %445 = vperm.xlu1 %1908, %v1734_v27   ;;  %440 = vperm.xlu0 %1907, %v1733_v28  }
  0x4c   : >> { %475 = vperm.xlu1 %1908, %v1738_v29   ;;  %470 = vperm.xlu0 %1907, %v1737_v30   ;;  %v1816_v29 = vld [vmem:[%s1971_s24 + $0x7c] sm:$0xf]  ;;  %v1815_v30 = vld [vmem:[%s1971_s24 + $0x74] sm:$0xff] }
  0x50   : >> { %485 = vperm.xlu1 %1908, %v1740_v31   ;;  %480 = vperm.xlu0 %1907, %v1739_v32  }
  0x54   : >> { %515 = vperm.xlu1 %1908, %v1744_v33   ;;  %510 = vperm.xlu0 %1907, %v1743_v34   ;;  %v1822_v33 = vld [vmem:[%s1971_s24 + $0x88] sm:$0xff]  ;;  %v1821_v34 = vld [vmem:[%s1971_s24 + $0x80] sm:$0xff] }
  0x58   : >> { %525 = vperm.xlu1 %1908, %v1746_v35   ;;  %520 = vperm.xlu0 %1907, %v1745_v36  }
  0x5c   : >> { %555 = vperm.xlu1 %1908, %v1750_v37   ;;  %550 = vperm.xlu0 %1907, %v1749_v38   ;;  %v1824_v37 = vld [vmem:[%s1971_s24 + $0x98] sm:$0xf]  ;;  %v1823_v38 = vld [vmem:[%s1971_s24 + $0x90] sm:$0xff] }
  0x60   : >> { %565 = vperm.xlu1 %1908, %v1752_v39   ;;  %560 = vperm.xlu0 %1907, %v1751_v40  }
  0x64   : >> { %598 = vperm.xlu1 %1908, %v1758_v41   ;;  %593 = vperm.xlu0 %1907, %v1757_v42   ;;  %v2068_v41 = vld [vmem:[%s2563_s1 + $0x1] ss:$0 sm:$0xff]  ;;  %v1828_v42 = vld [vmem:[%s1971_s24 + $0x89] sm:$0xff] }
  0x68   : >> { %608 = vperm.xlu1 %1908, %v1760_v43   ;;  %603 = vperm.xlu0 %1907, %v1759_v44   ;;  %v2074_v43 = vld [vmem:[%s2563_s1] ss:$0 sm:$0xff] }
  0x6c   : >> { %638 = vperm.xlu1 %1908, %v1764_v45   ;;  %633 = vperm.xlu0 %1907, %v1763_v46   ;;  %v2081_v46 = vld [vmem:[%s2563_s1 + $0x2] ss:$0 sm:$0xff] }
  0x70   : >> { %648 = vperm.xlu1 %1908, %v1766_v47   ;;  %643 = vperm.xlu0 %1907, %v1765_v48   ;;  %v1827_v47 = vld [vmem:[%s1971_s24 + $0x81] sm:$0xff] }
  0x74   : >> { %678 = vperm.xlu1 %1908, %v1770_v49   ;;  %673 = vperm.xlu0 %1907, %v1769_v50  }
  0x78   : >> { %688 = vperm.xlu1 %1908, %v1772_v51   ;;  %683 = vperm.xlu0 %1907, %v1771_v52  }
  0x7c   : >> { %718 = vperm.xlu1 %1908, %v1776_v53   ;;  %713 = vperm.xlu0 %1907, %v1775_v54  }
  0x80   : >> { %728 = vperm.xlu1 %1908, %v1778_v55   ;;  %723 = vperm.xlu0 %1907, %v1777_v56   ;;  %v2099_v56 = vld [vmem:[%s2563_s1 + $0x3] ss:$0 sm:$0xff] }
  0x84   : >> { %758 = vperm.xlu1 %1908, %v1782_v57   ;;  %753 = vperm.xlu0 %1907, %v1781_v58  }
  0x88   : >> { %768 = vperm.xlu1 %1908, %v1784_v59   ;;  %763 = vperm.xlu0 %1907, %v1783_v60  }
  0x8c   : >> { %801 = vperm.xlu1 %1908, %v1790_v61   ;;  %796 = vperm.xlu0 %1907, %v1789_v62   ;;  %v1830_v61 = vld [vmem:[%s1971_s24 + $0x99] sm:$0xf] }
  0x90   : >> { %811 = vperm.xlu1 %1908, %v1792_v63   ;;  %806 = vperm.xlu0 %1907, %v1791_v0  }
  0x93   : >> { %v2039_v3 = vpop.permute.xlu1 %197  ;;  %v2041_v4 = vpop.permute.xlu0 %187 }
  0x94   : >> { %841 = vperm.xlu1 %1908, %v1796_v1   ;;  %836 = vperm.xlu0 %1907, %v1795_v2   ;;  %v213_v52 = vmul.f32 %v2074_v43, %v2039_v3  ;;  %v211_v57 = vmul.f32 %v2074_v43, %v2041_v4  ;;  %v2113_v2 = vld [vmem:[%s2563_s1 + $0x4] ss:$0 sm:$0xff]  ;;  %v1829_v3 = vld [vmem:[%s1971_s24 + $0x91] sm:$0xff] }
  0x97   : >> { %v2045_v7 = vpop.permute.xlu1 %202  ;;  %v2047_v8 = vpop.permute.xlu0 %192 }
  0x98   : >> { %851 = vperm.xlu1 %1908, %v1798_v5   ;;  %846 = vperm.xlu0 %1907, %v1797_v6   ;;  %v214_v53 = vmul.f32 %v2074_v43, %v2045_v7  ;;  %v212_v58 = vmul.f32 %v2074_v43, %v2047_v8 }
  0x9b   : >> { %v233_v11 = vpop.permute.xlu1 %232  ;;  %v228_v12 = vpop.permute.xlu0 %227 }
  0x9c   : >> { %881 = vperm.xlu1 %1908, %v1802_v9   ;;  %876 = vperm.xlu0 %1907, %v1801_v10   ;;  %v252_v48 = vmul.f32 %v2068_v41, %v233_v11  ;;  %v251_v49 = vmul.f32 %v2068_v41, %v228_v12 }
  0x9e   : >> { %v256_v4 = vadd.f32 %v252_v48, %v212_v58  ;;  %v255_v5 = vadd.f32 %v251_v49, %v211_v57 }
  0x9f   : >> { %v243_v15 = vpop.permute.xlu1 %242  ;;  %v238_v16 = vpop.permute.xlu0 %237 }
  0xa0   : >> { %891 = vperm.xlu1 %1908, %v1804_v13   ;;  %886 = vperm.xlu0 %1907, %v1803_v14   ;;  %v254_v44 = vmul.f32 %v2068_v41, %v243_v15  ;;  %v253_v45 = vmul.f32 %v2068_v41, %v238_v16 }
  0xa2   : >> { %v258_v62 = vadd.f32 %v254_v44, %v214_v53  ;;  %v257_v63 = vadd.f32 %v253_v45, %v213_v52 }
  0xa3   : >> { %v273_v19 = vpop.permute.xlu1 %272  ;;  %v268_v20 = vpop.permute.xlu0 %267 }
  0xa4   : >> { %921 = vperm.xlu1 %1908, %v1808_v17   ;;  %916 = vperm.xlu0 %1907, %v1807_v18   ;;  %v292_v59 = vmul.f32 %v2081_v46, %v273_v19  ;;  %v291_v60 = vmul.f32 %v2081_v46, %v268_v20  ;;  %v2125_v18 = vld [vmem:[%s2563_s1 + $0x5] ss:$0 sm:$0xff]  ;;  %v1834_v19 = vld [vmem:[%s1971_s24 + $0x8a] sm:$0xff] }
  0xa6   : >> { %v296_v14 = vadd.f32 %v292_v59, %v256_v4  ;;  %v295_v15 = vadd.f32 %v291_v60, %v255_v5  ;;  %v1839_v4 = vld [vmem:[%s1971_s24 + $0x83] sm:$0xff] }
  0xa7   : >> { %v283_v23 = vpop.permute.xlu1 %282  ;;  %v278_v24 = vpop.permute.xlu0 %277 }
  0xa8   : >> { %931 = vperm.xlu1 %1908, %v1810_v21   ;;  %926 = vperm.xlu0 %1907, %v1809_v22   ;;  %v294_v54 = vmul.f32 %v2081_v46, %v283_v23  ;;  %v293_v55 = vmul.f32 %v2081_v46, %v278_v24  ;;  %v1833_v24 = vld [vmem:[%s1971_s24 + $0x82] sm:$0xff] }
  0xaa   : >> { %v298_v10 = vadd.f32 %v294_v54, %v258_v62  ;;  %v297_v11 = vadd.f32 %v293_v55, %v257_v63  ;;  %v2159_v62 = vld [vmem:[%s2563_s1 + $0x7] ss:$0 sm:$0xff]  ;;  %v1840_v63 = vld [vmem:[%s1971_s24 + $0x8b] sm:$0xff] }
  0xab   : >> { %v313_v27 = vpop.permute.xlu1 %312  ;;  %v308_v28 = vpop.permute.xlu0 %307 }
  0xac   : >> { %961 = vperm.xlu1 %1908, %v1814_v25   ;;  %956 = vperm.xlu0 %1907, %v1813_v26   ;;  %v332_v6 = vmul.f32 %v2099_v56, %v313_v27  ;;  %v331_v7 = vmul.f32 %v2099_v56, %v308_v28 }
  0xae   : >> { %v336_v25 = vadd.f32 %v332_v6, %v296_v14  ;;  %v335_v26 = vadd.f32 %v331_v7, %v295_v15 }
  0xaf   : >> { %v323_v31 = vpop.permute.xlu1 %322  ;;  %v318_v32 = vpop.permute.xlu0 %317 }
  0xb0   : >> { %971 = vperm.xlu1 %1908, %v1816_v29   ;;  %966 = vperm.xlu0 %1907, %v1815_v30   ;;  %v334_v0 = vmul.f32 %v2099_v56, %v323_v31  ;;  %v333_v1 = vmul.f32 %v2099_v56, %v318_v32  ;;  %v2134_v31 = vld [vmem:[%s2563_s1 + $0x6] ss:$0 sm:$0xff] }
  0xb2   : >> { %v338_v20 = vadd.f32 %v334_v0, %v298_v10  ;;  %v337_v21 = vadd.f32 %v333_v1, %v297_v11 }
  0xb3   : >> { %v353_v35 = vpop.permute.xlu1 %352  ;;  %v348_v36 = vpop.permute.xlu0 %347 }
  0xb4   : >> { %1004 = vperm.xlu1 %1908, %v1822_v33   ;;  %999 = vperm.xlu0 %1907, %v1821_v34   ;;  %v372_v16 = vmul.f32 %v2113_v2, %v353_v35  ;;  %v371_v17 = vmul.f32 %v2113_v2, %v348_v36  ;;  %v1836_v36 = vld [vmem:[%s1971_s24 + $0x9a] sm:$0xf] }
  0xb6   : >> { %v376_v32 = vadd.f32 %v372_v16, %v336_v25  ;;  %v375_v33 = vadd.f32 %v371_v17, %v335_v26  ;;  %v1841_v17 = vld [vmem:[%s1971_s24 + $0x93] sm:$0xff]  ;;  %v2176_v25 = vld [vmem:[%s2563_s1 + $0x8] ss:$0 sm:$0xff] }
  0xb7   : >> { %v363_v39 = vpop.permute.xlu1 %362  ;;  %v358_v40 = vpop.permute.xlu0 %357  ;;  %v1847_v26 = vld [vmem:[%s1971_s24 + $0x94] sm:$0xff] }
  0xb8   : >> { %1014 = vperm.xlu1 %1908, %v1824_v37   ;;  %1009 = vperm.xlu0 %1907, %v1823_v38   ;;  %v374_v12 = vmul.f32 %v2113_v2, %v363_v39  ;;  %v373_v13 = vmul.f32 %v2113_v2, %v358_v40 }
  0xba   : >> { %v378_v29 = vadd.f32 %v374_v12, %v338_v20  ;;  %v377_v30 = vadd.f32 %v373_v13, %v337_v21  ;;  %v1842_v12 = vld [vmem:[%s1971_s24 + $0x9b] sm:$0xf] }
  0xbb   : >> { %v2086_v50 = vpop.permute.xlu1 %395  ;;  %v2088_v51 = vpop.permute.xlu0 %390 }
  0xbc   : >> { %1044 = vperm.xlu1 %1908, %v1828_v42   ;;  %1039 = vperm.xlu0 %1907, %v1827_v47   ;;  %v415_v34 = vmul.f32 %v2125_v18, %v2086_v50  ;;  %v414_v35 = vmul.f32 %v2125_v18, %v2088_v51  ;;  %v1835_v42 = vld [vmem:[%s1971_s24 + $0x92] sm:$0xff]  ;;  %v1207_v59 = vmul.f32 %v2074_v43, %v2086_v50 }
  0xbe   : >> { %v419_v58 = vadd.f32 %v415_v34, %v376_v32  ;;  %v418_v60 = vadd.f32 %v414_v35, %v375_v33  ;;  %v1845_v32 = vld [vmem:[%s1971_s24 + $0x84] sm:$0xff] }
  0xbf   : >> { %v406_v8 = vpop.permute.xlu1 %405  ;;  %v401_v9 = vpop.permute.xlu0 %400 }
  0xc0   : >> { %1054 = vperm.xlu1 %1908, %v1830_v61   ;;  %1049 = vperm.xlu0 %1907, %v1829_v3   ;;  %v417_v22 = vmul.f32 %v2125_v18, %v406_v8  ;;  %v416_v23 = vmul.f32 %v2125_v18, %v401_v9  ;;  %v1209_v38 = vmul.f32 %v2074_v43, %v406_v8 }
  0xc1   : >> { %v1208_v40 = vmul.f32 %v2074_v43, %v401_v9  ;;  %v1206_v61 = vmul.f32 %v2074_v43, %v2088_v51 }
  0xc2   : >> { %v421_v37 = vadd.f32 %v417_v22, %v378_v29  ;;  %v420_v39 = vadd.f32 %v416_v23, %v377_v30 }
  0xc3   : >> { %v436_v27 = vpop.permute.xlu1 %435  ;;  %v431_v28 = vpop.permute.xlu0 %430 }
  0xc4   : >> { %1084 = vperm.xlu1 %1908, %v1834_v19   ;;  %1079 = vperm.xlu0 %1907, %v1833_v24   ;;  %v455_v44 = vmul.f32 %v2134_v31, %v436_v27  ;;  %v1215_v45 = vmul.f32 %v2068_v41, %v436_v27  ;;  %v454_v47 = vmul.f32 %v2134_v31, %v431_v28 }
  0xc5   : >> { %v1214_v48 = vmul.f32 %v2068_v41, %v431_v28 }
  0xc6   : >> { %v459_v5 = vadd.f32 %v455_v44, %v419_v58  ;;  %v1219_v6 = vadd.f32 %v1215_v45, %v1207_v59  ;;  %v458_v50 = vadd.f32 %v454_v47, %v418_v60  ;;  %v1854_v45 = vld [vmem:[%s1971_s24 + $0xa0] sm:$0xff] }
  0xc7   : >> { %v446_v49 = vpop.permute.xlu1 %445  ;;  %v441_v52 = vpop.permute.xlu0 %440  ;;  %v1218_v7 = vadd.f32 %v1214_v48, %v1206_v61 }
  0xc8   : >> { %v457_v53 = vmul.f32 %v2134_v31, %v446_v49  ;;  %v1217_v54 = vmul.f32 %v2068_v41, %v446_v49  ;;  %v456_v55 = vmul.f32 %v2134_v31, %v441_v52  ;;  %v1216_v57 = vmul.f32 %v2068_v41, %v441_v52  ;;  %1094 = vperm.xlu1 %1908, %v1836_v36  }
  0xc9   : >> { %1089 = vperm.xlu0 %1907, %v1835_v42  }
  0xca   : >> { %v461_v0 = vadd.f32 %v457_v53, %v421_v37  ;;  %v1221_v1 = vadd.f32 %v1217_v54, %v1209_v38  ;;  %v460_v41 = vadd.f32 %v456_v55, %v420_v39  ;;  %v1220_v3 = vadd.f32 %v1216_v57, %v1208_v40  ;;  %v1846_v38 = vld [vmem:[%s1971_s24 + $0x8c] sm:$0xff]  ;;  %v2193_v55 = vld [vmem:[%s2563_s1 + $0x9] ss:$0 sm:$0xff]  ;;  %v1858_v57 = vld [vmem:[%s1971_s24 + $0xa1] sm:$0xff] }
  0xcb   : >> { %v476_v8 = vpop.permute.xlu1 %475  ;;  %v471_v43 = vpop.permute.xlu0 %470 }
  0xcc   : >> { %v495_v51 = vmul.f32 %v2159_v62, %v476_v8  ;;  %v1223_v9 = vmul.f32 %v2081_v46, %v476_v8  ;;  %v494_v10 = vmul.f32 %v2159_v62, %v471_v43  ;;  %v1222_v11 = vmul.f32 %v2081_v46, %v471_v43  ;;  %1124 = vperm.xlu1 %1908, %v1840_v63   ;;  %v1856_v63 = vld [vmem:[%s1971_s24 + $0xb0] sm:$0xff]  ;;  %v1848_v43 = vld [vmem:[%s1971_s24 + $0x9c] sm:$0xf] }
  0xcd   : >> { %1119 = vperm.xlu0 %1907, %v1839_v4  }
  0xce   : >> { %v499_v13 = vadd.f32 %v495_v51, %v459_v5  ;;  %v1227_v14 = vadd.f32 %v1223_v9, %v1219_v6  ;;  %v498_v15 = vadd.f32 %v494_v10, %v458_v50  ;;  %v1226_v16 = vadd.f32 %v1222_v11, %v1218_v7  ;;  %v1855_v5 = vld [vmem:[%s1971_s24 + $0xa8] sm:$0xff] }
  0xcf   : >> { %v486_v19 = vpop.permute.xlu1 %485  ;;  %v481_v20 = vpop.permute.xlu0 %480 }
  0xd0   : >> { %v497_v21 = vmul.f32 %v2159_v62, %v486_v19  ;;  %v1225_v22 = vmul.f32 %v2081_v46, %v486_v19  ;;  %v496_v23 = vmul.f32 %v2159_v62, %v481_v20  ;;  %v1224_v24 = vmul.f32 %v2081_v46, %v481_v20  ;;  %1134 = vperm.xlu1 %1908, %v1842_v12  }
  0xd1   : >> { %1129 = vperm.xlu0 %1907, %v1841_v17  }
  0xd2   : >> { %v501_v27 = vadd.f32 %v497_v21, %v461_v0  ;;  %v1229_v28 = vadd.f32 %v1225_v22, %v1221_v1  ;;  %v500_v29 = vadd.f32 %v496_v23, %v460_v41  ;;  %v1228_v30 = vadd.f32 %v1224_v24, %v1220_v3  ;;  %v1860_v21 = vld [vmem:[%s1971_s24 + $0xb1] sm:$0xff] }
  0xd3   : >> { %v516_v33 = vpop.permute.xlu1 %515  ;;  %v511_v34 = vpop.permute.xlu0 %510 }
  0xd4   : >> { %v535_v35 = vmul.f32 %v2176_v25, %v516_v33  ;;  %v1231_v46 = vmul.f32 %v2099_v56, %v516_v33  ;;  %v534_v36 = vmul.f32 %v2176_v25, %v511_v34  ;;  %v1230_v37 = vmul.f32 %v2099_v56, %v511_v34  ;;  %1169 = vperm.xlu1 %1908, %v1847_v26   ;;  %v1857_v34 = vld [vmem:[%s1971_s24 + $0xb8] sm:$0xf] }
  0xd5   : >> { %1159 = vperm.xlu0 %1907, %v1845_v32  }
  0xd6   : >> { %v539_v39 = vadd.f32 %v535_v35, %v499_v13  ;;  %v1235_v40 = vadd.f32 %v1231_v46, %v1227_v14  ;;  %v538_v42 = vadd.f32 %v534_v36, %v498_v15  ;;  %v1234_v44 = vadd.f32 %v1230_v37, %v1226_v16  ;;  %v2210_v14 = vld [vmem:[%s2563_s1 + $0xa] ss:$0 sm:$0xff]  ;;  %v1862_v15 = vld [vmem:[%s1971_s24 + $0xa2] sm:$0xff] }
  0xd7   : >> { %v526_v47 = vpop.permute.xlu1 %525  ;;  %v521_v48 = vpop.permute.xlu0 %520 }
  0xd8   : >> { %v537_v49 = vmul.f32 %v2176_v25, %v526_v47  ;;  %v1233_v52 = vmul.f32 %v2099_v56, %v526_v47  ;;  %v536_v53 = vmul.f32 %v2176_v25, %v521_v48  ;;  %v1232_v54 = vmul.f32 %v2099_v56, %v521_v48  ;;  %1164 = vperm.xlu1 %1908, %v1846_v38  }
  0xd9   : >> { %1375 = vperm.xlu0 %1907, %v1854_v45  }
  0xda   : >> { %v541_v58 = vadd.f32 %v537_v49, %v501_v27  ;;  %v1237_v59 = vadd.f32 %v1233_v52, %v1229_v28  ;;  %v540_v60 = vadd.f32 %v536_v53, %v500_v29  ;;  %v1236_v61 = vadd.f32 %v1232_v54, %v1228_v30  ;;  %v1859_v28 = vld [vmem:[%s1971_s24 + $0xa9] sm:$0xff]  ;;  %v1864_v49 = vld [vmem:[%s1971_s24 + $0xb2] sm:$0xff] }
  0xdb   : >> { %v556_v0 = vpop.permute.xlu1 %555  ;;  %v551_v1 = vpop.permute.xlu0 %550 }
  0xdc   : >> { %v575_v41 = vmul.f32 %v2193_v55, %v556_v0  ;;  %v1239_v56 = vmul.f32 %v2113_v2, %v556_v0  ;;  %v574_v3 = vmul.f32 %v2193_v55, %v551_v1  ;;  %v1238_v4 = vmul.f32 %v2113_v2, %v551_v1  ;;  %1407 = vperm.xlu1 %1908, %v1858_v57   ;;  %v1861_v1 = vld [vmem:[%s1971_s24 + $0xb9] sm:$0xf] }
  0xdd   : >> { %1385 = vperm.xlu0 %1907, %v1856_v63  }
  0xde   : >> { %v579_v6 = vadd.f32 %v575_v41, %v539_v39  ;;  %v1243_v50 = vadd.f32 %v1239_v56, %v1235_v40  ;;  %v578_v7 = vadd.f32 %v574_v3, %v538_v42  ;;  %v1242_v8 = vadd.f32 %v1238_v4, %v1234_v44  ;;  %v2227_v40 = vld [vmem:[%s2563_s1 + $0xb] ss:$0 sm:$0xff]  ;;  %v1866_v42 = vld [vmem:[%s1971_s24 + $0xa3] sm:$0xff] }
  0xdf   : >> { %v566_v51 = vpop.permute.xlu1 %565  ;;  %v561_v9 = vpop.permute.xlu0 %560 }
  0xe0   : >> { %v577_v10 = vmul.f32 %v2193_v55, %v566_v51  ;;  %v1241_v11 = vmul.f32 %v2113_v2, %v566_v51  ;;  %v576_v12 = vmul.f32 %v2193_v55, %v561_v9  ;;  %v1240_v13 = vmul.f32 %v2113_v2, %v561_v9  ;;  %1380 = vperm.xlu1 %1908, %v1855_v5  }
  0xe1   : >> { %1174 = vperm.xlu0 %1907, %v1848_v43  }
  0xe2   : >> { %v581_v16 = vadd.f32 %v577_v10, %v541_v58  ;;  %v1245_v17 = vadd.f32 %v1241_v11, %v1237_v59  ;;  %v580_v19 = vadd.f32 %v576_v12, %v540_v60  ;;  %v1244_v20 = vadd.f32 %v1240_v13, %v1236_v61  ;;  %v1863_v59 = vld [vmem:[%s1971_s24 + $0xaa] sm:$0xff]  ;;  %v1868_v10 = vld [vmem:[%s1971_s24 + $0xb3] sm:$0xff] }
  0xe3   : >> { %v599_v22 = vpop.permute.xlu1 %598  ;;  %v594_v23 = vpop.permute.xlu0 %593 }
  0xe4   : >> { %v618_v24 = vmul.f32 %v2210_v14, %v599_v22  ;;  %v1247_v2 = vmul.f32 %v2125_v18, %v599_v22  ;;  %v617_v26 = vmul.f32 %v2210_v14, %v594_v23  ;;  %v1246_v27 = vmul.f32 %v2125_v18, %v594_v23  ;;  %1439 = vperm.xlu1 %1908, %v1862_v15   ;;  %v1865_v23 = vld [vmem:[%s1971_s24 + $0xba] sm:$0xf] }
  0xe5   : >> { %1417 = vperm.xlu0 %1907, %v1860_v21  }
  0xe6   : >> { %v622_v29 = vadd.f32 %v618_v24, %v579_v6  ;;  %v1251_v30 = vadd.f32 %v1247_v2, %v1243_v50  ;;  %v621_v32 = vadd.f32 %v617_v26, %v578_v7  ;;  %v1250_v33 = vadd.f32 %v1246_v27, %v1242_v8  ;;  %v2244_v50 = vld [vmem:[%s2563_s1 + $0xc] ss:$0 sm:$0xff]  ;;  %v1870_v7 = vld [vmem:[%s1971_s24 + $0xa4] sm:$0xff] }
  0xe7   : >> { %v609_v35 = vpop.permute.xlu1 %608  ;;  %v604_v46 = vpop.permute.xlu0 %603 }
  0xe8   : >> { %v620_v36 = vmul.f32 %v2210_v14, %v609_v35  ;;  %v1249_v37 = vmul.f32 %v2125_v18, %v609_v35  ;;  %v619_v38 = vmul.f32 %v2210_v14, %v604_v46  ;;  %v1248_v39 = vmul.f32 %v2125_v18, %v604_v46  ;;  %1412 = vperm.xlu1 %1908, %v1859_v28  }
  0xe9   : >> { %1390 = vperm.xlu0 %1907, %v1857_v34  }
  0xea   : >> { %v624_v44 = vadd.f32 %v620_v36, %v581_v16  ;;  %v1253_v45 = vadd.f32 %v1249_v37, %v1245_v17  ;;  %v623_v47 = vadd.f32 %v619_v38, %v580_v19  ;;  %v1252_v48 = vadd.f32 %v1248_v39, %v1244_v20  ;;  %v1867_v17 = vld [vmem:[%s1971_s24 + $0xab] sm:$0xff]  ;;  %v1872_v36 = vld [vmem:[%s1971_s24 + $0xb4] sm:$0xff] }
  0xeb   : >> { %v639_v52 = vpop.permute.xlu1 %638  ;;  %v634_v53 = vpop.permute.xlu0 %633 }
  0xec   : >> { %v658_v54 = vmul.f32 %v2227_v40, %v639_v52  ;;  %v1255_v18 = vmul.f32 %v2134_v31, %v639_v52  ;;  %v657_v57 = vmul.f32 %v2227_v40, %v634_v53  ;;  %v1254_v58 = vmul.f32 %v2134_v31, %v634_v53  ;;  %1471 = vperm.xlu1 %1908, %v1866_v42   ;;  %v1871_v53 = vld [vmem:[%s1971_s24 + $0xac] sm:$0xff] }
  0xed   : >> { %1449 = vperm.xlu0 %1907, %v1864_v49  }
  0xee   : >> { %v662_v60 = vadd.f32 %v658_v54, %v622_v29  ;;  %v1259_v61 = vadd.f32 %v1255_v18, %v1251_v30  ;;  %v661_v63 = vadd.f32 %v657_v57, %v621_v32  ;;  %v1258_v0 = vadd.f32 %v1254_v58, %v1250_v33  ;;  %v2261_v30 = vld [vmem:[%s2563_s1 + $0xd] ss:$0 sm:$0xff]  ;;  %v1869_v32 = vld [vmem:[%s1971_s24 + $0xbb] sm:$0xf] }
  0xef   : >> { %v649_v41 = vpop.permute.xlu1 %648  ;;  %v644_v56 = vpop.permute.xlu0 %643 }
  0xf0   : >> { %v660_v3 = vmul.f32 %v2227_v40, %v649_v41  ;;  %v1257_v4 = vmul.f32 %v2134_v31, %v649_v41  ;;  %v659_v5 = vmul.f32 %v2227_v40, %v644_v56  ;;  %v1256_v6 = vmul.f32 %v2134_v31, %v644_v56  ;;  %1444 = vperm.xlu1 %1908, %v1863_v59  }
  0xf1   : >> { %1422 = vperm.xlu0 %1907, %v1861_v1  }
  0xf2   : >> { %v664_v8 = vadd.f32 %v660_v3, %v624_v44  ;;  %v1261_v43 = vadd.f32 %v1257_v4, %v1253_v45  ;;  %v663_v51 = vadd.f32 %v659_v5, %v623_v47  ;;  %v1260_v9 = vadd.f32 %v1256_v6, %v1252_v48  ;;  %v1873_v45 = vld [vmem:[%s1971_s24 + $0xbc] sm:$0xf]  ;;  %s1617_s24 = scalar_lea.vmem %s1962_s21, %s1888_s5 }
  0xf3   : >> { %v679_v11 = vpop.permute.xlu1 %678  ;;  %v674_v12 = vpop.permute.xlu0 %673 }
  0xf4   : >> { %v698_v13 = vmul.f32 %v2244_v50, %v679_v11  ;;  %v1263_v31 = vmul.f32 %v2159_v62, %v679_v11  ;;  %v697_v15 = vmul.f32 %v2244_v50, %v674_v12  ;;  %v1262_v16 = vmul.f32 %v2159_v62, %v674_v12  ;;  %1503 = vperm.xlu1 %1908, %v1870_v7  }
  0xf5   : >> { %1481 = vperm.xlu0 %1907, %v1868_v10  }
  0xf6   : >> { %v702_v19 = vadd.f32 %v698_v13, %v662_v60  ;;  %v1267_v20 = vadd.f32 %v1263_v31, %v1259_v61  ;;  %v701_v21 = vadd.f32 %v697_v15, %v661_v63  ;;  %v1266_v22 = vadd.f32 %v1262_v16, %v1258_v0  ;;  %v2278_v61 = vld [vmem:[%s2563_s1 + $0xe] ss:$0 sm:$0xff]  ;;  %v2291_v15 = vld [vmem:[%s2563_s1 + $0xf] ss:$0 sm:$0xff] }
  0xf7   : >> { %v689_v24 = vpop.permute.xlu1 %688  ;;  %v684_v2 = vpop.permute.xlu0 %683 }
  0xf8   : >> { %v700_v26 = vmul.f32 %v2244_v50, %v689_v24  ;;  %v1265_v27 = vmul.f32 %v2159_v62, %v689_v24  ;;  %v699_v28 = vmul.f32 %v2244_v50, %v684_v2  ;;  %v1264_v29 = vmul.f32 %v2159_v62, %v684_v2  ;;  %1476 = vperm.xlu1 %1908, %v1867_v17  }
  0xf9   : >> { %1454 = vperm.xlu0 %1907, %v1865_v23  }
  0xfa   : >> { %v704_v33 = vadd.f32 %v700_v26, %v664_v8  ;;  %v1269_v34 = vadd.f32 %v1265_v27, %v1261_v43  ;;  %v703_v35 = vadd.f32 %v699_v28, %v663_v51  ;;  %v1268_v46 = vadd.f32 %v1264_v29, %v1260_v9 }
  0xfb   : >> { %v719_v37 = vpop.permute.xlu1 %718  ;;  %v714_v38 = vpop.permute.xlu0 %713 }
  0xfc   : >> { %v738_v39 = vmul.f32 %v2261_v30, %v719_v37  ;;  %v1271_v62 = vmul.f32 %v2176_v25, %v719_v37  ;;  %v737_v42 = vmul.f32 %v2261_v30, %v714_v38  ;;  %v1270_v44 = vmul.f32 %v2176_v25, %v714_v38  ;;  %1486 = vperm.xlu1 %1908, %v1869_v32   ;;  %v2304_v37 = vld [vmem:[%s2563_s1 + $0x10] ss:$0 sm:$0xff] }
  0xfd   : >> { %1513 = vperm.xlu0 %1907, %v1872_v36  }
  0xfe   : >> { %v742_v47 = vadd.f32 %v738_v39, %v702_v19  ;;  %v1275_v48 = vadd.f32 %v1271_v62, %v1267_v20  ;;  %v741_v49 = vadd.f32 %v737_v42, %v701_v21  ;;  %v1274_v52 = vadd.f32 %v1270_v44, %v1266_v22 }
  0xff   : >> { %v729_v54 = vpop.permute.xlu1 %728  ;;  %v724_v18 = vpop.permute.xlu0 %723 }
 0x100   : >> { %v740_v57 = vmul.f32 %v2261_v30, %v729_v54  ;;  %v1273_v58 = vmul.f32 %v2176_v25, %v729_v54  ;;  %v739_v59 = vmul.f32 %v2261_v30, %v724_v18  ;;  %v1272_v60 = vmul.f32 %v2176_v25, %v724_v18  ;;  %1518 = vperm.xlu1 %1908, %v1873_v45  }
 0x101   : >> { %1508 = vperm.xlu0 %1907, %v1871_v53  }
 0x102   : >> { %v744_v63 = vadd.f32 %v740_v57, %v704_v33  ;;  %v1277_v0 = vadd.f32 %v1273_v58, %v1269_v34  ;;  %v743_v1 = vadd.f32 %v739_v59, %v703_v35  ;;  %v1276_v41 = vadd.f32 %v1272_v60, %v1268_v46 }
 0x103   : >> { %v759_v56 = vpop.permute.xlu1 %758  ;;  %v754_v3 = vpop.permute.xlu0 %753 }
 0x104   : >> { %v778_v4 = vmul.f32 %v2278_v61, %v759_v56  ;;  %v1279_v5 = vmul.f32 %v2193_v55, %v759_v56  ;;  %v777_v6 = vmul.f32 %v2278_v61, %v754_v3  ;;  %v1278_v25 = vmul.f32 %v2193_v55, %v754_v3 }
 0x106   : >> { %v782_v7 = vadd.f32 %v778_v4, %v742_v47  ;;  %v1283_v8 = vadd.f32 %v1279_v5, %v1275_v48  ;;  %v781_v43 = vadd.f32 %v777_v6, %v741_v49  ;;  %v1282_v51 = vadd.f32 %v1278_v25, %v1274_v52 }
 0x107   : >> { %v769_v9 = vpop.permute.xlu1 %768  ;;  %v764_v10 = vpop.permute.xlu0 %763 }
 0x108   : >> { %v780_v11 = vmul.f32 %v2278_v61, %v769_v9  ;;  %v1281_v12 = vmul.f32 %v2193_v55, %v769_v9  ;;  %v779_v13 = vmul.f32 %v2278_v61, %v764_v10  ;;  %v1280_v31 = vmul.f32 %v2193_v55, %v764_v10 }
 0x10a   : >> { %v784_v16 = vadd.f32 %v780_v11, %v744_v63  ;;  %v1285_v17 = vadd.f32 %v1281_v12, %v1277_v0  ;;  %v783_v19 = vadd.f32 %v779_v13, %v743_v1  ;;  %v1284_v20 = vadd.f32 %v1280_v31, %v1276_v41  ;;  %v2317_v1 = vld [vmem:[%s2563_s1 + $0x11] ss:$0 sm:$0xff] }
 0x10b   : >> { %v802_v21 = vpop.permute.xlu1 %801  ;;  %v797_v22 = vpop.permute.xlu0 %796 }
 0x10c   : >> { %v821_v23 = vmul.f32 %v2291_v15, %v802_v21  ;;  %v1287_v24 = vmul.f32 %v2210_v14, %v802_v21  ;;  %v820_v2 = vmul.f32 %v2291_v15, %v797_v22  ;;  %v1286_v26 = vmul.f32 %v2210_v14, %v797_v22 }
 0x10e   : >> { %v825_v55 = vadd.f32 %v821_v23, %v782_v7  ;;  %v1291_v27 = vadd.f32 %v1287_v24, %v1283_v8  ;;  %v824_v28 = vadd.f32 %v820_v2, %v781_v43  ;;  %v1290_v29 = vadd.f32 %v1286_v26, %v1282_v51 }
 0x10f   : >> { %v812_v32 = vpop.permute.xlu1 %811  ;;  %v807_v33 = vpop.permute.xlu0 %806 }
 0x110   : >> { %v823_v34 = vmul.f32 %v2291_v15, %v812_v32  ;;  %v1289_v35 = vmul.f32 %v2210_v14, %v812_v32  ;;  %v822_v46 = vmul.f32 %v2291_v15, %v807_v33  ;;  %v1288_v36 = vmul.f32 %v2210_v14, %v807_v33 }
 0x112   : >> { %v827_v38 = vadd.f32 %v823_v34, %v784_v16  ;;  %v1293_v39 = vadd.f32 %v1289_v35, %v1285_v17  ;;  %v826_v62 = vadd.f32 %v822_v46, %v783_v19  ;;  %v1292_v42 = vadd.f32 %v1288_v36, %v1284_v20  ;;  %v2330_v19 = vld [vmem:[%s2563_s1 + $0x12] ss:$0 sm:$0xff] }
 0x113   : >> { %v842_v44 = vpop.permute.xlu1 %841  ;;  %v837_v45 = vpop.permute.xlu0 %836 }
 0x114   : >> { %v861_v47 = vmul.f32 %v2304_v37, %v842_v44  ;;  %v1295_v48 = vmul.f32 %v2227_v40, %v842_v44  ;;  %v860_v49 = vmul.f32 %v2304_v37, %v837_v45  ;;  %v1294_v52 = vmul.f32 %v2227_v40, %v837_v45 }
 0x116   : >> { %v865_v14 = vadd.f32 %v861_v47, %v825_v55  ;;  %v1299_v53 = vadd.f32 %v1295_v48, %v1291_v27  ;;  %v864_v54 = vadd.f32 %v860_v49, %v824_v28  ;;  %v1298_v18 = vadd.f32 %v1294_v52, %v1290_v29 }
 0x117   : >> { %v852_v57 = vpop.permute.xlu1 %851  ;;  %v847_v58 = vpop.permute.xlu0 %846 }
 0x118   : >> { %v863_v59 = vmul.f32 %v2304_v37, %v852_v57  ;;  %v1297_v60 = vmul.f32 %v2227_v40, %v852_v57  ;;  %v862_v63 = vmul.f32 %v2304_v37, %v847_v58  ;;  %v1296_v0 = vmul.f32 %v2227_v40, %v847_v58 }
 0x11a   : >> { %v867_v41 = vadd.f32 %v863_v59, %v827_v38  ;;  %v1301_v56 = vadd.f32 %v1297_v60, %v1293_v39  ;;  %v866_v3 = vadd.f32 %v862_v63, %v826_v62  ;;  %v1300_v4 = vadd.f32 %v1296_v0, %v1292_v42  ;;  %v2344_v39 = vld [vmem:[%s2563_s1 + $0x13] ss:$0 sm:$0xff]  ;;  %v2358_v60 = vld [vmem:[%s2563_s1 + $0x14] ss:$0 sm:$0xff] }
 0x11b   : >> { %v882_v5 = vpop.permute.xlu1 %881  ;;  %v877_v6 = vpop.permute.xlu0 %876 }
 0x11c   : >> { %v901_v25 = vmul.f32 %v2317_v1, %v882_v5  ;;  %v1303_v7 = vmul.f32 %v2244_v50, %v882_v5  ;;  %v900_v8 = vmul.f32 %v2317_v1, %v877_v6  ;;  %v1302_v43 = vmul.f32 %v2244_v50, %v877_v6 }
 0x11e   : >> { %v905_v40 = vadd.f32 %v901_v25, %v865_v14  ;;  %v1307_v51 = vadd.f32 %v1303_v7, %v1299_v53  ;;  %v904_v9 = vadd.f32 %v900_v8, %v864_v54  ;;  %v1306_v10 = vadd.f32 %v1302_v43, %v1298_v18  ;;  %v2370_v43 = vld [vmem:[%s2563_s1 + $0x15] ss:$0 sm:$0xff] }
 0x11f   : >> { %v892_v11 = vpop.permute.xlu1 %891  ;;  %v887_v12 = vpop.permute.xlu0 %886 }
 0x120   : >> { %v903_v13 = vmul.f32 %v2317_v1, %v892_v11  ;;  %v1305_v31 = vmul.f32 %v2244_v50, %v892_v11  ;;  %v902_v16 = vmul.f32 %v2317_v1, %v887_v12  ;;  %v1304_v17 = vmul.f32 %v2244_v50, %v887_v12 }
 0x122   : >> { %v907_v20 = vadd.f32 %v903_v13, %v867_v41  ;;  %v1309_v21 = vadd.f32 %v1305_v31, %v1301_v56  ;;  %v906_v22 = vadd.f32 %v902_v16, %v866_v3  ;;  %v2332_v23 = vadd.f32 %v1304_v17, %v1300_v4 }
 0x123   : >> { %v922_v24 = vpop.permute.xlu1 %921  ;;  %v917_v2 = vpop.permute.xlu0 %916 }
 0x124   : >> { %v941_v26 = vmul.f32 %v2330_v19, %v922_v24  ;;  %v1311_v55 = vmul.f32 %v2261_v30, %v922_v24  ;;  %v940_v27 = vmul.f32 %v2330_v19, %v917_v2  ;;  %v1310_v50 = vmul.f32 %v2261_v30, %v917_v2 }
 0x126   : >> { %v945_v28 = vadd.f32 %v941_v26, %v905_v40  ;;  %v1315_v29 = vadd.f32 %v1311_v55, %v1307_v51  ;;  %v944_v32 = vadd.f32 %v940_v27, %v904_v9  ;;  %v1314_v33 = vadd.f32 %v1310_v50, %v1306_v10 }
 0x127   : >> { %v932_v34 = vpop.permute.xlu1 %931  ;;  %v927_v35 = vpop.permute.xlu0 %926 }
 0x128   : >> { %v943_v46 = vmul.f32 %v2330_v19, %v932_v34  ;;  %v1313_v36 = vmul.f32 %v2261_v30, %v932_v34  ;;  %v942_v38 = vmul.f32 %v2330_v19, %v927_v35  ;;  %v1312_v34 = vmul.f32 %v2261_v30, %v927_v35 }
 0x12a   : >> { %v947_v62 = vadd.f32 %v943_v46, %v907_v20  ;;  %v2346_v42 = vadd.f32 %v1313_v36, %v1309_v21  ;;  %v946_v44 = vadd.f32 %v942_v38, %v906_v22 }
 0x12b   : >> { %v962_v45 = vpop.permute.xlu1 %961  ;;  %v957_v47 = vpop.permute.xlu0 %956 }
 0x12c   : >> { %v981_v48 = vmul.f32 %v2344_v39, %v962_v45  ;;  %v1319_v49 = vmul.f32 %v2278_v61, %v962_v45  ;;  %v980_v52 = vmul.f32 %v2344_v39, %v957_v47 }
 0x12e   : >> { %v985_v14 = vadd.f32 %v981_v48, %v945_v28  ;;  %v2351_v53 = vadd.f32 %v1319_v49, %v1315_v29  ;;  %v984_v54 = vadd.f32 %v980_v52, %v944_v32  ;;  %v1318_v32 = vmul.f32 %v2278_v61, %v957_v47 }
 0x12f   : >> { %v972_v18 = vpop.permute.xlu1 %971  ;;  %v967_v57 = vpop.permute.xlu0 %966  ;;  %v1316_v49 = vadd.f32 %v1312_v34, %v2332_v23 }
 0x130   : >> { %v983_v58 = vmul.f32 %v2344_v39, %v972_v18  ;;  %v982_v59 = vmul.f32 %v2344_v39, %v967_v57  ;;  %v1320_v45 = vmul.f32 %v2278_v61, %v967_v57 }
 0x132   : >> { %v987_v63 = vadd.f32 %v983_v58, %v947_v62  ;;  %v2360_v0 = vadd.f32 %v982_v59, %v946_v44  ;;  %v1321_v62 = vmul.f32 %v2278_v61, %v972_v18  ;;  %v1322_v44 = vadd.f32 %v1318_v32, %v1314_v33 }
 0x133   : >> { %v1005_v41 = vpop.permute.xlu1 %1004  ;;  %v1000_v56 = vpop.permute.xlu0 %999  ;;  %v1324_v57 = vadd.f32 %v1320_v45, %v1316_v49 }
 0x134   : >> { %v1024_v3 = vmul.f32 %v2358_v60, %v1005_v41  ;;  %v1023_v4 = vmul.f32 %v2358_v60, %v1000_v56  ;;  %v1326_v36 = vmul.f32 %v2291_v15, %v1000_v56  ;;  %v1327_v52 = vmul.f32 %v2291_v15, %v1005_v41  ;;  %v2418_v41 = vld [vmem:[%s2563_s1 + $0x16] ss:$0 sm:$0xff] }
 0x135   : >> { %v1325_v61 = vadd.f32 %v1321_v62, %v2346_v42 }
 0x136   : >> { %v1028_v5 = vadd.f32 %v1024_v3, %v985_v14  ;;  %v2364_v6 = vadd.f32 %v1023_v4, %v984_v54  ;;  %v1330_v35 = vadd.f32 %v1326_v36, %v1322_v44  ;;  %v1331_v56 = vadd.f32 %v1327_v52, %v2351_v53  ;;  %v2443_v44 = vld [vmem:[%s2563_s1 + $0x18] ss:$0 sm:$0xff] }
 0x137   : >> { %v1015_v25 = vpop.permute.xlu1 %1014  ;;  %v1010_v7 = vpop.permute.xlu0 %1009 }
 0x138   : >> { %v1026_v8 = vmul.f32 %v2358_v60, %v1015_v25  ;;  %v1329_v47 = vmul.f32 %v2291_v15, %v1015_v25  ;;  %v1025_v14 = vmul.f32 %v2358_v60, %v1010_v7  ;;  %v1328_v54 = vmul.f32 %v2291_v15, %v1010_v7 }
 0x13a   : >> { %v1030_v40 = vadd.f32 %v1026_v8, %v987_v63  ;;  %v1333_v3 = vadd.f32 %v1329_v47, %v1325_v61  ;;  %v1029_v25 = vadd.f32 %v1025_v14, %v2360_v0  ;;  %v1332_v7 = vadd.f32 %v1328_v54, %v1324_v57 }
 0x13b   : >> { %v1045_v51 = vpop.permute.xlu1 %1044  ;;  %v1040_v10 = vpop.permute.xlu0 %1039 }
 0x13c   : >> { %v1064_v9 = vmul.f32 %v2370_v43, %v1045_v51  ;;  %v1334_v48 = vmul.f32 %v2304_v37, %v1040_v10  ;;  %v1335_v33 = vmul.f32 %v2304_v37, %v1045_v51  ;;  %v1063_v23 = vmul.f32 %v2370_v43, %v1040_v10  ;;  %v2430_v51 = vld [vmem:[%s2563_s1 + $0x17] ss:$0 sm:$0xff] }
 0x13e   : >> { %v2373_v11 = vadd.f32 %v1064_v9, %v1028_v5  ;;  %v1338_v59 = vadd.f32 %v1334_v48, %v1330_v35  ;;  %v1339_v10 = vadd.f32 %v1335_v33, %v1331_v56 }
 0x13f   : >> { %v1055_v12 = vpop.permute.xlu1 %1054  ;;  %v1050_v13 = vpop.permute.xlu0 %1049 }
 0x140   : >> { %v1066_v63 = vmul.f32 %v2370_v43, %v1055_v12  ;;  %v1337_v42 = vmul.f32 %v2304_v37, %v1055_v12  ;;  %v1065_v4 = vmul.f32 %v2370_v43, %v1050_v13  ;;  %v1067_v12 = vadd.f32 %v1063_v23, %v2364_v6 }
 0x141   : >> { %v1336_v32 = vmul.f32 %v2304_v37, %v1050_v13 }
 0x142   : >> { %v1070_v0 = vadd.f32 %v1066_v63, %v1030_v40  ;;  %v1341_v48 = vadd.f32 %v1337_v42, %v1333_v3  ;;  %v1069_v49 = vadd.f32 %v1065_v4, %v1029_v25 }
 0x143   : >> { %v1085_v31 = vpop.permute.xlu1 %1084  ;;  %v1080_v16 = vpop.permute.xlu0 %1079  ;;  %v1340_v14 = vadd.f32 %v1336_v32, %v1332_v7  ;;  %v2479_v7 = vld [vmem:[%s2564_s2] ss:$0 sm:$0xff] }
 0x144   : >> { %v1342_v58 = vmul.f32 %v2317_v1, %v1080_v16  ;;  %v1103_v34 = vmul.f32 %v2418_v41, %v1080_v16  ;;  %v1104_v36 = vmul.f32 %v2418_v41, %v1085_v31  ;;  %v1343_v52 = vmul.f32 %v2317_v1, %v1085_v31 }
 0x146   : >> { %v1346_v8 = vadd.f32 %v1342_v58, %v1338_v59  ;;  %v1107_v54 = vadd.f32 %v1103_v34, %v1067_v12  ;;  %v1347_v33 = vadd.f32 %v1343_v52, %v1339_v10 }
 0x147   : >> { %v2375_v17 = vpop.permute.xlu1 %1094 }
 0x148   : >> { %v2377_v20 = vpop.permute.xlu0 %1089  ;;  %v1106_v40 = vmul.f32 %v2418_v41, %v2375_v17  ;;  %v1345_v13 = vmul.f32 %v2317_v1, %v2375_v17 }
 0x149   : >> { %v1105_v58 = vmul.f32 %v2418_v41, %v2377_v20 }
 0x14a   : >> { %v1110_v59 = vadd.f32 %v1106_v40, %v1070_v0 }
 0x14b   : >> { %v2379_v21 = vpop.permute.xlu1 %1124  ;;  %v1109_v42 = vadd.f32 %v1105_v58, %v1069_v49 }
 0x14c   : >> { %v1120_v22 = vpop.permute.xlu0 %1119 }
 0x14d   : >> { %v1350_v15 = vmul.f32 %v2330_v19, %v1120_v22  ;;  %v1143_v6 = vmul.f32 %v2430_v51, %v1120_v22  ;;  %v2458_v22 = vadd.f32 %v1104_v36, %v2373_v11 }
 0x14f   : >> { %v2381_v24 = vpop.permute.xlu1 %1134  ;;  %v1354_v62 = vadd.f32 %v1350_v15, %v1346_v8  ;;  %v1147_v23 = vadd.f32 %v1143_v6, %v1107_v54 }
 0x150   : >> { %v2383_v2 = vpop.permute.xlu0 %1129  ;;  %v1353_v4 = vmul.f32 %v2330_v19, %v2381_v24 }
 0x151   : >> { %v1145_v25 = vmul.f32 %v2430_v51, %v2383_v2 }
 0x153   : >> { %v2385_v26 = vpop.permute.xlu1 %1169 }
 0x154   : >> { %v2387_v55 = vpop.permute.xlu0 %1159 }
 0x155   : >> { %v1358_v9 = vmul.f32 %v2344_v39, %v2387_v55  ;;  %v1183_v31 = vmul.f32 %v2443_v44, %v2387_v55  ;;  %v1349_v55 = vadd.f32 %v1345_v13, %v1341_v48 }
 0x157   : >> { %v2389_v27 = vpop.permute.xlu1 %1164  ;;  %v1362_v16 = vadd.f32 %v1358_v9, %v1354_v62  ;;  %v1187_v3 = vadd.f32 %v1183_v31, %v1147_v23  ;;  %v1144_v9 = vmul.f32 %v2430_v51, %v2379_v21  ;;  %v1357_v49 = vadd.f32 %v1353_v4, %v1349_v55 }
 0x158   : >> { %v1376_v50 = vpop.permute.xlu0 %1375 }
 0x159   : >> { %v1393_v45 = vmul.f32 %v2358_v60, %v1376_v50  ;;  %v1344_v50 = vmul.f32 %v2317_v1, %v2377_v20  ;;  %v1352_v1 = vmul.f32 %v2330_v19, %v2383_v2  ;;  %v1146_v20 = vmul.f32 %v2430_v51, %v2381_v24 }
 0x15b   : >> { %v1408_v28 = vpop.permute.xlu1 %1407  ;;  %v1397_v61 = vadd.f32 %v1393_v45, %v1362_v16  ;;  %v1348_v56 = vadd.f32 %v1344_v50, %v1340_v14  ;;  %v1150_v62 = vadd.f32 %v1146_v20, %v1110_v59  ;;  %v1184_v59 = vmul.f32 %v2443_v44, %v2389_v27 }
 0x15c   : >> { %v2391_v29 = vpop.permute.xlu0 %1385  ;;  %v1425_v47 = vmul.f32 %v2370_v43, %v1408_v28  ;;  %v1351_v28 = vmul.f32 %v2330_v19, %v2379_v21  ;;  %v1359_v19 = vmul.f32 %v2344_v39, %v2389_v27  ;;  %v1198_v21 = vadd.f32 %v2479_v7, %v1187_v3 }
 0x15d   : >> { %v1356_v12 = vadd.f32 %v1352_v1, %v1348_v56  ;;  %v1395_v32 = vmul.f32 %v2358_v60, %v2391_v29  ;;  %v1149_v29 = vadd.f32 %v1145_v25, %v1109_v42  ;;  %v1148_v20 = vadd.f32 %v1144_v9, %v2458_v22 }
 0x15e   : >> { %v1429_v63 = vadd.f32 %v1425_v47, %v1397_v61  ;;  %v1355_v10 = vadd.f32 %v1351_v28, %v1347_v33  ;;  %v1202_v31 = vmax.f32 %v1198_v21, 0.0 }
 0x15f   : >> { %v2395_v46 = vpop.permute.xlu1 %1380  ;;  %v1188_v4 = vadd.f32 %v1184_v59, %v1148_v20 }
 0x160   : >> { %v2398_v38 = vpop.permute.xlu0 %1174  ;;  %v1394_v40 = vmul.f32 %v2358_v60, %v2395_v46  ;;  %v1363_v47 = vadd.f32 %v1359_v19, %v1355_v10 }
 0x161   : >> { %v1361_v24 = vmul.f32 %v2344_v39, %v2398_v38 }
 0x162   : >> { %v1398_v33 = vadd.f32 %v1394_v40, %v1363_v47 }
 0x163   : >> { %v1440_v30 = vpop.permute.xlu1 %1439  ;;  %v1365_v14 = vadd.f32 %v1361_v24, %v1357_v49 }
 0x164   : >> { %v2409_v18 = vpop.permute.xlu0 %1417  ;;  %v1457_v17 = vmul.f32 %v2418_v41, %v1440_v30  ;;  %v1360_v30 = vmul.f32 %v2344_v39, %v2385_v26  ;;  %v1185_v39 = vmul.f32 %v2443_v44, %v2385_v26 }
 0x165   : >> { %v1427_v48 = vmul.f32 %v2370_v43, %v2409_v18 }
 0x166   : >> { %v1461_v8 = vadd.f32 %v1457_v17, %v1429_v63  ;;  %v1364_v45 = vadd.f32 %v1360_v30, %v1356_v12  ;;  %v1189_v17 = vadd.f32 %v1185_v39, %v1149_v29 }
 0x167   : >> { %v2424_v5 = vpop.permute.xlu1 %1412 }
 0x168   : >> { %v2434_v53 = vpop.permute.xlu0 %1390  ;;  %v1426_v58 = vmul.f32 %v2370_v43, %v2424_v5 }
 0x169   : >> { %v1396_v52 = vmul.f32 %v2358_v60, %v2434_v53  ;;  %v1186_v60 = vmul.f32 %v2443_v44, %v2398_v38 }
 0x16a   : >> { %v1430_v38 = vadd.f32 %v1426_v58, %v1398_v33 }
 0x16b   : >> { %v1472_v37 = vpop.permute.xlu1 %1471  ;;  %v1400_v46 = vadd.f32 %v1396_v52, %v1365_v14  ;;  %v1190_v30 = vadd.f32 %v1186_v60, %v1150_v62 }
 0x16c   : >> { %v1450_v35 = vpop.permute.xlu0 %1449  ;;  %v1489_v11 = vmul.f32 %v2430_v51, %v1472_v37  ;;  %v1399_v37 = vadd.f32 %v1395_v32, %v1364_v45 }
 0x16d   : >> { %v1459_v13 = vmul.f32 %v2418_v41, %v1450_v35 }
 0x16e   : >> { %v1493_v2 = vadd.f32 %v1489_v11, %v1461_v8  ;;  %v1431_v53 = vadd.f32 %v1427_v48, %v1399_v37 }
 0x16f   : >> { %v1445_v57 = vpop.permute.xlu1 %1444 }
 0x170   : >> { %v1423_v15 = vpop.permute.xlu0 %1422  ;;  %v1463_v28 = vadd.f32 %v1459_v13, %v1431_v53  ;;  %v1458_v23 = vmul.f32 %v2418_v41, %v1445_v57  ;;  %v1200_v57 = vadd.f32 %v2479_v7, %v1189_v17 }
 0x171   : >> { %v1428_v18 = vmul.f32 %v2370_v43, %v1423_v15 }
 0x172   : >> { %v1462_v3 = vadd.f32 %v1458_v23, %v1430_v38  ;;  %v1204_v19 = vmax.f32 %v1200_v57, 0.0 }
 0x173   : >> { %v1504_v34 = vpop.permute.xlu1 %1503  ;;  %v1432_v55 = vadd.f32 %v1428_v18, %v1400_v46 }
 0x174   : >> { %v1521_v0 = vmul.f32 %v2443_v44, %v1504_v34  ;;  %v1482_v36 = vpop.permute.xlu0 %1481  ;;  %v1201_v34 = vadd.f32 %v2479_v7, %v1190_v30 }
 0x175   : >> { %v1491_v26 = vmul.f32 %v2430_v51, %v1482_v36 }
 0x176   : >> { %v1525_v6 = vadd.f32 %v1521_v0, %v1493_v2  ;;  %v1199_v0 = vadd.f32 %v2479_v7, %v1188_v4  ;;  %v1205_v21 = vmax.f32 %v1201_v34, 0.0 }
 0x177   : >> { %v1477_v16 = vpop.permute.xlu1 %1476  ;;  %v1495_v11 = vadd.f32 %v1491_v26, %v1463_v28 }
 0x178   : >> { %v1529_v54 = vadd.f32 %v2479_v7, %v1525_v6  ;;  %v1455_v50 = vpop.permute.xlu0 %1454  ;;  %v1490_v15 = vmul.f32 %v2430_v51, %v1477_v16  ;;  %v1203_v37 = vmax.f32 %v1199_v0, 0.0 }
 0x179   : >> { %v1460_v61 = vmul.f32 %v2418_v41, %v1455_v50 }
 0x17a   : >> { %v1533_v35 = vmax.f32 %v1529_v54, 0.0  ;;  %v1494_v12 = vadd.f32 %v1490_v15, %v1462_v3 }
 0x17b   : >> { %v1487_v1 = vpop.permute.xlu1 %1486  ;;  %v1464_v41 = vadd.f32 %v1460_v61, %v1432_v55 }
 0x17c   : >> { %v2511_v43 = vmax.f32 %v1202_v31, %v1533_v35  ;;  %v1492_v5 = vmul.f32 %v2430_v51, %v1487_v1  ;;  %v1514_v63 = vpop.permute.xlu0 %1513 }
 0x17d   : >> { %v1523_v56 = vmul.f32 %v2443_v44, %v1514_v63 }
 0x17e   : >> { %v1496_v25 = vadd.f32 %v1492_v5, %v1464_v41  ;;  %v1542_v22 = vrot.slane %v2511_v43, 1  ;;  %v1544_v36 = vrot.slane %v2511_v43, 2  ;;  %v1546_v29 = vrot.slane %v2511_v43, 3 }
 0x17f   : >> { %v1527_v27 = vadd.f32 %v1523_v56, %v1495_v11  ;;  %v1519_v42 = vpop.permute.xlu1 %1518  ;;  %v1588_v35 = vrot.slane %v2511_v43, 4 }
 0x180   : >> { %v1524_v8 = vmul.f32 %v2443_v44, %v1519_v42  ;;  %v1509_v10 = vpop.permute.xlu0 %1508  ;;  %v1570_v48 = vsel %vm1569_vm0, %v2511_v43, %v1542_v22  ;;  %v1594_v40 = vsel %vm1569_vm0, %v1542_v22, %v1544_v36 }
 0x181   : >> { %v1531_v32 = vadd.f32 %v2479_v7, %v1527_v27  ;;  %v1522_v51 = vmul.f32 %v2443_v44, %v1509_v10  ;;  %v1572_v47 = vsel %vm1571_vm1, %v1570_v48, %v1544_v36  ;;  %v1595_v58 = vsel %vm1571_vm1, %v1594_v40, %v1546_v29 }
 0x182   : >> { %v1528_v9 = vadd.f32 %v1524_v8, %v1496_v25  ;;  %v1574_v55 = vsel %vm1573_vm2, %v1572_v47, %v1546_v29  ;;  %v1596_v5 = vsel %vm1573_vm2, %v1595_v58, %v1588_v35 }
 0x183   : >> { %v1535_v24 = vmax.f32 %v1531_v32, 0.0  ;;  %v1526_v2 = vadd.f32 %v1522_v51, %v1494_v12 }
 0x184   : >> { %v1532_v62 = vadd.f32 %v2479_v7, %v1528_v9 }
 0x185   : >> { %v1539_v45 = vmax.f32 %v1204_v19, %v1535_v24  ;;  %v1530_v44 = vadd.f32 %v2479_v7, %v1526_v2 }
 0x186   : >> { %v1536_v49 = vmax.f32 %v1532_v62, 0.0 }
 0x187   : >> { %v1558_v52 = vrot.slane %v1539_v45, 1  ;;  %v1560_v6 = vrot.slane %v1539_v45, 2  ;;  %v1562_v39 = vrot.slane %v1539_v45, 3  ;;  %v1534_v16 = vmax.f32 %v1530_v44, 0.0 }
 0x188   : >> { %v1540_v13 = vmax.f32 %v1205_v21, %v1536_v49  ;;  %v1590_v14 = vrot.slane %v1539_v45, 4 }
 0x189   : >> { %v1583_v7 = vsel %vm1569_vm0, %v1539_v45, %v1558_v52  ;;  %v1601_v18 = vsel %vm1569_vm0, %v1558_v52, %v1560_v6  ;;  %v1538_v46 = vmax.f32 %v1203_v37, %v1534_v16 }
 0x18a   : >> { %v1565_v54 = vrot.slane %v1540_v13, 4  ;;  %v1567_v50 = vrot.slane %v1540_v13, 5  ;;  %v1584_v31 = vsel %vm1571_vm1, %v1583_v7, %v1560_v6  ;;  %v1592_v53 = vrot.slane %v1540_v13, 6 }
 0x18b   : >> { %v1585_v26 = vsel %vm1573_vm2, %v1584_v31, %v1562_v39  ;;  %v1602_v60 = vsel %vm1571_vm1, %v1601_v18, %v1562_v39  ;;  %v1549_v23 = vrot.slane %v1538_v46, 4  ;;  %v1551_v1 = vrot.slane %v1538_v46, 5 }
 0x18c   : >> { %v1586_v61 = vsel %vm1575_vm3, %v1585_v26, %v1565_v54  ;;  %v1603_v17 = vsel %vm1573_vm2, %v1602_v60, %v1590_v14  ;;  %v1553_v43 = vrot.slane %v1538_v46, 6  ;;  %v1555_v38 = vrot.slane %v1538_v46, 7 }
 0x18d   : >> { %v1587_v33 = vsel %vm1577_vm4, %v1586_v61, %v1567_v50  ;;  %v1604_v28 = vsel %vm1575_vm3, %v1603_v17, %v1567_v50  ;;  %v1576_v11 = vsel %vm1575_vm3, %v1574_v55, %v1549_v23  ;;  %v1597_v15 = vsel %vm1575_vm3, %v1596_v5, %v1551_v1 }
 0x18e   : >> { %v1605_v59 = vsel %vm1577_vm4, %v1604_v28, %v1592_v53  ;;  %v1578_v56 = vsel %vm1577_vm4, %v1576_v11, %v1551_v1  ;;  %v1598_v20 = vsel %vm1577_vm4, %v1597_v15, %v1553_v43 }
 0x18f   : >> { %v1607_v63 = vmax.f32 %v1587_v33, %v1605_v59  ;;  %v1580_v41 = vsel %vm1579_vm5, %v1578_v56, %v1553_v43  ;;  %v1599_v57 = vsel %vm1579_vm5, %v1598_v20, %v1555_v38  ;;  %175 = sbr.rel (!%p173_p4) target bundleno = 17 (0x11), region = 100 }
 0x190   : >> { %v1582_v3 = vsel %vm1581_vm6, %v1580_v41, %v1555_v38  ;;  %v1600_v27 = vsel %vm1581_vm6, %v1599_v57, %v1538_v46 }
 0x191   : >> { %v1887_v30 = vpack.c.bf16 %v1607_v63, %v1607_v63  ;;  %v1606_v42 = vmax.f32 %v1582_v3, %v1600_v27 }
 0x193   : >> { %1619 = vst [vmem:[%s1617_s24 + $0x4] sm:$0x7] %v1887_v30  ;;  %v1886_v4 = vpack.c.bf16 %v1606_v42, %v1606_v42 }
 0x195   : >> { %1618 = vst [vmem:[%s1617_s24] sm:$0xf] %v1886_v4 }
 0x196 PF: > { %s13_s12 = sadd.s32 1, %s1919_s12  }
 0x197   : > { %p10_p5 = scmp.ge.s32.totalorder %s13_s12, 4  }
 0x199   :  { %12 = sbr.rel (!%p10_p5) target bundleno = 1 (0x1), region = 111 }

// kernel: classifier_forward.4
= control target key start
LH: loop header
LB: loop body
LE: loop exit
PB: predicated region body
PF: predicated region fallthrough
CT: control target
= control target key end

     0   :  { %s7100_s12 = smov 0   ;;  %s9058_s0 = inlined_call_operand.vmem [shape: bf16[2,18,18,128], index: 0, kind: input, shape index: {}]   ;;  %s9059_s1 = inlined_call_operand.vmem [shape: bf16[25,128,128], index: 1, kind: input, shape index: {}]   ;;  %s9060_s2 = inlined_call_operand.vmem [shape: f32[1,128], index: 2, kind: input, shape index: {}]   ;;  %s9061_s3 = inlined_call_operand.vmem [shape: bf16[2,7,7,128], index: 3, kind: output, shape index: {}]  }
   0x1 LB: > { %s4471_s13 = sadd.s32 4294967295, %s7072_s12   ;;  %p4475_p0 = scmp.ge.s32.totalorder %s7072_s12, 1  ;;  %s7072_s12 = sphi %s7100_s12, %s13_s12  }
   0x2   : > { %p137_p1 = scmp.lt.s32.totalorder %s7072_s12, 3 }
   0x4   : > { %p138_p2 = pnand %p4475_p0, %p137_p1 }
   0x5   : > { %p161_p3 = scmp.lt.s32.totalorder (!%p138_p2), %s4471_s13, 1  ;;  %s7118_s22 = smov (!%p138_p2), 0  }
   0x6   : > { %141 = sbr.rel (%p138_p2) target bundleno = 1055 (0x41f), region = 32 }
   0xd   : > { %s9063_s13 = smov (!%p161_p3, %s4471_s13), 1 }
   0xe   : > { %s6606_s14 = smul.u32 216, %s9063_s13 }
   0xf   : > { %s6607_s15 = smul.u32 28, %s9063_s13 }
  0x10   : > { %s7111_s18 = scalar_lea.vmem %s9058_s0, %s6606_s14 }
  0x11   : > { %s7116_s21 = scalar_lea.vmem %s9061_s3, %s6607_s15 }
  0x12 LB: >> { %v6626_v0 = vld [vmem:[%s9059_s1 + $0x40] sm:$0xff]   ;;  %v7078_v1 = vmov 0.0   ;;  %v6628_v3 = vld [vmem:[%s9059_s1 + $0x48] sm:$0xff]   ;;  %vm7079_vm0 = vmmov 0   ;;  %v6630_v5 = vld [vmem:[%s9059_s1 + $0x50] sm:$0xff]   ;;  %s5155_s8 = smul.u32 24, %s7076_s22  ;;  %s7076_s22 = sphi %s7118_s22, %s177_s22  }
  0x13   : >> { %5606 = vmatprep.subr.bf16.mxu0 %v7078_v1  ;;  %5626 = vmatprep.subr.bf16.mxu1 %v7078_v1  ;;  %v6627_v2 = vld [vmem:[%s9059_s1] sm:$0xff]   ;;  %v6629_v4 = vld [vmem:[%s9059_s1 + $0x8] sm:$0xff]   ;;  %v6631_v6 = vld [vmem:[%s9059_s1 + $0x10] sm:$0xff]   ;;  %vm555_vm1 = vsmask.f32 6400  ;;  %vm682_vm2 = vcmask 1045504  }
  0x14   : >> { %5607 = vmatpush3.bf16.msra.mxu0 %v6626_v0  ;;  %5622 = vmatprep.mubr.msk.bf16.mxu0 %vm7079_vm0, %v7078_v1  ;;  %v6632_v7 = vld [vmem:[%s9059_s1 + $0x58] sm:$0xff]   ;;  %s7161_s14 = scalar_lea.vmem %s7111_s18, %s5155_s8  ;;  %v6634_v9 = vld [vmem:[%s9059_s1 + $0x60] sm:$0xff]   ;;  %v6636_v14 = vld [vmem:[%s9059_s1 + $0x68] sm:$0xff]   ;;  %vm4355_vm3 = vcmask 1040384   ;;  %vm4357_vm4 = vcmask 1041408   ;;  %vm4359_vm5 = vcmask 1042432  }
  0x15   : >> { %5627 = vmatpush3.bf16.msra.mxu1 %v6627_v2  ;;  %5608 = vmatprep.subr.bf16.mxu0 %v7078_v1  ;;  %v6633_v8 = vld [vmem:[%s9059_s1 + $0x18] sm:$0xff]   ;;  %v6635_v10 = vld [vmem:[%s9059_s1 + $0x20] sm:$0xff]   ;;  %v6637_v15 = vld [vmem:[%s9059_s1 + $0x28] sm:$0xff]   ;;  %vm4361_vm6 = vcmask 1043456   ;;  %vm4363_vm7 = vcmask 1044480   ;;  %s5152_s6 = sshll.u32 %s7076_s22, 2 }
  0x16   : >> { %5628 = vmatprep.subr.bf16.mxu1 %v7078_v1  ;;  %5642 = vmatprep.mubr.msk.bf16.mxu1 %vm7079_vm0, %v7078_v1  ;;  %v182_v11 = vld [vmem:[%s7161_s14] sm:$0xf]  ;;  %v7173_v12 = vld [vmem:[%s7161_s14 + $0x4] sm:$0xf]  ;;  %v6638_v17 = vld [vmem:[%s9059_s1 + $0x70] sm:$0xff]   ;;  %s4380_s7 = scalar_lea.vmem %s7116_s21, %s5152_s6  ;;  %s177_s22 = sadd.s32 1, %s7076_s22  }
  0x17   : >> { %v4497_v13 = vcombine.low %v182_v11, %v7173_v12  ;;  %v6639_v18 = vld [vmem:[%s9059_s1 + $0x30] sm:$0xff]   ;;  %v6640_v19 = vld [vmem:[%s9059_s1 + $0x78] sm:$0xff]   ;;  %v183_v23 = vld [vmem:[%s7161_s14 + $0x4] sm:$0x7]  ;;  %vm4382_vm8 = vsmask.f32 3328 }
  0x18   : >> { %5609 = vmatpush3.bf16.msra.mxu0 %v6628_v3  ;;  %v6641_v22 = vld [vmem:[%s9059_s1 + $0x38] sm:$0xff]   ;;  %v4506_v25 = vcombine.low %v182_v11, %v183_v23  ;;  %v6644_v26 = vld [vmem:[%s9059_s1 + $0x80] sm:$0xff]   ;;  %v6646_v28 = vld [vmem:[%s9059_s1 + $0x88] sm:$0xff]   ;;  %p174_p4 = scmp.ge.s32.totalorder %s177_s22, 7  }
  0x19   : >> { %5629 = vmatpush3.bf16.msra.mxu1 %v6629_v4  ;;  %5610 = vmatprep.subr.bf16.mxu0 %v7078_v1  ;;  %v226_v16 = vshll.u32 %v4497_v13, 16  ;;  %v224_v20 = vshrl.u32 %v4497_v13, 16  ;;  %v6645_v27 = vld [vmem:[%s9059_s1 + $0xc0] sm:$0xff]   ;;  %v6647_v29 = vld [vmem:[%s9059_s1 + $0xc8] sm:$0xff]   ;;  %v6648_v30 = vld [vmem:[%s9059_s1 + $0x90] sm:$0xff]  }
  0x1a   : >> { %5630 = vmatprep.subr.bf16.mxu1 %v7078_v1  ;;  %v6649_v31 = vld [vmem:[%s9059_s1 + $0xd0] sm:$0xff]   ;;  %v6650_v32 = vld [vmem:[%s9059_s1 + $0x98] sm:$0xff]   ;;  %v527_v34 = vld [vmem:[%s7161_s14] sm:$0xe] }
  0x1b   : >> { %v228_v21 = vrot.slane %v226_v16, 1  ;;  %v6651_v33 = vld [vmem:[%s9059_s1 + $0xd8] sm:$0xff]   ;;  %v7239_v35 = vld [vmem:[%s7161_s14 + $0x4] sm:$0xf]  ;;  %v6654_v40 = vld [vmem:[%s9059_s1 + $0xa8] sm:$0xff]  }
  0x1c   : >> { %5611 = vmatpush3.bf16.msra.mxu0 %v6630_v5  ;;  %v6652_v36 = vld [vmem:[%s9059_s1 + $0xa0] sm:$0xff]   ;;  %v4556_v38 = vcombine.low %v527_v34, %v7239_v35  ;;  %v7251_v39 = vld [vmem:[%s7161_s14 + $0x8] ss:$0 sps:$4 sm:$0x11]   ;;  %v6656_v44 = vld [vmem:[%s9059_s1 + $0xb0] sm:$0xff]  }
  0x1d   : >> { %5631 = vmatpush3.bf16.msra.mxu1 %v6631_v6  ;;  %5612 = vmatprep.subr.bf16.mxu0 %v7078_v1  ;;  %v229_v24 = vor.u32 %v228_v21, %v224_v20  ;;  %v6653_v37 = vld [vmem:[%s9059_s1 + $0xe0] sm:$0xff]   ;;  %v6655_v41 = vld [vmem:[%s9059_s1 + $0xe8] sm:$0xff]   ;;  %v6657_v46 = vld [vmem:[%s9059_s1 + $0xf0] sm:$0xff]   ;;  %v565_v47 = vshll.u32 %v7251_v39, 16  ;;  %v684_v11 = vrot.slane %v7251_v39, 2 }
  0x1e   : >> { %5632 = vmatprep.subr.bf16.mxu1 %v7078_v1  ;;  %v557_v42 = vshrl.u32 %v4556_v38, 16  ;;  %v560_v43 = vshll.u32 %v4556_v38, 16  ;;  %v413_v45 = vld [vmem:[%s7161_s14] sm:$0xe]  ;;  %v6658_v51 = vld [vmem:[%s9059_s1 + $0xb8] sm:$0xff]   ;;  %v6665_v59 = vld [vmem:[%s9059_s1 + $0x108] sm:$0xff]  }
  0x1f   : >> { %v4531_v50 = vcombine.low %v413_v45, %v7173_v12  ;;  %v6659_v52 = vld [vmem:[%s9059_s1 + $0xf8] sm:$0xff]   ;;  %v567_v54 = vrot.slane %v565_v47, 2  ;;  %v6663_v56 = vld [vmem:[%s9059_s1 + $0x100] sm:$0xff]   ;;  %v6666_v60 = vld [vmem:[%s9059_s1 + $0x148] sm:$0xff]  }
  0x20   : >> { %5613 = vmatpush3.bf16.msra.mxu0 %v6632_v7  ;;  %v559_v48 = vrot.slane %v557_v42, 1  ;;  %v562_v49 = vrot.slane %v560_v43, 2  ;;  %v6664_v58 = vld [vmem:[%s9059_s1 + $0x140] sm:$0xff]   ;;  %v6667_v61 = vld [vmem:[%s9059_s1 + $0x110] sm:$0xff]   ;;  %v6669_v63 = vld [vmem:[%s9059_s1 + $0x118] sm:$0xff]  }
  0x21   : >> { %5633 = vmatpush3.bf16.msra.mxu1 %v6633_v8  ;;  %5614 = vmatprep.subr.bf16.mxu0 %v7078_v1  ;;  %v434_v55 = vrot.slane %v4531_v50, 1  ;;  %v6668_v62 = vld [vmem:[%s9059_s1 + $0x150] sm:$0xff]   ;;  %v6670_v0 = vld [vmem:[%s9059_s1 + $0x158] sm:$0xff]   ;;  %v6671_v2 = vld [vmem:[%s9059_s1 + $0x120] sm:$0xff]  }
  0x22   : >> { %5634 = vmatprep.subr.bf16.mxu1 %v7078_v1  ;;  %v563_v53 = vor.u32 %v562_v49, %v559_v48  ;;  %v6672_v3 = vld [vmem:[%s9059_s1 + $0x160] sm:$0xff]   ;;  %v6673_v4 = vld [vmem:[%s9059_s1 + $0x128] sm:$0xff]   ;;  %v6675_v7 = vld [vmem:[%s9059_s1 + $0x130] sm:$0xff]  }
  0x23   : >> { %v6674_v5 = vld [vmem:[%s9059_s1 + $0x168] sm:$0xff]   ;;  %v661_v6 = vld [vmem:[%s7161_s14] sm:$0xc]  ;;  %v6678_v12 = vld [vmem:[%s9059_s1 + $0x178] sm:$0xff]  }
  0x24   : >> { %5615 = vmatpush3.bf16.msra.mxu0 %v6634_v9  ;;  %v568_v57 = vsel %vm555_vm1, %v563_v53, %v567_v54  ;;  %v4582_v8 = vcombine.low %v661_v6, %v7239_v35  ;;  %v6676_v9 = vld [vmem:[%s9059_s1 + $0x170] sm:$0xff]   ;;  %v6684_v20 = vld [vmem:[%s9059_s1 + $0x188] sm:$0xff]   ;;  %v6696_v39 = vld [vmem:[%s9059_s1 + $0x1b8] sm:$0xff]  }
  0x25   : >> { %5635 = vmatpush3.bf16.msra.mxu1 %v6635_v10  ;;  %5616 = vmatprep.subr.bf16.mxu0 %v7078_v1  ;;  %v6677_v10 = vld [vmem:[%s9059_s1 + $0x138] sm:$0xff]   ;;  %v6685_v21 = vld [vmem:[%s9059_s1 + $0x1c8] sm:$0xff]   ;;  %v6687_v23 = vld [vmem:[%s9059_s1 + $0x1d0] sm:$0xff]  }
  0x26   : >> { %5636 = vmatprep.subr.bf16.mxu1 %v7078_v1  ;;  %v683_v13 = vrot.slane %v4582_v8, 2  ;;  %v4646_v34 = vld [vmem:[%s7161_s14 + $0xc] sm:$0xe]  ;;  %v6695_v35 = vld [vmem:[%s9059_s1 + $0x1f0] sm:$0xff]   ;;  %v6699_v43 = vld [vmem:[%s9059_s1 + $0x200] sm:$0xff]  }
  0x27   : >> { %v6701_v45 = vld [vmem:[%s9059_s1 + $0x208] sm:$0xff]   ;;  %v6703_v47 = vld [vmem:[%s9059_s1 + $0x210] sm:$0xff]   ;;  %v6705_v49 = vld [vmem:[%s9059_s1 + $0x218] sm:$0xff]  }
  0x28   : >> { %5617 = vmatpush3.bf16.msra.mxu0 %v6636_v14  ;;  %v4593_v14 = vld [vmem:[%s7161_s14 + $0xc] sm:$0xf]  ;;  %v685_v16 = vsel %vm682_vm2, %v683_v13, %v684_v11  ;;  %v6704_v48 = vld [vmem:[%s9059_s1 + $0x250] sm:$0xff]   ;;  %v6706_v50 = vld [vmem:[%s9059_s1 + $0x258] sm:$0xff]  }
  0x29   : >> { %5637 = vmatpush3.bf16.msra.mxu1 %v6637_v15  ;;  %5618 = vmatprep.subr.bf16.mxu0 %v7078_v1  ;;  %v4594_v15 = vld [vmem:[%s7161_s14 + $0x10] sm:$0x7]  ;;  %v6707_v53 = vld [vmem:[%s9059_s1 + $0x220] sm:$0xff]   ;;  %v6714_v6 = vld [vmem:[%s9059_s1 + $0x278] sm:$0xff]  }
  0x2a   : >> { %5638 = vmatprep.subr.bf16.mxu1 %v7078_v1  ;;  %v6718_v11 = vld [vmem:[%s9059_s1 + $0x280] sm:$0xff]   ;;  %vm4383_vm9 = vmand %vm4361_vm6, %vm4382_vm8 }
  0x2b   : >> { %v6719_v13 = vld [vmem:[%s9059_s1 + $0x2c0] sm:$0xff]  }
  0x2c   : >> { %5619 = vmatpush3.bf16.msra.mxu0 %v6638_v17  ;;  %v7355_v17 = vcombine.low %v4593_v14, %v4594_v15  ;;  %v6720_v15 = vld [vmem:[%s9059_s1 + $0x288] sm:$0xff]  }
  0x2d   : >> { %5639 = vmatpush3.bf16.msra.mxu1 %v6639_v18  ;;  %5620 = vmatprep.subr.bf16.mxu0 %v7078_v1  ;;  %v6682_v18 = vld [vmem:[%s9059_s1 + $0x180] sm:$0xff]  }
  0x2e   : >> { %5640 = vmatprep.subr.bf16.mxu1 %v7078_v1 }
  0x30   : >> { %5621 = vmatpush3.bf16.msra.mxu0 %v6640_v19  ;;  %v6683_v19 = vld [vmem:[%s9059_s1 + $0x1c0] sm:$0xff]  }
  0x31   : >> { %5641 = vmatpush3.bf16.msra.mxu1 %v6641_v22  ;;  %5646 = vmatprep.subr.bf16.mxu0 %v7078_v1  ;;  %v6686_v22 = vld [vmem:[%s9059_s1 + $0x190] sm:$0xff]  }
  0x32   : >> { %5666 = vmatprep.subr.bf16.mxu1 %v7078_v1 }
  0x33   : >> { %5623 = vmatmul.mubr.bf16.vlgmr.msra.gmra.mrb[0].mxu0 %v229_v24  ;;  %v6688_v24 = vld [vmem:[%s9059_s1 + $0x198] sm:$0xff]  }
  0x34   : >> { %5643 = vmatmul.mubr.bf16.vlgmr.msra.gmra.mrb[0].mxu1 %v4506_v25  ;;  %5647 = vmatpush3.bf16.msra.mxu0 %v6644_v26  ;;  %v6689_v25 = vld [vmem:[%s9059_s1 + $0x1d8] sm:$0xff]   ;;  %v4620_v26 = vld [vmem:[%s7161_s14 + $0x10] sm:$0xf] }
  0x35   : >> { %5667 = vmatpush3.bf16.msra.mxu1 %v6645_v27  ;;  %5648 = vmatprep.subr.bf16.mxu0 %v7078_v1  ;;  %v6690_v27 = vld [vmem:[%s9059_s1 + $0x1a0] sm:$0xff]   ;;  %v4663_v38 = vcombine.low %v4646_v34, %v4620_v26 }
  0x36   : >> { %5668 = vmatprep.subr.bf16.mxu1 %v7078_v1  ;;  %5662 = vmatprep.mubr.msk.bf16.mxu0 %vm7079_vm0, %v7078_v1 }
  0x37   : >> { %5682 = vmatprep.mubr.msk.bf16.mxu1 %vm7079_vm0, %v7078_v1  ;;  %v7430_v42 = vrot.slane %v4663_v38, 1  ;;  %v6736_v38 = vld [vmem:[%s9059_s1 + $0x300] sm:$0xff]  }
  0x38   : >> { %5649 = vmatpush3.bf16.msra.mxu0 %v6646_v28  ;;  %v6691_v28 = vld [vmem:[%s9059_s1 + $0x1e0] sm:$0xff]  }
  0x39   : >> { %5669 = vmatpush3.bf16.msra.mxu1 %v6647_v29  ;;  %5650 = vmatprep.subr.bf16.mxu0 %v7078_v1  ;;  %v4637_v29 = vcombine.low %v4593_v14, %v4620_v26  ;;  %v6728_v26 = vld [vmem:[%s9059_s1 + $0x2a8] sm:$0xff]  }
  0x3a   : >> { %5670 = vmatprep.subr.bf16.mxu1 %v7078_v1 }
  0x3c   : >> { %5651 = vmatpush3.bf16.msra.mxu0 %v6648_v30  ;;  %v6692_v30 = vld [vmem:[%s9059_s1 + $0x1a8] sm:$0xff]  }
  0x3d   : >> { %5671 = vmatpush3.bf16.msra.mxu1 %v6649_v31  ;;  %5652 = vmatprep.subr.bf16.mxu0 %v7078_v1  ;;  %v6693_v31 = vld [vmem:[%s9059_s1 + $0x1e8] sm:$0xff]  }
  0x3e   : >> { %5672 = vmatprep.subr.bf16.mxu1 %v7078_v1 }
  0x40   : >> { %5653 = vmatpush3.bf16.msra.mxu0 %v6650_v32  ;;  %v6694_v32 = vld [vmem:[%s9059_s1 + $0x1b0] sm:$0xff]  }
  0x41   : >> { %5673 = vmatpush3.bf16.msra.mxu1 %v6651_v33  ;;  %5654 = vmatprep.subr.bf16.mxu0 %v7078_v1  ;;  %v922_v33 = vshll.u32 %v4637_v29, 16 }
  0x42   : >> { %5674 = vmatprep.subr.bf16.mxu1 %v7078_v1 }
  0x44   : >> { %5655 = vmatpush3.bf16.msra.mxu0 %v6652_v36  ;;  %v920_v36 = vshrl.u32 %v4637_v29, 16  ;;  %v6730_v29 = vld [vmem:[%s9059_s1 + $0x2b0] sm:$0xff]  }
  0x45   : >> { %5675 = vmatpush3.bf16.msra.mxu1 %v6653_v37  ;;  %5656 = vmatprep.subr.bf16.mxu0 %v7078_v1  ;;  %v924_v37 = vrot.slane %v922_v33, 1  ;;  %v4730_v33 = vld [vmem:[%s7161_s14 + $0x1c] sm:$0x7] }
  0x46   : >> { %5676 = vmatprep.subr.bf16.mxu1 %v7078_v1 }
  0x48   : >> { %5657 = vmatpush3.bf16.msra.mxu0 %v6654_v40  ;;  %v6697_v40 = vld [vmem:[%s9059_s1 + $0x1f8] sm:$0xff]  }
  0x49   : >> { %5677 = vmatpush3.bf16.msra.mxu1 %v6655_v41  ;;  %5658 = vmatprep.subr.bf16.mxu0 %v7078_v1  ;;  %v7428_v41 = vor.u32 %v924_v37, %v920_v36  ;;  %v6733_v36 = vld [vmem:[%s9059_s1 + $0x2f8] sm:$0xff]  }
  0x4a   : >> { %5678 = vmatprep.subr.bf16.mxu1 %v7078_v1 }
  0x4c   : >> { %5659 = vmatpush3.bf16.msra.mxu0 %v6656_v44  ;;  %v6700_v44 = vld [vmem:[%s9059_s1 + $0x240] sm:$0xff]  }
  0x4d   : >> { %5679 = vmatpush3.bf16.msra.mxu1 %v6657_v46  ;;  %5660 = vmatprep.subr.bf16.mxu0 %v7078_v1  ;;  %v6702_v46 = vld [vmem:[%s9059_s1 + $0x248] sm:$0xff]  }
  0x4e   : >> { %5680 = vmatprep.subr.bf16.mxu1 %v7078_v1 }
  0x50   : >> { %5661 = vmatpush3.bf16.msra.mxu0 %v6658_v51  ;;  %v4672_v51 = vld [vmem:[%s7161_s14 + $0xc] sm:$0xe] }
  0x51   : >> { %5681 = vmatpush3.bf16.msra.mxu1 %v6659_v52  ;;  %5686 = vmatprep.subr.bf16.mxu0 %v7078_v1  ;;  %v4673_v52 = vld [vmem:[%s7161_s14 + $0x10] sm:$0xf] }
  0x52   : >> { %5706 = vmatprep.subr.bf16.mxu1 %v7078_v1  ;;  %v4691_v54 = vcombine.low %v4672_v51, %v4673_v52  ;;  %v6744_v51 = vld [vmem:[%s9059_s1 + $0x320] sm:$0xff]  }
  0x53   : >> { %5663 = vmatmul.mubr.bf16.vlgmr.msra.gmra.mrb[4].mxu0 %v434_v55  ;;  %v6708_v55 = vld [vmem:[%s9059_s1 + $0x260] sm:$0xff]  }
  0x54   : >> { %5683 = vmatmul.mubr.bf16.vlgmr.msra.gmra.mrb[4].mxu1 %v568_v57  ;;  %5687 = vmatpush3.bf16.msra.mxu0 %v6663_v56  ;;  %v6716_v56 = vld [vmem:[%s7161_s14 + $0x14] ss:$0 sps:$4 sm:$0x11]   ;;  %v6709_v57 = vld [vmem:[%s9059_s1 + $0x228] sm:$0xff]  }
  0x55   : >> { %5707 = vmatpush3.bf16.msra.mxu1 %v6664_v58  ;;  %5688 = vmatprep.subr.bf16.mxu0 %v7078_v1  ;;  %v4701_v58 = vld [vmem:[%s7161_s14 + $0xc] sm:$0xc] }
  0x56   : >> { %5708 = vmatprep.subr.bf16.mxu1 %v7078_v1  ;;  %5702 = vmatprep.mubr.msk.bf16.mxu0 %vm7079_vm0, %v7078_v1 }
  0x57   : >> { %5722 = vmatprep.mubr.msk.bf16.mxu1 %vm7079_vm0, %v7078_v1 }
  0x58   : >> { %5689 = vmatpush3.bf16.msra.mxu0 %v6665_v59  ;;  %v1161_v59 = vshrl.u32 %v4691_v54, 16 }
  0x59   : >> { %5709 = vmatpush3.bf16.msra.mxu1 %v6666_v60  ;;  %5690 = vmatprep.subr.bf16.mxu0 %v7078_v1  ;;  %v1164_v60 = vshll.u32 %v4691_v54, 16  ;;  %v6746_v54 = vld [vmem:[%s9059_s1 + $0x328] sm:$0xff]  }
  0x5a   : >> { %5710 = vmatprep.subr.bf16.mxu1 %v7078_v1 }
  0x5c   : >> { %5691 = vmatpush3.bf16.msra.mxu0 %v6667_v61  ;;  %v6710_v61 = vld [vmem:[%s9059_s1 + $0x268] sm:$0xff]  }
  0x5d   : >> { %5711 = vmatpush3.bf16.msra.mxu1 %v6668_v62  ;;  %5692 = vmatprep.subr.bf16.mxu0 %v7078_v1  ;;  %v6711_v62 = vld [vmem:[%s9059_s1 + $0x230] sm:$0xff]  }
  0x5e   : >> { %5712 = vmatprep.subr.bf16.mxu1 %v7078_v1 }
  0x60   : >> { %5693 = vmatpush3.bf16.msra.mxu0 %v6669_v63  ;;  %v1169_v63 = vshll.u32 %v6716_v56, 16 }
  0x61   : >> { %5713 = vmatpush3.bf16.msra.mxu1 %v6670_v0  ;;  %5694 = vmatprep.subr.bf16.mxu0 %v7078_v1  ;;  %v4718_v0 = vcombine.low %v4701_v58, %v4673_v52  ;;  %v6745_v52 = vld [vmem:[%s9059_s1 + $0x360] sm:$0xff]  }
  0x62   : >> { %5714 = vmatprep.subr.bf16.mxu1 %v7078_v1 }
  0x64   : >> { %5695 = vmatpush3.bf16.msra.mxu0 %v6671_v2  ;;  %v1163_v2 = vrot.slane %v1161_v59, 1  ;;  %v6748_v59 = vld [vmem:[%s9059_s1 + $0x330] sm:$0xff]  }
  0x65   : >> { %5715 = vmatpush3.bf16.msra.mxu1 %v6672_v3  ;;  %5696 = vmatprep.subr.bf16.mxu0 %v7078_v1  ;;  %v1166_v3 = vrot.slane %v1164_v60, 2  ;;  %v4782_v60 = vld [vmem:[%s7161_s14 + $0x18] sm:$0xe] }
  0x66   : >> { %5716 = vmatprep.subr.bf16.mxu1 %v7078_v1 }
  0x67   : >> { %v1167_v8 = vor.u32 %v1166_v3, %v1163_v2  ;;  %v6750_v3 = vld [vmem:[%s9059_s1 + $0x338] sm:$0xff]  }
  0x68   : >> { %5697 = vmatpush3.bf16.msra.mxu0 %v6673_v4  ;;  %v6712_v4 = vld [vmem:[%s9059_s1 + $0x270] sm:$0xff]  }
  0x69   : >> { %5717 = vmatpush3.bf16.msra.mxu1 %v6674_v5  ;;  %5698 = vmatprep.subr.bf16.mxu0 %v7078_v1  ;;  %v6713_v5 = vld [vmem:[%s9059_s1 + $0x238] sm:$0xff]  }
  0x6a   : >> { %5718 = vmatprep.subr.bf16.mxu1 %v7078_v1 }
  0x6c   : >> { %5699 = vmatpush3.bf16.msra.mxu0 %v6675_v7  ;;  %v1286_v7 = vrot.slane %v4718_v0, 2 }
  0x6d   : >> { %5719 = vmatpush3.bf16.msra.mxu1 %v6676_v9  ;;  %5700 = vmatprep.subr.bf16.mxu0 %v7078_v1  ;;  %v1171_v9 = vrot.slane %v1169_v63, 2 }
  0x6e   : >> { %5720 = vmatprep.subr.bf16.mxu1 %v7078_v1 }
  0x70   : >> { %5701 = vmatpush3.bf16.msra.mxu0 %v6677_v10  ;;  %v1287_v10 = vrot.slane %v6716_v56, 2  ;;  %v7651_v56 = vld [vmem:[%s7161_s14 + $0x20] ss:$0 sps:$4 sm:$0x11]  }
  0x71   : >> { %5721 = vmatpush3.bf16.msra.mxu1 %v6678_v12  ;;  %5726 = vmatprep.subr.bf16.mxu0 %v7078_v1  ;;  %v7510_v12 = vsel %vm555_vm1, %v1167_v8, %v1171_v9  ;;  %v1772_v0 = vshll.u32 %v7651_v56, 16  ;;  %v6755_v8 = vld [vmem:[%s9059_s1 + $0x380] sm:$0xff]  }
  0x72   : >> { %5746 = vmatprep.subr.bf16.mxu1 %v7078_v1  ;;  %v7516_v14 = vsel %vm682_vm2, %v1286_v7, %v1287_v10  ;;  %v6756_v10 = vld [vmem:[%s9059_s1 + $0x3c0] sm:$0xff]  }
  0x73   : >> { %5703 = vmatmul.mubr.bf16.vlgmr.msra.gmra.mrb[8].mxu0 %v685_v16  ;;  %v6721_v16 = vld [vmem:[%s9059_s1 + $0x2c8] sm:$0xff]  }
  0x74   : >> { %5723 = vmatmul.mubr.bf16.vlgmr.msra.gmra.mrb[8].mxu1 %v7355_v17  ;;  %5727 = vmatpush3.bf16.msra.mxu0 %v6682_v18  ;;  %v6722_v18 = vld [vmem:[%s9059_s1 + $0x290] sm:$0xff]  }
  0x75   : >> { %5747 = vmatpush3.bf16.msra.mxu1 %v6683_v19  ;;  %5728 = vmatprep.subr.bf16.mxu0 %v7078_v1  ;;  %v6723_v19 = vld [vmem:[%s9059_s1 + $0x2d0] sm:$0xff]  }
  0x76   : >> { %5748 = vmatprep.subr.bf16.mxu1 %v7078_v1  ;;  %5742 = vmatprep.mubr.msk.bf16.mxu0 %vm7079_vm0, %v7078_v1 }
  0x77   : >> { %5762 = vmatprep.mubr.msk.bf16.mxu1 %vm7079_vm0, %v7078_v1 }
  0x78   : >> { %5729 = vmatpush3.bf16.msra.mxu0 %v6684_v20  ;;  %v6724_v20 = vld [vmem:[%s9059_s1 + $0x298] sm:$0xff]  }
  0x79   : >> { %5749 = vmatpush3.bf16.msra.mxu1 %v6685_v21  ;;  %5730 = vmatprep.subr.bf16.mxu0 %v7078_v1  ;;  %v6725_v21 = vld [vmem:[%s9059_s1 + $0x2d8] sm:$0xff]  }
  0x7a   : >> { %5750 = vmatprep.subr.bf16.mxu1 %v7078_v1 }
  0x7c   : >> { %5731 = vmatpush3.bf16.msra.mxu0 %v6686_v22  ;;  %v6726_v22 = vld [vmem:[%s9059_s1 + $0x2a0] sm:$0xff]  }
  0x7d   : >> { %5751 = vmatpush3.bf16.msra.mxu1 %v6687_v23  ;;  %5732 = vmatprep.subr.bf16.mxu0 %v7078_v1  ;;  %v4729_v23 = vld [vmem:[%s7161_s14 + $0x18] sm:$0xf] }
  0x7e   : >> { %5752 = vmatprep.subr.bf16.mxu1 %v7078_v1  ;;  %v7588_v37 = vcombine.low %v4729_v23, %v4730_v33 }
  0x80   : >> { %5733 = vmatpush3.bf16.msra.mxu0 %v6688_v24  ;;  %v6727_v24 = vld [vmem:[%s9059_s1 + $0x2e0] sm:$0xff]  }
  0x81   : >> { %5753 = vmatpush3.bf16.msra.mxu1 %v6689_v25  ;;  %5734 = vmatprep.subr.bf16.mxu0 %v7078_v1  ;;  %v7558_v25 = vld [vmem:[%s7161_s14 + $0x1c] sm:$0xf] }
  0x82   : >> { %5754 = vmatprep.subr.bf16.mxu1 %v7078_v1  ;;  %v4799_v2 = vcombine.low %v4782_v60, %v7558_v25  ;;  %v6783_v60 = vld [vmem:[%s9059_s1 + $0x460] sm:$0xff]  }
  0x84   : >> { %5735 = vmatpush3.bf16.msra.mxu0 %v6690_v27  ;;  %v6729_v27 = vld [vmem:[%s9059_s1 + $0x2e8] sm:$0xff]   ;;  %v7673_v7 = vrot.slane %v4799_v2, 1 }
  0x85   : >> { %5755 = vmatpush3.bf16.msra.mxu1 %v6691_v28  ;;  %5736 = vmatprep.subr.bf16.mxu0 %v7078_v1  ;;  %v4773_v28 = vcombine.low %v4729_v23, %v7558_v25  ;;  %v6766_v23 = vld [vmem:[%s9059_s1 + $0x3e8] sm:$0xff]  }
  0x86   : >> { %5756 = vmatprep.subr.bf16.mxu1 %v7078_v1 }
  0x87   : >> { %v1523_v34 = vshrl.u32 %v4773_v28, 16 }
  0x88   : >> { %5737 = vmatpush3.bf16.msra.mxu0 %v6692_v30  ;;  %v6731_v30 = vld [vmem:[%s9059_s1 + $0x2f0] sm:$0xff]  }
  0x89   : >> { %5757 = vmatpush3.bf16.msra.mxu1 %v6693_v31  ;;  %5738 = vmatprep.subr.bf16.mxu0 %v7078_v1  ;;  %v1525_v31 = vshll.u32 %v4773_v28, 16 }
  0x8a   : >> { %5758 = vmatprep.subr.bf16.mxu1 %v7078_v1 }
  0x8c   : >> { %5739 = vmatpush3.bf16.msra.mxu0 %v6694_v32  ;;  %v6732_v32 = vld [vmem:[%s9059_s1 + $0x2b8] sm:$0xff]  }
  0x8d   : >> { %5759 = vmatpush3.bf16.msra.mxu1 %v6695_v35  ;;  %5740 = vmatprep.subr.bf16.mxu0 %v7078_v1  ;;  %v1527_v35 = vrot.slane %v1525_v31, 1  ;;  %v6767_v31 = vld [vmem:[%s9059_s1 + $0x3b0] sm:$0xff]  }
  0x8e   : >> { %5760 = vmatprep.subr.bf16.mxu1 %v7078_v1 }
  0x90   : >> { %5741 = vmatpush3.bf16.msra.mxu0 %v6696_v39  ;;  %v7593_v39 = vor.u32 %v1527_v35, %v1523_v34  ;;  %v6768_v35 = vld [vmem:[%s9059_s1 + $0x3f0] sm:$0xff]  }
  0x91   : >> { %5761 = vmatpush3.bf16.msra.mxu1 %v6697_v40  ;;  %5766 = vmatprep.subr.bf16.mxu0 %v7078_v1  ;;  %v6737_v40 = vld [vmem:[%s9059_s1 + $0x340] sm:$0xff]  }
  0x92   : >> { %5786 = vmatprep.subr.bf16.mxu1 %v7078_v1 }
  0x93   : >> { %5743 = vmatmul.mubr.bf16.vlgmr.msra.gmra.mrb[12].mxu0 %v7428_v41 }
  0x94   : >> { %5763 = vmatmul.mubr.bf16.vlgmr.msra.gmra.mrb[12].mxu1 %v7430_v42  ;;  %5767 = vmatpush3.bf16.msra.mxu0 %v6699_v43  ;;  %v6738_v43 = vld [vmem:[%s9059_s1 + $0x308] sm:$0xff]  }
  0x95   : >> { %5787 = vmatpush3.bf16.msra.mxu1 %v6700_v44  ;;  %5768 = vmatprep.subr.bf16.mxu0 %v7078_v1  ;;  %v6739_v44 = vld [vmem:[%s9059_s1 + $0x348] sm:$0xff]  }
  0x96   : >> { %5788 = vmatprep.subr.bf16.mxu1 %v7078_v1  ;;  %5782 = vmatprep.mubr.msk.bf16.mxu0 %vm7079_vm0, %v7078_v1 }
  0x97   : >> { %5802 = vmatprep.mubr.msk.bf16.mxu1 %vm7079_vm0, %v7078_v1 }
  0x98   : >> { %5769 = vmatpush3.bf16.msra.mxu0 %v6701_v45  ;;  %v6740_v45 = vld [vmem:[%s9059_s1 + $0x310] sm:$0xff]  }
  0x99   : >> { %5789 = vmatpush3.bf16.msra.mxu1 %v6702_v46  ;;  %5770 = vmatprep.subr.bf16.mxu0 %v7078_v1  ;;  %v6741_v46 = vld [vmem:[%s9059_s1 + $0x350] sm:$0xff]  }
  0x9a   : >> { %5790 = vmatprep.subr.bf16.mxu1 %v7078_v1 }
  0x9c   : >> { %5771 = vmatpush3.bf16.msra.mxu0 %v6703_v47  ;;  %v6742_v47 = vld [vmem:[%s9059_s1 + $0x318] sm:$0xff]  }
  0x9d   : >> { %5791 = vmatpush3.bf16.msra.mxu1 %v6704_v48  ;;  %5772 = vmatprep.subr.bf16.mxu0 %v7078_v1  ;;  %v6743_v48 = vld [vmem:[%s9059_s1 + $0x358] sm:$0xff]  }
  0x9e   : >> { %5792 = vmatprep.subr.bf16.mxu1 %v7078_v1 }
  0xa0   : >> { %5773 = vmatpush3.bf16.msra.mxu0 %v6705_v49  ;;  %v4808_v49 = vld [vmem:[%s7161_s14 + $0x18] sm:$0xe] }
  0xa1   : >> { %5793 = vmatpush3.bf16.msra.mxu1 %v6706_v50  ;;  %5774 = vmatprep.subr.bf16.mxu0 %v7078_v1  ;;  %v7632_v50 = vld [vmem:[%s7161_s14 + $0x1c] sm:$0xf] }
  0xa2   : >> { %5794 = vmatprep.subr.bf16.mxu1 %v7078_v1 }
  0xa4   : >> { %5775 = vmatpush3.bf16.msra.mxu0 %v6707_v53  ;;  %v4827_v53 = vcombine.low %v4808_v49, %v7632_v50 }
  0xa5   : >> { %5795 = vmatpush3.bf16.msra.mxu1 %v6708_v55  ;;  %5776 = vmatprep.subr.bf16.mxu0 %v7078_v1  ;;  %v6747_v55 = vld [vmem:[%s9059_s1 + $0x368] sm:$0xff]  }
  0xa6   : >> { %5796 = vmatprep.subr.bf16.mxu1 %v7078_v1  ;;  %v1767_v58 = vshll.u32 %v4827_v53, 16 }
  0xa8   : >> { %5777 = vmatpush3.bf16.msra.mxu0 %v6709_v57  ;;  %v1764_v57 = vshrl.u32 %v4827_v53, 16  ;;  %v1769_v63 = vrot.slane %v1767_v58, 2  ;;  %v6777_v53 = vld [vmem:[%s9059_s1 + $0x448] sm:$0xff]  }
  0xa9   : >> { %5797 = vmatpush3.bf16.msra.mxu1 %v6710_v61  ;;  %5778 = vmatprep.subr.bf16.mxu0 %v7078_v1  ;;  %v6749_v61 = vld [vmem:[%s9059_s1 + $0x370] sm:$0xff]   ;;  %v4892_v58 = vld [vmem:[%s7161_s14 + $0x28] sm:$0xf] }
  0xaa   : >> { %5798 = vmatprep.subr.bf16.mxu1 %v7078_v1 }
  0xac   : >> { %5779 = vmatpush3.bf16.msra.mxu0 %v6711_v62  ;;  %v1766_v62 = vrot.slane %v1764_v57, 1  ;;  %v6781_v57 = vld [vmem:[%s9059_s1 + $0x458] sm:$0xff]  }
  0xad   : >> { %5799 = vmatpush3.bf16.msra.mxu1 %v6712_v4  ;;  %5780 = vmatprep.subr.bf16.mxu0 %v7078_v1  ;;  %v6751_v4 = vld [vmem:[%s9059_s1 + $0x378] sm:$0xff]  }
  0xae   : >> { %5800 = vmatprep.subr.bf16.mxu1 %v7078_v1 }
  0xb0   : >> { %5781 = vmatpush3.bf16.msra.mxu0 %v6713_v5  ;;  %v1770_v5 = vor.u32 %v1769_v63, %v1766_v62  ;;  %v6784_v62 = vld [vmem:[%s9059_s1 + $0x428] sm:$0xff]  }
  0xb1   : >> { %5801 = vmatpush3.bf16.msra.mxu1 %v6714_v6  ;;  %5806 = vmatprep.subr.bf16.mxu0 %v7078_v1  ;;  %v1774_v6 = vrot.slane %v1772_v0, 2  ;;  %v6785_v63 = vld [vmem:[%s9059_s1 + $0x468] sm:$0xff]  }
  0xb2   : >> { %5826 = vmatprep.subr.bf16.mxu1 %v7078_v1 }
  0xb3   : >> { %5783 = vmatmul.mubr.bf16.vlgmr.msra.gmra.mrb[16].mxu0 %v7510_v12  ;;  %v7679_v9 = vsel %vm555_vm1, %v1770_v5, %v1774_v6 }
  0xb4   : >> { %5803 = vmatmul.mubr.bf16.vlgmr.msra.gmra.mrb[16].mxu1 %v7516_v14  ;;  %5807 = vmatpush3.bf16.msra.mxu0 %v6718_v11  ;;  %v6757_v11 = vld [vmem:[%s9059_s1 + $0x388] sm:$0xff]  }
  0xb5   : >> { %5827 = vmatpush3.bf16.msra.mxu1 %v6719_v13  ;;  %5808 = vmatprep.subr.bf16.mxu0 %v7078_v1  ;;  %v6758_v13 = vld [vmem:[%s9059_s1 + $0x3c8] sm:$0xff]  }
  0xb6   : >> { %5828 = vmatprep.subr.bf16.mxu1 %v7078_v1  ;;  %5822 = vmatprep.mubr.msk.bf16.mxu0 %vm7079_vm0, %v7078_v1 }
  0xb7   : >> { %5842 = vmatprep.mubr.msk.bf16.mxu1 %vm7079_vm0, %v7078_v1 }
  0xb8   : >> { %5809 = vmatpush3.bf16.msra.mxu0 %v6720_v15  ;;  %v6759_v15 = vld [vmem:[%s9059_s1 + $0x390] sm:$0xff]  }
  0xb9   : >> { %5829 = vmatpush3.bf16.msra.mxu1 %v6721_v16  ;;  %5810 = vmatprep.subr.bf16.mxu0 %v7078_v1  ;;  %v6760_v16 = vld [vmem:[%s9059_s1 + $0x3d0] sm:$0xff]  }
  0xba   : >> { %5830 = vmatprep.subr.bf16.mxu1 %v7078_v1 }
  0xbc   : >> { %5811 = vmatpush3.bf16.msra.mxu0 %v6722_v18  ;;  %v6761_v18 = vld [vmem:[%s9059_s1 + $0x398] sm:$0xff]  }
  0xbd   : >> { %5831 = vmatpush3.bf16.msra.mxu1 %v6723_v19  ;;  %5812 = vmatprep.subr.bf16.mxu0 %v7078_v1  ;;  %v6762_v19 = vld [vmem:[%s9059_s1 + $0x3d8] sm:$0xff]  }
  0xbe   : >> { %5832 = vmatprep.subr.bf16.mxu1 %v7078_v1 }
  0xc0   : >> { %5813 = vmatpush3.bf16.msra.mxu0 %v6724_v20  ;;  %v6763_v20 = vld [vmem:[%s9059_s1 + $0x3a0] sm:$0xff]  }
  0xc1   : >> { %5833 = vmatpush3.bf16.msra.mxu1 %v6725_v21  ;;  %5814 = vmatprep.subr.bf16.mxu0 %v7078_v1  ;;  %v6764_v21 = vld [vmem:[%s9059_s1 + $0x3e0] sm:$0xff]  }
  0xc2   : >> { %5834 = vmatprep.subr.bf16.mxu1 %v7078_v1 }
  0xc4   : >> { %5815 = vmatpush3.bf16.msra.mxu0 %v6726_v22  ;;  %v6765_v22 = vld [vmem:[%s9059_s1 + $0x3a8] sm:$0xff]  }
  0xc5   : >> { %5835 = vmatpush3.bf16.msra.mxu1 %v6727_v24  ;;  %5816 = vmatprep.subr.bf16.mxu0 %v7078_v1  ;;  %v4837_v24 = vld [vmem:[%s7161_s14 + $0x18] sm:$0xc] }
  0xc6   : >> { %5836 = vmatprep.subr.bf16.mxu1 %v7078_v1 }
  0xc8   : >> { %5817 = vmatpush3.bf16.msra.mxu0 %v6728_v26 }
  0xc9   : >> { %5837 = vmatpush3.bf16.msra.mxu1 %v6729_v27  ;;  %5818 = vmatprep.subr.bf16.mxu0 %v7078_v1 }
  0xca   : >> { %5838 = vmatprep.subr.bf16.mxu1 %v7078_v1 }
  0xcc   : >> { %5819 = vmatpush3.bf16.msra.mxu0 %v6730_v29 }
  0xcd   : >> { %5839 = vmatpush3.bf16.msra.mxu1 %v6731_v30  ;;  %5820 = vmatprep.subr.bf16.mxu0 %v7078_v1 }
  0xce   : >> { %5840 = vmatprep.subr.bf16.mxu1 %v7078_v1 }
  0xd0   : >> { %5821 = vmatpush3.bf16.msra.mxu0 %v6732_v32  ;;  %v4854_v32 = vcombine.low %v4837_v24, %v7632_v50  ;;  %v6774_v50 = vld [vmem:[%s9059_s1 + $0x400] sm:$0xff]   ;;  %v6788_v24 = vld [vmem:[%s9059_s1 + $0x438] sm:$0xff]  }
  0xd1   : >> { %5841 = vmatpush3.bf16.msra.mxu1 %v6733_v36  ;;  %5846 = vmatprep.subr.bf16.mxu0 %v7078_v1 }
  0xd2   : >> { %5866 = vmatprep.subr.bf16.mxu1 %v7078_v1 }
  0xd3   : >> { %5823 = vmatmul.mubr.bf16.vlgmr.msra.gmra.mrb[20].mxu0 %v7588_v37 }
  0xd4   : >> { %5843 = vmatmul.mubr.bf16.vlgmr.msra.gmra.mrb[20].mxu1 %v7593_v39  ;;  %5847 = vmatpush3.bf16.msra.mxu0 %v6736_v38 }
  0xd5   : >> { %5867 = vmatpush3.bf16.msra.mxu1 %v6737_v40  ;;  %5848 = vmatprep.subr.bf16.mxu0 %v7078_v1  ;;  %v6769_v40 = vld [vmem:[%s9059_s1 + $0x3b8] sm:$0xff]  }
  0xd6   : >> { %5868 = vmatprep.subr.bf16.mxu1 %v7078_v1  ;;  %5862 = vmatprep.mubr.msk.bf16.mxu0 %vm7079_vm0, %v7078_v1 }
  0xd7   : >> { %5882 = vmatprep.mubr.msk.bf16.mxu1 %vm7079_vm0, %v7078_v1 }
  0xd8   : >> { %5849 = vmatpush3.bf16.msra.mxu0 %v6738_v43  ;;  %v1889_v43 = vrot.slane %v4854_v32, 2  ;;  %v6794_v32 = vld [vmem:[%s9059_s1 + $0x4c8] sm:$0xff]  }
  0xd9   : >> { %5869 = vmatpush3.bf16.msra.mxu1 %v6739_v44  ;;  %5850 = vmatprep.subr.bf16.mxu0 %v7078_v1  ;;  %v1890_v44 = vrot.slane %v7651_v56, 2  ;;  %v6780_v56 = vld [vmem:[%s9059_s1 + $0x418] sm:$0xff]  }
  0xda   : >> { %5870 = vmatprep.subr.bf16.mxu1 %v7078_v1 }
  0xdc   : >> { %5851 = vmatpush3.bf16.msra.mxu0 %v6740_v45  ;;  %v6770_v45 = vld [vmem:[%s9059_s1 + $0x3f8] sm:$0xff]  }
  0xdd   : >> { %5871 = vmatpush3.bf16.msra.mxu1 %v6741_v46  ;;  %5852 = vmatprep.subr.bf16.mxu0 %v7078_v1  ;;  %v4865_v46 = vld [vmem:[%s7161_s14 + $0x24] sm:$0xf] }
  0xde   : >> { %5872 = vmatprep.subr.bf16.mxu1 %v7078_v1 }
  0xe0   : >> { %5853 = vmatpush3.bf16.msra.mxu0 %v6742_v47  ;;  %v4866_v47 = vld [vmem:[%s7161_s14 + $0x28] sm:$0x7] }
  0xe1   : >> { %5873 = vmatpush3.bf16.msra.mxu1 %v6743_v48  ;;  %5854 = vmatprep.subr.bf16.mxu0 %v7078_v1  ;;  %v7758_v48 = vsel %vm682_vm2, %v1889_v43, %v1890_v44  ;;  %v7760_v49 = vcombine.low %v4865_v46, %v4866_v47  ;;  %v6799_v43 = vld [vmem:[%s9059_s1 + $0x4a0] sm:$0xff]   ;;  %v6808_v47 = vld [vmem:[%s7161_s14 + $0x2c] ss:$0 sps:$4 sm:$0x11]  }
  0xe2   : >> { %5874 = vmatprep.subr.bf16.mxu1 %v7078_v1 }
  0xe4   : >> { %5855 = vmatpush3.bf16.msra.mxu0 %v6744_v51  ;;  %v6775_v51 = vld [vmem:[%s9059_s1 + $0x440] sm:$0xff]  }
  0xe5   : >> { %5875 = vmatpush3.bf16.msra.mxu1 %v6745_v52  ;;  %5856 = vmatprep.subr.bf16.mxu0 %v7078_v1  ;;  %v6776_v52 = vld [vmem:[%s9059_s1 + $0x408] sm:$0xff]  }
  0xe6   : >> { %5876 = vmatprep.subr.bf16.mxu1 %v7078_v1 }
  0xe8   : >> { %5857 = vmatpush3.bf16.msra.mxu0 %v6746_v54  ;;  %v6778_v54 = vld [vmem:[%s9059_s1 + $0x410] sm:$0xff]  }
  0xe9   : >> { %5877 = vmatpush3.bf16.msra.mxu1 %v6747_v55  ;;  %5858 = vmatprep.subr.bf16.mxu0 %v7078_v1  ;;  %v6779_v55 = vld [vmem:[%s9059_s1 + $0x450] sm:$0xff]  }
  0xea   : >> { %5878 = vmatprep.subr.bf16.mxu1 %v7078_v1 }
  0xec   : >> { %5859 = vmatpush3.bf16.msra.mxu0 %v6748_v59  ;;  %v6782_v59 = vld [vmem:[%s9059_s1 + $0x420] sm:$0xff]  }
  0xed   : >> { %5879 = vmatpush3.bf16.msra.mxu1 %v6749_v61  ;;  %5860 = vmatprep.subr.bf16.mxu0 %v7078_v1  ;;  %v4909_v61 = vcombine.low %v4865_v46, %v4892_v58  ;;  %v6801_v46 = vld [vmem:[%s9059_s1 + $0x4a8] sm:$0xff]  }
  0xee   : >> { %5880 = vmatprep.subr.bf16.mxu1 %v7078_v1 }
  0xef   : >> { %v2128_v5 = vshll.u32 %v4909_v61, 16 }
  0xf0   : >> { %5861 = vmatpush3.bf16.msra.mxu0 %v6750_v3 }
  0xf1   : >> { %5881 = vmatpush3.bf16.msra.mxu1 %v6751_v4  ;;  %5886 = vmatprep.subr.bf16.mxu0 %v7078_v1 }
  0xf2   : >> { %5906 = vmatprep.subr.bf16.mxu1 %v7078_v1 }
  0xf3   : >> { %5863 = vmatmul.mubr.bf16.vlgmr.msra.gmra.mrb[24].mxu0 %v7673_v7 }
  0xf4   : >> { %5883 = vmatmul.mubr.bf16.vlgmr.msra.gmra.mrb[24].mxu1 %v7679_v9  ;;  %5887 = vmatpush3.bf16.msra.mxu0 %v6755_v8 }
  0xf5   : >> { %5907 = vmatpush3.bf16.msra.mxu1 %v6756_v10  ;;  %5888 = vmatprep.subr.bf16.mxu0 %v7078_v1  ;;  %v6786_v10 = vld [vmem:[%s9059_s1 + $0x430] sm:$0xff]  }
  0xf6   : >> { %5908 = vmatprep.subr.bf16.mxu1 %v7078_v1  ;;  %5902 = vmatprep.mubr.msk.bf16.mxu0 %vm7079_vm0, %v7078_v1 }
  0xf7   : >> { %5922 = vmatprep.mubr.msk.bf16.mxu1 %vm7079_vm0, %v7078_v1 }
  0xf8   : >> { %5889 = vmatpush3.bf16.msra.mxu0 %v6757_v11 }
  0xf9   : >> { %5909 = vmatpush3.bf16.msra.mxu1 %v6758_v13  ;;  %5890 = vmatprep.subr.bf16.mxu0 %v7078_v1 }
  0xfa   : >> { %5910 = vmatprep.subr.bf16.mxu1 %v7078_v1 }
  0xfc   : >> { %5891 = vmatpush3.bf16.msra.mxu0 %v6759_v15 }
  0xfd   : >> { %5911 = vmatpush3.bf16.msra.mxu1 %v6760_v16  ;;  %5892 = vmatprep.subr.bf16.mxu0 %v7078_v1 }
  0xfe   : >> { %5912 = vmatprep.subr.bf16.mxu1 %v7078_v1 }
 0x100   : >> { %5893 = vmatpush3.bf16.msra.mxu0 %v6761_v18  ;;  %v6787_v18 = vld [vmem:[%s9059_s1 + $0x470] sm:$0xff]  }
 0x101   : >> { %5913 = vmatpush3.bf16.msra.mxu1 %v6762_v19  ;;  %5894 = vmatprep.subr.bf16.mxu0 %v7078_v1  ;;  %v4918_v19 = vld [vmem:[%s7161_s14 + $0x24] sm:$0xe] }
 0x102   : >> { %5914 = vmatprep.subr.bf16.mxu1 %v7078_v1 }
 0x104   : >> { %5895 = vmatpush3.bf16.msra.mxu0 %v6763_v20 }
 0x105   : >> { %5915 = vmatpush3.bf16.msra.mxu1 %v6764_v21  ;;  %5896 = vmatprep.subr.bf16.mxu0 %v7078_v1 }
 0x106   : >> { %v313_v25 = vpop.f32.mrb[0].mxu0  ;;  %5916 = vmatprep.subr.bf16.mxu1 %v7078_v1 }
 0x107   : >> { %v406_v26 = vpop.f32.mrb[0].mxu1  ;;  %v5624_v27 = vpop.f32.mrb[1].mxu0 }
 0x108   : >> { %v7733_v28 = vadd.f32 %v406_v26, %v313_v25  ;;  %v5644_v29 = vpop.f32.mrb[1].mxu1  ;;  %v316_v30 = vpop.f32.mrb[2].mxu0  ;;  %5897 = vmatpush3.bf16.msra.mxu0 %v6765_v22  ;;  %v2126_v22 = vshrl.u32 %v4909_v61, 16  ;;  %v4935_v25 = vcombine.low %v4918_v19, %v4892_v58  ;;  %v6789_v26 = vld [vmem:[%s9059_s1 + $0x478] sm:$0xff]   ;;  %v2493_v19 = vrot.slane %v6808_v47, 2 }
 0x109   : >> { %v409_v33 = vpop.f32.mrb[2].mxu1  ;;  %5917 = vmatpush3.bf16.msra.mxu1 %v6766_v23  ;;  %v5625_v34 = vpop.f32.mrb[3].mxu0  ;;  %5898 = vmatprep.subr.bf16.mxu0 %v7078_v1  ;;  %v2130_v23 = vrot.slane %v2128_v5, 1  ;;  %v6791_v29 = vld [vmem:[%s9059_s1 + $0x480] sm:$0xff]   ;;  %v6804_v5 = vld [vmem:[%s9059_s1 + $0x4f0] sm:$0xff]  }
 0x10a   : >> { %v7743_v36 = vadd.f32 %v409_v33, %v316_v30  ;;  %v5645_v38 = vpop.f32.mrb[3].mxu1  ;;  %5918 = vmatprep.subr.bf16.mxu1 %v7078_v1  ;;  %v6792_v30 = vld [vmem:[%s9059_s1 + $0x4c0] sm:$0xff]   ;;  %v6795_v33 = vld [vmem:[%s9059_s1 + $0x490] sm:$0xff]  }
 0x10b   : >> { %v7840_v27 = vor.u32 %v2130_v23, %v2126_v22  ;;  %v6796_v34 = vld [vmem:[%s9059_s1 + $0x4d0] sm:$0xff]   ;;  %v4944_v38 = vld [vmem:[%s7161_s14 + $0x24] sm:$0xe] }
 0x10c   : >> { %5899 = vmatpush3.bf16.msra.mxu0 %v6767_v31  ;;  %v6793_v31 = vld [vmem:[%s9059_s1 + $0x488] sm:$0xff]   ;;  %v6811_v23 = vld [vmem:[%s9059_s1 + $0x540] sm:$0xff]  }
 0x10d   : >> { %5919 = vmatpush3.bf16.msra.mxu1 %v6768_v35  ;;  %5900 = vmatprep.subr.bf16.mxu0 %v7078_v1  ;;  %v6797_v35 = vld [vmem:[%s9059_s1 + $0x498] sm:$0xff]  }
 0x10e   : >> { %5920 = vmatprep.subr.bf16.mxu1 %v7078_v1 }
 0x110   : >> { %5901 = vmatpush3.bf16.msra.mxu0 %v6769_v40  ;;  %v4945_v40 = vld [vmem:[%s7161_s14 + $0x28] sm:$0xf] }
 0x111   : >> { %5921 = vmatpush3.bf16.msra.mxu1 %v6770_v45  ;;  %5926 = vmatprep.subr.bf16.mxu0 %v7078_v1  ;;  %v4963_v44 = vcombine.low %v4944_v38, %v4945_v40  ;;  %v6800_v45 = vld [vmem:[%s9059_s1 + $0x4e0] sm:$0xff]  }
 0x112   : >> { %5946 = vmatprep.subr.bf16.mxu1 %v7078_v1 }
 0x113   : >> { %5903 = vmatmul.mubr.bf16.vlgmr.msra.gmra.mrb[28].mxu0 %v7758_v48 }
 0x114   : >> { %5923 = vmatmul.mubr.bf16.vlgmr.msra.gmra.mrb[28].mxu1 %v7760_v49  ;;  %5927 = vmatpush3.bf16.msra.mxu0 %v6774_v50  ;;  %v2367_v50 = vshrl.u32 %v4963_v44, 16 }
 0x115   : >> { %5947 = vmatpush3.bf16.msra.mxu1 %v6775_v51  ;;  %5928 = vmatprep.subr.bf16.mxu0 %v7078_v1  ;;  %v2370_v51 = vshll.u32 %v4963_v44, 16 }
 0x116   : >> { %5948 = vmatprep.subr.bf16.mxu1 %v7078_v1  ;;  %5942 = vmatprep.mubr.msk.bf16.mxu0 %vm7079_vm0, %v7078_v1  ;;  %v2369_v61 = vrot.slane %v2367_v50, 1 }
 0x117   : >> { %5962 = vmatprep.mubr.msk.bf16.mxu1 %vm7079_vm0, %v7078_v1 }
 0x118   : >> { %5929 = vmatpush3.bf16.msra.mxu0 %v6776_v52  ;;  %v6802_v52 = vld [vmem:[%s9059_s1 + $0x4e8] sm:$0xff]  }
 0x119   : >> { %5949 = vmatpush3.bf16.msra.mxu1 %v6777_v53  ;;  %5930 = vmatprep.subr.bf16.mxu0 %v7078_v1 }
 0x11a   : >> { %5950 = vmatprep.subr.bf16.mxu1 %v7078_v1 }
 0x11c   : >> { %5931 = vmatpush3.bf16.msra.mxu0 %v6778_v54  ;;  %v4973_v54 = vld [vmem:[%s7161_s14 + $0x24] sm:$0xc] }
 0x11d   : >> { %5951 = vmatpush3.bf16.msra.mxu1 %v6779_v55  ;;  %5932 = vmatprep.subr.bf16.mxu0 %v7078_v1 }
 0x11e   : >> { %5952 = vmatprep.subr.bf16.mxu1 %v7078_v1 }
 0x120   : >> { %5933 = vmatpush3.bf16.msra.mxu0 %v6780_v56 }
 0x121   : >> { %5953 = vmatpush3.bf16.msra.mxu1 %v6781_v57  ;;  %5934 = vmatprep.subr.bf16.mxu0 %v7078_v1 }
 0x122   : >> { %5954 = vmatprep.subr.bf16.mxu1 %v7078_v1 }
 0x124   : >> { %5935 = vmatpush3.bf16.msra.mxu0 %v6782_v59 }
 0x125   : >> { %5955 = vmatpush3.bf16.msra.mxu1 %v6783_v60  ;;  %5936 = vmatprep.subr.bf16.mxu0 %v7078_v1  ;;  %v6803_v60 = vld [vmem:[%s9059_s1 + $0x4b0] sm:$0xff]  }
 0x126   : >> { %v518_v0 = vpop.f32.mrb[4].mxu0  ;;  %5956 = vmatprep.subr.bf16.mxu1 %v7078_v1 }
 0x127   : >> { %v525_v2 = vadd.f32 %v518_v0, %v7733_v28  ;;  %v652_v3 = vpop.f32.mrb[4].mxu1  ;;  %v5664_v4 = vpop.f32.mrb[5].mxu0  ;;  %v7842_v28 = vrot.slane %v4935_v25, 1  ;;  %v6813_v25 = vld [vmem:[%s9059_s1 + $0x548] sm:$0xff]  }
 0x128   : >> { %v5684_v6 = vpop.f32.mrb[5].mxu1  ;;  %v521_v8 = vpop.f32.mrb[6].mxu0  ;;  %5937 = vmatpush3.bf16.msra.mxu0 %v6784_v62  ;;  %v2372_v62 = vrot.slane %v2370_v51, 2  ;;  %v6822_v51 = vld [vmem:[%s9059_s1 + $0x530] sm:$0xff]  }
 0x129   : >> { %v7821_v11 = vadd.f32 %v652_v3, %v525_v2  ;;  %v526_v13 = vadd.f32 %v521_v8, %v7743_v36  ;;  %v655_v15 = vpop.f32.mrb[6].mxu1  ;;  %5957 = vmatpush3.bf16.msra.mxu1 %v6785_v63  ;;  %v5665_v16 = vpop.f32.mrb[7].mxu0  ;;  %5938 = vmatprep.subr.bf16.mxu0 %v7078_v1  ;;  %v6798_v36 = vld [vmem:[%s9059_s1 + $0x4d8] sm:$0xff]   ;;  %v2375_v63 = vshll.u32 %v6808_v47, 16  ;;  %v4990_v6 = vcombine.low %v4973_v54, %v4945_v40  ;;  %v6821_v40 = vld [vmem:[%s9059_s1 + $0x568] sm:$0xff]  }
 0x12a   : >> { %v5685_v20 = vpop.f32.mrb[7].mxu1  ;;  %5958 = vmatprep.subr.bf16.mxu1 %v7078_v1  ;;  %v6806_v16 = vld [vmem:[%s9059_s1 + $0x4f8] sm:$0xff]  }
 0x12b   : >> { %v7830_v21 = vadd.f32 %v655_v15, %v526_v13  ;;  %v2373_v13 = vor.u32 %v2372_v62, %v2369_v61  ;;  %v2377_v15 = vrot.slane %v2375_v63, 2  ;;  %v5002_v61 = vld [vmem:[%s7161_s14 + $0x34] sm:$0x7] }
 0x12c   : >> { %5939 = vmatpush3.bf16.msra.mxu0 %v6786_v10 }
 0x12d   : >> { %5959 = vmatpush3.bf16.msra.mxu1 %v6787_v18  ;;  %5940 = vmatprep.subr.bf16.mxu0 %v7078_v1  ;;  %v2492_v18 = vrot.slane %v4990_v6, 2  ;;  %v7925_v20 = vsel %vm555_vm1, %v2373_v13, %v2377_v15  ;;  %v6830_v6 = vld [vmem:[%s9059_s1 + $0x588] sm:$0xff]   ;;  %v6834_v13 = vld [vmem:[%s9059_s1 + $0x598] sm:$0xff]  }
 0x12e   : >> { %5960 = vmatprep.subr.bf16.mxu1 %v7078_v1  ;;  %v6835_v15 = vld [vmem:[%s9059_s1 + $0x5d8] sm:$0xff]  }
 0x12f   : >> { %v7931_v22 = vsel %vm682_vm2, %v2492_v18, %v2493_v19  ;;  %v8055_v18 = vld [vmem:[%s7161_s14 + $0x34] sm:$0xf]  ;;  %v6836_v19 = vld [vmem:[%s9059_s1 + $0x5a0] sm:$0xff]  }
 0x130   : >> { %5941 = vmatpush3.bf16.msra.mxu0 %v6788_v24  ;;  %v6812_v24 = vld [vmem:[%s9059_s1 + $0x508] sm:$0xff]  }
 0x131   : >> { %5961 = vmatpush3.bf16.msra.mxu1 %v6789_v26  ;;  %5966 = vmatprep.subr.bf16.mxu0 %v7078_v1  ;;  %v6814_v26 = vld [vmem:[%s9059_s1 + $0x510] sm:$0xff]  }
 0x132   : >> { %5986 = vmatprep.subr.bf16.mxu1 %v7078_v1 }
 0x133   : >> { %5943 = vmatmul.mubr.bf16.vlgmr.msra.gmra.mrb[32].mxu0 %v7840_v27 }
 0x134   : >> { %5963 = vmatmul.mubr.bf16.vlgmr.msra.gmra.mrb[32].mxu1 %v7842_v28  ;;  %5967 = vmatpush3.bf16.msra.mxu0 %v6791_v29  ;;  %v6815_v29 = vld [vmem:[%s9059_s1 + $0x550] sm:$0xff]  }
 0x135   : >> { %5987 = vmatpush3.bf16.msra.mxu1 %v6792_v30  ;;  %5968 = vmatprep.subr.bf16.mxu0 %v7078_v1  ;;  %v6816_v30 = vld [vmem:[%s9059_s1 + $0x518] sm:$0xff]  }
 0x136   : >> { %5988 = vmatprep.subr.bf16.mxu1 %v7078_v1  ;;  %5982 = vmatprep.mubr.msk.bf16.mxu0 %vm7079_vm0, %v7078_v1 }
 0x137   : >> { %6002 = vmatprep.mubr.msk.bf16.mxu1 %vm7079_vm0, %v7078_v1 }
 0x138   : >> { %5969 = vmatpush3.bf16.msra.mxu0 %v6793_v31  ;;  %v6817_v31 = vld [vmem:[%s9059_s1 + $0x558] sm:$0xff]  }
 0x139   : >> { %5989 = vmatpush3.bf16.msra.mxu1 %v6794_v32  ;;  %5970 = vmatprep.subr.bf16.mxu0 %v7078_v1  ;;  %v6818_v32 = vld [vmem:[%s9059_s1 + $0x520] sm:$0xff]  }
 0x13a   : >> { %5990 = vmatprep.subr.bf16.mxu1 %v7078_v1 }
 0x13c   : >> { %5971 = vmatpush3.bf16.msra.mxu0 %v6795_v33  ;;  %v6819_v33 = vld [vmem:[%s9059_s1 + $0x560] sm:$0xff]  }
 0x13d   : >> { %5991 = vmatpush3.bf16.msra.mxu1 %v6796_v34  ;;  %5972 = vmatprep.subr.bf16.mxu0 %v7078_v1  ;;  %v5001_v34 = vld [vmem:[%s7161_s14 + $0x30] sm:$0xf] }
 0x13e   : >> { %5992 = vmatprep.subr.bf16.mxu1 %v7078_v1 }
 0x140   : >> { %5973 = vmatpush3.bf16.msra.mxu0 %v6797_v35  ;;  %v7977_v35 = vld [vmem:[%s7161_s14 + $0x34] sm:$0xf] }
 0x141   : >> { %5993 = vmatpush3.bf16.msra.mxu1 %v6798_v36  ;;  %5974 = vmatprep.subr.bf16.mxu0 %v7078_v1  ;;  %v6820_v36 = vld [vmem:[%s9059_s1 + $0x528] sm:$0xff]   ;;  %v5045_v38 = vcombine.low %v5001_v34, %v7977_v35 }
 0x142   : >> { %5994 = vmatprep.subr.bf16.mxu1 %v7078_v1 }
 0x143   : >> { %v2729_v62 = vshrl.u32 %v5045_v38, 16 }
 0x144   : >> { %5975 = vmatpush3.bf16.msra.mxu0 %v6799_v43 }
 0x145   : >> { %5995 = vmatpush3.bf16.msra.mxu1 %v6800_v45  ;;  %5976 = vmatprep.subr.bf16.mxu0 %v7078_v1 }
 0x146   : >> { %v769_v53 = vpop.f32.mrb[8].mxu0  ;;  %5996 = vmatprep.subr.bf16.mxu1 %v7078_v1 }
 0x147   : >> { %v776_v55 = vadd.f32 %v769_v53, %v7821_v11  ;;  %v889_v56 = vpop.f32.mrb[8].mxu1  ;;  %v5704_v57 = vpop.f32.mrb[9].mxu0  ;;  %v6805_v11 = vld [vmem:[%s9059_s1 + $0x4b8] sm:$0xff]  }
 0x148   : >> { %v5724_v58 = vpop.f32.mrb[9].mxu1  ;;  %v772_v59 = vpop.f32.mrb[10].mxu0  ;;  %5977 = vmatpush3.bf16.msra.mxu0 %v6801_v46  ;;  %v6823_v57 = vld [vmem:[%s9059_s1 + $0x570] sm:$0xff]  }
 0x149   : >> { %v7906_v0 = vadd.f32 %v889_v56, %v776_v55  ;;  %v777_v2 = vadd.f32 %v772_v59, %v7830_v21  ;;  %v892_v3 = vpop.f32.mrb[10].mxu1  ;;  %5997 = vmatpush3.bf16.msra.mxu1 %v6802_v52  ;;  %v5705_v4 = vpop.f32.mrb[11].mxu0  ;;  %5978 = vmatprep.subr.bf16.mxu0 %v7078_v1  ;;  %v6810_v21 = vld [vmem:[%s9059_s1 + $0x500] sm:$0xff]   ;;  %v2731_v52 = vshll.u32 %v5045_v38, 16 }
 0x14a   : >> { %v5725_v8 = vpop.f32.mrb[11].mxu1  ;;  %5998 = vmatprep.subr.bf16.mxu1 %v7078_v1  ;;  %v6828_v4 = vld [vmem:[%s9059_s1 + $0x580] sm:$0xff]  }
 0x14b   : >> { %v7914_v10 = vadd.f32 %v892_v3, %v777_v2  ;;  %v2733_v63 = vrot.slane %v2731_v52, 1  ;;  %v8012_v2 = vcombine.low %v5001_v34, %v5002_v61  ;;  %v6831_v8 = vld [vmem:[%s9059_s1 + $0x5c8] sm:$0xff]  }
 0x14c   : >> { %5979 = vmatpush3.bf16.msra.mxu0 %v6803_v60  ;;  %v6824_v60 = vld [vmem:[%s9059_s1 + $0x538] sm:$0xff]  }
 0x14d   : >> { %5999 = vmatpush3.bf16.msra.mxu1 %v6804_v5  ;;  %5980 = vmatprep.subr.bf16.mxu0 %v7078_v1  ;;  %v8014_v3 = vor.u32 %v2733_v63, %v2729_v62  ;;  %v6829_v5 = vld [vmem:[%s9059_s1 + $0x5c0] sm:$0xff]   ;;  %v6848_v63 = vld [vmem:[%s9059_s1 + $0x608] sm:$0xff]  }
 0x14e   : >> { %6000 = vmatprep.subr.bf16.mxu1 %v7078_v1 }
 0x150   : >> { %5981 = vmatpush3.bf16.msra.mxu0 %v6805_v11  ;;  %v6833_v11 = vld [vmem:[%s9059_s1 + $0x5d0] sm:$0xff]  }
 0x151   : >> { %6001 = vmatpush3.bf16.msra.mxu1 %v6806_v16  ;;  %6006 = vmatprep.subr.bf16.mxu0 %v7078_v1  ;;  %v5080_v16 = vld [vmem:[%s7161_s14 + $0x30] sm:$0xe] }
 0x152   : >> { %6026 = vmatprep.subr.bf16.mxu1 %v7078_v1 }
 0x153   : >> { %5983 = vmatmul.mubr.bf16.vlgmr.msra.gmra.mrb[36].mxu0 %v7925_v20 }
 0x154   : >> { %6003 = vmatmul.mubr.bf16.vlgmr.msra.gmra.mrb[36].mxu1 %v7931_v22  ;;  %6007 = vmatpush3.bf16.msra.mxu0 %v6810_v21  ;;  %v5099_v21 = vcombine.low %v5080_v16, %v8055_v18  ;;  %v5109_v16 = vld [vmem:[%s7161_s14 + $0x30] sm:$0xc] }
 0x155   : >> { %6027 = vmatpush3.bf16.msra.mxu1 %v6811_v23  ;;  %6008 = vmatprep.subr.bf16.mxu0 %v7078_v1  ;;  %v6837_v23 = vld [vmem:[%s9059_s1 + $0x5e0] sm:$0xff]  }
 0x156   : >> { %6028 = vmatprep.subr.bf16.mxu1 %v7078_v1  ;;  %6022 = vmatprep.mubr.msk.bf16.mxu0 %vm7079_vm0, %v7078_v1 }
 0x157   : >> { %6042 = vmatprep.mubr.msk.bf16.mxu1 %vm7079_vm0, %v7078_v1 }
 0x158   : >> { %6009 = vmatpush3.bf16.msra.mxu0 %v6812_v24  ;;  %v6838_v24 = vld [vmem:[%s9059_s1 + $0x5a8] sm:$0xff]  }
 0x159   : >> { %6029 = vmatpush3.bf16.msra.mxu1 %v6813_v25  ;;  %6010 = vmatprep.subr.bf16.mxu0 %v7078_v1  ;;  %v2970_v25 = vshrl.u32 %v5099_v21, 16 }
 0x15a   : >> { %6030 = vmatprep.subr.bf16.mxu1 %v7078_v1 }
 0x15c   : >> { %6011 = vmatpush3.bf16.msra.mxu0 %v6814_v26  ;;  %v6839_v26 = vld [vmem:[%s9059_s1 + $0x5e8] sm:$0xff]  }
 0x15d   : >> { %6031 = vmatpush3.bf16.msra.mxu1 %v6815_v29  ;;  %6012 = vmatprep.subr.bf16.mxu0 %v7078_v1  ;;  %v8075_v29 = vld [vmem:[%s7161_s14 + $0x38] ss:$0 sps:$4 sm:$0x11]  }
 0x15e   : >> { %6032 = vmatprep.subr.bf16.mxu1 %v7078_v1 }
 0x160   : >> { %6013 = vmatpush3.bf16.msra.mxu0 %v6816_v30  ;;  %v2973_v30 = vshll.u32 %v5099_v21, 16 }
 0x161   : >> { %6033 = vmatpush3.bf16.msra.mxu1 %v6817_v31  ;;  %6014 = vmatprep.subr.bf16.mxu0 %v7078_v1 }
 0x162   : >> { %6034 = vmatprep.subr.bf16.mxu1 %v7078_v1  ;;  %v2975_v52 = vrot.slane %v2973_v30, 2  ;;  %v6853_v30 = vld [vmem:[%s9059_s1 + $0x630] sm:$0xff]  }
 0x164   : >> { %6015 = vmatpush3.bf16.msra.mxu0 %v6818_v32 }
 0x165   : >> { %6035 = vmatpush3.bf16.msra.mxu1 %v6819_v33  ;;  %6016 = vmatprep.subr.bf16.mxu0 %v7078_v1 }
 0x166   : >> { %v1009_v43 = vpop.f32.mrb[12].mxu0  ;;  %6036 = vmatprep.subr.bf16.mxu1 %v7078_v1 }
 0x167   : >> { %v1016_v44 = vadd.f32 %v1009_v43, %v7906_v0  ;;  %v1123_v45 = vpop.f32.mrb[12].mxu1  ;;  %v5744_v46 = vpop.f32.mrb[13].mxu0  ;;  %v6825_v0 = vld [vmem:[%s9059_s1 + $0x578] sm:$0xff]   ;;  %v5054_v43 = vld [vmem:[%s7161_s14 + $0x30] sm:$0xe] }
 0x168   : >> { %v5764_v47 = vpop.f32.mrb[13].mxu1  ;;  %v1012_v50 = vpop.f32.mrb[14].mxu0  ;;  %6017 = vmatpush3.bf16.msra.mxu0 %v6820_v36 }
 0x169   : >> { %v7993_v53 = vadd.f32 %v1123_v45, %v1016_v44  ;;  %v1017_v54 = vadd.f32 %v1012_v50, %v7914_v10  ;;  %v1126_v55 = vpop.f32.mrb[14].mxu1  ;;  %6037 = vmatpush3.bf16.msra.mxu1 %v6821_v40  ;;  %v5745_v56 = vpop.f32.mrb[15].mxu0  ;;  %6018 = vmatprep.subr.bf16.mxu0 %v7078_v1  ;;  %v6832_v10 = vld [vmem:[%s9059_s1 + $0x590] sm:$0xff]   ;;  %v2972_v44 = vrot.slane %v2970_v25, 1 }
 0x16a   : >> { %v5765_v58 = vpop.f32.mrb[15].mxu1  ;;  %6038 = vmatprep.subr.bf16.mxu1 %v7078_v1  ;;  %v6840_v40 = vld [vmem:[%s9059_s1 + $0x5b0] sm:$0xff]   ;;  %v5071_v56 = vcombine.low %v5054_v43, %v7977_v35  ;;  %v6847_v35 = vld [vmem:[%s9059_s1 + $0x600] sm:$0xff]  }
 0x16b   : >> { %v8001_v59 = vadd.f32 %v1126_v55, %v1017_v54  ;;  %v6843_v58 = vld [vmem:[%s9059_s1 + $0x5f8] sm:$0xff]  }
 0x16c   : >> { %6019 = vmatpush3.bf16.msra.mxu0 %v6822_v51  ;;  %v6841_v51 = vld [vmem:[%s9059_s1 + $0x5f0] sm:$0xff]   ;;  %v8101_v61 = vrot.slane %v5071_v56, 1  ;;  %v6877_v56 = vld [vmem:[%s9059_s1 + $0x98] sm:$0xff]  }
 0x16d   : >> { %6039 = vmatpush3.bf16.msra.mxu1 %v6823_v57  ;;  %6020 = vmatprep.subr.bf16.mxu0 %v7078_v1  ;;  %v6842_v57 = vld [vmem:[%s9059_s1 + $0x5b8] sm:$0xff]  }
 0x16e   : >> { %6040 = vmatprep.subr.bf16.mxu1 %v7078_v1 }
 0x170   : >> { %6021 = vmatpush3.bf16.msra.mxu0 %v6824_v60 }
 0x171   : >> { %6041 = vmatpush3.bf16.msra.mxu1 %v6825_v0  ;;  %6046 = vmatprep.subr.bf16.mxu0 %v7078_v1  ;;  %v6862_v0 = vld [vmem:[%s9059_s1 + $0x40] sm:$0xff]  }
 0x172   : >> { %6066 = vmatprep.subr.bf16.mxu1 %v7078_v1 }
 0x173   : >> { %6023 = vmatmul.mubr.bf16.vlgmr.msra.gmra.mrb[40].mxu0 %v8012_v2 }
 0x174   : >> { %6043 = vmatmul.mubr.bf16.vlgmr.msra.gmra.mrb[40].mxu1 %v8014_v3  ;;  %6047 = vmatpush3.bf16.msra.mxu0 %v6828_v4  ;;  %v6849_v4 = vld [vmem:[%s9059_s1 + $0x610] sm:$0xff]  }
 0x175   : >> { %6067 = vmatpush3.bf16.msra.mxu1 %v6829_v5  ;;  %6048 = vmatprep.subr.bf16.mxu0 %v7078_v1  ;;  %v6863_v5 = vld [vmem:[%s9059_s1 + $0x48] sm:$0xff]  }
 0x176   : >> { %6068 = vmatprep.subr.bf16.mxu1 %v7078_v1  ;;  %6062 = vmatprep.mubr.msk.bf16.mxu0 %vm7079_vm0, %v7078_v1 }
 0x177   : >> { %6082 = vmatprep.mubr.msk.bf16.mxu1 %vm7079_vm0, %v7078_v1 }
 0x178   : >> { %6049 = vmatpush3.bf16.msra.mxu0 %v6830_v6  ;;  %v6850_v6 = vld [vmem:[%s9059_s1 + $0x618] sm:$0xff]  }
 0x179   : >> { %6069 = vmatpush3.bf16.msra.mxu1 %v6831_v8  ;;  %6050 = vmatprep.subr.bf16.mxu0 %v7078_v1  ;;  %v6864_v8 = vld [vmem:[%s9059_s1 + $0x50] sm:$0xff]  }
 0x17a   : >> { %6070 = vmatprep.subr.bf16.mxu1 %v7078_v1 }
 0x17c   : >> { %6051 = vmatpush3.bf16.msra.mxu0 %v6832_v10  ;;  %v6851_v10 = vld [vmem:[%s9059_s1 + $0x620] sm:$0xff]  }
 0x17d   : >> { %6071 = vmatpush3.bf16.msra.mxu1 %v6833_v11  ;;  %6052 = vmatprep.subr.bf16.mxu0 %v7078_v1  ;;  %v6865_v11 = vld [vmem:[%s9059_s1 + $0x58] sm:$0xff]  }
 0x17e   : >> { %6072 = vmatprep.subr.bf16.mxu1 %v7078_v1 }
 0x180   : >> { %6053 = vmatpush3.bf16.msra.mxu0 %v6834_v13  ;;  %v6852_v13 = vld [vmem:[%s9059_s1 + $0x628] sm:$0xff]  }
 0x181   : >> { %6073 = vmatpush3.bf16.msra.mxu1 %v6835_v15  ;;  %6054 = vmatprep.subr.bf16.mxu0 %v7078_v1  ;;  %v6866_v15 = vld [vmem:[%s9059_s1 + $0x60] sm:$0xff]  }
 0x182   : >> { %6074 = vmatprep.subr.bf16.mxu1 %v7078_v1 }
 0x184   : >> { %6055 = vmatpush3.bf16.msra.mxu0 %v6836_v19 }
 0x185   : >> { %6075 = vmatpush3.bf16.msra.mxu1 %v6837_v23  ;;  %6056 = vmatprep.subr.bf16.mxu0 %v7078_v1 }
 0x186   : >> { %v1256_v31 = vpop.f32.mrb[16].mxu0  ;;  %6076 = vmatprep.subr.bf16.mxu1 %v7078_v1 }
 0x187   : >> { %v1263_v32 = vadd.f32 %v1256_v31, %v7993_v53  ;;  %v1372_v33 = vpop.f32.mrb[16].mxu1  ;;  %v5784_v34 = vpop.f32.mrb[17].mxu0  ;;  %v2978_v53 = vshll.u32 %v8075_v29, 16  ;;  %v5126_v31 = vcombine.low %v5109_v16, %v8055_v18  ;;  %v6854_v18 = vld [vmem:[%s9059_s1 + $0x638] sm:$0xff]  }
 0x188   : >> { %v5804_v36 = vpop.f32.mrb[17].mxu1  ;;  %v1259_v38 = vpop.f32.mrb[18].mxu0  ;;  %6057 = vmatpush3.bf16.msra.mxu0 %v6838_v24 }
 0x189   : >> { %v8083_v45 = vadd.f32 %v1372_v33, %v1263_v32  ;;  %v1264_v46 = vadd.f32 %v1259_v38, %v8001_v59  ;;  %v1375_v47 = vpop.f32.mrb[18].mxu1  ;;  %6077 = vmatpush3.bf16.msra.mxu1 %v6839_v26  ;;  %v5785_v50 = vpop.f32.mrb[19].mxu0  ;;  %6058 = vmatprep.subr.bf16.mxu0 %v7078_v1  ;;  %v2976_v59 = vor.u32 %v2975_v52, %v2972_v44  ;;  %v2980_v60 = vrot.slane %v2978_v53, 2  ;;  %v6867_v36 = vld [vmem:[%s9059_s1 + $0x68] sm:$0xff]   ;;  %v6874_v53 = vld [vmem:[%s9059_s1 + $0x10] sm:$0xff]  }
 0x18a   : >> { %v5805_v54 = vpop.f32.mrb[19].mxu1  ;;  %6078 = vmatprep.subr.bf16.mxu1 %v7078_v1  ;;  %v3095_v44 = vrot.slane %v5126_v31, 2  ;;  %v6869_v50 = vld [vmem:[%s9059_s1 + $0x78] sm:$0xff]   ;;  %v6873_v52 = vld [vmem:[%s9059_s1 + $0x88] sm:$0xff]   ;;  %v6891_v31 = vld [vmem:[%s9059_s1 + $0x110] sm:$0xff]  }
 0x18b   : >> { %v1380_v55 = vadd.f32 %v1375_v47, %v1264_v46  ;;  %v8107_v62 = vsel %vm555_vm1, %v2976_v59, %v2980_v60  ;;  %v6868_v46 = vld [vmem:[%s9059_s1 + $0x70] sm:$0xff]  }
 0x18c   : >> { %6059 = vmatpush3.bf16.msra.mxu0 %v6840_v40  ;;  %v6875_v54 = vld [vmem:[%s9059_s1 + $0x90] sm:$0xff]  }
 0x18d   : >> { %6079 = vmatpush3.bf16.msra.mxu1 %v6841_v51  ;;  %6060 = vmatprep.subr.bf16.mxu0 %v7078_v1  ;;  %v6871_v51 = vld [vmem:[%s9059_s1 + $0x80] sm:$0xff]  }
 0x18e   : >> { %6080 = vmatprep.subr.bf16.mxu1 %v7078_v1 }
 0x190   : >> { %6061 = vmatpush3.bf16.msra.mxu0 %v6842_v57  ;;  %v6878_v57 = vld [vmem:[%s9059_s1 + $0x20] sm:$0xff]  }
 0x191   : >> { %6081 = vmatpush3.bf16.msra.mxu1 %v6843_v58  ;;  %6086 = vmatprep.subr.bf16.mxu0 %v7078_v1  ;;  %v6879_v58 = vld [vmem:[%s9059_s1 + $0xa0] sm:$0xff]  }
 0x192   : >> { %6106 = vmatprep.subr.bf16.mxu1 %v7078_v1 }
 0x193   : >> { %6063 = vmatmul.mubr.bf16.vlgmr.msra.gmra.mrb[44].mxu0 %v8101_v61 }
 0x194   : >> { %6083 = vmatmul.mubr.bf16.vlgmr.msra.gmra.mrb[44].mxu1 %v8107_v62  ;;  %6087 = vmatpush3.bf16.msra.mxu0 %v6847_v35 }
 0x195   : >> { %6107 = vmatpush3.bf16.msra.mxu1 %v6862_v0  ;;  %6088 = vmatprep.subr.bf16.mxu0 %v7078_v1 }
 0x196   : >> { %6108 = vmatprep.subr.bf16.mxu1 %v7078_v1  ;;  %6102 = vmatprep.mubr.msk.bf16.mxu0 %vm7079_vm0, %v7078_v1 }
 0x197   : >> { %6122 = vmatprep.mubr.msk.bf16.mxu1 %vm7079_vm0, %v7078_v1 }
 0x198   : >> { %6089 = vmatpush3.bf16.msra.mxu0 %v6848_v63 }
 0x199   : >> { %6109 = vmatpush3.bf16.msra.mxu1 %v6863_v5  ;;  %6090 = vmatprep.subr.bf16.mxu0 %v7078_v1  ;;  %v6880_v5 = vld [vmem:[%s9059_s1 + $0x28] sm:$0xff]  }
 0x19a   : >> { %6110 = vmatprep.subr.bf16.mxu1 %v7078_v1 }
 0x19c   : >> { %6091 = vmatpush3.bf16.msra.mxu0 %v6849_v4 }
 0x19d   : >> { %6111 = vmatpush3.bf16.msra.mxu1 %v6864_v8  ;;  %6092 = vmatprep.subr.bf16.mxu0 %v7078_v1 }
 0x19e   : >> { %6112 = vmatprep.subr.bf16.mxu1 %v7078_v1 }
 0x1a0   : >> { %6093 = vmatpush3.bf16.msra.mxu0 %v6850_v6 }
 0x1a1   : >> { %6113 = vmatpush3.bf16.msra.mxu1 %v6865_v11  ;;  %6094 = vmatprep.subr.bf16.mxu0 %v7078_v1  ;;  %v6881_v11 = vld [vmem:[%s9059_s1 + $0xa8] sm:$0xff]  }
 0x1a2   : >> { %6114 = vmatprep.subr.bf16.mxu1 %v7078_v1 }
 0x1a4   : >> { %6095 = vmatpush3.bf16.msra.mxu0 %v6851_v10 }
 0x1a5   : >> { %6115 = vmatpush3.bf16.msra.mxu1 %v6866_v15  ;;  %6096 = vmatprep.subr.bf16.mxu0 %v7078_v1 }
 0x1a6   : >> { %v1492_v19 = vpop.f32.mrb[20].mxu0  ;;  %6116 = vmatprep.subr.bf16.mxu1 %v7078_v1 }
 0x1a7   : >> { %v1499_v21 = vadd.f32 %v1492_v19, %v8083_v45  ;;  %v1612_v23 = vpop.f32.mrb[20].mxu1  ;;  %v5824_v24 = vpop.f32.mrb[21].mxu0  ;;  %v3096_v45 = vrot.slane %v8075_v29, 2  ;;  %v6870_v29 = vld [vmem:[%s9059_s1] sm:$0xff]   ;;  %v6882_v19 = vld [vmem:[%s9059_s1 + $0x30] sm:$0xff]  }
 0x1a8   : >> { %v5844_v25 = vpop.f32.mrb[21].mxu1  ;;  %v1495_v26 = vpop.f32.mrb[22].mxu0  ;;  %6097 = vmatpush3.bf16.msra.mxu0 %v6852_v13  ;;  %v6885_v24 = vld [vmem:[%s9059_s1 + $0xb8] sm:$0xff]  }
 0x1a9   : >> { %v1619_v32 = vadd.f32 %v1612_v23, %v1499_v21  ;;  %v1500_v33 = vadd.f32 %v1495_v26, %v1380_v55  ;;  %v1615_v34 = vpop.f32.mrb[22].mxu1  ;;  %6117 = vmatpush3.bf16.msra.mxu1 %v6867_v36  ;;  %v5825_v38 = vpop.f32.mrb[23].mxu0  ;;  %6098 = vmatprep.subr.bf16.mxu0 %v7078_v1  ;;  %v8178_v47 = vsel %vm682_vm2, %v3095_v44, %v3096_v45  ;;  %v6876_v55 = vld [vmem:[%s9059_s1 + $0x18] sm:$0xff]   ;;  %v6883_v21 = vld [vmem:[%s9059_s1 + $0xb0] sm:$0xff]   ;;  %v6886_v25 = vld [vmem:[%s9059_s1 + $0xc0] sm:$0xff]  }
 0x1aa   : >> { %v5845_v40 = vpop.f32.mrb[23].mxu1  ;;  %6118 = vmatprep.subr.bf16.mxu1 %v7078_v1  ;;  %v6884_v23 = vld [vmem:[%s9059_s1 + $0x38] sm:$0xff]   ;;  %v6887_v26 = vld [vmem:[%s9059_s1 + $0x100] sm:$0xff]  }
 0x1ab   : >> { %v1620_v43 = vadd.f32 %v1615_v34, %v1500_v33  ;;  %v6893_v33 = vld [vmem:[%s9059_s1 + $0x118] sm:$0xff]   ;;  %v6894_v34 = vld [vmem:[%s9059_s1 + $0xe0] sm:$0xff]  }
 0x1ac   : >> { %6099 = vmatpush3.bf16.msra.mxu0 %v6853_v30  ;;  %v6890_v30 = vld [vmem:[%s9059_s1 + $0xd0] sm:$0xff]   ;;  %v6895_v36 = vld [vmem:[%s9059_s1 + $0x120] sm:$0xff]  }
 0x1ad   : >> { %6119 = vmatpush3.bf16.msra.mxu1 %v6868_v46  ;;  %6100 = vmatprep.subr.bf16.mxu0 %v7078_v1  ;;  %v6896_v46 = vld [vmem:[%s9059_s1 + $0xe8] sm:$0xff]  }
 0x1ae   : >> { %6120 = vmatprep.subr.bf16.mxu1 %v7078_v1 }
 0x1b0   : >> { %6101 = vmatpush3.bf16.msra.mxu0 %v6854_v18 }
 0x1b1   : >> { %6121 = vmatpush3.bf16.msra.mxu1 %v6869_v50  ;;  %6126 = vmatprep.subr.bf16.mxu0 %v7078_v1 }
 0x1b2   : >> { %6146 = vmatprep.subr.bf16.mxu1 %v7078_v1 }
 0x1b3   : >> { %6103 = vmatmul.mubr.bf16.vlgmr.msra.gmra.mrb[48].mxu0 %v8178_v47 }
 0x1b4   : >> { %6123 = vmatmul.mubr.bf16.vlgmr.msra.gmra.mrb[48].mxu1 %v7428_v41  ;;  %6127 = vmatpush3.bf16.msra.mxu0 %v6870_v29  ;;  %v6872_v41 = vld [vmem:[%s9059_s1 + $0x8] sm:$0xff]  }
 0x1b5   : >> { %6147 = vmatpush3.bf16.msra.mxu1 %v6871_v51  ;;  %6128 = vmatprep.subr.bf16.mxu0 %v7078_v1 }
 0x1b6   : >> { %6148 = vmatprep.subr.bf16.mxu1 %v7078_v1  ;;  %6142 = vmatprep.mubr.msk.bf16.mxu0 %vm7079_vm0, %v7078_v1 }
 0x1b7   : >> { %6162 = vmatprep.mubr.msk.bf16.mxu1 %vm7079_vm0, %v7078_v1 }
 0x1b8   : >> { %6129 = vmatpush3.bf16.msra.mxu0 %v6872_v41  ;;  %v6897_v41 = vld [vmem:[%s9059_s1 + $0x128] sm:$0xff]  }
 0x1b9   : >> { %6149 = vmatpush3.bf16.msra.mxu1 %v6873_v52  ;;  %6130 = vmatprep.subr.bf16.mxu0 %v7078_v1 }
 0x1ba   : >> { %6150 = vmatprep.subr.bf16.mxu1 %v7078_v1 }
 0x1bc   : >> { %6131 = vmatpush3.bf16.msra.mxu0 %v6874_v53 }
 0x1bd   : >> { %6151 = vmatpush3.bf16.msra.mxu1 %v6875_v54  ;;  %6132 = vmatprep.subr.bf16.mxu0 %v7078_v1 }
 0x1be   : >> { %6152 = vmatprep.subr.bf16.mxu1 %v7078_v1 }
 0x1c0   : >> { %6133 = vmatpush3.bf16.msra.mxu0 %v6876_v55  ;;  %v6898_v55 = vld [vmem:[%s9059_s1 + $0xf0] sm:$0xff]  }
 0x1c1   : >> { %6153 = vmatpush3.bf16.msra.mxu1 %v6877_v56  ;;  %6134 = vmatprep.subr.bf16.mxu0 %v7078_v1  ;;  %v6899_v56 = vld [vmem:[%s9059_s1 + $0x130] sm:$0xff]  }
 0x1c2   : >> { %6154 = vmatprep.subr.bf16.mxu1 %v7078_v1 }
 0x1c4   : >> { %6135 = vmatpush3.bf16.msra.mxu0 %v6878_v57  ;;  %v6900_v57 = vld [vmem:[%s9059_s1 + $0xf8] sm:$0xff]  }
 0x1c5   : >> { %6155 = vmatpush3.bf16.msra.mxu1 %v6879_v58  ;;  %6136 = vmatprep.subr.bf16.mxu0 %v7078_v1  ;;  %v6901_v58 = vld [vmem:[%s9059_s1 + $0x138] sm:$0xff]  }
 0x1c6   : >> { %v1726_v59 = vpop.f32.mrb[24].mxu0  ;;  %6156 = vmatprep.subr.bf16.mxu1 %v7078_v1 }
 0x1c7   : >> { %v1733_v60 = vadd.f32 %v1726_v59, %v1619_v32  ;;  %v1859_v35 = vpop.f32.mrb[24].mxu1  ;;  %v5864_v63 = vpop.f32.mrb[25].mxu0  ;;  %v6892_v32 = vld [vmem:[%s9059_s1 + $0xd8] sm:$0xff]   ;;  %v6902_v59 = vld [vmem:[%s9059_s1 + $0x140] sm:$0xff]  }
 0x1c8   : >> { %v5884_v0 = vpop.f32.mrb[25].mxu1  ;;  %v1729_v4 = vpop.f32.mrb[26].mxu0  ;;  %6137 = vmatpush3.bf16.msra.mxu0 %v6880_v5  ;;  %v6907_v63 = vld [vmem:[%s9059_s1 + $0x190] sm:$0xff]   ;;  %v6910_v5 = vld [vmem:[%s9059_s1 + $0x160] sm:$0xff]  }
 0x1c9   : >> { %v1866_v6 = vadd.f32 %v1859_v35, %v1733_v60  ;;  %v1734_v8 = vadd.f32 %v1729_v4, %v1620_v43  ;;  %v1862_v10 = vpop.f32.mrb[26].mxu1  ;;  %6157 = vmatpush3.bf16.msra.mxu1 %v6881_v11  ;;  %v5865_v13 = vpop.f32.mrb[27].mxu0  ;;  %6138 = vmatprep.subr.bf16.mxu0 %v7078_v1  ;;  %v6903_v60 = vld [vmem:[%s9059_s1 + $0x180] sm:$0xff]   ;;  %v6906_v35 = vld [vmem:[%s9059_s1 + $0x150] sm:$0xff]   ;;  %v6908_v0 = vld [vmem:[%s9059_s1 + $0x158] sm:$0xff]  }
 0x1ca   : >> { %v5885_v15 = vpop.f32.mrb[27].mxu1  ;;  %6158 = vmatprep.subr.bf16.mxu1 %v7078_v1  ;;  %v6909_v4 = vld [vmem:[%s9059_s1 + $0x198] sm:$0xff]  }
 0x1cb   : >> { %v1867_v16 = vadd.f32 %v1862_v10, %v1734_v8 }
 0x1cc   : >> { %6139 = vmatpush3.bf16.msra.mxu0 %v6882_v19  ;;  %v6912_v19 = vld [vmem:[%s9059_s1 + $0x168] sm:$0xff]  }
 0x1cd   : >> { %6159 = vmatpush3.bf16.msra.mxu1 %v6883_v21  ;;  %6140 = vmatprep.subr.bf16.mxu0 %v7078_v1 }
 0x1ce   : >> { %6160 = vmatprep.subr.bf16.mxu1 %v7078_v1 }
 0x1d0   : >> { %6141 = vmatpush3.bf16.msra.mxu0 %v6884_v23 }
 0x1d1   : >> { %6161 = vmatpush3.bf16.msra.mxu1 %v6885_v24  ;;  %6166 = vmatprep.subr.bf16.mxu0 %v7078_v1 }
 0x1d2   : >> { %6186 = vmatprep.subr.bf16.mxu1 %v7078_v1 }
 0x1d3   : >> { %6143 = vmatmul.mubr.bf16.vlgmr.msra.gmra.mrb[52].mxu0 %v7355_v17  ;;  %v6888_v17 = vld [vmem:[%s9059_s1 + $0xc8] sm:$0xff]  }
 0x1d4   : >> { %6163 = vmatmul.mubr.bf16.vlgmr.msra.gmra.mrb[52].mxu1 %v7430_v42  ;;  %6167 = vmatpush3.bf16.msra.mxu0 %v6886_v25  ;;  %v6889_v42 = vld [vmem:[%s9059_s1 + $0x108] sm:$0xff]  }
 0x1d5   : >> { %6187 = vmatpush3.bf16.msra.mxu1 %v6887_v26  ;;  %6168 = vmatprep.subr.bf16.mxu0 %v7078_v1  ;;  %v6913_v25 = vld [vmem:[%s9059_s1 + $0x1a8] sm:$0xff]  }
 0x1d6   : >> { %6188 = vmatprep.subr.bf16.mxu1 %v7078_v1  ;;  %6182 = vmatprep.mubr.msk.bf16.mxu0 %vm7079_vm0, %v7078_v1 }
 0x1d7   : >> { %6202 = vmatprep.mubr.msk.bf16.mxu1 %vm7079_vm0, %v7078_v1 }
 0x1d8   : >> { %6169 = vmatpush3.bf16.msra.mxu0 %v6888_v17 }
 0x1d9   : >> { %6189 = vmatpush3.bf16.msra.mxu1 %v6889_v42  ;;  %6170 = vmatprep.subr.bf16.mxu0 %v7078_v1 }
 0x1da   : >> { %6190 = vmatprep.subr.bf16.mxu1 %v7078_v1 }
 0x1dc   : >> { %6171 = vmatpush3.bf16.msra.mxu0 %v6890_v30  ;;  %v6914_v30 = vld [vmem:[%s9059_s1 + $0x170] sm:$0xff]  }
 0x1dd   : >> { %6191 = vmatpush3.bf16.msra.mxu1 %v6891_v31  ;;  %6172 = vmatprep.subr.bf16.mxu0 %v7078_v1  ;;  %v6915_v31 = vld [vmem:[%s9059_s1 + $0x1b0] sm:$0xff]  }
 0x1de   : >> { %6192 = vmatprep.subr.bf16.mxu1 %v7078_v1 }
 0x1e0   : >> { %6173 = vmatpush3.bf16.msra.mxu0 %v6892_v32  ;;  %v6916_v32 = vld [vmem:[%s9059_s1 + $0x178] sm:$0xff]  }
 0x1e1   : >> { %6193 = vmatpush3.bf16.msra.mxu1 %v6893_v33  ;;  %6174 = vmatprep.subr.bf16.mxu0 %v7078_v1  ;;  %v6917_v33 = vld [vmem:[%s9059_s1 + $0x1b8] sm:$0xff]  }
 0x1e2   : >> { %6194 = vmatprep.subr.bf16.mxu1 %v7078_v1 }
 0x1e4   : >> { %6175 = vmatpush3.bf16.msra.mxu0 %v6894_v34  ;;  %v6918_v34 = vld [vmem:[%s9059_s1 + $0x1c0] sm:$0xff]  }
 0x1e5   : >> { %6195 = vmatpush3.bf16.msra.mxu1 %v6895_v36  ;;  %6176 = vmatprep.subr.bf16.mxu0 %v7078_v1  ;;  %v6919_v36 = vld [vmem:[%s9059_s1 + $0x200] sm:$0xff]  }
 0x1e6   : >> { %v1975_v38 = vpop.f32.mrb[28].mxu0  ;;  %6196 = vmatprep.subr.bf16.mxu1 %v7078_v1 }
 0x1e7   : >> { %v1982_v40 = vadd.f32 %v1975_v38, %v1866_v6  ;;  %v2095_v43 = vpop.f32.mrb[28].mxu1  ;;  %v5904_v18 = vpop.f32.mrb[29].mxu0  ;;  %v6911_v6 = vld [vmem:[%s9059_s1 + $0x1a0] sm:$0xff]   ;;  %v6922_v38 = vld [vmem:[%s9059_s1 + $0x1d0] sm:$0xff]  }
 0x1e8   : >> { %v5924_v44 = vpop.f32.mrb[29].mxu1  ;;  %v1978_v45 = vpop.f32.mrb[30].mxu0  ;;  %6177 = vmatpush3.bf16.msra.mxu0 %v6896_v46  ;;  %v6925_v18 = vld [vmem:[%s9059_s1 + $0x218] sm:$0xff]  }
 0x1e9   : >> { %v2102_v50 = vadd.f32 %v2095_v43, %v1982_v40  ;;  %v1983_v29 = vadd.f32 %v1978_v45, %v1867_v16  ;;  %v2098_v51 = vpop.f32.mrb[30].mxu1  ;;  %6197 = vmatpush3.bf16.msra.mxu1 %v6897_v41  ;;  %v5905_v52 = vpop.f32.mrb[31].mxu0  ;;  %6178 = vmatprep.subr.bf16.mxu0 %v7078_v1  ;;  %v6923_v40 = vld [vmem:[%s9059_s1 + $0x210] sm:$0xff]   ;;  %v6924_v43 = vld [vmem:[%s9059_s1 + $0x1d8] sm:$0xff]   ;;  %v6926_v44 = vld [vmem:[%s9059_s1 + $0x1e0] sm:$0xff]  }
 0x1ea   : >> { %v5925_v53 = vpop.f32.mrb[31].mxu1  ;;  %6198 = vmatprep.subr.bf16.mxu1 %v7078_v1  ;;  %v6927_v45 = vld [vmem:[%s9059_s1 + $0x220] sm:$0xff]  }
 0x1eb   : >> { %v2103_v54 = vadd.f32 %v2098_v51, %v1983_v29  ;;  %v6928_v53 = vld [vmem:[%s9059_s1 + $0x1e8] sm:$0xff]  }
 0x1ec   : >> { %6179 = vmatpush3.bf16.msra.mxu0 %v6898_v55 }
 0x1ed   : >> { %6199 = vmatpush3.bf16.msra.mxu1 %v6899_v56  ;;  %6180 = vmatprep.subr.bf16.mxu0 %v7078_v1 }
 0x1ee   : >> { %6200 = vmatprep.subr.bf16.mxu1 %v7078_v1 }
 0x1f0   : >> { %6181 = vmatpush3.bf16.msra.mxu0 %v6900_v57  ;;  %v6929_v57 = vld [vmem:[%s9059_s1 + $0x228] sm:$0xff]  }
 0x1f1   : >> { %6201 = vmatpush3.bf16.msra.mxu1 %v6901_v58  ;;  %6206 = vmatprep.subr.bf16.mxu0 %v7078_v1 }
 0x1f2   : >> { %6226 = vmatprep.subr.bf16.mxu1 %v7078_v1 }
 0x1f3   : >> { %6183 = vmatmul.mubr.bf16.vlgmr.msra.gmra.mrb[56].mxu0 %v7510_v12  ;;  %v6904_v12 = vld [vmem:[%s9059_s1 + $0x148] sm:$0xff]  }
 0x1f4   : >> { %6203 = vmatmul.mubr.bf16.vlgmr.msra.gmra.mrb[56].mxu1 %v7516_v14  ;;  %6207 = vmatpush3.bf16.msra.mxu0 %v6902_v59  ;;  %v6905_v14 = vld [vmem:[%s9059_s1 + $0x188] sm:$0xff]  }
 0x1f5   : >> { %6227 = vmatpush3.bf16.msra.mxu1 %v6903_v60  ;;  %6208 = vmatprep.subr.bf16.mxu0 %v7078_v1 }
 0x1f6   : >> { %6228 = vmatprep.subr.bf16.mxu1 %v7078_v1  ;;  %6222 = vmatprep.mubr.msk.bf16.mxu0 %vm7079_vm0, %v7078_v1 }
 0x1f7   : >> { %6242 = vmatprep.mubr.msk.bf16.mxu1 %vm7079_vm0, %v7078_v1 }
 0x1f8   : >> { %6209 = vmatpush3.bf16.msra.mxu0 %v6904_v12  ;;  %v6930_v12 = vld [vmem:[%s9059_s1 + $0x1f0] sm:$0xff]  }
 0x1f9   : >> { %6229 = vmatpush3.bf16.msra.mxu1 %v6905_v14  ;;  %6210 = vmatprep.subr.bf16.mxu0 %v7078_v1  ;;  %v6931_v14 = vld [vmem:[%s9059_s1 + $0x230] sm:$0xff]  }
 0x1fa   : >> { %6230 = vmatprep.subr.bf16.mxu1 %v7078_v1 }
 0x1fc   : >> { %6211 = vmatpush3.bf16.msra.mxu0 %v6906_v35  ;;  %v6932_v35 = vld [vmem:[%s9059_s1 + $0x1f8] sm:$0xff]  }
 0x1fd   : >> { %6231 = vmatpush3.bf16.msra.mxu1 %v6907_v63  ;;  %6212 = vmatprep.subr.bf16.mxu0 %v7078_v1  ;;  %v6933_v63 = vld [vmem:[%s9059_s1 + $0x238] sm:$0xff]  }
 0x1fe   : >> { %6232 = vmatprep.subr.bf16.mxu1 %v7078_v1 }
 0x200   : >> { %6213 = vmatpush3.bf16.msra.mxu0 %v6908_v0  ;;  %v6934_v0 = vld [vmem:[%s9059_s1 + $0x240] sm:$0xff]  }
 0x201   : >> { %6233 = vmatpush3.bf16.msra.mxu1 %v6909_v4  ;;  %6214 = vmatprep.subr.bf16.mxu0 %v7078_v1  ;;  %v6935_v4 = vld [vmem:[%s9059_s1 + $0x280] sm:$0xff]  }
 0x202   : >> { %6234 = vmatprep.subr.bf16.mxu1 %v7078_v1 }
 0x204   : >> { %6215 = vmatpush3.bf16.msra.mxu0 %v6910_v5  ;;  %v6938_v5 = vld [vmem:[%s9059_s1 + $0x250] sm:$0xff]  }
 0x205   : >> { %6235 = vmatpush3.bf16.msra.mxu1 %v6911_v6  ;;  %6216 = vmatprep.subr.bf16.mxu0 %v7078_v1  ;;  %v6939_v6 = vld [vmem:[%s9059_s1 + $0x290] sm:$0xff]  }
 0x206   : >> { %v2215_v8 = vpop.f32.mrb[32].mxu0  ;;  %6236 = vmatprep.subr.bf16.mxu1 %v7078_v1 }
 0x207   : >> { %v2222_v10 = vadd.f32 %v2215_v8, %v2102_v50  ;;  %v2329_v11 = vpop.f32.mrb[32].mxu1  ;;  %v5944_v13 = vpop.f32.mrb[33].mxu0  ;;  %v6940_v8 = vld [vmem:[%s9059_s1 + $0x258] sm:$0xff]  }
 0x208   : >> { %v5964_v15 = vpop.f32.mrb[33].mxu1  ;;  %v2218_v16 = vpop.f32.mrb[34].mxu0  ;;  %6217 = vmatpush3.bf16.msra.mxu0 %v6912_v19  ;;  %v6943_v13 = vld [vmem:[%s9059_s1 + $0x2a0] sm:$0xff]  }
 0x209   : >> { %v2336_v21 = vadd.f32 %v2329_v11, %v2222_v10  ;;  %v2223_v23 = vadd.f32 %v2218_v16, %v2103_v54  ;;  %v2332_v24 = vpop.f32.mrb[34].mxu1  ;;  %6237 = vmatpush3.bf16.msra.mxu1 %v6913_v25  ;;  %v5945_v26 = vpop.f32.mrb[35].mxu0  ;;  %6218 = vmatprep.subr.bf16.mxu0 %v7078_v1  ;;  %v6941_v10 = vld [vmem:[%s9059_s1 + $0x298] sm:$0xff]   ;;  %v6942_v11 = vld [vmem:[%s9059_s1 + $0x260] sm:$0xff]   ;;  %v6944_v25 = vld [vmem:[%s9059_s1 + $0x268] sm:$0xff]  }
 0x20a   : >> { %v5965_v17 = vpop.f32.mrb[35].mxu1  ;;  %6238 = vmatprep.subr.bf16.mxu1 %v7078_v1 }
 0x20b   : >> { %v2337_v42 = vadd.f32 %v2332_v24, %v2223_v23 }
 0x20c   : >> { %6219 = vmatpush3.bf16.msra.mxu0 %v6914_v30  ;;  %v6945_v30 = vld [vmem:[%s9059_s1 + $0x2a8] sm:$0xff]  }
 0x20d   : >> { %6239 = vmatpush3.bf16.msra.mxu1 %v6915_v31  ;;  %6220 = vmatprep.subr.bf16.mxu0 %v7078_v1 }
 0x20e   : >> { %6240 = vmatprep.subr.bf16.mxu1 %v7078_v1 }
 0x210   : >> { %6221 = vmatpush3.bf16.msra.mxu0 %v6916_v32 }
 0x211   : >> { %6241 = vmatpush3.bf16.msra.mxu1 %v6917_v33  ;;  %6246 = vmatprep.subr.bf16.mxu0 %v7078_v1 }
 0x212   : >> { %6266 = vmatprep.subr.bf16.mxu1 %v7078_v1 }
 0x213   : >> { %6223 = vmatmul.mubr.bf16.vlgmr.msra.gmra.mrb[60].mxu0 %v7588_v37  ;;  %v6920_v37 = vld [vmem:[%s9059_s1 + $0x1c8] sm:$0xff]  }
 0x214   : >> { %6243 = vmatmul.mubr.bf16.vlgmr.msra.gmra.mrb[60].mxu1 %v7593_v39  ;;  %6247 = vmatpush3.bf16.msra.mxu0 %v6918_v34  ;;  %v6921_v39 = vld [vmem:[%s9059_s1 + $0x208] sm:$0xff]   ;;  %v6946_v34 = vld [vmem:[%s9059_s1 + $0x270] sm:$0xff]  }
 0x215   : >> { %6267 = vmatpush3.bf16.msra.mxu1 %v6919_v36  ;;  %6248 = vmatprep.subr.bf16.mxu0 %v7078_v1  ;;  %v6947_v36 = vld [vmem:[%s9059_s1 + $0x2b0] sm:$0xff]  }
 0x216   : >> { %6268 = vmatprep.subr.bf16.mxu1 %v7078_v1  ;;  %6262 = vmatprep.mubr.msk.bf16.mxu0 %vm7079_vm0, %v7078_v1 }
 0x217   : >> { %6282 = vmatprep.mubr.msk.bf16.mxu1 %vm7079_vm0, %v7078_v1 }
 0x218   : >> { %6249 = vmatpush3.bf16.msra.mxu0 %v6920_v37  ;;  %v6948_v37 = vld [vmem:[%s9059_s1 + $0x278] sm:$0xff]  }
 0x219   : >> { %6269 = vmatpush3.bf16.msra.mxu1 %v6921_v39  ;;  %6250 = vmatprep.subr.bf16.mxu0 %v7078_v1  ;;  %v6949_v39 = vld [vmem:[%s9059_s1 + $0x2b8] sm:$0xff]  }
 0x21a   : >> { %6270 = vmatprep.subr.bf16.mxu1 %v7078_v1 }
 0x21c   : >> { %6251 = vmatpush3.bf16.msra.mxu0 %v6922_v38  ;;  %v6950_v38 = vld [vmem:[%s9059_s1 + $0x2c0] sm:$0xff]  }
 0x21d   : >> { %6271 = vmatpush3.bf16.msra.mxu1 %v6923_v40  ;;  %6252 = vmatprep.subr.bf16.mxu0 %v7078_v1  ;;  %v6951_v40 = vld [vmem:[%s9059_s1 + $0x300] sm:$0xff]  }
 0x21e   : >> { %6272 = vmatprep.subr.bf16.mxu1 %v7078_v1 }
 0x220   : >> { %6253 = vmatpush3.bf16.msra.mxu0 %v6924_v43  ;;  %v6954_v43 = vld [vmem:[%s9059_s1 + $0x2d0] sm:$0xff]  }
 0x221   : >> { %6273 = vmatpush3.bf16.msra.mxu1 %v6925_v18  ;;  %6254 = vmatprep.subr.bf16.mxu0 %v7078_v1  ;;  %v6955_v18 = vld [vmem:[%s9059_s1 + $0x310] sm:$0xff]  }
 0x222   : >> { %6274 = vmatprep.subr.bf16.mxu1 %v7078_v1 }
 0x224   : >> { %6255 = vmatpush3.bf16.msra.mxu0 %v6926_v44  ;;  %v6956_v44 = vld [vmem:[%s9059_s1 + $0x2d8] sm:$0xff]  }
 0x225   : >> { %6275 = vmatpush3.bf16.msra.mxu1 %v6927_v45  ;;  %6256 = vmatprep.subr.bf16.mxu0 %v7078_v1  ;;  %v6957_v45 = vld [vmem:[%s9059_s1 + $0x318] sm:$0xff]  }
 0x226   : >> { %v2462_v46 = vpop.f32.mrb[36].mxu0  ;;  %6276 = vmatprep.subr.bf16.mxu1 %v7078_v1 }
 0x227   : >> { %v2469_v50 = vadd.f32 %v2462_v46, %v2336_v21  ;;  %v2578_v29 = vpop.f32.mrb[36].mxu1  ;;  %v5984_v51 = vpop.f32.mrb[37].mxu0  ;;  %v6958_v46 = vld [vmem:[%s9059_s1 + $0x2e0] sm:$0xff]  }
 0x228   : >> { %v6004_v41 = vpop.f32.mrb[37].mxu1  ;;  %v2465_v52 = vpop.f32.mrb[38].mxu0  ;;  %6257 = vmatpush3.bf16.msra.mxu0 %v6928_v53 }
 0x229   : >> { %v2585_v54 = vadd.f32 %v2578_v29, %v2469_v50  ;;  %v2470_v55 = vadd.f32 %v2465_v52, %v2337_v42  ;;  %v2581_v56 = vpop.f32.mrb[38].mxu1  ;;  %6277 = vmatpush3.bf16.msra.mxu1 %v6929_v57  ;;  %v5985_v58 = vpop.f32.mrb[39].mxu0  ;;  %6258 = vmatprep.subr.bf16.mxu0 %v7078_v1  ;;  %v6959_v50 = vld [vmem:[%s9059_s1 + $0x320] sm:$0xff]  }
 0x22a   : >> { %v6005_v59 = vpop.f32.mrb[39].mxu1  ;;  %6278 = vmatprep.subr.bf16.mxu1 %v7078_v1 }
 0x22b   : >> { %v2586_v60 = vadd.f32 %v2581_v56, %v2470_v55  ;;  %v6960_v55 = vld [vmem:[%s9059_s1 + $0x2e8] sm:$0xff]  }
 0x22c   : >> { %6259 = vmatpush3.bf16.msra.mxu0 %v6930_v12  ;;  %v6961_v59 = vld [vmem:[%s9059_s1 + $0x328] sm:$0xff]  }
 0x22d   : >> { %6279 = vmatpush3.bf16.msra.mxu1 %v6931_v14  ;;  %6260 = vmatprep.subr.bf16.mxu0 %v7078_v1 }
 0x22e   : >> { %6280 = vmatprep.subr.bf16.mxu1 %v7078_v1 }
 0x230   : >> { %6261 = vmatpush3.bf16.msra.mxu0 %v6932_v35  ;;  %v6962_v35 = vld [vmem:[%s9059_s1 + $0x2f0] sm:$0xff]  }
 0x231   : >> { %6281 = vmatpush3.bf16.msra.mxu1 %v6933_v63  ;;  %6286 = vmatprep.subr.bf16.mxu0 %v7078_v1  ;;  %v6963_v63 = vld [vmem:[%s9059_s1 + $0x330] sm:$0xff]  }
 0x232   : >> { %6306 = vmatprep.subr.bf16.mxu1 %v7078_v1 }
 0x233   : >> { %6263 = vmatmul.mubr.bf16.vlgmr.msra.gmra.mrb[64].mxu0 %v7673_v7  ;;  %v6936_v7 = vld [vmem:[%s9059_s1 + $0x248] sm:$0xff]  }
 0x234   : >> { %6283 = vmatmul.mubr.bf16.vlgmr.msra.gmra.mrb[64].mxu1 %v7679_v9  ;;  %6287 = vmatpush3.bf16.msra.mxu0 %v6934_v0  ;;  %v6937_v9 = vld [vmem:[%s9059_s1 + $0x288] sm:$0xff]   ;;  %v6964_v0 = vld [vmem:[%s9059_s1 + $0x2f8] sm:$0xff]  }
 0x235   : >> { %6307 = vmatpush3.bf16.msra.mxu1 %v6935_v4  ;;  %6288 = vmatprep.subr.bf16.mxu0 %v7078_v1  ;;  %v6965_v4 = vld [vmem:[%s9059_s1 + $0x338] sm:$0xff]  }
 0x236   : >> { %6308 = vmatprep.subr.bf16.mxu1 %v7078_v1  ;;  %6302 = vmatprep.mubr.msk.bf16.mxu0 %vm7079_vm0, %v7078_v1 }
 0x237   : >> { %6322 = vmatprep.mubr.msk.bf16.mxu1 %vm7079_vm0, %v7078_v1 }
 0x238   : >> { %6289 = vmatpush3.bf16.msra.mxu0 %v6936_v7  ;;  %v6966_v7 = vld [vmem:[%s9059_s1 + $0x340] sm:$0xff]  }
 0x239   : >> { %6309 = vmatpush3.bf16.msra.mxu1 %v6937_v9  ;;  %6290 = vmatprep.subr.bf16.mxu0 %v7078_v1  ;;  %v6967_v9 = vld [vmem:[%s9059_s1 + $0x380] sm:$0xff]  }
 0x23a   : >> { %6310 = vmatprep.subr.bf16.mxu1 %v7078_v1 }
 0x23c   : >> { %6291 = vmatpush3.bf16.msra.mxu0 %v6938_v5  ;;  %v6970_v5 = vld [vmem:[%s9059_s1 + $0x350] sm:$0xff]  }
 0x23d   : >> { %6311 = vmatpush3.bf16.msra.mxu1 %v6939_v6  ;;  %6292 = vmatprep.subr.bf16.mxu0 %v7078_v1  ;;  %v6971_v6 = vld [vmem:[%s9059_s1 + $0x390] sm:$0xff]  }
 0x23e   : >> { %6312 = vmatprep.subr.bf16.mxu1 %v7078_v1 }
 0x240   : >> { %6293 = vmatpush3.bf16.msra.mxu0 %v6940_v8  ;;  %v6972_v8 = vld [vmem:[%s9059_s1 + $0x358] sm:$0xff]  }
 0x241   : >> { %6313 = vmatpush3.bf16.msra.mxu1 %v6941_v10  ;;  %6294 = vmatprep.subr.bf16.mxu0 %v7078_v1  ;;  %v6973_v10 = vld [vmem:[%s9059_s1 + $0x398] sm:$0xff]  }
 0x242   : >> { %6314 = vmatprep.subr.bf16.mxu1 %v7078_v1 }
 0x244   : >> { %6295 = vmatpush3.bf16.msra.mxu0 %v6942_v11  ;;  %v6974_v11 = vld [vmem:[%s9059_s1 + $0x360] sm:$0xff]  }
 0x245   : >> { %6315 = vmatpush3.bf16.msra.mxu1 %v6943_v13  ;;  %6296 = vmatprep.subr.bf16.mxu0 %v7078_v1  ;;  %v6975_v13 = vld [vmem:[%s9059_s1 + $0x3a0] sm:$0xff]  }
 0x246   : >> { %v2698_v15 = vpop.f32.mrb[40].mxu0  ;;  %6316 = vmatprep.subr.bf16.mxu1 %v7078_v1 }
 0x247   : >> { %v2705_v16 = vadd.f32 %v2698_v15, %v2585_v54  ;;  %v2818_v19 = vpop.f32.mrb[40].mxu1  ;;  %v6024_v21 = vpop.f32.mrb[41].mxu0 }
 0x248   : >> { %v6044_v23 = vpop.f32.mrb[41].mxu1  ;;  %v2701_v24 = vpop.f32.mrb[42].mxu0  ;;  %6297 = vmatpush3.bf16.msra.mxu0 %v6944_v25  ;;  %v6976_v25 = vld [vmem:[%s9059_s1 + $0x368] sm:$0xff]  }
 0x249   : >> { %v2825_v26 = vadd.f32 %v2818_v19, %v2705_v16  ;;  %v2706_v17 = vadd.f32 %v2701_v24, %v2586_v60  ;;  %v2821_v42 = vpop.f32.mrb[42].mxu1  ;;  %6317 = vmatpush3.bf16.msra.mxu1 %v6945_v30  ;;  %v6025_v31 = vpop.f32.mrb[43].mxu0  ;;  %6298 = vmatprep.subr.bf16.mxu0 %v7078_v1 }
 0x24a   : >> { %v6045_v32 = vpop.f32.mrb[43].mxu1  ;;  %6318 = vmatprep.subr.bf16.mxu1 %v7078_v1 }
 0x24b   : >> { %v2826_v33 = vadd.f32 %v2821_v42, %v2706_v17  ;;  %v6977_v42 = vld [vmem:[%s9059_s1 + $0x3a8] sm:$0xff]   ;;  %v6978_v32 = vld [vmem:[%s9059_s1 + $0x370] sm:$0xff]  }
 0x24c   : >> { %6299 = vmatpush3.bf16.msra.mxu0 %v6946_v34  ;;  %v6980_v34 = vld [vmem:[%s9059_s1 + $0x378] sm:$0xff]  }
 0x24d   : >> { %6319 = vmatpush3.bf16.msra.mxu1 %v6947_v36  ;;  %6300 = vmatprep.subr.bf16.mxu0 %v7078_v1  ;;  %v6981_v36 = vld [vmem:[%s9059_s1 + $0x3b8] sm:$0xff]  }
 0x24e   : >> { %6320 = vmatprep.subr.bf16.mxu1 %v7078_v1 }
 0x250   : >> { %6301 = vmatpush3.bf16.msra.mxu0 %v6948_v37  ;;  %v6982_v37 = vld [vmem:[%s9059_s1 + $0x3c0] sm:$0xff]  }
 0x251   : >> { %6321 = vmatpush3.bf16.msra.mxu1 %v6949_v39  ;;  %6326 = vmatprep.subr.bf16.mxu0 %v7078_v1  ;;  %v6983_v39 = vld [vmem:[%s9059_s1 + $0x400] sm:$0xff]  }
 0x252   : >> { %6346 = vmatprep.subr.bf16.mxu1 %v7078_v1 }
 0x253   : >> { %6303 = vmatmul.mubr.bf16.vlgmr.msra.gmra.mrb[68].mxu0 %v7758_v48  ;;  %v6952_v48 = vld [vmem:[%s9059_s1 + $0x2c8] sm:$0xff]  }
 0x254   : >> { %6323 = vmatmul.mubr.bf16.vlgmr.msra.gmra.mrb[68].mxu1 %v7760_v49  ;;  %6327 = vmatpush3.bf16.msra.mxu0 %v6950_v38  ;;  %v6953_v49 = vld [vmem:[%s9059_s1 + $0x308] sm:$0xff]   ;;  %v6986_v38 = vld [vmem:[%s9059_s1 + $0x3d0] sm:$0xff]  }
 0x255   : >> { %6347 = vmatpush3.bf16.msra.mxu1 %v6951_v40  ;;  %6328 = vmatprep.subr.bf16.mxu0 %v7078_v1  ;;  %v6987_v40 = vld [vmem:[%s9059_s1 + $0x410] sm:$0xff]  }
 0x256   : >> { %6348 = vmatprep.subr.bf16.mxu1 %v7078_v1  ;;  %6342 = vmatprep.mubr.msk.bf16.mxu0 %vm7079_vm0, %v7078_v1 }
 0x257   : >> { %6362 = vmatprep.mubr.msk.bf16.mxu1 %vm7079_vm0, %v7078_v1 }
 0x258   : >> { %6329 = vmatpush3.bf16.msra.mxu0 %v6952_v48  ;;  %v6988_v48 = vld [vmem:[%s9059_s1 + $0x3d8] sm:$0xff]  }
 0x259   : >> { %6349 = vmatpush3.bf16.msra.mxu1 %v6953_v49  ;;  %6330 = vmatprep.subr.bf16.mxu0 %v7078_v1  ;;  %v6989_v49 = vld [vmem:[%s9059_s1 + $0x418] sm:$0xff]  }
 0x25a   : >> { %6350 = vmatprep.subr.bf16.mxu1 %v7078_v1 }
 0x25c   : >> { %6331 = vmatpush3.bf16.msra.mxu0 %v6954_v43  ;;  %v6990_v43 = vld [vmem:[%s9059_s1 + $0x3e0] sm:$0xff]  }
 0x25d   : >> { %6351 = vmatpush3.bf16.msra.mxu1 %v6955_v18  ;;  %6332 = vmatprep.subr.bf16.mxu0 %v7078_v1  ;;  %v6991_v18 = vld [vmem:[%s9059_s1 + $0x420] sm:$0xff]  }
 0x25e   : >> { %6352 = vmatprep.subr.bf16.mxu1 %v7078_v1 }
 0x260   : >> { %6333 = vmatpush3.bf16.msra.mxu0 %v6956_v44 }
 0x261   : >> { %6353 = vmatpush3.bf16.msra.mxu1 %v6957_v45  ;;  %6334 = vmatprep.subr.bf16.mxu0 %v7078_v1 }
 0x262   : >> { %6354 = vmatprep.subr.bf16.mxu1 %v7078_v1 }
 0x264   : >> { %6335 = vmatpush3.bf16.msra.mxu0 %v6958_v46 }
 0x265   : >> { %6355 = vmatpush3.bf16.msra.mxu1 %v6959_v50  ;;  %6336 = vmatprep.subr.bf16.mxu0 %v7078_v1 }
 0x266   : >> { %v2932_v29 = vpop.f32.mrb[44].mxu0  ;;  %6356 = vmatprep.subr.bf16.mxu1 %v7078_v1 }
 0x267   : >> { %v2939_v51 = vadd.f32 %v2932_v29, %v2825_v26  ;;  %v3065_v41 = vpop.f32.mrb[44].mxu1  ;;  %v6064_v52 = vpop.f32.mrb[45].mxu0 }
 0x268   : >> { %v6084_v53 = vpop.f32.mrb[45].mxu1  ;;  %v2935_v54 = vpop.f32.mrb[46].mxu0  ;;  %6337 = vmatpush3.bf16.msra.mxu0 %v6960_v55  ;;  %v6993_v55 = vld [vmem:[%s9059_s1 + $0x428] sm:$0xff]  }
 0x269   : >> { %v3072_v56 = vadd.f32 %v3065_v41, %v2939_v51  ;;  %v2940_v57 = vadd.f32 %v2935_v54, %v2826_v33  ;;  %v3068_v58 = vpop.f32.mrb[46].mxu1  ;;  %6357 = vmatpush3.bf16.msra.mxu1 %v6961_v59  ;;  %v6065_v60 = vpop.f32.mrb[47].mxu0  ;;  %6338 = vmatprep.subr.bf16.mxu0 %v7078_v1  ;;  %v6979_v33 = vld [vmem:[%s9059_s1 + $0x3b0] sm:$0xff]   ;;  %v6992_v41 = vld [vmem:[%s9059_s1 + $0x3e8] sm:$0xff]  }
 0x26a   : >> { %v6085_v12 = vpop.f32.mrb[47].mxu1  ;;  %6358 = vmatprep.subr.bf16.mxu1 %v7078_v1  ;;  %v6994_v59 = vld [vmem:[%s9059_s1 + $0x3f0] sm:$0xff]  }
 0x26b   : >> { %v3073_v14 = vadd.f32 %v3068_v58, %v2940_v57  ;;  %v6995_v60 = vld [vmem:[%s9059_s1 + $0x430] sm:$0xff]   ;;  %v6996_v12 = vld [vmem:[%s9059_s1 + $0x3f8] sm:$0xff]  }
 0x26c   : >> { %6339 = vmatpush3.bf16.msra.mxu0 %v6962_v35  ;;  %v6998_v35 = vld [vmem:[%s9059_s1 + $0x440] sm:$0xff]  }
 0x26d   : >> { %6359 = vmatpush3.bf16.msra.mxu1 %v6963_v63  ;;  %6340 = vmatprep.subr.bf16.mxu0 %v7078_v1  ;;  %v6999_v63 = vld [vmem:[%s9059_s1 + $0x480] sm:$0xff]  }
 0x26e   : >> { %6360 = vmatprep.subr.bf16.mxu1 %v7078_v1 }
 0x270   : >> { %6341 = vmatpush3.bf16.msra.mxu0 %v6964_v0  ;;  %v7002_v0 = vld [vmem:[%s9059_s1 + $0x450] sm:$0xff]  }
 0x271   : >> { %6361 = vmatpush3.bf16.msra.mxu1 %v6965_v4  ;;  %6366 = vmatprep.subr.bf16.mxu0 %v7078_v1  ;;  %v7003_v4 = vld [vmem:[%s9059_s1 + $0x490] sm:$0xff]  }
 0x272   : >> { %6386 = vmatprep.subr.bf16.mxu1 %v7078_v1 }
 0x273   : >> { %6343 = vmatmul.mubr.bf16.vlgmr.msra.gmra.mrb[72].mxu0 %v7840_v27  ;;  %v6968_v27 = vld [vmem:[%s9059_s1 + $0x348] sm:$0xff]  }
 0x274   : >> { %6363 = vmatmul.mubr.bf16.vlgmr.msra.gmra.mrb[72].mxu1 %v7842_v28  ;;  %6367 = vmatpush3.bf16.msra.mxu0 %v6966_v7  ;;  %v6969_v28 = vld [vmem:[%s9059_s1 + $0x388] sm:$0xff]   ;;  %v7004_v7 = vld [vmem:[%s9059_s1 + $0x458] sm:$0xff]  }
 0x275   : >> { %6387 = vmatpush3.bf16.msra.mxu1 %v6967_v9  ;;  %6368 = vmatprep.subr.bf16.mxu0 %v7078_v1  ;;  %v7005_v9 = vld [vmem:[%s9059_s1 + $0x498] sm:$0xff]  }
 0x276   : >> { %6388 = vmatprep.subr.bf16.mxu1 %v7078_v1  ;;  %6382 = vmatprep.mubr.msk.bf16.mxu0 %vm7079_vm0, %v7078_v1 }
 0x277   : >> { %6402 = vmatprep.mubr.msk.bf16.mxu1 %vm7079_vm0, %v7078_v1 }
 0x278   : >> { %6369 = vmatpush3.bf16.msra.mxu0 %v6968_v27  ;;  %v7006_v27 = vld [vmem:[%s9059_s1 + $0x460] sm:$0xff]  }
 0x279   : >> { %6389 = vmatpush3.bf16.msra.mxu1 %v6969_v28  ;;  %6370 = vmatprep.subr.bf16.mxu0 %v7078_v1  ;;  %v7007_v28 = vld [vmem:[%s9059_s1 + $0x4a0] sm:$0xff]  }
 0x27a   : >> { %6390 = vmatprep.subr.bf16.mxu1 %v7078_v1 }
 0x27c   : >> { %6371 = vmatpush3.bf16.msra.mxu0 %v6970_v5 }
 0x27d   : >> { %6391 = vmatpush3.bf16.msra.mxu1 %v6971_v6  ;;  %6372 = vmatprep.subr.bf16.mxu0 %v7078_v1 }
 0x27e   : >> { %6392 = vmatprep.subr.bf16.mxu1 %v7078_v1 }
 0x280   : >> { %6373 = vmatpush3.bf16.msra.mxu0 %v6972_v8 }
 0x281   : >> { %6393 = vmatpush3.bf16.msra.mxu1 %v6973_v10  ;;  %6374 = vmatprep.subr.bf16.mxu0 %v7078_v1 }
 0x282   : >> { %6394 = vmatprep.subr.bf16.mxu1 %v7078_v1 }
 0x284   : >> { %6375 = vmatpush3.bf16.msra.mxu0 %v6974_v11 }
 0x285   : >> { %6395 = vmatpush3.bf16.msra.mxu1 %v6975_v13  ;;  %6376 = vmatprep.subr.bf16.mxu0 %v7078_v1 }
 0x286   : >> { %v3181_v15 = vpop.f32.mrb[48].mxu0  ;;  %6396 = vmatprep.subr.bf16.mxu1 %v7078_v1 }
 0x287   : >> { %v8651_v16 = vadd.f32 %v3181_v15, %v3072_v56  ;;  %v3235_v19 = vpop.f32.mrb[48].mxu1  ;;  %v6104_v21 = vpop.f32.mrb[49].mxu0  ;;  %v7008_v15 = vld [vmem:[%s9059_s1 + $0x468] sm:$0xff]  }
 0x288   : >> { %v6124_v23 = vpop.f32.mrb[49].mxu1  ;;  %v3184_v24 = vpop.f32.mrb[50].mxu0  ;;  %6377 = vmatpush3.bf16.msra.mxu0 %v6976_v25 }
 0x289   : >> { %v8656_v26 = vadd.f32 %v3184_v24, %v3073_v14  ;;  %v3238_v17 = vpop.f32.mrb[50].mxu1  ;;  %6397 = vmatpush3.bf16.msra.mxu1 %v6977_v42  ;;  %v6105_v30 = vpop.f32.mrb[51].mxu0  ;;  %6378 = vmatprep.subr.bf16.mxu0 %v7078_v1  ;;  %v6997_v14 = vld [vmem:[%s9059_s1 + $0x438] sm:$0xff]   ;;  %v7009_v24 = vld [vmem:[%s9059_s1 + $0x4a8] sm:$0xff]  }
 0x28a   : >> { %v6125_v31 = vpop.f32.mrb[51].mxu1  ;;  %6398 = vmatprep.subr.bf16.mxu1 %v7078_v1  ;;  %v7010_v30 = vld [vmem:[%s9059_s1 + $0x470] sm:$0xff]  }
 0x28b   : >> { %v7011_v31 = vld [vmem:[%s9059_s1 + $0x4b0] sm:$0xff]  }
 0x28c   : >> { %6379 = vmatpush3.bf16.msra.mxu0 %v6978_v32  ;;  %v7012_v32 = vld [vmem:[%s9059_s1 + $0x478] sm:$0xff]  }
 0x28d   : >> { %6399 = vmatpush3.bf16.msra.mxu1 %v6979_v33  ;;  %6380 = vmatprep.subr.bf16.mxu0 %v7078_v1  ;;  %v7013_v33 = vld [vmem:[%s9059_s1 + $0x4b8] sm:$0xff]  }
 0x28e   : >> { %6400 = vmatprep.subr.bf16.mxu1 %v7078_v1 }
 0x290   : >> { %6381 = vmatpush3.bf16.msra.mxu0 %v6980_v34  ;;  %v7014_v34 = vld [vmem:[%s9059_s1 + $0x4c0] sm:$0xff]  }
 0x291   : >> { %6401 = vmatpush3.bf16.msra.mxu1 %v6981_v36  ;;  %6406 = vmatprep.subr.bf16.mxu0 %v7078_v1  ;;  %v7015_v36 = vld [vmem:[%s9059_s1 + $0x500] sm:$0xff]  }
 0x292   : >> { %6426 = vmatprep.subr.bf16.mxu1 %v7078_v1 }
 0x293   : >> { %6383 = vmatmul.mubr.bf16.vlgmr.msra.gmra.mrb[76].mxu0 %v7925_v20  ;;  %v6984_v20 = vld [vmem:[%s9059_s1 + $0x3c8] sm:$0xff]  }
 0x294   : >> { %6403 = vmatmul.mubr.bf16.vlgmr.msra.gmra.mrb[76].mxu1 %v7931_v22  ;;  %6407 = vmatpush3.bf16.msra.mxu0 %v6982_v37  ;;  %v6985_v22 = vld [vmem:[%s9059_s1 + $0x408] sm:$0xff]   ;;  %v7018_v37 = vld [vmem:[%s9059_s1 + $0x4d0] sm:$0xff]  }
 0x295   : >> { %6427 = vmatpush3.bf16.msra.mxu1 %v6983_v39  ;;  %6408 = vmatprep.subr.bf16.mxu0 %v7078_v1  ;;  %v7019_v39 = vld [vmem:[%s9059_s1 + $0x510] sm:$0xff]  }
 0x296   : >> { %6428 = vmatprep.subr.bf16.mxu1 %v7078_v1  ;;  %6422 = vmatprep.mubr.msk.bf16.mxu0 %vm7079_vm0, %v7078_v1 }
 0x297   : >> { %6442 = vmatprep.mubr.msk.bf16.mxu1 %vm7079_vm0, %v7078_v1 }
 0x298   : >> { %6409 = vmatpush3.bf16.msra.mxu0 %v6984_v20  ;;  %v7020_v20 = vld [vmem:[%s9059_s1 + $0x4d8] sm:$0xff]  }
 0x299   : >> { %6429 = vmatpush3.bf16.msra.mxu1 %v6985_v22  ;;  %6410 = vmatprep.subr.bf16.mxu0 %v7078_v1  ;;  %v7021_v22 = vld [vmem:[%s9059_s1 + $0x518] sm:$0xff]  }
 0x29a   : >> { %6430 = vmatprep.subr.bf16.mxu1 %v7078_v1 }
 0x29c   : >> { %6411 = vmatpush3.bf16.msra.mxu0 %v6986_v38  ;;  %v7022_v38 = vld [vmem:[%s9059_s1 + $0x4e0] sm:$0xff]  }
 0x29d   : >> { %6431 = vmatpush3.bf16.msra.mxu1 %v6987_v40  ;;  %6412 = vmatprep.subr.bf16.mxu0 %v7078_v1  ;;  %v7023_v40 = vld [vmem:[%s9059_s1 + $0x520] sm:$0xff]  }
 0x29e   : >> { %6432 = vmatprep.subr.bf16.mxu1 %v7078_v1 }
 0x2a0   : >> { %6413 = vmatpush3.bf16.msra.mxu0 %v6988_v48 }
 0x2a1   : >> { %6433 = vmatpush3.bf16.msra.mxu1 %v6989_v49  ;;  %6414 = vmatprep.subr.bf16.mxu0 %v7078_v1 }
 0x2a2   : >> { %6434 = vmatprep.subr.bf16.mxu1 %v7078_v1 }
 0x2a4   : >> { %6415 = vmatpush3.bf16.msra.mxu0 %v6990_v43 }
 0x2a5   : >> { %6435 = vmatpush3.bf16.msra.mxu1 %v6991_v18  ;;  %6416 = vmatprep.subr.bf16.mxu0 %v7078_v1 }
 0x2a6   : >> { %v3276_v44 = vpop.f32.mrb[52].mxu0  ;;  %6436 = vmatprep.subr.bf16.mxu1 %v7078_v1 }
 0x2a7   : >> { %v3277_v45 = vadd.f32 %v3276_v44, %v3235_v19  ;;  %v3317_v46 = vpop.f32.mrb[52].mxu1  ;;  %v6144_v50 = vpop.f32.mrb[53].mxu0 }
 0x2a8   : >> { %v6164_v29 = vpop.f32.mrb[53].mxu1  ;;  %v3279_v51 = vpop.f32.mrb[54].mxu0  ;;  %6417 = vmatpush3.bf16.msra.mxu0 %v6992_v41  ;;  %v7025_v41 = vld [vmem:[%s9059_s1 + $0x528] sm:$0xff]  }
 0x2a9   : >> { %v3324_v52 = vadd.f32 %v3317_v46, %v3277_v45  ;;  %v3280_v53 = vadd.f32 %v3279_v51, %v3238_v17  ;;  %v3320_v54 = vpop.f32.mrb[54].mxu1  ;;  %6437 = vmatpush3.bf16.msra.mxu1 %v6993_v55  ;;  %v6145_v56 = vpop.f32.mrb[55].mxu0  ;;  %6418 = vmatprep.subr.bf16.mxu0 %v7078_v1  ;;  %v7024_v46 = vld [vmem:[%s9059_s1 + $0x4e8] sm:$0xff]   ;;  %v7026_v55 = vld [vmem:[%s9059_s1 + $0x4f0] sm:$0xff]  }
 0x2aa   : >> { %v6165_v57 = vpop.f32.mrb[55].mxu1  ;;  %6438 = vmatprep.subr.bf16.mxu1 %v7078_v1  ;;  %v7027_v56 = vld [vmem:[%s9059_s1 + $0x530] sm:$0xff]  }
 0x2ab   : >> { %v3325_v58 = vadd.f32 %v3320_v54, %v3280_v53  ;;  %v5138_v57 = vld [vmem:[%s7161_s14 + $0x3c] sm:$0xf] }
 0x2ac   : >> { %6419 = vmatpush3.bf16.msra.mxu0 %v6994_v59  ;;  %v7028_v59 = vld [vmem:[%s9059_s1 + $0x4f8] sm:$0xff]  }
 0x2ad   : >> { %6439 = vmatpush3.bf16.msra.mxu1 %v6995_v60  ;;  %6420 = vmatprep.subr.bf16.mxu0 %v7078_v1 }
 0x2ae   : >> { %6440 = vmatprep.subr.bf16.mxu1 %v7078_v1 }
 0x2b0   : >> { %6421 = vmatpush3.bf16.msra.mxu0 %v6996_v12  ;;  %v7029_v12 = vld [vmem:[%s9059_s1 + $0x538] sm:$0xff]  }
 0x2b1   : >> { %6441 = vmatpush3.bf16.msra.mxu1 %v6997_v14  ;;  %6446 = vmatprep.subr.bf16.mxu0 %v7078_v1  ;;  %v7030_v14 = vld [vmem:[%s9059_s1 + $0x540] sm:$0xff]  }
 0x2b2   : >> { %6466 = vmatprep.subr.bf16.mxu1 %v7078_v1 }
 0x2b3   : >> { %6423 = vmatmul.mubr.bf16.vlgmr.msra.gmra.mrb[80].mxu0 %v8012_v2  ;;  %v7000_v2 = vld [vmem:[%s9059_s1 + $0x448] sm:$0xff]  }
 0x2b4   : >> { %6443 = vmatmul.mubr.bf16.vlgmr.msra.gmra.mrb[80].mxu1 %v8014_v3  ;;  %6447 = vmatpush3.bf16.msra.mxu0 %v6998_v35  ;;  %v7001_v3 = vld [vmem:[%s9059_s1 + $0x488] sm:$0xff]   ;;  %v7031_v35 = vld [vmem:[%s9059_s1 + $0x580] sm:$0xff]  }
 0x2b5   : >> { %6467 = vmatpush3.bf16.msra.mxu1 %v6999_v63  ;;  %6448 = vmatprep.subr.bf16.mxu0 %v7078_v1  ;;  %v7033_v63 = vld [vmem:[%s9059_s1 + $0x588] sm:$0xff]  }
 0x2b6   : >> { %6468 = vmatprep.subr.bf16.mxu1 %v7078_v1  ;;  %6462 = vmatprep.mubr.msk.bf16.mxu0 %vm7079_vm0, %v7078_v1 }
 0x2b7   : >> { %6482 = vmatprep.mubr.msk.bf16.mxu1 %vm7079_vm0, %v7078_v1 }
 0x2b8   : >> { %6449 = vmatpush3.bf16.msra.mxu0 %v7000_v2  ;;  %v7034_v2 = vld [vmem:[%s9059_s1 + $0x550] sm:$0xff]  }
 0x2b9   : >> { %6469 = vmatpush3.bf16.msra.mxu1 %v7001_v3  ;;  %6450 = vmatprep.subr.bf16.mxu0 %v7078_v1  ;;  %v7035_v3 = vld [vmem:[%s9059_s1 + $0x590] sm:$0xff]  }
 0x2ba   : >> { %6470 = vmatprep.subr.bf16.mxu1 %v7078_v1 }
 0x2bc   : >> { %6451 = vmatpush3.bf16.msra.mxu0 %v7002_v0  ;;  %v5141_v0 = vld [vmem:[%s7161_s14 + $0x40] sm:$0xf] }
 0x2bd   : >> { %6471 = vmatpush3.bf16.msra.mxu1 %v7003_v4  ;;  %6452 = vmatprep.subr.bf16.mxu0 %v7078_v1  ;;  %v7036_v4 = vld [vmem:[%s9059_s1 + $0x558] sm:$0xff]  }
 0x2be   : >> { %6472 = vmatprep.subr.bf16.mxu1 %v7078_v1 }
 0x2c0   : >> { %6453 = vmatpush3.bf16.msra.mxu0 %v7004_v7  ;;  %v7037_v7 = vld [vmem:[%s9059_s1 + $0x598] sm:$0xff]  }
 0x2c1   : >> { %6473 = vmatpush3.bf16.msra.mxu1 %v7005_v9  ;;  %6454 = vmatprep.subr.bf16.mxu0 %v7078_v1  ;;  %v5142_v9 = vcombine.low %v5138_v57, %v5141_v0 }
 0x2c2   : >> { %6474 = vmatprep.subr.bf16.mxu1 %v7078_v1 }
 0x2c4   : >> { %6455 = vmatpush3.bf16.msra.mxu0 %v7006_v27  ;;  %v7038_v27 = vld [vmem:[%s9059_s1 + $0x560] sm:$0xff]  }
 0x2c5   : >> { %6475 = vmatpush3.bf16.msra.mxu1 %v7007_v28  ;;  %6456 = vmatprep.subr.bf16.mxu0 %v7078_v1  ;;  %v7039_v28 = vld [vmem:[%s9059_s1 + $0x5a0] sm:$0xff]  }
 0x2c6   : >> { %v3360_v5 = vpop.f32.mrb[56].mxu0  ;;  %6476 = vmatprep.subr.bf16.mxu1 %v7078_v1 }
 0x2c7   : >> { %v3367_v6 = vadd.f32 %v3360_v5, %v3324_v52  ;;  %v3403_v8 = vpop.f32.mrb[56].mxu1  ;;  %v6184_v10 = vpop.f32.mrb[57].mxu0 }
 0x2c8   : >> { %v6204_v11 = vpop.f32.mrb[57].mxu1  ;;  %v3363_v13 = vpop.f32.mrb[58].mxu0  ;;  %6457 = vmatpush3.bf16.msra.mxu0 %v7008_v15 }
 0x2c9   : >> { %v3410_v19 = vadd.f32 %v3403_v8, %v3367_v6  ;;  %v3368_v21 = vadd.f32 %v3363_v13, %v3325_v58  ;;  %v3406_v23 = vpop.f32.mrb[58].mxu1  ;;  %6477 = vmatpush3.bf16.msra.mxu1 %v7009_v24  ;;  %v6185_v25 = vpop.f32.mrb[59].mxu0  ;;  %6458 = vmatprep.subr.bf16.mxu0 %v7078_v1  ;;  %v5139_v58 = vld [vmem:[%s7161_s14 + $0x40] sm:$0x7]  ;;  %v4119_v11 = vshll.u32 %v5142_v9, 16 }
 0x2ca   : >> { %v6205_v17 = vpop.f32.mrb[59].mxu1  ;;  %6478 = vmatprep.subr.bf16.mxu1 %v7078_v1  ;;  %v5140_v60 = vcombine.low %v5138_v57, %v5139_v58  ;;  %v7041_v25 = vld [vmem:[%s9059_s1 + $0x5a8] sm:$0xff]  }
 0x2cb   : >> { %v3411_v42 = vadd.f32 %v3406_v23, %v3368_v21 }
 0x2cc   : >> { %6459 = vmatpush3.bf16.msra.mxu0 %v7010_v30 }
 0x2cd   : >> { %6479 = vmatpush3.bf16.msra.mxu1 %v7011_v31  ;;  %6460 = vmatprep.subr.bf16.mxu0 %v7078_v1 }
 0x2ce   : >> { %6480 = vmatprep.subr.bf16.mxu1 %v7078_v1 }
 0x2d0   : >> { %6461 = vmatpush3.bf16.msra.mxu0 %v7012_v32  ;;  %v4117_v32 = vshrl.u32 %v5142_v9, 16 }
 0x2d1   : >> { %6481 = vmatpush3.bf16.msra.mxu1 %v7013_v33  ;;  %6486 = vmatprep.subr.bf16.mxu0 %v7078_v1  ;;  %v4121_v33 = vrot.slane %v4119_v11, 1 }
 0x2d2   : >> { %6506 = vmatprep.subr.bf16.mxu1 %v7078_v1 }
 0x2d3   : >> { %6463 = vmatmul.mubr.bf16.vlgmr.msra.gmra.mrb[84].mxu0 %v8101_v61  ;;  %v7016_v61 = vld [vmem:[%s9059_s1 + $0x4c8] sm:$0xff]  }
 0x2d4   : >> { %6483 = vmatmul.mubr.bf16.vlgmr.msra.gmra.mrb[84].mxu1 %v8107_v62  ;;  %6487 = vmatpush3.bf16.msra.mxu0 %v7014_v34  ;;  %v7017_v62 = vld [vmem:[%s9059_s1 + $0x508] sm:$0xff]   ;;  %v7042_v34 = vld [vmem:[%s9059_s1 + $0x570] sm:$0xff]  }
 0x2d5   : >> { %6507 = vmatpush3.bf16.msra.mxu1 %v7015_v36  ;;  %6488 = vmatprep.subr.bf16.mxu0 %v7078_v1 }
 0x2d6   : >> { %6508 = vmatprep.subr.bf16.mxu1 %v7078_v1  ;;  %6502 = vmatprep.mubr.msk.bf16.mxu0 %vm7079_vm0, %v7078_v1 }
 0x2d7   : >> { %6522 = vmatprep.mubr.msk.bf16.mxu1 %vm7079_vm0, %v7078_v1 }
 0x2d8   : >> { %6489 = vmatpush3.bf16.msra.mxu0 %v7016_v61  ;;  %v7043_v61 = vld [vmem:[%s9059_s1 + $0x5b0] sm:$0xff]  }
 0x2d9   : >> { %6509 = vmatpush3.bf16.msra.mxu1 %v7017_v62  ;;  %6490 = vmatprep.subr.bf16.mxu0 %v7078_v1  ;;  %v4122_v62 = vor.u32 %v4121_v33, %v4117_v32 }
 0x2da   : >> { %6510 = vmatprep.subr.bf16.mxu1 %v7078_v1 }
 0x2dc   : >> { %6491 = vmatpush3.bf16.msra.mxu0 %v7018_v37  ;;  %v7044_v37 = vld [vmem:[%s9059_s1 + $0x578] sm:$0xff]  }
 0x2dd   : >> { %6511 = vmatpush3.bf16.msra.mxu1 %v7019_v39  ;;  %6492 = vmatprep.subr.bf16.mxu0 %v7078_v1 }
 0x2de   : >> { %6512 = vmatprep.subr.bf16.mxu1 %v7078_v1 }
 0x2e0   : >> { %6493 = vmatpush3.bf16.msra.mxu0 %v7020_v20  ;;  %v7045_v20 = vld [vmem:[%s9059_s1 + $0x5b8] sm:$0xff]  }
 0x2e1   : >> { %6513 = vmatpush3.bf16.msra.mxu1 %v7021_v22  ;;  %6494 = vmatprep.subr.bf16.mxu0 %v7078_v1  ;;  %v7046_v22 = vld [vmem:[%s9059_s1 + $0x5c0] sm:$0xff]  }
 0x2e2   : >> { %6514 = vmatprep.subr.bf16.mxu1 %v7078_v1 }
 0x2e4   : >> { %6495 = vmatpush3.bf16.msra.mxu0 %v7022_v38  ;;  %v7047_v38 = vld [vmem:[%s9059_s1 + $0x600] sm:$0xff]  }
 0x2e5   : >> { %6515 = vmatpush3.bf16.msra.mxu1 %v7023_v40  ;;  %6496 = vmatprep.subr.bf16.mxu0 %v7078_v1  ;;  %v7048_v40 = vld [vmem:[%s9059_s1 + $0x5c8] sm:$0xff]  }
 0x2e6   : >> { %v3446_v48 = vpop.f32.mrb[60].mxu0  ;;  %6516 = vmatprep.subr.bf16.mxu1 %v7078_v1 }
 0x2e7   : >> { %v3453_v49 = vadd.f32 %v3446_v48, %v3410_v19  ;;  %v3489_v43 = vpop.f32.mrb[60].mxu1  ;;  %v6224_v18 = vpop.f32.mrb[61].mxu0  ;;  %v7040_v19 = vld [vmem:[%s9059_s1 + $0x568] sm:$0xff]  }
 0x2e8   : >> { %v6244_v44 = vpop.f32.mrb[61].mxu1  ;;  %v3449_v45 = vpop.f32.mrb[62].mxu0  ;;  %6497 = vmatpush3.bf16.msra.mxu0 %v7024_v46  ;;  %v7049_v48 = vld [vmem:[%s9059_s1 + $0x608] sm:$0xff]   ;;  %v5145_v18 = vld [vmem:[%s7161_s14 + $0x3c] sm:$0xe] }
 0x2e9   : >> { %v3496_v50 = vadd.f32 %v3489_v43, %v3453_v49  ;;  %v3454_v29 = vadd.f32 %v3449_v45, %v3411_v42  ;;  %v3492_v51 = vpop.f32.mrb[62].mxu1  ;;  %6517 = vmatpush3.bf16.msra.mxu1 %v7025_v41  ;;  %v6225_v52 = vpop.f32.mrb[63].mxu0  ;;  %6498 = vmatprep.subr.bf16.mxu0 %v7078_v1  ;;  %v5143_v42 = vld [vmem:[%s7161_s14 + $0x3c] sm:$0xe]  ;;  %v7050_v49 = vld [vmem:[%s9059_s1 + $0x5d0] sm:$0xff]  }
 0x2ea   : >> { %v6245_v53 = vpop.f32.mrb[63].mxu1  ;;  %6518 = vmatprep.subr.bf16.mxu1 %v7078_v1  ;;  %v5144_v36 = vcombine.low %v5143_v42, %v5141_v0  ;;  %v7051_v43 = vld [vmem:[%s9059_s1 + $0x610] sm:$0xff]   ;;  %v5146_v44 = vld [vmem:[%s7161_s14 + $0x40] sm:$0xf]  ;;  %v7052_v45 = vld [vmem:[%s9059_s1 + $0x5d8] sm:$0xff]  }
 0x2eb   : >> { %v3497_v54 = vadd.f32 %v3492_v51, %v3454_v29  ;;  %v5148_v46 = vcombine.low %v5145_v18, %v5146_v44  ;;  %v7054_v29 = vld [vmem:[%s9059_s1 + $0x5e0] sm:$0xff]   ;;  %v7057_v0 = vld [vmem:[%s9059_s1 + $0x628] sm:$0xff]  }
 0x2ec   : >> { %6499 = vmatpush3.bf16.msra.mxu0 %v7026_v55  ;;  %v4171_v39 = vrot.slane %v5144_v36, 1  ;;  %v6860_v51 = vld [vmem:[%s7161_s14 + $0x44] ss:$0 sps:$4 sm:$0x11]   ;;  %v5150_v55 = vld [vmem:[%s7161_s14 + $0x3c] sm:$0xc] }
 0x2ed   : >> { %6519 = vmatpush3.bf16.msra.mxu1 %v7027_v56  ;;  %6500 = vmatprep.subr.bf16.mxu0 %v7078_v1  ;;  %v4228_v41 = vshrl.u32 %v5148_v46, 16  ;;  %v4231_v52 = vshll.u32 %v5148_v46, 16  ;;  %v7055_v53 = vld [vmem:[%s9059_s1 + $0x620] sm:$0xff]   ;;  %v4289_v11 = vrot.slane %v6860_v51, 2 }
 0x2ee   : >> { %6520 = vmatprep.subr.bf16.mxu1 %v7078_v1 }
 0x2f0   : >> { %6501 = vmatpush3.bf16.msra.mxu0 %v7028_v59 }
 0x2f1   : >> { %6521 = vmatpush3.bf16.msra.mxu1 %v7029_v12  ;;  %6526 = vmatprep.subr.bf16.mxu0 %v7078_v1  ;;  %v7056_v12 = vld [vmem:[%s9059_s1 + $0x5e8] sm:$0xff]  }
 0x2f2   : >> { %6546 = vmatprep.subr.bf16.mxu1 %v7078_v1 }
 0x2f3   : >> { %6503 = vmatmul.mubr.bf16.vlgmr.msra.gmra.mrb[88].mxu0 %v8178_v47  ;;  %v7032_v47 = vld [vmem:[%s9059_s1 + $0x548] sm:$0xff]  }
 0x2f4   : >> { %6523 = vmatmul.mubr.bf16.vlgmr.msra.gmra.mrb[88].mxu1 %v5140_v60  ;;  %6527 = vmatpush3.bf16.msra.mxu0 %v7030_v14  ;;  %v4230_v14 = vrot.slane %v4228_v41, 1 }
 0x2f5   : >> { %6547 = vmatpush3.bf16.msra.mxu1 %v7031_v35  ;;  %6528 = vmatprep.subr.bf16.mxu0 %v7078_v1  ;;  %v4233_v35 = vrot.slane %v4231_v52, 2 }
 0x2f6   : >> { %6548 = vmatprep.subr.bf16.mxu1 %v7078_v1  ;;  %6542 = vmatprep.mubr.msk.bf16.mxu0 %vm7079_vm0, %v7078_v1 }
 0x2f7   : >> { %6562 = vmatprep.mubr.msk.bf16.mxu1 %vm7079_vm0, %v7078_v1 }
 0x2f8   : >> { %6529 = vmatpush3.bf16.msra.mxu0 %v7032_v47  ;;  %v4236_v47 = vshll.u32 %v6860_v51, 16 }
 0x2f9   : >> { %6549 = vmatpush3.bf16.msra.mxu1 %v7033_v63  ;;  %6530 = vmatprep.subr.bf16.mxu0 %v7078_v1 }
 0x2fa   : >> { %6550 = vmatprep.subr.bf16.mxu1 %v7078_v1 }
 0x2fc   : >> { %6531 = vmatpush3.bf16.msra.mxu0 %v7034_v2 }
 0x2fd   : >> { %6551 = vmatpush3.bf16.msra.mxu1 %v7035_v3  ;;  %6532 = vmatprep.subr.bf16.mxu0 %v7078_v1 }
 0x2fe   : >> { %6552 = vmatprep.subr.bf16.mxu1 %v7078_v1 }
 0x300   : >> { %6533 = vmatpush3.bf16.msra.mxu0 %v7036_v4 }
 0x301   : >> { %6553 = vmatpush3.bf16.msra.mxu1 %v7037_v7  ;;  %6534 = vmatprep.subr.bf16.mxu0 %v7078_v1  ;;  %v5151_v7 = vcombine.low %v5150_v55, %v5146_v44 }
 0x302   : >> { %6554 = vmatprep.subr.bf16.mxu1 %v7078_v1 }
 0x304   : >> { %6535 = vmatpush3.bf16.msra.mxu0 %v7038_v27 }
 0x305   : >> { %6555 = vmatpush3.bf16.msra.mxu1 %v7039_v28  ;;  %6536 = vmatprep.subr.bf16.mxu0 %v7078_v1  ;;  %v7058_v28 = vld [vmem:[%s9059_s1 + $0x5f0] sm:$0xff]  }
 0x306   : >> { %v3532_v5 = vpop.f32.mrb[64].mxu0  ;;  %6556 = vmatprep.subr.bf16.mxu1 %v7078_v1 }
 0x307   : >> { %v3539_v6 = vadd.f32 %v3532_v5, %v3496_v50  ;;  %v3575_v8 = vpop.f32.mrb[64].mxu1  ;;  %v6264_v10 = vpop.f32.mrb[65].mxu0  ;;  %v7053_v50 = vld [vmem:[%s9059_s1 + $0x618] sm:$0xff]   ;;  %v4234_v5 = vor.u32 %v4233_v35, %v4230_v14 }
 0x308   : >> { %v6284_v13 = vpop.f32.mrb[65].mxu1  ;;  %v3535_v15 = vpop.f32.mrb[66].mxu0  ;;  %6537 = vmatpush3.bf16.msra.mxu0 %v7040_v19  ;;  %v4288_v10 = vrot.slane %v5151_v7, 2  ;;  %v7061_v19 = vld [vmem:[%s9059_s1 + $0x638] sm:$0xff]  }
 0x309   : >> { %v8940_v21 = vadd.f32 %v3575_v8, %v3539_v6  ;;  %v3540_v23 = vadd.f32 %v3535_v15, %v3497_v54  ;;  %v3578_v24 = vpop.f32.mrb[66].mxu1  ;;  %6557 = vmatpush3.bf16.msra.mxu1 %v7041_v25  ;;  %v6265_v17 = vpop.f32.mrb[67].mxu0  ;;  %6538 = vmatprep.subr.bf16.mxu0 %v7078_v1  ;;  %v4238_v6 = vrot.slane %v4236_v47, 2  ;;  %v7059_v8 = vld [vmem:[%s9059_s1 + $0x630] sm:$0xff]   ;;  %v7060_v13 = vld [vmem:[%s9059_s1 + $0x5f8] sm:$0xff]  }
 0x30a   : >> { %v6285_v30 = vpop.f32.mrb[67].mxu1  ;;  %6558 = vmatprep.subr.bf16.mxu1 %v7078_v1 }
 0x30b   : >> { %v8948_v31 = vadd.f32 %v3578_v24, %v3540_v23  ;;  %v4239_v15 = vsel %vm555_vm1, %v4234_v5, %v4238_v6 }
 0x30c   : >> { %6539 = vmatpush3.bf16.msra.mxu0 %v7042_v34 }
 0x30d   : >> { %6559 = vmatpush3.bf16.msra.mxu1 %v7043_v61  ;;  %6540 = vmatprep.subr.bf16.mxu0 %v7078_v1 }
 0x30e   : >> { %6560 = vmatprep.subr.bf16.mxu1 %v7078_v1 }
 0x310   : >> { %6541 = vmatpush3.bf16.msra.mxu0 %v7044_v37 }
 0x311   : >> { %6561 = vmatpush3.bf16.msra.mxu1 %v7045_v20  ;;  %6566 = vmatprep.subr.bf16.mxu0 %v7078_v1 }
 0x312   : >> { %6586 = vmatprep.subr.bf16.mxu1 %v7078_v1 }
 0x313   : >> { %6543 = vmatmul.mubr.bf16.vlgmr.msra.gmra.mrb[92].mxu0 %v4122_v62 }
 0x314   : >> { %6563 = vmatmul.mubr.bf16.vlgmr.msra.gmra.mrb[92].mxu1 %v4171_v39  ;;  %6567 = vmatpush3.bf16.msra.mxu0 %v7046_v22 }
 0x315   : >> { %6587 = vmatpush3.bf16.msra.mxu1 %v7047_v38  ;;  %6568 = vmatprep.subr.bf16.mxu0 %v7078_v1 }
 0x316   : >> { %6588 = vmatprep.subr.bf16.mxu1 %v7078_v1  ;;  %6582 = vmatprep.mubr.msk.bf16.mxu0 %vm7079_vm0, %v7078_v1 }
 0x317   : >> { %6602 = vmatprep.mubr.msk.bf16.mxu1 %vm7079_vm0, %v7078_v1 }
 0x318   : >> { %6569 = vmatpush3.bf16.msra.mxu0 %v7048_v40 }
 0x319   : >> { %6589 = vmatpush3.bf16.msra.mxu1 %v7049_v48  ;;  %6570 = vmatprep.subr.bf16.mxu0 %v7078_v1 }
 0x31a   : >> { %6590 = vmatprep.subr.bf16.mxu1 %v7078_v1 }
 0x31c   : >> { %6571 = vmatpush3.bf16.msra.mxu0 %v7050_v49 }
 0x31d   : >> { %6591 = vmatpush3.bf16.msra.mxu1 %v7051_v43  ;;  %6572 = vmatprep.subr.bf16.mxu0 %v7078_v1 }
 0x31e   : >> { %6592 = vmatprep.subr.bf16.mxu1 %v7078_v1 }
 0x320   : >> { %6573 = vmatpush3.bf16.msra.mxu0 %v7052_v45 }
 0x321   : >> { %6593 = vmatpush3.bf16.msra.mxu1 %v7053_v50  ;;  %6574 = vmatprep.subr.bf16.mxu0 %v7078_v1 }
 0x322   : >> { %6594 = vmatprep.subr.bf16.mxu1 %v7078_v1 }
 0x324   : >> { %6575 = vmatpush3.bf16.msra.mxu0 %v7054_v29 }
 0x325   : >> { %6595 = vmatpush3.bf16.msra.mxu1 %v7055_v53  ;;  %6576 = vmatprep.subr.bf16.mxu0 %v7078_v1 }
 0x326   : >> { %v3618_v54 = vpop.f32.mrb[68].mxu0  ;;  %6596 = vmatprep.subr.bf16.mxu1 %v7078_v1 }
 0x327   : >> { %v3625_v56 = vadd.f32 %v3618_v54, %v8940_v21  ;;  %v3661_v57 = vpop.f32.mrb[68].mxu1  ;;  %v6304_v58 = vpop.f32.mrb[69].mxu0  ;;  %v4290_v21 = vsel %vm682_vm2, %v4288_v10, %v4289_v11 }
 0x328   : >> { %v6324_v59 = vpop.f32.mrb[69].mxu1  ;;  %v3621_v60 = vpop.f32.mrb[70].mxu0  ;;  %6577 = vmatpush3.bf16.msra.mxu0 %v7056_v12 }
 0x329   : >> { %v3668_v63 = vadd.f32 %v3661_v57, %v3625_v56  ;;  %v3626_v2 = vadd.f32 %v3621_v60, %v8948_v31  ;;  %v3664_v3 = vpop.f32.mrb[70].mxu1  ;;  %6597 = vmatpush3.bf16.msra.mxu1 %v7057_v0  ;;  %v6305_v4 = vpop.f32.mrb[71].mxu0  ;;  %6578 = vmatprep.subr.bf16.mxu0 %v7078_v1 }
 0x32a   : >> { %v6325_v9 = vpop.f32.mrb[71].mxu1  ;;  %6598 = vmatprep.subr.bf16.mxu1 %v7078_v1 }
 0x32b   : >> { %v3669_v27 = vadd.f32 %v3664_v3, %v3626_v2 }
 0x32c   : >> { %6579 = vmatpush3.bf16.msra.mxu0 %v7058_v28 }
 0x32d   : >> { %6599 = vmatpush3.bf16.msra.mxu1 %v7059_v8  ;;  %6580 = vmatprep.subr.bf16.mxu0 %v7078_v1 }
 0x32e   : >> { %6600 = vmatprep.subr.bf16.mxu1 %v7078_v1 }
 0x330   : >> { %6581 = vmatpush3.bf16.msra.mxu0 %v7060_v13 }
 0x331   : >> { %6601 = vmatpush3.bf16.msra.mxu1 %v7061_v19 }
 0x333   : >> { %6583 = vmatmul.mubr.bf16.vlgmr.msra.gmra.mrb[96].mxu0 %v4239_v15 }
 0x334   : >> { %6603 = vmatmul.mubr.bf16.vlgmr.msra.gmra.mrb[96].mxu1 %v4290_v21 }
 0x346   : >> { %v3704_v23 = vpop.f32.mrb[72].mxu0 }
 0x347   : >> { %v3711_v24 = vadd.f32 %v3704_v23, %v3668_v63  ;;  %v3747_v25 = vpop.f32.mrb[72].mxu1  ;;  %v6344_v1 = vpop.f32.mrb[73].mxu0 }
 0x348   : >> { %v6364_v17 = vpop.f32.mrb[73].mxu1  ;;  %v3707_v42 = vpop.f32.mrb[74].mxu0 }
 0x349   : >> { %v3754_v30 = vadd.f32 %v3747_v25, %v3711_v24  ;;  %v3712_v31 = vadd.f32 %v3707_v42, %v3669_v27  ;;  %v3750_v32 = vpop.f32.mrb[74].mxu1  ;;  %v6345_v33 = vpop.f32.mrb[75].mxu0 }
 0x34a   : >> { %v6365_v34 = vpop.f32.mrb[75].mxu1 }
 0x34b   : >> { %v3755_v36 = vadd.f32 %v3750_v32, %v3712_v31  ;;  %v5135_v34 = vld [vmem:[%s9060_s2] ss:$0 sm:$0xff] }
 0x366   : >> { %v3790_v61 = vpop.f32.mrb[76].mxu0 }
 0x367   : >> { %v3797_v62 = vadd.f32 %v3790_v61, %v3754_v30  ;;  %v3833_v37 = vpop.f32.mrb[76].mxu1  ;;  %v6384_v39 = vpop.f32.mrb[77].mxu0 }
 0x368   : >> { %v6404_v20 = vpop.f32.mrb[77].mxu1  ;;  %v3793_v22 = vpop.f32.mrb[78].mxu0 }
 0x369   : >> { %v3840_v38 = vadd.f32 %v3833_v37, %v3797_v62  ;;  %v3798_v40 = vadd.f32 %v3793_v22, %v3755_v36  ;;  %v3836_v48 = vpop.f32.mrb[78].mxu1  ;;  %v6385_v49 = vpop.f32.mrb[79].mxu0  ;;  %v3197_v22 = vadd.f32 %v5135_v34, %v8651_v16 }
 0x36a   : >> { %v6405_v43 = vpop.f32.mrb[79].mxu1 }
 0x36b   : >> { %v3841_v18 = vadd.f32 %v3836_v48, %v3798_v40 }
 0x386   : >> { %v3876_v44 = vpop.f32.mrb[80].mxu0 }
 0x387   : >> { %v3883_v45 = vadd.f32 %v3876_v44, %v3840_v38  ;;  %v3919_v46 = vpop.f32.mrb[80].mxu1  ;;  %v6424_v50 = vpop.f32.mrb[81].mxu0 }
 0x388   : >> { %v6444_v29 = vpop.f32.mrb[81].mxu1  ;;  %v3879_v51 = vpop.f32.mrb[82].mxu0 }
 0x389   : >> { %v3926_v41 = vadd.f32 %v3919_v46, %v3883_v45  ;;  %v3884_v52 = vadd.f32 %v3879_v51, %v3841_v18  ;;  %v3922_v53 = vpop.f32.mrb[82].mxu1  ;;  %v6425_v54 = vpop.f32.mrb[83].mxu0  ;;  %v3198_v45 = vadd.f32 %v5135_v34, %v8656_v26  ;;  %v3199_v46 = vmax.f32 %v3197_v22, 0.0 }
 0x38a   : >> { %v6445_v55 = vpop.f32.mrb[83].mxu1 }
 0x38b   : >> { %v3927_v56 = vadd.f32 %v3922_v53, %v3884_v52  ;;  %v3200_v52 = vmax.f32 %v3198_v45, 0.0 }
 0x3a6   : >> { %v3962_v57 = vpop.f32.mrb[84].mxu0 }
 0x3a7   : >> { %v3969_v58 = vadd.f32 %v3962_v57, %v3926_v41  ;;  %v4005_v59 = vpop.f32.mrb[84].mxu1  ;;  %v6464_v60 = vpop.f32.mrb[85].mxu0 }
 0x3a8   : >> { %v6484_v12 = vpop.f32.mrb[85].mxu1  ;;  %v3965_v14 = vpop.f32.mrb[86].mxu0 }
 0x3a9   : >> { %v4012_v35 = vadd.f32 %v4005_v59, %v3969_v58  ;;  %v3970_v47 = vadd.f32 %v3965_v14, %v3927_v56  ;;  %v4008_v63 = vpop.f32.mrb[86].mxu1  ;;  %v6465_v2 = vpop.f32.mrb[87].mxu0 }
 0x3aa   : >> { %v6485_v3 = vpop.f32.mrb[87].mxu1 }
 0x3ab   : >> { %v4013_v0 = vadd.f32 %v4008_v63, %v3970_v47 }
 0x3c6   : >> { %v4048_v4 = vpop.f32.mrb[88].mxu0 }
 0x3c7   : >> { %v4055_v7 = vadd.f32 %v4048_v4, %v4012_v35  ;;  %v4103_v9 = vpop.f32.mrb[88].mxu1  ;;  %v6504_v27 = vpop.f32.mrb[89].mxu0 }
 0x3c8   : >> { %v6524_v28 = vpop.f32.mrb[89].mxu1  ;;  %v4051_v5 = vpop.f32.mrb[90].mxu0 }
 0x3c9   : >> { %v4110_v6 = vadd.f32 %v4103_v9, %v4055_v7  ;;  %v4056_v8 = vadd.f32 %v4051_v5, %v4013_v0  ;;  %v4106_v10 = vpop.f32.mrb[90].mxu1  ;;  %v6505_v11 = vpop.f32.mrb[91].mxu0  ;;  %v4384_v28 = vld [vmem:[%s4380_s7] sm:$0xf] }
 0x3ca   : >> { %v6525_v13 = vpop.f32.mrb[91].mxu1 }
 0x3cb   : >> { %v4111_v15 = vadd.f32 %v4106_v10, %v4056_v8 }
 0x3e6   : >> { %v4158_v19 = vpop.f32.mrb[92].mxu0 }
 0x3e7   : >> { %v4165_v21 = vadd.f32 %v4158_v19, %v4110_v6  ;;  %v4207_v23 = vpop.f32.mrb[92].mxu1  ;;  %v6544_v24 = vpop.f32.mrb[93].mxu0 }
 0x3e8   : >> { %v6564_v25 = vpop.f32.mrb[93].mxu1  ;;  %v4161_v1 = vpop.f32.mrb[94].mxu0 }
 0x3e9   : >> { %v4214_v17 = vadd.f32 %v4207_v23, %v4165_v21  ;;  %v4166_v42 = vadd.f32 %v4161_v1, %v4111_v15  ;;  %v4210_v30 = vpop.f32.mrb[94].mxu1  ;;  %v6545_v31 = vpop.f32.mrb[95].mxu0 }
 0x3ea   : >> { %v6565_v32 = vpop.f32.mrb[95].mxu1 }
 0x3eb   : >> { %v4215_v33 = vadd.f32 %v4210_v30, %v4166_v42 }
 0x406   : >> { %v4275_v36 = vpop.f32.mrb[96].mxu0 }
 0x407   : >> { %v4282_v61 = vadd.f32 %v4275_v36, %v4214_v17  ;;  %v4326_v62 = vpop.f32.mrb[96].mxu1  ;;  %v6584_v37 = vpop.f32.mrb[97].mxu0 }
 0x408   : >> { %v6604_v39 = vpop.f32.mrb[97].mxu1  ;;  %v4278_v20 = vpop.f32.mrb[98].mxu0 }
 0x409   : >> { %v4333_v38 = vadd.f32 %v4326_v62, %v4282_v61  ;;  %v4283_v40 = vadd.f32 %v4278_v20, %v4215_v33  ;;  %v4329_v48 = vpop.f32.mrb[98].mxu1  ;;  %v6585_v49 = vpop.f32.mrb[99].mxu0 }
 0x40a   : >> { %v6605_v43 = vpop.f32.mrb[99].mxu1 }
 0x40b   : >> { %v4335_v18 = vadd.f32 %v5135_v34, %v4333_v38  ;;  %v4334_v44 = vadd.f32 %v4329_v48, %v4283_v40 }
 0x40d   : >> { %v4337_v50 = vmax.f32 %v4335_v18, 0.0  ;;  %v4336_v29 = vadd.f32 %v5135_v34, %v4334_v44 }
 0x40f   : >> { %v4339_v51 = vmax.f32 %v3199_v46, %v4337_v50  ;;  %v4338_v41 = vmax.f32 %v4336_v29, 0.0 }
 0x411   : >> { %v4342_v53 = vrot.slane %v4339_v51, 1  ;;  %v4344_v54 = vrot.slane %v4339_v51, 2  ;;  %v4346_v16 = vrot.slane %v4339_v51, 3  ;;  %v4340_v55 = vmax.f32 %v3200_v52, %v4338_v41 }
 0x412   : >> { %v4367_v58 = vrot.slane %v4339_v51, 4 }
 0x413   : >> { %v4356_v56 = vsel %vm4355_vm3, %v4339_v51, %v4342_v53  ;;  %v4371_v57 = vsel %vm4355_vm3, %v4342_v53, %v4344_v54  ;;  %v4349_v59 = vrot.slane %v4340_v55, 4  ;;  %v4351_v60 = vrot.slane %v4340_v55, 5 }
 0x414   : >> { %v4358_v26 = vsel %vm4357_vm4, %v4356_v56, %v4344_v54  ;;  %v4372_v14 = vsel %vm4357_vm4, %v4371_v57, %v4346_v16  ;;  %v4353_v35 = vrot.slane %v4340_v55, 6  ;;  %v4369_v3 = vrot.slane %v4340_v55, 7 }
 0x415   : >> { %v4360_v12 = vsel %vm4359_vm5, %v4358_v26, %v4346_v16  ;;  %v4373_v63 = vsel %vm4359_vm5, %v4372_v14, %v4367_v58 }
 0x416   : >> { %v4362_v47 = vsel %vm4361_vm6, %v4360_v12, %v4349_v59  ;;  %v4374_v0 = vsel %vm4361_vm6, %v4373_v63, %v4351_v60 }
 0x417   : >> { %v4364_v2 = vsel %vm4363_vm7, %v4362_v47, %v4351_v60  ;;  %v4375_v7 = vsel %vm4363_vm7, %v4374_v0, %v4353_v35 }
 0x418   : >> { %v4366_v4 = vsel %vm682_vm2, %v4364_v2, %v4353_v35  ;;  %v4376_v9 = vsel %vm682_vm2, %v4375_v7, %v4369_v3  ;;  %176 = sbr.rel (!%p174_p4) target bundleno = 18 (0x12), region = 100 }
 0x419   : >> { %v4377_v27 = vmax.f32 %v4366_v4, %v4376_v9 }
 0x41b   : >> { %v4378_v5 = vpack.c.bf16 %v4377_v27, %v4377_v27 }
 0x41d   : >> { %v4385_v6 = vsel %vm4383_vm9, %v4378_v5, %v4384_v28 }
 0x41e   : >> { %4386 = vst [vmem:[%s4380_s7] sm:$0xf] %v4385_v6 }
 0x41f PF: > { %s13_s12 = sadd.s32 1, %s7072_s12  }
 0x420   : > { %p10_p5 = scmp.ge.s32.totalorder %s13_s12, 4  }
 0x422   :  { %12 = sbr.rel (!%p10_p5) target bundleno = 1 (0x1), region = 111 }

// kernel: classifier_forward.5
= control target key start
LH: loop header
LB: loop body
LE: loop exit
PB: predicated region body
PF: predicated region fallthrough
CT: control target
= control target key end

     0   :  { %vm5985_vm0 = vmmov 0   ;;  %s7330_s1 = inlined_call_operand.vmem [shape: bf16[6272,128], index: 1, kind: input, shape index: {}]   ;;  %s7331_s0 = inlined_call_operand.vmem [shape: bf16[8,6272], index: 0, kind: input, shape index: {}]   ;;  %s7332_s2 = inlined_call_operand.vmem [shape: f32[1,128], index: 2, kind: input, shape index: {}]   ;;  %s7333_s3 = inlined_call_operand.vmem [shape: bf16[128,128], index: 3, kind: input, shape index: {}]   ;;  %s7334_s4 = inlined_call_operand.vmem [shape: f32[1,128], index: 4, kind: input, shape index: {}]   ;;  %s7335_s5 = inlined_call_operand.vmem [shape: f32[8,128], index: 5, kind: output, shape index: {}]  }
   0x1   :  { %v5531_v0 = vld [vmem:[%s7330_s1 + $0x40] sm:$0xff]   ;;  %v5535_v4 = vld [vmem:[%s7330_s1 + $0x48] sm:$0xff]   ;;  %v5539_v8 = vld [vmem:[%s7330_s1 + $0x50] sm:$0xff]  }
   0x2   :  { %v5532_v1 = vld [vmem:[%s7330_s1] sm:$0xff]   ;;  %4943 = vmatprep.subr.bf16.mxu0 %v5531_v0  ;;  %v5536_v5 = vld [vmem:[%s7330_s1 + $0x8] sm:$0xff]   ;;  %v5540_v9 = vld [vmem:[%s7330_s1 + $0x10] sm:$0xff]  }
   0x3   :  { %v5533_v2 = vld [vmem:[%s7330_s1 + $0xc0] sm:$0xff]   ;;  %4944 = vmatpush3.bf16.msra.mxu0 %v5532_v1  ;;  %v5537_v6 = vld [vmem:[%s7330_s1 + $0xc8] sm:$0xff]   ;;  %v5541_v10 = vld [vmem:[%s7330_s1 + $0xd0] sm:$0xff]  }
   0x4   :  { %v5534_v3 = vld [vmem:[%s7330_s1 + $0x80] sm:$0xff]   ;;  %4965 = vmatprep.subr.bf16.mxu1 %v5533_v2  ;;  %4945 = vmatprep.subr.bf16.mxu0 %v5535_v4  ;;  %v5538_v7 = vld [vmem:[%s7330_s1 + $0x88] sm:$0xff]   ;;  %v5542_v11 = vld [vmem:[%s7330_s1 + $0x90] sm:$0xff]  }
   0x5   :  { %4966 = vmatpush3.bf16.msra.mxu1 %v5534_v3  ;;  %v5543_v12 = vld [vmem:[%s7330_s1 + $0x58] sm:$0xff]   ;;  %v5547_v16 = vld [vmem:[%s7330_s1 + $0x60] sm:$0xff]   ;;  %v5551_v20 = vld [vmem:[%s7330_s1 + $0x68] sm:$0xff]  }
   0x6   :  { %4967 = vmatprep.subr.bf16.mxu1 %v5537_v6  ;;  %v5544_v13 = vld [vmem:[%s7330_s1 + $0x18] sm:$0xff]   ;;  %v5548_v17 = vld [vmem:[%s7330_s1 + $0x20] sm:$0xff]   ;;  %v5552_v21 = vld [vmem:[%s7330_s1 + $0x28] sm:$0xff]  }
   0x7   :  { %4946 = vmatpush3.bf16.msra.mxu0 %v5536_v5  ;;  %v5545_v14 = vld [vmem:[%s7330_s1 + $0xd8] sm:$0xff]   ;;  %v5549_v18 = vld [vmem:[%s7330_s1 + $0xe0] sm:$0xff]   ;;  %v5553_v22 = vld [vmem:[%s7330_s1 + $0xe8] sm:$0xff]  }
   0x8   :  { %4947 = vmatprep.subr.bf16.mxu0 %v5539_v8  ;;  %v5546_v15 = vld [vmem:[%s7330_s1 + $0x98] sm:$0xff]   ;;  %v5550_v19 = vld [vmem:[%s7330_s1 + $0xa0] sm:$0xff]   ;;  %v5554_v23 = vld [vmem:[%s7330_s1 + $0xa8] sm:$0xff]  }
   0x9   :  { %4968 = vmatpush3.bf16.msra.mxu1 %v5538_v7  ;;  %v5555_v24 = vld [vmem:[%s7330_s1 + $0x70] sm:$0xff]   ;;  %v5559_v28 = vld [vmem:[%s7330_s1 + $0x78] sm:$0xff]   ;;  %v21_v31 = vld [vmem:[%s7331_s0] sm:$0xff] }
   0xa   :  { %4969 = vmatprep.subr.bf16.mxu1 %v5541_v10  ;;  %v5556_v25 = vld [vmem:[%s7330_s1 + $0x30] sm:$0xff]   ;;  %v5560_v29 = vld [vmem:[%s7330_s1 + $0x38] sm:$0xff]   ;;  %v4493_v32 = vcombine.low %v21_v31, %v21_v31  ;;  %v4494_v33 = vcombine.high %v21_v31, %v21_v31  ;;  %v5565_v35 = vld [vmem:[%s7330_s1 + $0x140] sm:$0xff]  }
   0xb   :  { %4948 = vmatpush3.bf16.msra.mxu0 %v5540_v9  ;;  %v5557_v26 = vld [vmem:[%s7330_s1 + $0xf0] sm:$0xff]   ;;  %v5561_v30 = vld [vmem:[%s7330_s1 + $0xf8] sm:$0xff]   ;;  %v22_v36 = vld [vmem:[%s7331_s0 + $0x8] sm:$0xff] }
   0xc   :  { %4949 = vmatprep.subr.bf16.mxu0 %v5543_v12  ;;  %v5558_v27 = vld [vmem:[%s7330_s1 + $0xb0] sm:$0xff]   ;;  %v5564_v34 = vld [vmem:[%s7330_s1 + $0xb8] sm:$0xff]   ;;  %3393 = vmatprep.mubr.bf16.mxu0 %v4494_v33  ;;  %v4495_v37 = vcombine.low %v22_v36, %v22_v36  ;;  %v4496_v38 = vcombine.high %v22_v36, %v22_v36  ;;  %v5568_v39 = vld [vmem:[%s7330_s1 + $0x100] sm:$0xff]  }
   0xd   :  { %4970 = vmatpush3.bf16.msra.mxu1 %v5542_v11  ;;  %v5569_v40 = vld [vmem:[%s7330_s1 + $0x1c0] sm:$0xff]   ;;  %v5571_v42 = vld [vmem:[%s7330_s1 + $0x148] sm:$0xff]   ;;  %v5575_v46 = vld [vmem:[%s7330_s1 + $0x150] sm:$0xff]  }
   0xe   :  { %4971 = vmatprep.subr.bf16.mxu1 %v5545_v14  ;;  %3433 = vmatprep.mubr.bf16.mxu1 %v4496_v38  ;;  %v5570_v41 = vld [vmem:[%s7330_s1 + $0x180] sm:$0xff]   ;;  %v5572_v43 = vld [vmem:[%s7330_s1 + $0x108] sm:$0xff]   ;;  %v5576_v47 = vld [vmem:[%s7330_s1 + $0x110] sm:$0xff]  }
   0xf   :  { %4950 = vmatpush3.bf16.msra.mxu0 %v5544_v13  ;;  %v5573_v44 = vld [vmem:[%s7330_s1 + $0x1c8] sm:$0xff]   ;;  %v5577_v48 = vld [vmem:[%s7330_s1 + $0x1d0] sm:$0xff]   ;;  %v5579_v50 = vld [vmem:[%s7330_s1 + $0x158] sm:$0xff]  }
  0x10   :  { %4951 = vmatprep.subr.bf16.mxu0 %v5547_v16  ;;  %v5574_v45 = vld [vmem:[%s7330_s1 + $0x188] sm:$0xff]   ;;  %v5578_v49 = vld [vmem:[%s7330_s1 + $0x190] sm:$0xff]   ;;  %v5580_v51 = vld [vmem:[%s7330_s1 + $0x118] sm:$0xff]  }
  0x11   :  { %4972 = vmatpush3.bf16.msra.mxu1 %v5546_v15  ;;  %v5581_v52 = vld [vmem:[%s7330_s1 + $0x1d8] sm:$0xff]   ;;  %v5583_v54 = vld [vmem:[%s7330_s1 + $0x160] sm:$0xff]   ;;  %v5587_v58 = vld [vmem:[%s7330_s1 + $0x168] sm:$0xff]  }
  0x12   :  { %4973 = vmatprep.subr.bf16.mxu1 %v5549_v18  ;;  %v5582_v53 = vld [vmem:[%s7330_s1 + $0x198] sm:$0xff]   ;;  %v5584_v55 = vld [vmem:[%s7330_s1 + $0x120] sm:$0xff]   ;;  %v5588_v59 = vld [vmem:[%s7330_s1 + $0x128] sm:$0xff]  }
  0x13   :  { %4952 = vmatpush3.bf16.msra.mxu0 %v5548_v17  ;;  %v5585_v56 = vld [vmem:[%s7330_s1 + $0x1e0] sm:$0xff]   ;;  %v5589_v60 = vld [vmem:[%s7330_s1 + $0x1e8] sm:$0xff]   ;;  %v5591_v62 = vld [vmem:[%s7330_s1 + $0x170] sm:$0xff]  }
  0x14   :  { %4953 = vmatprep.subr.bf16.mxu0 %v5551_v20  ;;  %v5586_v57 = vld [vmem:[%s7330_s1 + $0x1a0] sm:$0xff]   ;;  %v5590_v61 = vld [vmem:[%s7330_s1 + $0x1a8] sm:$0xff]   ;;  %v5592_v63 = vld [vmem:[%s7330_s1 + $0x130] sm:$0xff]  }
  0x15   :  { %4974 = vmatpush3.bf16.msra.mxu1 %v5550_v19  ;;  %v5593_v0 = vld [vmem:[%s7330_s1 + $0x1f0] sm:$0xff]   ;;  %v5595_v2 = vld [vmem:[%s7330_s1 + $0x178] sm:$0xff]   ;;  %v5601_v9 = vld [vmem:[%s7330_s1 + $0x240] sm:$0xff]  }
  0x16   :  { %4975 = vmatprep.subr.bf16.mxu1 %v5553_v22  ;;  %v5594_v1 = vld [vmem:[%s7330_s1 + $0x1b0] sm:$0xff]   ;;  %v5596_v3 = vld [vmem:[%s7330_s1 + $0x138] sm:$0xff]   ;;  %v5604_v13 = vld [vmem:[%s7330_s1 + $0x200] sm:$0xff]  }
  0x17   :  { %4954 = vmatpush3.bf16.msra.mxu0 %v5552_v21  ;;  %v5597_v4 = vld [vmem:[%s7330_s1 + $0x1f8] sm:$0xff]   ;;  %v23_v5 = vld [vmem:[%s7331_s0 + $0x10] sm:$0xff]  ;;  %v5605_v14 = vld [vmem:[%s7330_s1 + $0x2c0] sm:$0xff]  }
  0x18   :  { %4955 = vmatprep.subr.bf16.mxu0 %v5555_v24  ;;  %v4497_v6 = vcombine.low %v23_v5, %v23_v5  ;;  %v4498_v7 = vcombine.high %v23_v5, %v23_v5  ;;  %v5600_v8 = vld [vmem:[%s7330_s1 + $0x1b8] sm:$0xff]   ;;  %v5606_v15 = vld [vmem:[%s7330_s1 + $0x280] sm:$0xff]   ;;  %v5607_v16 = vld [vmem:[%s7330_s1 + $0x248] sm:$0xff]  }
  0x19   :  { %4976 = vmatpush3.bf16.msra.mxu1 %v5554_v23  ;;  %v24_v10 = vld [vmem:[%s7331_s0 + $0x18] sm:$0xff]  ;;  %v5608_v17 = vld [vmem:[%s7330_s1 + $0x208] sm:$0xff]   ;;  %v5611_v20 = vld [vmem:[%s7330_s1 + $0x250] sm:$0xff]  }
  0x1a   :  { %4977 = vmatprep.subr.bf16.mxu1 %v5557_v26  ;;  %v4499_v11 = vcombine.low %v24_v10, %v24_v10  ;;  %v4500_v12 = vcombine.high %v24_v10, %v24_v10  ;;  %v5609_v18 = vld [vmem:[%s7330_s1 + $0x2c8] sm:$0xff]   ;;  %v5612_v21 = vld [vmem:[%s7330_s1 + $0x210] sm:$0xff]   ;;  %v5615_v24 = vld [vmem:[%s7330_s1 + $0x258] sm:$0xff]  }
  0x1b   :  { %4956 = vmatpush3.bf16.msra.mxu0 %v5556_v25  ;;  %v5610_v19 = vld [vmem:[%s7330_s1 + $0x288] sm:$0xff]   ;;  %v5613_v22 = vld [vmem:[%s7330_s1 + $0x2d0] sm:$0xff]   ;;  %v5616_v25 = vld [vmem:[%s7330_s1 + $0x218] sm:$0xff]  }
  0x1c   :  { %4957 = vmatprep.subr.bf16.mxu0 %v5559_v28  ;;  %v5614_v23 = vld [vmem:[%s7330_s1 + $0x290] sm:$0xff]   ;;  %v5617_v26 = vld [vmem:[%s7330_s1 + $0x2d8] sm:$0xff]   ;;  %v5619_v28 = vld [vmem:[%s7330_s1 + $0x260] sm:$0xff]  }
  0x1d   :  { %4978 = vmatpush3.bf16.msra.mxu1 %v5558_v27  ;;  %v5618_v27 = vld [vmem:[%s7330_s1 + $0x298] sm:$0xff]   ;;  %v5622_v31 = vld [vmem:[%s7330_s1 + $0x2a0] sm:$0xff]   ;;  %v5624_v33 = vld [vmem:[%s7330_s1 + $0x228] sm:$0xff]  }
  0x1e   :  { %4979 = vmatprep.subr.bf16.mxu1 %v5561_v30  ;;  %v5621_v30 = vld [vmem:[%s7330_s1 + $0x2e0] sm:$0xff]   ;;  %v5627_v36 = vld [vmem:[%s7330_s1 + $0x270] sm:$0xff]  }
  0x1f   :  { %4958 = vmatpush3.bf16.msra.mxu0 %v5560_v29  ;;  %v5620_v29 = vld [vmem:[%s7330_s1 + $0x220] sm:$0xff]   ;;  %v5629_v38 = vld [vmem:[%s7330_s1 + $0x2f0] sm:$0xff]  }
  0x20   :  { %4987 = vmatprep.subr.bf16.mxu0 %v5565_v35  ;;  %v5626_v35 = vld [vmem:[%s7330_s1 + $0x2a8] sm:$0xff]   ;;  %v5658_v5 = vld [vmem:[%s7330_s1 + $0x3a0] sm:$0xff]   ;;  %v5663_v10 = vld [vmem:[%s7330_s1 + $0x370] sm:$0xff]  }
  0x21   :  { %4980 = vmatpush3.bf16.msra.mxu1 %v5564_v34  ;;  %v5625_v34 = vld [vmem:[%s7330_s1 + $0x2e8] sm:$0xff]  }
  0x22   :  { %3394 = vmatmul.mubr.bf16.vlgmr.msra.gmra.mrb[0].mxu0 %v4493_v32  ;;  %5009 = vmatprep.subr.bf16.mxu1 %v5569_v40  ;;  %v5623_v32 = vld [vmem:[%s7330_s1 + $0x268] sm:$0xff]   ;;  %v5631_v40 = vld [vmem:[%s7330_s1 + $0x278] sm:$0xff]  }
  0x23   :  { %4988 = vmatpush3.bf16.msra.mxu0 %v5568_v39  ;;  %3473 = vmatprep.mubr.bf16.mxu0 %v4498_v7  ;;  %v5630_v39 = vld [vmem:[%s7330_s1 + $0x2b0] sm:$0xff]   ;;  %v5660_v7 = vld [vmem:[%s7330_s1 + $0x328] sm:$0xff]  }
  0x24   :  { %3434 = vmatmul.mubr.bf16.vlgmr.msra.gmra.mrb[0].mxu1 %v4495_v37  ;;  %4989 = vmatprep.subr.bf16.mxu0 %v5571_v42  ;;  %v5628_v37 = vld [vmem:[%s7330_s1 + $0x230] sm:$0xff]   ;;  %v5633_v42 = vld [vmem:[%s7330_s1 + $0x2f8] sm:$0xff]  }
  0x25   :  { %5010 = vmatpush3.bf16.msra.mxu1 %v5570_v41  ;;  %3513 = vmatprep.mubr.bf16.mxu1 %v4500_v12  ;;  %v5632_v41 = vld [vmem:[%s7330_s1 + $0x238] sm:$0xff]   ;;  %v5665_v12 = vld [vmem:[%s7330_s1 + $0x3f0] sm:$0xff]  }
  0x26   :  { %5011 = vmatprep.subr.bf16.mxu1 %v5573_v44 }
  0x27   :  { %4990 = vmatpush3.bf16.msra.mxu0 %v5572_v43  ;;  %v25_v43 = vld [vmem:[%s7331_s0 + $0x20] sm:$0xff] }
  0x28   :  { %4991 = vmatprep.subr.bf16.mxu0 %v5575_v46  ;;  %v4501_v44 = vcombine.low %v25_v43, %v25_v43  ;;  %v5636_v46 = vld [vmem:[%s7330_s1 + $0x2b8] sm:$0xff]  }
  0x29   :  { %5012 = vmatpush3.bf16.msra.mxu1 %v5574_v45  ;;  %v4502_v45 = vcombine.high %v25_v43, %v25_v43  ;;  %v5694_v43 = vld [vmem:[%s7330_s1 + $0x4a0] sm:$0xff]  }
  0x2a   :  { %5013 = vmatprep.subr.bf16.mxu1 %v5577_v48  ;;  %v26_v48 = vld [vmem:[%s7331_s0 + $0x28] sm:$0xff] }
  0x2b   :  { %4992 = vmatpush3.bf16.msra.mxu0 %v5576_v47  ;;  %v5637_v47 = vld [vmem:[%s7330_s1 + $0x340] sm:$0xff]  }
  0x2c   :  { %4993 = vmatprep.subr.bf16.mxu0 %v5579_v50  ;;  %v4504_v50 = vcombine.high %v26_v48, %v26_v48 }
  0x2d   :  { %5014 = vmatpush3.bf16.msra.mxu1 %v5578_v49  ;;  %v4503_v49 = vcombine.low %v26_v48, %v26_v48  ;;  %v5699_v48 = vld [vmem:[%s7330_s1 + $0x470] sm:$0xff]  }
  0x2e   :  { %5015 = vmatprep.subr.bf16.mxu1 %v5581_v52  ;;  %v5641_v52 = vld [vmem:[%s7330_s1 + $0x3c0] sm:$0xff]  }
  0x2f   :  { %4994 = vmatpush3.bf16.msra.mxu0 %v5580_v51  ;;  %v5640_v51 = vld [vmem:[%s7330_s1 + $0x300] sm:$0xff]  }
  0x30   :  { %4995 = vmatprep.subr.bf16.mxu0 %v5583_v54  ;;  %v5643_v54 = vld [vmem:[%s7330_s1 + $0x348] sm:$0xff]  }
  0x31   :  { %5016 = vmatpush3.bf16.msra.mxu1 %v5582_v53  ;;  %v5642_v53 = vld [vmem:[%s7330_s1 + $0x380] sm:$0xff]  }
  0x32   :  { %5017 = vmatprep.subr.bf16.mxu1 %v5585_v56  ;;  %v5645_v56 = vld [vmem:[%s7330_s1 + $0x3c8] sm:$0xff]  }
  0x33   :  { %4996 = vmatpush3.bf16.msra.mxu0 %v5584_v55  ;;  %v5644_v55 = vld [vmem:[%s7330_s1 + $0x308] sm:$0xff]  }
  0x34   :  { %4997 = vmatprep.subr.bf16.mxu0 %v5587_v58  ;;  %v5647_v58 = vld [vmem:[%s7330_s1 + $0x350] sm:$0xff]  }
  0x35   :  { %5018 = vmatpush3.bf16.msra.mxu1 %v5586_v57  ;;  %v5646_v57 = vld [vmem:[%s7330_s1 + $0x388] sm:$0xff]  }
  0x36   :  { %5019 = vmatprep.subr.bf16.mxu1 %v5589_v60  ;;  %v5649_v60 = vld [vmem:[%s7330_s1 + $0x3d0] sm:$0xff]  }
  0x37   :  { %4998 = vmatpush3.bf16.msra.mxu0 %v5588_v59  ;;  %v5648_v59 = vld [vmem:[%s7330_s1 + $0x310] sm:$0xff]  }
  0x38   :  { %4999 = vmatprep.subr.bf16.mxu0 %v5591_v62  ;;  %v5651_v62 = vld [vmem:[%s7330_s1 + $0x358] sm:$0xff]  }
  0x39   :  { %5020 = vmatpush3.bf16.msra.mxu1 %v5590_v61  ;;  %v5650_v61 = vld [vmem:[%s7330_s1 + $0x390] sm:$0xff]  }
  0x3a   :  { %5021 = vmatprep.subr.bf16.mxu1 %v5593_v0  ;;  %v5653_v0 = vld [vmem:[%s7330_s1 + $0x3d8] sm:$0xff]  }
  0x3b   :  { %5000 = vmatpush3.bf16.msra.mxu0 %v5592_v63  ;;  %v5652_v63 = vld [vmem:[%s7330_s1 + $0x318] sm:$0xff]  }
  0x3c   :  { %5001 = vmatprep.subr.bf16.mxu0 %v5595_v2  ;;  %v5655_v2 = vld [vmem:[%s7330_s1 + $0x360] sm:$0xff]  }
  0x3d   :  { %5022 = vmatpush3.bf16.msra.mxu1 %v5594_v1  ;;  %v5654_v1 = vld [vmem:[%s7330_s1 + $0x398] sm:$0xff]  }
  0x3e   :  { %5023 = vmatprep.subr.bf16.mxu1 %v5597_v4  ;;  %v5657_v4 = vld [vmem:[%s7330_s1 + $0x3e0] sm:$0xff]  }
  0x3f   :  { %5002 = vmatpush3.bf16.msra.mxu0 %v5596_v3  ;;  %v5656_v3 = vld [vmem:[%s7330_s1 + $0x320] sm:$0xff]  }
  0x40   :  { %5031 = vmatprep.subr.bf16.mxu0 %v5601_v9  ;;  %v5662_v9 = vld [vmem:[%s7330_s1 + $0x3a8] sm:$0xff]  }
  0x41   :  { %5024 = vmatpush3.bf16.msra.mxu1 %v5600_v8  ;;  %v5661_v8 = vld [vmem:[%s7330_s1 + $0x3e8] sm:$0xff]  }
  0x42   :  { %3474 = vmatmul.mubr.bf16.vlgmr.msra.gmra.mrb[4].mxu0 %v4497_v6  ;;  %5053 = vmatprep.subr.bf16.mxu1 %v5605_v14  ;;  %v5659_v6 = vld [vmem:[%s7330_s1 + $0x368] sm:$0xff]   ;;  %v5667_v14 = vld [vmem:[%s7330_s1 + $0x378] sm:$0xff]  }
  0x43   :  { %5032 = vmatpush3.bf16.msra.mxu0 %v5604_v13  ;;  %3553 = vmatprep.mubr.bf16.mxu0 %v4502_v45  ;;  %v5666_v13 = vld [vmem:[%s7330_s1 + $0x3b0] sm:$0xff]   ;;  %v5696_v45 = vld [vmem:[%s7330_s1 + $0x428] sm:$0xff]  }
  0x44   :  { %3514 = vmatmul.mubr.bf16.vlgmr.msra.gmra.mrb[4].mxu1 %v4499_v11  ;;  %5033 = vmatprep.subr.bf16.mxu0 %v5607_v16  ;;  %v5664_v11 = vld [vmem:[%s7330_s1 + $0x330] sm:$0xff]   ;;  %v5669_v16 = vld [vmem:[%s7330_s1 + $0x3f8] sm:$0xff]  }
  0x45   :  { %5054 = vmatpush3.bf16.msra.mxu1 %v5606_v15  ;;  %3593 = vmatprep.mubr.bf16.mxu1 %v4504_v50  ;;  %v5668_v15 = vld [vmem:[%s7330_s1 + $0x338] sm:$0xff]   ;;  %v5701_v50 = vld [vmem:[%s7330_s1 + $0x4f0] sm:$0xff]  }
  0x46   :  { %5055 = vmatprep.subr.bf16.mxu1 %v5609_v18 }
  0x47   :  { %5034 = vmatpush3.bf16.msra.mxu0 %v5608_v17  ;;  %v27_v17 = vld [vmem:[%s7331_s0 + $0x30] sm:$0xff] }
  0x48   :  { %5035 = vmatprep.subr.bf16.mxu0 %v5611_v20  ;;  %v4505_v18 = vcombine.low %v27_v17, %v27_v17  ;;  %v5672_v20 = vld [vmem:[%s7330_s1 + $0x3b8] sm:$0xff]  }
  0x49   :  { %5056 = vmatpush3.bf16.msra.mxu1 %v5610_v19  ;;  %v4506_v19 = vcombine.high %v27_v17, %v27_v17  ;;  %v5730_v17 = vld [vmem:[%s7330_s1 + $0x5a0] sm:$0xff]  }
  0x4a   :  { %5057 = vmatprep.subr.bf16.mxu1 %v5613_v22  ;;  %v28_v22 = vld [vmem:[%s7331_s0 + $0x38] sm:$0xff] }
  0x4b   :  { %5036 = vmatpush3.bf16.msra.mxu0 %v5612_v21  ;;  %v5673_v21 = vld [vmem:[%s7330_s1 + $0x440] sm:$0xff]  }
  0x4c   :  { %5037 = vmatprep.subr.bf16.mxu0 %v5615_v24  ;;  %v4508_v24 = vcombine.high %v28_v22, %v28_v22 }
  0x4d   :  { %5058 = vmatpush3.bf16.msra.mxu1 %v5614_v23  ;;  %v4507_v23 = vcombine.low %v28_v22, %v28_v22  ;;  %v5735_v22 = vld [vmem:[%s7330_s1 + $0x570] sm:$0xff]  }
  0x4e   :  { %5059 = vmatprep.subr.bf16.mxu1 %v5617_v26  ;;  %v5677_v26 = vld [vmem:[%s7330_s1 + $0x4c0] sm:$0xff]  }
  0x4f   :  { %5038 = vmatpush3.bf16.msra.mxu0 %v5616_v25  ;;  %v5676_v25 = vld [vmem:[%s7330_s1 + $0x400] sm:$0xff]  }
  0x50   :  { %5039 = vmatprep.subr.bf16.mxu0 %v5619_v28  ;;  %v5679_v28 = vld [vmem:[%s7330_s1 + $0x448] sm:$0xff]  }
  0x51   :  { %5060 = vmatpush3.bf16.msra.mxu1 %v5618_v27  ;;  %v5678_v27 = vld [vmem:[%s7330_s1 + $0x480] sm:$0xff]  }
  0x52   :  { %5061 = vmatprep.subr.bf16.mxu1 %v5621_v30  ;;  %v5681_v30 = vld [vmem:[%s7330_s1 + $0x4c8] sm:$0xff]  }
  0x53   :  { %5040 = vmatpush3.bf16.msra.mxu0 %v5620_v29  ;;  %v5680_v29 = vld [vmem:[%s7330_s1 + $0x408] sm:$0xff]  }
  0x54   :  { %5041 = vmatprep.subr.bf16.mxu0 %v5623_v32  ;;  %v5683_v32 = vld [vmem:[%s7330_s1 + $0x450] sm:$0xff]  }
  0x55   :  { %5062 = vmatpush3.bf16.msra.mxu1 %v5622_v31  ;;  %v5682_v31 = vld [vmem:[%s7330_s1 + $0x488] sm:$0xff]  }
  0x56   :  { %5063 = vmatprep.subr.bf16.mxu1 %v5625_v34  ;;  %v5685_v34 = vld [vmem:[%s7330_s1 + $0x4d0] sm:$0xff]  }
  0x57   :  { %5042 = vmatpush3.bf16.msra.mxu0 %v5624_v33  ;;  %v5684_v33 = vld [vmem:[%s7330_s1 + $0x410] sm:$0xff]  }
  0x58   :  { %5043 = vmatprep.subr.bf16.mxu0 %v5627_v36  ;;  %v5687_v36 = vld [vmem:[%s7330_s1 + $0x458] sm:$0xff]  }
  0x59   :  { %5064 = vmatpush3.bf16.msra.mxu1 %v5626_v35  ;;  %v5686_v35 = vld [vmem:[%s7330_s1 + $0x490] sm:$0xff]  }
  0x5a   :  { %5065 = vmatprep.subr.bf16.mxu1 %v5629_v38  ;;  %v5689_v38 = vld [vmem:[%s7330_s1 + $0x4d8] sm:$0xff]  }
  0x5b   :  { %5044 = vmatpush3.bf16.msra.mxu0 %v5628_v37  ;;  %v5688_v37 = vld [vmem:[%s7330_s1 + $0x418] sm:$0xff]  }
  0x5c   :  { %5045 = vmatprep.subr.bf16.mxu0 %v5631_v40  ;;  %v5691_v40 = vld [vmem:[%s7330_s1 + $0x460] sm:$0xff]  }
  0x5d   :  { %5066 = vmatpush3.bf16.msra.mxu1 %v5630_v39  ;;  %v5690_v39 = vld [vmem:[%s7330_s1 + $0x498] sm:$0xff]  }
  0x5e   :  { %5067 = vmatprep.subr.bf16.mxu1 %v5633_v42  ;;  %v5693_v42 = vld [vmem:[%s7330_s1 + $0x4e0] sm:$0xff]  }
  0x5f   :  { %5046 = vmatpush3.bf16.msra.mxu0 %v5632_v41  ;;  %v5692_v41 = vld [vmem:[%s7330_s1 + $0x420] sm:$0xff]  }
  0x60   :  { %5075 = vmatprep.subr.bf16.mxu0 %v5637_v47  ;;  %v5698_v47 = vld [vmem:[%s7330_s1 + $0x4a8] sm:$0xff]  }
  0x61   :  { %5068 = vmatpush3.bf16.msra.mxu1 %v5636_v46  ;;  %v5697_v46 = vld [vmem:[%s7330_s1 + $0x4e8] sm:$0xff]  }
  0x62   :  { %3554 = vmatmul.mubr.bf16.vlgmr.msra.gmra.mrb[8].mxu0 %v4501_v44  ;;  %5097 = vmatprep.subr.bf16.mxu1 %v5641_v52  ;;  %v5695_v44 = vld [vmem:[%s7330_s1 + $0x468] sm:$0xff]   ;;  %v5703_v52 = vld [vmem:[%s7330_s1 + $0x478] sm:$0xff]  }
  0x63   :  { %5076 = vmatpush3.bf16.msra.mxu0 %v5640_v51  ;;  %3633 = vmatprep.mubr.bf16.mxu0 %v4506_v19  ;;  %v5702_v51 = vld [vmem:[%s7330_s1 + $0x4b0] sm:$0xff]   ;;  %v5732_v19 = vld [vmem:[%s7330_s1 + $0x528] sm:$0xff]  }
  0x64   :  { %3594 = vmatmul.mubr.bf16.vlgmr.msra.gmra.mrb[8].mxu1 %v4503_v49  ;;  %5077 = vmatprep.subr.bf16.mxu0 %v5643_v54  ;;  %v5700_v49 = vld [vmem:[%s7330_s1 + $0x430] sm:$0xff]   ;;  %v5705_v54 = vld [vmem:[%s7330_s1 + $0x4f8] sm:$0xff]  }
  0x65   :  { %5098 = vmatpush3.bf16.msra.mxu1 %v5642_v53  ;;  %3673 = vmatprep.mubr.bf16.mxu1 %v4508_v24  ;;  %v5704_v53 = vld [vmem:[%s7330_s1 + $0x438] sm:$0xff]   ;;  %v5737_v24 = vld [vmem:[%s7330_s1 + $0x5f0] sm:$0xff]  }
  0x66   :  { %5099 = vmatprep.subr.bf16.mxu1 %v5645_v56 }
  0x67   :  { %5078 = vmatpush3.bf16.msra.mxu0 %v5644_v55  ;;  %v29_v55 = vld [vmem:[%s7331_s0 + $0x40] sm:$0xff] }
  0x68   :  { %5079 = vmatprep.subr.bf16.mxu0 %v5647_v58  ;;  %v4509_v56 = vcombine.low %v29_v55, %v29_v55  ;;  %v5708_v58 = vld [vmem:[%s7330_s1 + $0x4b8] sm:$0xff]  }
  0x69   :  { %5100 = vmatpush3.bf16.msra.mxu1 %v5646_v57  ;;  %v4510_v57 = vcombine.high %v29_v55, %v29_v55  ;;  %v5766_v55 = vld [vmem:[%s7330_s1 + $0x6a0] sm:$0xff]  }
  0x6a   :  { %5101 = vmatprep.subr.bf16.mxu1 %v5649_v60  ;;  %v30_v60 = vld [vmem:[%s7331_s0 + $0x48] sm:$0xff] }
  0x6b   :  { %5080 = vmatpush3.bf16.msra.mxu0 %v5648_v59  ;;  %v5709_v59 = vld [vmem:[%s7330_s1 + $0x540] sm:$0xff]  }
  0x6c   :  { %5081 = vmatprep.subr.bf16.mxu0 %v5651_v62  ;;  %v4512_v62 = vcombine.high %v30_v60, %v30_v60 }
  0x6d   :  { %5102 = vmatpush3.bf16.msra.mxu1 %v5650_v61  ;;  %v4511_v61 = vcombine.low %v30_v60, %v30_v60  ;;  %v5771_v60 = vld [vmem:[%s7330_s1 + $0x670] sm:$0xff]  }
  0x6e   :  { %5103 = vmatprep.subr.bf16.mxu1 %v5653_v0  ;;  %v5713_v0 = vld [vmem:[%s7330_s1 + $0x5c0] sm:$0xff]  }
  0x6f   :  { %5082 = vmatpush3.bf16.msra.mxu0 %v5652_v63  ;;  %v5712_v63 = vld [vmem:[%s7330_s1 + $0x500] sm:$0xff]  }
  0x70   :  { %5083 = vmatprep.subr.bf16.mxu0 %v5655_v2  ;;  %v5715_v2 = vld [vmem:[%s7330_s1 + $0x548] sm:$0xff]  }
  0x71   :  { %5104 = vmatpush3.bf16.msra.mxu1 %v5654_v1  ;;  %v5714_v1 = vld [vmem:[%s7330_s1 + $0x580] sm:$0xff]  }
  0x72   :  { %5105 = vmatprep.subr.bf16.mxu1 %v5657_v4  ;;  %v5717_v4 = vld [vmem:[%s7330_s1 + $0x5c8] sm:$0xff]  }
  0x73   :  { %5084 = vmatpush3.bf16.msra.mxu0 %v5656_v3  ;;  %v5716_v3 = vld [vmem:[%s7330_s1 + $0x508] sm:$0xff]  }
  0x74   :  { %5085 = vmatprep.subr.bf16.mxu0 %v5659_v6  ;;  %v5719_v6 = vld [vmem:[%s7330_s1 + $0x550] sm:$0xff]  }
  0x75   :  { %5106 = vmatpush3.bf16.msra.mxu1 %v5658_v5  ;;  %v5718_v5 = vld [vmem:[%s7330_s1 + $0x588] sm:$0xff]  }
  0x76   :  { %5107 = vmatprep.subr.bf16.mxu1 %v5661_v8  ;;  %v5721_v8 = vld [vmem:[%s7330_s1 + $0x5d0] sm:$0xff]  }
  0x77   :  { %5086 = vmatpush3.bf16.msra.mxu0 %v5660_v7  ;;  %v5720_v7 = vld [vmem:[%s7330_s1 + $0x510] sm:$0xff]  }
  0x78   :  { %5087 = vmatprep.subr.bf16.mxu0 %v5663_v10  ;;  %v5723_v10 = vld [vmem:[%s7330_s1 + $0x558] sm:$0xff]  }
  0x79   :  { %5108 = vmatpush3.bf16.msra.mxu1 %v5662_v9  ;;  %v5722_v9 = vld [vmem:[%s7330_s1 + $0x590] sm:$0xff]  }
  0x7a   :  { %5109 = vmatprep.subr.bf16.mxu1 %v5665_v12  ;;  %v5725_v12 = vld [vmem:[%s7330_s1 + $0x5d8] sm:$0xff]  }
  0x7b   :  { %5088 = vmatpush3.bf16.msra.mxu0 %v5664_v11  ;;  %v5724_v11 = vld [vmem:[%s7330_s1 + $0x518] sm:$0xff]  }
  0x7c   :  { %5089 = vmatprep.subr.bf16.mxu0 %v5667_v14  ;;  %v5727_v14 = vld [vmem:[%s7330_s1 + $0x560] sm:$0xff]  }
  0x7d   :  { %5110 = vmatpush3.bf16.msra.mxu1 %v5666_v13  ;;  %v5726_v13 = vld [vmem:[%s7330_s1 + $0x598] sm:$0xff]  }
  0x7e   :  { %5111 = vmatprep.subr.bf16.mxu1 %v5669_v16  ;;  %v5729_v16 = vld [vmem:[%s7330_s1 + $0x5e0] sm:$0xff]  }
  0x7f   :  { %5090 = vmatpush3.bf16.msra.mxu0 %v5668_v15  ;;  %v5728_v15 = vld [vmem:[%s7330_s1 + $0x520] sm:$0xff]  }
  0x80   :  { %5119 = vmatprep.subr.bf16.mxu0 %v5673_v21  ;;  %v5734_v21 = vld [vmem:[%s7330_s1 + $0x5a8] sm:$0xff]  }
  0x81   :  { %5112 = vmatpush3.bf16.msra.mxu1 %v5672_v20  ;;  %v5733_v20 = vld [vmem:[%s7330_s1 + $0x5e8] sm:$0xff]  }
  0x82   :  { %3634 = vmatmul.mubr.bf16.vlgmr.msra.gmra.mrb[12].mxu0 %v4505_v18  ;;  %5141 = vmatprep.subr.bf16.mxu1 %v5677_v26  ;;  %v5731_v18 = vld [vmem:[%s7330_s1 + $0x568] sm:$0xff]   ;;  %v5739_v26 = vld [vmem:[%s7330_s1 + $0x578] sm:$0xff]  }
  0x83   :  { %5120 = vmatpush3.bf16.msra.mxu0 %v5676_v25  ;;  %3713 = vmatprep.mubr.bf16.mxu0 %v4510_v57  ;;  %v5738_v25 = vld [vmem:[%s7330_s1 + $0x5b0] sm:$0xff]   ;;  %v5768_v57 = vld [vmem:[%s7330_s1 + $0x628] sm:$0xff]  }
  0x84   :  { %3674 = vmatmul.mubr.bf16.vlgmr.msra.gmra.mrb[12].mxu1 %v4507_v23  ;;  %5121 = vmatprep.subr.bf16.mxu0 %v5679_v28  ;;  %v5736_v23 = vld [vmem:[%s7330_s1 + $0x530] sm:$0xff]   ;;  %v5741_v28 = vld [vmem:[%s7330_s1 + $0x5f8] sm:$0xff]  }
  0x85   :  { %5142 = vmatpush3.bf16.msra.mxu1 %v5678_v27  ;;  %3753 = vmatprep.mubr.bf16.mxu1 %v4512_v62  ;;  %v5740_v27 = vld [vmem:[%s7330_s1 + $0x538] sm:$0xff]   ;;  %v5773_v62 = vld [vmem:[%s7330_s1 + $0x6f0] sm:$0xff]  }
  0x86   :  { %5143 = vmatprep.subr.bf16.mxu1 %v5681_v30 }
  0x87   :  { %5122 = vmatpush3.bf16.msra.mxu0 %v5680_v29  ;;  %v31_v29 = vld [vmem:[%s7331_s0 + $0x50] sm:$0xff] }
  0x88   :  { %5123 = vmatprep.subr.bf16.mxu0 %v5683_v32  ;;  %v4513_v30 = vcombine.low %v31_v29, %v31_v29  ;;  %v5744_v32 = vld [vmem:[%s7330_s1 + $0x5b8] sm:$0xff]  }
  0x89   :  { %5144 = vmatpush3.bf16.msra.mxu1 %v5682_v31  ;;  %v4514_v31 = vcombine.high %v31_v29, %v31_v29  ;;  %v5801_v29 = vld [vmem:[%s7330_s1 + $0x7e0] sm:$0xff]  }
  0x8a   :  { %5145 = vmatprep.subr.bf16.mxu1 %v5685_v34  ;;  %v32_v34 = vld [vmem:[%s7331_s0 + $0x58] sm:$0xff] }
  0x8b   :  { %5124 = vmatpush3.bf16.msra.mxu0 %v5684_v33  ;;  %v5745_v33 = vld [vmem:[%s7330_s1 + $0x640] sm:$0xff]  }
  0x8c   :  { %5125 = vmatprep.subr.bf16.mxu0 %v5687_v36  ;;  %v4516_v36 = vcombine.high %v32_v34, %v32_v34 }
  0x8d   :  { %5146 = vmatpush3.bf16.msra.mxu1 %v5686_v35  ;;  %v4515_v35 = vcombine.low %v32_v34, %v32_v34 }
  0x8e   :  { %5147 = vmatprep.subr.bf16.mxu1 %v5689_v38  ;;  %v5749_v38 = vld [vmem:[%s7330_s1 + $0x6c0] sm:$0xff]  }
  0x8f   :  { %5126 = vmatpush3.bf16.msra.mxu0 %v5688_v37  ;;  %v5748_v37 = vld [vmem:[%s7330_s1 + $0x600] sm:$0xff]  }
  0x90   :  { %5127 = vmatprep.subr.bf16.mxu0 %v5691_v40  ;;  %v5751_v40 = vld [vmem:[%s7330_s1 + $0x648] sm:$0xff]  }
  0x91   :  { %5148 = vmatpush3.bf16.msra.mxu1 %v5690_v39  ;;  %v5750_v39 = vld [vmem:[%s7330_s1 + $0x680] sm:$0xff]  }
  0x92   :  { %5149 = vmatprep.subr.bf16.mxu1 %v5693_v42  ;;  %v5753_v42 = vld [vmem:[%s7330_s1 + $0x6c8] sm:$0xff]  }
  0x93   :  { %5128 = vmatpush3.bf16.msra.mxu0 %v5692_v41  ;;  %v5752_v41 = vld [vmem:[%s7330_s1 + $0x608] sm:$0xff]  }
  0x94   :  { %5129 = vmatprep.subr.bf16.mxu0 %v5695_v44  ;;  %v5755_v44 = vld [vmem:[%s7330_s1 + $0x650] sm:$0xff]  }
  0x95   :  { %5150 = vmatpush3.bf16.msra.mxu1 %v5694_v43  ;;  %v5754_v43 = vld [vmem:[%s7330_s1 + $0x688] sm:$0xff]  }
  0x96   :  { %5151 = vmatprep.subr.bf16.mxu1 %v5697_v46  ;;  %v5757_v46 = vld [vmem:[%s7330_s1 + $0x6d0] sm:$0xff]  }
  0x97   :  { %5130 = vmatpush3.bf16.msra.mxu0 %v5696_v45  ;;  %v5756_v45 = vld [vmem:[%s7330_s1 + $0x610] sm:$0xff]  }
  0x98   :  { %5131 = vmatprep.subr.bf16.mxu0 %v5699_v48  ;;  %v5759_v48 = vld [vmem:[%s7330_s1 + $0x658] sm:$0xff]  }
  0x99   :  { %5152 = vmatpush3.bf16.msra.mxu1 %v5698_v47  ;;  %v5758_v47 = vld [vmem:[%s7330_s1 + $0x690] sm:$0xff]  }
  0x9a   :  { %5153 = vmatprep.subr.bf16.mxu1 %v5701_v50  ;;  %v5761_v50 = vld [vmem:[%s7330_s1 + $0x6d8] sm:$0xff]  }
  0x9b   :  { %5132 = vmatpush3.bf16.msra.mxu0 %v5700_v49  ;;  %v5760_v49 = vld [vmem:[%s7330_s1 + $0x618] sm:$0xff]  }
  0x9c   :  { %5133 = vmatprep.subr.bf16.mxu0 %v5703_v52  ;;  %v5763_v52 = vld [vmem:[%s7330_s1 + $0x660] sm:$0xff]  }
  0x9d   :  { %5154 = vmatpush3.bf16.msra.mxu1 %v5702_v51  ;;  %v5762_v51 = vld [vmem:[%s7330_s1 + $0x698] sm:$0xff]  }
  0x9e   :  { %5155 = vmatprep.subr.bf16.mxu1 %v5705_v54  ;;  %v5765_v54 = vld [vmem:[%s7330_s1 + $0x6e0] sm:$0xff]  }
  0x9f   :  { %5134 = vmatpush3.bf16.msra.mxu0 %v5704_v53  ;;  %v5764_v53 = vld [vmem:[%s7330_s1 + $0x620] sm:$0xff]  }
  0xa0   :  { %5163 = vmatprep.subr.bf16.mxu0 %v5709_v59  ;;  %v5770_v59 = vld [vmem:[%s7330_s1 + $0x6a8] sm:$0xff]  }
  0xa1   :  { %5156 = vmatpush3.bf16.msra.mxu1 %v5708_v58  ;;  %v5769_v58 = vld [vmem:[%s7330_s1 + $0x6e8] sm:$0xff]  }
  0xa2   :  { %3714 = vmatmul.mubr.bf16.vlgmr.msra.gmra.mrb[16].mxu0 %v4509_v56  ;;  %5185 = vmatprep.subr.bf16.mxu1 %v5713_v0  ;;  %v5767_v56 = vld [vmem:[%s7330_s1 + $0x668] sm:$0xff]   ;;  %v5775_v0 = vld [vmem:[%s7330_s1 + $0x678] sm:$0xff]  }
  0xa3   :  { %5164 = vmatpush3.bf16.msra.mxu0 %v5712_v63  ;;  %3793 = vmatprep.mubr.bf16.mxu0 %v4514_v31  ;;  %v5774_v63 = vld [vmem:[%s7330_s1 + $0x6b0] sm:$0xff]   ;;  %v5802_v31 = vld [vmem:[%s7330_s1 + $0x7a0] sm:$0xff]  }
  0xa4   :  { %3754 = vmatmul.mubr.bf16.vlgmr.msra.gmra.mrb[16].mxu1 %v4511_v61  ;;  %5165 = vmatprep.subr.bf16.mxu0 %v5715_v2  ;;  %v5772_v61 = vld [vmem:[%s7330_s1 + $0x630] sm:$0xff]   ;;  %v5777_v2 = vld [vmem:[%s7330_s1 + $0x6f8] sm:$0xff]  }
  0xa5   :  { %5186 = vmatpush3.bf16.msra.mxu1 %v5714_v1  ;;  %3833 = vmatprep.mubr.bf16.mxu1 %v4516_v36  ;;  %v5776_v1 = vld [vmem:[%s7330_s1 + $0x638] sm:$0xff]  }
  0xa6   :  { %5187 = vmatprep.subr.bf16.mxu1 %v5717_v4 }
  0xa7   :  { %5166 = vmatpush3.bf16.msra.mxu0 %v5716_v3  ;;  %v33_v3 = vld [vmem:[%s7331_s0 + $0x60] sm:$0xff] }
  0xa8   :  { %5167 = vmatprep.subr.bf16.mxu0 %v5719_v6  ;;  %v4517_v4 = vcombine.low %v33_v3, %v33_v3  ;;  %v5780_v6 = vld [vmem:[%s7330_s1 + $0x6b8] sm:$0xff]  }
  0xa9   :  { %5188 = vmatpush3.bf16.msra.mxu1 %v5718_v5  ;;  %v4518_v5 = vcombine.high %v33_v3, %v33_v3  ;;  %v5825_v3 = vld [vmem:[%s7330_s1 + $0x8c8] sm:$0xff]  }
  0xaa   :  { %5189 = vmatprep.subr.bf16.mxu1 %v5721_v8  ;;  %v34_v8 = vld [vmem:[%s7331_s0 + $0x68] sm:$0xff] }
  0xab   :  { %5168 = vmatpush3.bf16.msra.mxu0 %v5720_v7  ;;  %v5781_v7 = vld [vmem:[%s7330_s1 + $0x740] sm:$0xff]  }
  0xac   :  { %5169 = vmatprep.subr.bf16.mxu0 %v5723_v10  ;;  %v4520_v10 = vcombine.high %v34_v8, %v34_v8 }
  0xad   :  { %5190 = vmatpush3.bf16.msra.mxu1 %v5722_v9  ;;  %v4519_v9 = vcombine.low %v34_v8, %v34_v8  ;;  %v5830_v8 = vld [vmem:[%s7330_s1 + $0x890] sm:$0xff]  }
  0xae   :  { %5191 = vmatprep.subr.bf16.mxu1 %v5725_v12  ;;  %v5785_v12 = vld [vmem:[%s7330_s1 + $0x7c0] sm:$0xff]  }
  0xaf   :  { %5170 = vmatpush3.bf16.msra.mxu0 %v5724_v11  ;;  %v5784_v11 = vld [vmem:[%s7330_s1 + $0x700] sm:$0xff]  }
  0xb0   :  { %5171 = vmatprep.subr.bf16.mxu0 %v5727_v14  ;;  %v5787_v14 = vld [vmem:[%s7330_s1 + $0x748] sm:$0xff]  }
  0xb1   :  { %5192 = vmatpush3.bf16.msra.mxu1 %v5726_v13  ;;  %v5786_v13 = vld [vmem:[%s7330_s1 + $0x780] sm:$0xff]  }
  0xb2   :  { %5193 = vmatprep.subr.bf16.mxu1 %v5729_v16  ;;  %v5789_v16 = vld [vmem:[%s7330_s1 + $0x7c8] sm:$0xff]  }
  0xb3   :  { %5172 = vmatpush3.bf16.msra.mxu0 %v5728_v15  ;;  %v5788_v15 = vld [vmem:[%s7330_s1 + $0x708] sm:$0xff]  }
  0xb4   :  { %5173 = vmatprep.subr.bf16.mxu0 %v5731_v18  ;;  %v5791_v18 = vld [vmem:[%s7330_s1 + $0x750] sm:$0xff]  }
  0xb5   :  { %5194 = vmatpush3.bf16.msra.mxu1 %v5730_v17  ;;  %v5790_v17 = vld [vmem:[%s7330_s1 + $0x788] sm:$0xff]  }
  0xb6   :  { %5195 = vmatprep.subr.bf16.mxu1 %v5733_v20  ;;  %v5793_v20 = vld [vmem:[%s7330_s1 + $0x7d0] sm:$0xff]  }
  0xb7   :  { %5174 = vmatpush3.bf16.msra.mxu0 %v5732_v19  ;;  %v5792_v19 = vld [vmem:[%s7330_s1 + $0x710] sm:$0xff]  }
  0xb8   :  { %5175 = vmatprep.subr.bf16.mxu0 %v5735_v22  ;;  %v5795_v22 = vld [vmem:[%s7330_s1 + $0x758] sm:$0xff]  }
  0xb9   :  { %5196 = vmatpush3.bf16.msra.mxu1 %v5734_v21  ;;  %v5794_v21 = vld [vmem:[%s7330_s1 + $0x790] sm:$0xff]  }
  0xba   :  { %5197 = vmatprep.subr.bf16.mxu1 %v5737_v24  ;;  %v5797_v24 = vld [vmem:[%s7330_s1 + $0x7d8] sm:$0xff]  }
  0xbb   :  { %5176 = vmatpush3.bf16.msra.mxu0 %v5736_v23  ;;  %v5796_v23 = vld [vmem:[%s7330_s1 + $0x718] sm:$0xff]  }
  0xbc   :  { %5177 = vmatprep.subr.bf16.mxu0 %v5739_v26  ;;  %v5799_v26 = vld [vmem:[%s7330_s1 + $0x760] sm:$0xff]  }
  0xbd   :  { %5198 = vmatpush3.bf16.msra.mxu1 %v5738_v25  ;;  %v5798_v25 = vld [vmem:[%s7330_s1 + $0x798] sm:$0xff]  }
  0xbe   :  { %5199 = vmatprep.subr.bf16.mxu1 %v5741_v28 }
  0xbf   :  { %5178 = vmatpush3.bf16.msra.mxu0 %v5740_v27  ;;  %v5800_v27 = vld [vmem:[%s7330_s1 + $0x720] sm:$0xff]  }
  0xc0   :  { %5207 = vmatprep.subr.bf16.mxu0 %v5745_v33 }
  0xc1   :  { %5200 = vmatpush3.bf16.msra.mxu1 %v5744_v32  ;;  %v4492_v32 = vld [vmem:[%s7332_s2] ss:$0 sm:$0xff] }
  0xc2   :  { %3794 = vmatmul.mubr.bf16.vlgmr.msra.gmra.mrb[20].mxu0 %v4513_v30  ;;  %5229 = vmatprep.subr.bf16.mxu1 %v5749_v38  ;;  %v5804_v38 = vld [vmem:[%s7330_s1 + $0x728] sm:$0xff]  }
  0xc3   :  { %5208 = vmatpush3.bf16.msra.mxu0 %v5748_v37  ;;  %3873 = vmatprep.mubr.bf16.mxu0 %v4518_v5  ;;  %v5827_v5 = vld [vmem:[%s7330_s1 + $0x850] sm:$0xff]  }
  0xc4   :  { %3834 = vmatmul.mubr.bf16.vlgmr.msra.gmra.mrb[20].mxu1 %v4515_v35  ;;  %5209 = vmatprep.subr.bf16.mxu0 %v5751_v40  ;;  %v5803_v35 = vld [vmem:[%s7330_s1 + $0x768] sm:$0xff]  }
  0xc5   :  { %5230 = vmatpush3.bf16.msra.mxu1 %v5750_v39  ;;  %3913 = vmatprep.mubr.bf16.mxu1 %v4520_v10  ;;  %v5832_v10 = vld [vmem:[%s7330_s1 + $0x818] sm:$0xff]  }
  0xc6   :  { %5231 = vmatprep.subr.bf16.mxu1 %v5753_v42 }
  0xc7   :  { %5210 = vmatpush3.bf16.msra.mxu0 %v5752_v41  ;;  %v5805_v41 = vld [vmem:[%s7330_s1 + $0x7e8] sm:$0xff]  }
  0xc8   :  { %5211 = vmatprep.subr.bf16.mxu0 %v5755_v44 }
  0xc9   :  { %5232 = vmatpush3.bf16.msra.mxu1 %v5754_v43  ;;  %v5806_v43 = vld [vmem:[%s7330_s1 + $0x7a8] sm:$0xff]  }
  0xca   :  { %5233 = vmatprep.subr.bf16.mxu1 %v5757_v46 }
  0xcb   :  { %5212 = vmatpush3.bf16.msra.mxu0 %v5756_v45  ;;  %v5807_v45 = vld [vmem:[%s7330_s1 + $0x770] sm:$0xff]  }
  0xcc   :  { %5213 = vmatprep.subr.bf16.mxu0 %v5759_v48  ;;  %v5808_v48 = vld [vmem:[%s7330_s1 + $0x730] sm:$0xff]  }
  0xcd   :  { %5234 = vmatpush3.bf16.msra.mxu1 %v5758_v47 }
  0xce   :  { %5235 = vmatprep.subr.bf16.mxu1 %v5761_v50  ;;  %v5810_v50 = vld [vmem:[%s7330_s1 + $0x7b0] sm:$0xff]  }
  0xcf   :  { %5214 = vmatpush3.bf16.msra.mxu0 %v5760_v49  ;;  %v5809_v49 = vld [vmem:[%s7330_s1 + $0x7f0] sm:$0xff]  }
  0xd0   :  { %5215 = vmatprep.subr.bf16.mxu0 %v5763_v52  ;;  %v5812_v52 = vld [vmem:[%s7330_s1 + $0x738] sm:$0xff]  }
  0xd1   :  { %5236 = vmatpush3.bf16.msra.mxu1 %v5762_v51  ;;  %v5811_v51 = vld [vmem:[%s7330_s1 + $0x778] sm:$0xff]  }
  0xd2   :  { %5237 = vmatprep.subr.bf16.mxu1 %v5765_v54  ;;  %v35_v54 = vld [vmem:[%s7331_s0 + $0x70] sm:$0xff] }
  0xd3   :  { %5216 = vmatpush3.bf16.msra.mxu0 %v5764_v53  ;;  %v5813_v53 = vld [vmem:[%s7330_s1 + $0x7f8] sm:$0xff]  }
  0xd4   :  { %5217 = vmatprep.subr.bf16.mxu0 %v5767_v56  ;;  %v4522_v56 = vcombine.high %v35_v54, %v35_v54 }
  0xd5   :  { %5238 = vmatpush3.bf16.msra.mxu1 %v5766_v55  ;;  %v4521_v55 = vcombine.low %v35_v54, %v35_v54  ;;  %v5862_v54 = vld [vmem:[%s7330_s1 + $0x988] sm:$0xff]  }
  0xd6   :  { %5239 = vmatprep.subr.bf16.mxu1 %v5769_v58  ;;  %v5817_v58 = vld [vmem:[%s7330_s1 + $0x840] sm:$0xff]  }
  0xd7   :  { %5218 = vmatpush3.bf16.msra.mxu0 %v5768_v57  ;;  %v5816_v57 = vld [vmem:[%s7330_s1 + $0x7b8] sm:$0xff]  }
  0xd8   :  { %5219 = vmatprep.subr.bf16.mxu0 %v5771_v60 }
  0xd9   :  { %5240 = vmatpush3.bf16.msra.mxu1 %v5770_v59  ;;  %v36_v59 = vld [vmem:[%s7331_s0 + $0x78] sm:$0xff] }
  0xda   :  { %5241 = vmatprep.subr.bf16.mxu1 %v5773_v62  ;;  %v4523_v60 = vcombine.low %v36_v59, %v36_v59  ;;  %v5820_v62 = vld [vmem:[%s7330_s1 + $0x800] sm:$0xff]  }
  0xdb   :  { %5220 = vmatpush3.bf16.msra.mxu0 %v5772_v61  ;;  %v4524_v61 = vcombine.high %v36_v59, %v36_v59  ;;  %v5867_v59 = vld [vmem:[%s7330_s1 + $0x958] sm:$0xff]  }
  0xdc   :  { %5221 = vmatprep.subr.bf16.mxu0 %v5775_v0  ;;  %v5822_v0 = vld [vmem:[%s7330_s1 + $0x880] sm:$0xff]  }
  0xdd   :  { %5242 = vmatpush3.bf16.msra.mxu1 %v5774_v63  ;;  %v5821_v63 = vld [vmem:[%s7330_s1 + $0x8c0] sm:$0xff]  }
  0xde   :  { %5243 = vmatprep.subr.bf16.mxu1 %v5777_v2  ;;  %v5824_v2 = vld [vmem:[%s7330_s1 + $0x808] sm:$0xff]  }
  0xdf   :  { %5222 = vmatpush3.bf16.msra.mxu0 %v5776_v1  ;;  %v5823_v1 = vld [vmem:[%s7330_s1 + $0x848] sm:$0xff]  }
  0xe0   :  { %5251 = vmatprep.subr.bf16.mxu0 %v5781_v7  ;;  %v5829_v7 = vld [vmem:[%s7330_s1 + $0x8d0] sm:$0xff]  }
  0xe1   :  { %5244 = vmatpush3.bf16.msra.mxu1 %v5780_v6  ;;  %v5828_v6 = vld [vmem:[%s7330_s1 + $0x810] sm:$0xff]  }
  0xe2   :  { %3874 = vmatmul.mubr.bf16.vlgmr.msra.gmra.mrb[24].mxu0 %v4517_v4  ;;  %5273 = vmatprep.subr.bf16.mxu1 %v5785_v12  ;;  %v5826_v4 = vld [vmem:[%s7330_s1 + $0x888] sm:$0xff]   ;;  %v5834_v12 = vld [vmem:[%s7330_s1 + $0x898] sm:$0xff]  }
  0xe3   :  { %5252 = vmatpush3.bf16.msra.mxu0 %v5784_v11  ;;  %3953 = vmatprep.mubr.bf16.mxu0 %v4522_v56  ;;  %v5833_v11 = vld [vmem:[%s7330_s1 + $0x8d8] sm:$0xff]   ;;  %v5864_v56 = vld [vmem:[%s7330_s1 + $0x910] sm:$0xff]  }
  0xe4   :  { %3914 = vmatmul.mubr.bf16.vlgmr.msra.gmra.mrb[24].mxu1 %v4519_v9  ;;  %5253 = vmatprep.subr.bf16.mxu0 %v5787_v14  ;;  %v5831_v9 = vld [vmem:[%s7330_s1 + $0x858] sm:$0xff]  }
  0xe5   :  { %5274 = vmatpush3.bf16.msra.mxu1 %v5786_v13  ;;  %3993 = vmatprep.mubr.bf16.mxu1 %v4524_v61  ;;  %v5835_v13 = vld [vmem:[%s7330_s1 + $0x860] sm:$0xff]   ;;  %v5869_v61 = vld [vmem:[%s7330_s1 + $0x9d8] sm:$0xff]  }
  0xe6   :  { %5275 = vmatprep.subr.bf16.mxu1 %v5789_v16 }
  0xe7   :  { %5254 = vmatpush3.bf16.msra.mxu0 %v5788_v15  ;;  %v5836_v15 = vld [vmem:[%s7330_s1 + $0x820] sm:$0xff]  }
  0xe8   :  { %5255 = vmatprep.subr.bf16.mxu0 %v5791_v18 }
  0xe9   :  { %5276 = vmatpush3.bf16.msra.mxu1 %v5790_v17  ;;  %v5837_v17 = vld [vmem:[%s7330_s1 + $0x8e0] sm:$0xff]  }
  0xea   :  { %5277 = vmatprep.subr.bf16.mxu1 %v5793_v20  ;;  %v5838_v20 = vld [vmem:[%s7330_s1 + $0x8a0] sm:$0xff]  }
  0xeb   :  { %5256 = vmatpush3.bf16.msra.mxu0 %v5792_v19 }
  0xec   :  { %5257 = vmatprep.subr.bf16.mxu0 %v5795_v22 }
  0xed   :  { %5278 = vmatpush3.bf16.msra.mxu1 %v5794_v21 }
  0xee   :  { %5279 = vmatprep.subr.bf16.mxu1 %v5797_v24 }
  0xef   :  { %5258 = vmatpush3.bf16.msra.mxu0 %v5796_v23  ;;  %v5839_v23 = vld [vmem:[%s7330_s1 + $0x868] sm:$0xff]  }
  0xf0   :  { %5259 = vmatprep.subr.bf16.mxu0 %v5799_v26 }
  0xf1   :  { %5280 = vmatpush3.bf16.msra.mxu1 %v5798_v25  ;;  %v5840_v25 = vld [vmem:[%s7330_s1 + $0x828] sm:$0xff]  }
  0xf2   :  { %5281 = vmatprep.subr.bf16.mxu1 %v5801_v29 }
  0xf3   :  { %5260 = vmatpush3.bf16.msra.mxu0 %v5800_v27 }
  0xf4   :  { %5261 = vmatprep.subr.bf16.mxu0 %v5803_v35  ;;  %v5845_v35 = vld [vmem:[%s7330_s1 + $0x8f0] sm:$0xff]  }
  0xf5   :  { %v4959_v28 = vpop.f32.mrb[0].mxu0  ;;  %5282 = vmatpush3.bf16.msra.mxu1 %v5802_v31 }
  0xf6   :  { %v4960_v30 = vpop.f32.mrb[1].mxu0  ;;  %5283 = vmatprep.subr.bf16.mxu1 %v5805_v41 }
  0xf7   :  { %v4961_v33 = vadd.f32 %v4960_v30, %v4959_v28  ;;  %v4962_v34 = vpop.f32.mrb[2].mxu0  ;;  %v4981_v36 = vpop.f32.mrb[0].mxu1  ;;  %5262 = vmatpush3.bf16.msra.mxu0 %v5804_v38  ;;  %v5841_v28 = vld [vmem:[%s7330_s1 + $0x8e8] sm:$0xff]   ;;  %v5848_v38 = vld [vmem:[%s7330_s1 + $0x838] sm:$0xff]  }
  0xf8   :  { %v4963_v39 = vpop.f32.mrb[3].mxu0  ;;  %v4982_v40 = vpop.f32.mrb[1].mxu1  ;;  %5263 = vmatprep.subr.bf16.mxu0 %v5807_v45  ;;  %v5842_v30 = vld [vmem:[%s7330_s1 + $0x8a8] sm:$0xff]   ;;  %v5844_v34 = vld [vmem:[%s7330_s1 + $0x830] sm:$0xff]  }
  0xf9   :  { %v3396_v37 = vadd.f32 %v4961_v33, %v4492_v32  ;;  %v4983_v42 = vadd.f32 %v4982_v40, %v4981_v36  ;;  %v4984_v44 = vpop.f32.mrb[2].mxu1  ;;  %5284 = vmatpush3.bf16.msra.mxu1 %v5806_v43  ;;  %v5843_v33 = vld [vmem:[%s7330_s1 + $0x870] sm:$0xff]   ;;  %v5849_v39 = vld [vmem:[%s7330_s1 + $0x8f8] sm:$0xff]   ;;  %v37_v40 = vld [vmem:[%s7331_s0 + $0x80] sm:$0xff] }
  0xfa   :  { %v4985_v46 = vpop.f32.mrb[3].mxu1  ;;  %5285 = vmatprep.subr.bf16.mxu1 %v5809_v49  ;;  %v5846_v36 = vld [vmem:[%s7330_s1 + $0x8b0] sm:$0xff]   ;;  %v4525_v41 = vcombine.low %v37_v40, %v37_v40  ;;  %v5852_v43 = vld [vmem:[%s7330_s1 + $0x8b8] sm:$0xff]   ;;  %v5853_v44 = vld [vmem:[%s7330_s1 + $0x940] sm:$0xff]  }
  0xfb   :  { %v6808_v47 = vadd.f32 %v4983_v42, %v3396_v37  ;;  %5264 = vmatpush3.bf16.msra.mxu0 %v5808_v48  ;;  %v5847_v37 = vld [vmem:[%s7330_s1 + $0x878] sm:$0xff]   ;;  %v4526_v42 = vcombine.high %v37_v40, %v37_v40  ;;  %v38_v45 = vld [vmem:[%s7331_s0 + $0x88] sm:$0xff]  ;;  %v5856_v48 = vld [vmem:[%s7330_s1 + $0x900] sm:$0xff]  }
  0xfc   :  { %5265 = vmatprep.subr.bf16.mxu0 %v5811_v51  ;;  %v4527_v46 = vcombine.low %v38_v45, %v38_v45  ;;  %v5857_v49 = vld [vmem:[%s7330_s1 + $0x9c0] sm:$0xff]   ;;  %v5859_v51 = vld [vmem:[%s7330_s1 + $0x948] sm:$0xff]  }
  0xfd   :  { %5286 = vmatpush3.bf16.msra.mxu1 %v5810_v50  ;;  %v5858_v50 = vld [vmem:[%s7330_s1 + $0x980] sm:$0xff]   ;;  %v5898_v40 = vld [vmem:[%s7330_s1 + $0xa88] sm:$0xff]  }
  0xfe   :  { %5287 = vmatprep.subr.bf16.mxu1 %v5813_v53  ;;  %v5861_v53 = vld [vmem:[%s7330_s1 + $0x9c8] sm:$0xff]  }
  0xff   :  { %5266 = vmatpush3.bf16.msra.mxu0 %v5812_v52  ;;  %v5860_v52 = vld [vmem:[%s7330_s1 + $0x908] sm:$0xff]  }
 0x100   :  { %5295 = vmatprep.subr.bf16.mxu0 %v5817_v58  ;;  %v5866_v58 = vld [vmem:[%s7330_s1 + $0x990] sm:$0xff]  }
 0x101   :  { %5288 = vmatpush3.bf16.msra.mxu1 %v5816_v57  ;;  %v5865_v57 = vld [vmem:[%s7330_s1 + $0x9d0] sm:$0xff]  }
 0x102   :  { %3954 = vmatmul.mubr.bf16.vlgmr.msra.gmra.mrb[28].mxu0 %v4521_v55  ;;  %5317 = vmatprep.subr.bf16.mxu1 %v5821_v63  ;;  %v5863_v55 = vld [vmem:[%s7330_s1 + $0x950] sm:$0xff]   ;;  %v5871_v63 = vld [vmem:[%s7330_s1 + $0x960] sm:$0xff]  }
 0x103   :  { %5296 = vmatpush3.bf16.msra.mxu0 %v5820_v62  ;;  %4033 = vmatprep.mubr.bf16.mxu0 %v4526_v42  ;;  %v5870_v62 = vld [vmem:[%s7330_s1 + $0x998] sm:$0xff]   ;;  %v5900_v42 = vld [vmem:[%s7330_s1 + $0xa10] sm:$0xff]  }
 0x104   :  { %3994 = vmatmul.mubr.bf16.vlgmr.msra.gmra.mrb[28].mxu1 %v4523_v60  ;;  %5297 = vmatprep.subr.bf16.mxu0 %v5823_v1  ;;  %v5868_v60 = vld [vmem:[%s7330_s1 + $0x918] sm:$0xff]   ;;  %v5872_v1 = vld [vmem:[%s7330_s1 + $0x920] sm:$0xff]  }
 0x105   :  { %5318 = vmatpush3.bf16.msra.mxu1 %v5822_v0 }
 0x106   :  { %5319 = vmatprep.subr.bf16.mxu1 %v5825_v3  ;;  %v5873_v3 = vld [vmem:[%s7330_s1 + $0x9e0] sm:$0xff]  }
 0x107   :  { %5298 = vmatpush3.bf16.msra.mxu0 %v5824_v2 }
 0x108   :  { %5299 = vmatprep.subr.bf16.mxu0 %v5827_v5 }
 0x109   :  { %5320 = vmatpush3.bf16.msra.mxu1 %v5826_v4 }
 0x10a   :  { %5321 = vmatprep.subr.bf16.mxu1 %v5829_v7 }
 0x10b   :  { %5300 = vmatpush3.bf16.msra.mxu0 %v5828_v6  ;;  %v5874_v6 = vld [vmem:[%s7330_s1 + $0x9a0] sm:$0xff]  }
 0x10c   :  { %5301 = vmatprep.subr.bf16.mxu0 %v5831_v9  ;;  %v5875_v9 = vld [vmem:[%s7330_s1 + $0x968] sm:$0xff]  }
 0x10d   :  { %5322 = vmatpush3.bf16.msra.mxu1 %v5830_v8 }
 0x10e   :  { %5323 = vmatprep.subr.bf16.mxu1 %v5833_v11  ;;  %v5876_v11 = vld [vmem:[%s7330_s1 + $0x928] sm:$0xff]  }
 0x10f   :  { %5302 = vmatpush3.bf16.msra.mxu0 %v5832_v10 }
 0x110   :  { %5303 = vmatprep.subr.bf16.mxu0 %v5835_v13 }
 0x111   :  { %5324 = vmatpush3.bf16.msra.mxu1 %v5834_v12 }
 0x112   :  { %5325 = vmatprep.subr.bf16.mxu1 %v5837_v17 }
 0x113   :  { %5304 = vmatpush3.bf16.msra.mxu0 %v5836_v15 }
 0x114   :  { %5305 = vmatprep.subr.bf16.mxu0 %v5839_v23  ;;  %v5883_v23 = vld [vmem:[%s7330_s1 + $0x978] sm:$0xff]  }
 0x115   :  { %v5003_v14 = vpop.f32.mrb[4].mxu0  ;;  %5326 = vmatpush3.bf16.msra.mxu1 %v5838_v20  ;;  %v5880_v20 = vld [vmem:[%s7330_s1 + $0x930] sm:$0xff]  }
 0x116   :  { %v5004_v16 = vpop.f32.mrb[5].mxu0  ;;  %5327 = vmatprep.subr.bf16.mxu1 %v5841_v28 }
 0x117   :  { %v5005_v18 = vadd.f32 %v5004_v16, %v5003_v14  ;;  %v5006_v19 = vpop.f32.mrb[6].mxu0  ;;  %v5025_v21 = vpop.f32.mrb[4].mxu1  ;;  %5306 = vmatpush3.bf16.msra.mxu0 %v5840_v25  ;;  %v5877_v14 = vld [vmem:[%s7330_s1 + $0x9e8] sm:$0xff]   ;;  %v5885_v25 = vld [vmem:[%s7330_s1 + $0x9f8] sm:$0xff]  }
 0x118   :  { %v5007_v24 = vpop.f32.mrb[7].mxu0  ;;  %v5026_v26 = vpop.f32.mrb[5].mxu1  ;;  %5307 = vmatprep.subr.bf16.mxu0 %v5843_v33  ;;  %v5878_v16 = vld [vmem:[%s7330_s1 + $0x9a8] sm:$0xff]   ;;  %v5879_v19 = vld [vmem:[%s7330_s1 + $0x970] sm:$0xff]  }
 0x119   :  { %v3476_v22 = vadd.f32 %v5005_v18, %v6808_v47  ;;  %v5027_v27 = vadd.f32 %v5026_v26, %v5025_v21  ;;  %v5028_v29 = vpop.f32.mrb[6].mxu1  ;;  %5328 = vmatpush3.bf16.msra.mxu1 %v5842_v30  ;;  %v4528_v47 = vcombine.high %v38_v45, %v38_v45  ;;  %v5881_v21 = vld [vmem:[%s7330_s1 + $0x9f0] sm:$0xff]   ;;  %v5884_v24 = vld [vmem:[%s7330_s1 + $0x938] sm:$0xff]   ;;  %v5889_v30 = vld [vmem:[%s7330_s1 + $0xa40] sm:$0xff]  }
 0x11a   :  { %v5029_v31 = vpop.f32.mrb[7].mxu1  ;;  %5329 = vmatprep.subr.bf16.mxu1 %v5845_v35  ;;  %v39_v26 = vld [vmem:[%s7331_s0 + $0x90] sm:$0xff]  ;;  %v5888_v29 = vld [vmem:[%s7330_s1 + $0x9b8] sm:$0xff]   ;;  %v5893_v35 = vld [vmem:[%s7330_s1 + $0xac0] sm:$0xff]  }
 0x11b   :  { %v6910_v32 = vadd.f32 %v5027_v27, %v3476_v22  ;;  %5308 = vmatpush3.bf16.msra.mxu0 %v5844_v34  ;;  %4073 = vmatprep.mubr.bf16.mxu1 %v4528_v47  ;;  %v5882_v22 = vld [vmem:[%s7330_s1 + $0x9b0] sm:$0xff]   ;;  %v4529_v27 = vcombine.low %v39_v26, %v39_v26  ;;  %v4530_v28 = vcombine.high %v39_v26, %v39_v26  ;;  %v40_v31 = vld [vmem:[%s7331_s0 + $0x98] sm:$0xff]  ;;  %v5892_v34 = vld [vmem:[%s7330_s1 + $0xa00] sm:$0xff]  }
 0x11c   :  { %5309 = vmatprep.subr.bf16.mxu0 %v5847_v37  ;;  %v4532_v33 = vcombine.high %v40_v31, %v40_v31  ;;  %v5895_v37 = vld [vmem:[%s7330_s1 + $0xa48] sm:$0xff]   ;;  %v5903_v45 = vld [vmem:[%s7330_s1 + $0xa58] sm:$0xff]  }
 0x11d   :  { %5330 = vmatpush3.bf16.msra.mxu1 %v5846_v36  ;;  %v5894_v36 = vld [vmem:[%s7330_s1 + $0xa80] sm:$0xff]   ;;  %v5905_v47 = vld [vmem:[%s7330_s1 + $0xad8] sm:$0xff]   ;;  %v5934_v26 = vld [vmem:[%s7330_s1 + $0xb88] sm:$0xff]  }
 0x11e   :  { %5331 = vmatprep.subr.bf16.mxu1 %v5849_v39  ;;  %v5897_v39 = vld [vmem:[%s7330_s1 + $0xac8] sm:$0xff]  }
 0x11f   :  { %5310 = vmatpush3.bf16.msra.mxu0 %v5848_v38  ;;  %v5896_v38 = vld [vmem:[%s7330_s1 + $0xa08] sm:$0xff]  }
 0x120   :  { %5339 = vmatprep.subr.bf16.mxu0 %v5853_v44  ;;  %v5902_v44 = vld [vmem:[%s7330_s1 + $0xa90] sm:$0xff]  }
 0x121   :  { %5332 = vmatpush3.bf16.msra.mxu1 %v5852_v43  ;;  %v5901_v43 = vld [vmem:[%s7330_s1 + $0xad0] sm:$0xff]  }
 0x122   :  { %4034 = vmatmul.mubr.bf16.vlgmr.msra.gmra.mrb[32].mxu0 %v4525_v41  ;;  %5361 = vmatprep.subr.bf16.mxu1 %v5857_v49  ;;  %v5899_v41 = vld [vmem:[%s7330_s1 + $0xa50] sm:$0xff]   ;;  %v5907_v49 = vld [vmem:[%s7330_s1 + $0xa60] sm:$0xff]  }
 0x123   :  { %5340 = vmatpush3.bf16.msra.mxu0 %v5856_v48  ;;  %4113 = vmatprep.mubr.bf16.mxu0 %v4530_v28  ;;  %v5906_v48 = vld [vmem:[%s7330_s1 + $0xa98] sm:$0xff]   ;;  %v5936_v28 = vld [vmem:[%s7330_s1 + $0xb10] sm:$0xff]  }
 0x124   :  { %4074 = vmatmul.mubr.bf16.vlgmr.msra.gmra.mrb[32].mxu1 %v4527_v46  ;;  %5341 = vmatprep.subr.bf16.mxu0 %v5859_v51  ;;  %v5904_v46 = vld [vmem:[%s7330_s1 + $0xa18] sm:$0xff]  }
 0x125   :  { %5362 = vmatpush3.bf16.msra.mxu1 %v5858_v50  ;;  %4153 = vmatprep.mubr.bf16.mxu1 %v4532_v33  ;;  %v5908_v50 = vld [vmem:[%s7330_s1 + $0xa20] sm:$0xff]   ;;  %v5941_v33 = vld [vmem:[%s7330_s1 + $0xbd8] sm:$0xff]  }
 0x126   :  { %5363 = vmatprep.subr.bf16.mxu1 %v5861_v53 }
 0x127   :  { %5342 = vmatpush3.bf16.msra.mxu0 %v5860_v52  ;;  %v5909_v52 = vld [vmem:[%s7330_s1 + $0xae0] sm:$0xff]  }
 0x128   :  { %5343 = vmatprep.subr.bf16.mxu0 %v5863_v55 }
 0x129   :  { %5364 = vmatpush3.bf16.msra.mxu1 %v5862_v54  ;;  %v5910_v54 = vld [vmem:[%s7330_s1 + $0xaa0] sm:$0xff]  }
 0x12a   :  { %5365 = vmatprep.subr.bf16.mxu1 %v5865_v57  ;;  %v5911_v57 = vld [vmem:[%s7330_s1 + $0xa68] sm:$0xff]  }
 0x12b   :  { %5344 = vmatpush3.bf16.msra.mxu0 %v5864_v56 }
 0x12c   :  { %5345 = vmatprep.subr.bf16.mxu0 %v5867_v59 }
 0x12d   :  { %5366 = vmatpush3.bf16.msra.mxu1 %v5866_v58 }
 0x12e   :  { %5367 = vmatprep.subr.bf16.mxu1 %v5869_v61 }
 0x12f   :  { %5346 = vmatpush3.bf16.msra.mxu0 %v5868_v60  ;;  %v5912_v60 = vld [vmem:[%s7330_s1 + $0xa28] sm:$0xff]  }
 0x130   :  { %5347 = vmatprep.subr.bf16.mxu0 %v5871_v63  ;;  %v5913_v63 = vld [vmem:[%s7330_s1 + $0xae8] sm:$0xff]  }
 0x131   :  { %5368 = vmatpush3.bf16.msra.mxu1 %v5870_v62 }
 0x132   :  { %5369 = vmatprep.subr.bf16.mxu1 %v5873_v3  ;;  %v5915_v3 = vld [vmem:[%s7330_s1 + $0xa70] sm:$0xff]  }
 0x133   :  { %5348 = vmatpush3.bf16.msra.mxu0 %v5872_v1  ;;  %v5914_v1 = vld [vmem:[%s7330_s1 + $0xaa8] sm:$0xff]  }
 0x134   :  { %5349 = vmatprep.subr.bf16.mxu0 %v5875_v9  ;;  %v5919_v9 = vld [vmem:[%s7330_s1 + $0xa78] sm:$0xff]  }
 0x135   :  { %v5047_v0 = vpop.f32.mrb[8].mxu0  ;;  %5370 = vmatpush3.bf16.msra.mxu1 %v5874_v6  ;;  %v5916_v6 = vld [vmem:[%s7330_s1 + $0xa30] sm:$0xff]  }
 0x136   :  { %v5048_v2 = vpop.f32.mrb[9].mxu0  ;;  %5371 = vmatprep.subr.bf16.mxu1 %v5877_v14 }
 0x137   :  { %v5049_v4 = vadd.f32 %v5048_v2, %v5047_v0  ;;  %v5050_v5 = vpop.f32.mrb[10].mxu0  ;;  %v5069_v7 = vpop.f32.mrb[8].mxu1  ;;  %5350 = vmatpush3.bf16.msra.mxu0 %v5876_v11  ;;  %v5921_v11 = vld [vmem:[%s7330_s1 + $0xaf8] sm:$0xff]  }
 0x138   :  { %v5051_v10 = vpop.f32.mrb[11].mxu0  ;;  %v5070_v12 = vpop.f32.mrb[9].mxu1  ;;  %5351 = vmatprep.subr.bf16.mxu0 %v5879_v19 }
 0x139   :  { %v3556_v8 = vadd.f32 %v5049_v4, %v6910_v32  ;;  %v5071_v13 = vadd.f32 %v5070_v12, %v5069_v7  ;;  %v5072_v15 = vpop.f32.mrb[10].mxu1  ;;  %5372 = vmatpush3.bf16.msra.mxu1 %v5878_v16  ;;  %v4531_v32 = vcombine.low %v40_v31, %v40_v31  ;;  %v5917_v7 = vld [vmem:[%s7330_s1 + $0xaf0] sm:$0xff]   ;;  %v5920_v10 = vld [vmem:[%s7330_s1 + $0xa38] sm:$0xff]   ;;  %v41_v12 = vld [vmem:[%s7331_s0 + $0xa0] sm:$0xff] }
 0x13a   :  { %v5073_v17 = vpop.f32.mrb[11].mxu1  ;;  %5373 = vmatprep.subr.bf16.mxu1 %v5881_v21  ;;  %v4534_v14 = vcombine.high %v41_v12, %v41_v12  ;;  %v5924_v15 = vld [vmem:[%s7330_s1 + $0xab8] sm:$0xff]   ;;  %v5925_v16 = vld [vmem:[%s7330_s1 + $0xb40] sm:$0xff]  }
 0x13b   :  { %v7015_v18 = vadd.f32 %v5071_v13, %v3556_v8  ;;  %5352 = vmatpush3.bf16.msra.mxu0 %v5880_v20  ;;  %v5918_v8 = vld [vmem:[%s7330_s1 + $0xab0] sm:$0xff]   ;;  %v4533_v13 = vcombine.low %v41_v12, %v41_v12  ;;  %v42_v17 = vld [vmem:[%s7331_s0 + $0xa8] sm:$0xff]  ;;  %v5928_v20 = vld [vmem:[%s7330_s1 + $0xb00] sm:$0xff]  }
 0x13c   :  { %5353 = vmatprep.subr.bf16.mxu0 %v5883_v23  ;;  %v4536_v19 = vcombine.high %v42_v17, %v42_v17  ;;  %v5929_v21 = vld [vmem:[%s7330_s1 + $0xbc0] sm:$0xff]   ;;  %v5931_v23 = vld [vmem:[%s7330_s1 + $0xb48] sm:$0xff]   ;;  %v5939_v31 = vld [vmem:[%s7330_s1 + $0xb58] sm:$0xff]  }
 0x13d   :  { %5374 = vmatpush3.bf16.msra.mxu1 %v5882_v22  ;;  %v5930_v22 = vld [vmem:[%s7330_s1 + $0xb80] sm:$0xff]  }
 0x13e   :  { %5375 = vmatprep.subr.bf16.mxu1 %v5885_v25  ;;  %v5933_v25 = vld [vmem:[%s7330_s1 + $0xbc8] sm:$0xff]  }
 0x13f   :  { %5354 = vmatpush3.bf16.msra.mxu0 %v5884_v24  ;;  %v5932_v24 = vld [vmem:[%s7330_s1 + $0xb08] sm:$0xff]  }
 0x140   :  { %5383 = vmatprep.subr.bf16.mxu0 %v5889_v30  ;;  %v5938_v30 = vld [vmem:[%s7330_s1 + $0xb90] sm:$0xff]  }
 0x141   :  { %5376 = vmatpush3.bf16.msra.mxu1 %v5888_v29  ;;  %v5937_v29 = vld [vmem:[%s7330_s1 + $0xbd0] sm:$0xff]  }
 0x142   :  { %4114 = vmatmul.mubr.bf16.vlgmr.msra.gmra.mrb[36].mxu0 %v4529_v27  ;;  %5405 = vmatprep.subr.bf16.mxu1 %v5893_v35  ;;  %v5935_v27 = vld [vmem:[%s7330_s1 + $0xb50] sm:$0xff]   ;;  %v5943_v35 = vld [vmem:[%s7330_s1 + $0xb60] sm:$0xff]  }
 0x143   :  { %5384 = vmatpush3.bf16.msra.mxu0 %v5892_v34  ;;  %4193 = vmatprep.mubr.bf16.mxu0 %v4534_v14  ;;  %v5942_v34 = vld [vmem:[%s7330_s1 + $0xb98] sm:$0xff]  }
 0x144   :  { %4154 = vmatmul.mubr.bf16.vlgmr.msra.gmra.mrb[36].mxu1 %v4531_v32  ;;  %5385 = vmatprep.subr.bf16.mxu0 %v5895_v37  ;;  %v5940_v32 = vld [vmem:[%s7330_s1 + $0xb18] sm:$0xff]   ;;  %v5944_v37 = vld [vmem:[%s7330_s1 + $0xb20] sm:$0xff]  }
 0x145   :  { %5406 = vmatpush3.bf16.msra.mxu1 %v5894_v36  ;;  %4233 = vmatprep.mubr.bf16.mxu1 %v4536_v19 }
 0x146   :  { %5407 = vmatprep.subr.bf16.mxu1 %v5897_v39  ;;  %v5945_v39 = vld [vmem:[%s7330_s1 + $0xbe0] sm:$0xff]  }
 0x147   :  { %5386 = vmatpush3.bf16.msra.mxu0 %v5896_v38 }
 0x148   :  { %5387 = vmatprep.subr.bf16.mxu0 %v5899_v41 }
 0x149   :  { %5408 = vmatpush3.bf16.msra.mxu1 %v5898_v40 }
 0x14a   :  { %5409 = vmatprep.subr.bf16.mxu1 %v5901_v43 }
 0x14b   :  { %5388 = vmatpush3.bf16.msra.mxu0 %v5900_v42  ;;  %v5946_v42 = vld [vmem:[%s7330_s1 + $0xba0] sm:$0xff]  }
 0x14c   :  { %5389 = vmatprep.subr.bf16.mxu0 %v5903_v45  ;;  %v5947_v45 = vld [vmem:[%s7330_s1 + $0xb68] sm:$0xff]  }
 0x14d   :  { %5410 = vmatpush3.bf16.msra.mxu1 %v5902_v44 }
 0x14e   :  { %5411 = vmatprep.subr.bf16.mxu1 %v5905_v47  ;;  %v5948_v47 = vld [vmem:[%s7330_s1 + $0xb28] sm:$0xff]  }
 0x14f   :  { %5390 = vmatpush3.bf16.msra.mxu0 %v5904_v46 }
 0x150   :  { %5391 = vmatprep.subr.bf16.mxu0 %v5907_v49 }
 0x151   :  { %5412 = vmatpush3.bf16.msra.mxu1 %v5906_v48 }
 0x152   :  { %5413 = vmatprep.subr.bf16.mxu1 %v5909_v52  ;;  %v5950_v52 = vld [vmem:[%s7330_s1 + $0xba8] sm:$0xff]  }
 0x153   :  { %5392 = vmatpush3.bf16.msra.mxu0 %v5908_v50  ;;  %v5949_v50 = vld [vmem:[%s7330_s1 + $0xbe8] sm:$0xff]  }
 0x154   :  { %5393 = vmatprep.subr.bf16.mxu0 %v5911_v57  ;;  %v5953_v57 = vld [vmem:[%s7330_s1 + $0xbf0] sm:$0xff]  }
 0x155   :  { %v5091_v51 = vpop.f32.mrb[12].mxu0  ;;  %5414 = vmatpush3.bf16.msra.mxu1 %v5910_v54 }
 0x156   :  { %v5092_v53 = vpop.f32.mrb[13].mxu0  ;;  %5415 = vmatprep.subr.bf16.mxu1 %v5913_v63 }
 0x157   :  { %v5093_v55 = vadd.f32 %v5092_v53, %v5091_v51  ;;  %v5094_v56 = vpop.f32.mrb[14].mxu0  ;;  %v5113_v58 = vpop.f32.mrb[12].mxu1  ;;  %5394 = vmatpush3.bf16.msra.mxu0 %v5912_v60  ;;  %v5956_v60 = vld [vmem:[%s7330_s1 + $0xb38] sm:$0xff]  }
 0x158   :  { %v5095_v61 = vpop.f32.mrb[15].mxu0  ;;  %v5114_v62 = vpop.f32.mrb[13].mxu1  ;;  %5395 = vmatprep.subr.bf16.mxu0 %v5915_v3  ;;  %v5952_v56 = vld [vmem:[%s7330_s1 + $0xb30] sm:$0xff]   ;;  %v44_v3 = vld [vmem:[%s7331_s0 + $0xb8] sm:$0xff] }
 0x159   :  { %v3636_v59 = vadd.f32 %v5093_v55, %v7015_v18  ;;  %v5115_v0 = vadd.f32 %v5114_v62, %v5113_v58  ;;  %v5116_v2 = vpop.f32.mrb[14].mxu1  ;;  %5416 = vmatpush3.bf16.msra.mxu1 %v5914_v1  ;;  %v4535_v18 = vcombine.low %v42_v17, %v42_v17  ;;  %v5951_v55 = vld [vmem:[%s7330_s1 + $0xb70] sm:$0xff]   ;;  %v5957_v61 = vld [vmem:[%s7330_s1 + $0xbf8] sm:$0xff]  }
 0x15a   :  { %v5117_v4 = vpop.f32.mrb[15].mxu1  ;;  %5417 = vmatprep.subr.bf16.mxu1 %v5917_v7  ;;  %v5954_v58 = vld [vmem:[%s7330_s1 + $0xbb0] sm:$0xff]   ;;  %v5960_v1 = vld [vmem:[%s7330_s1 + $0xbb8] sm:$0xff]   ;;  %v5984_v2 = vmov 0.0   ;;  %v5964_v7 = vld [vmem:[%s7330_s1 + $0xc08] sm:$0xff]  }
 0x15b   :  { %v7123_v5 = vadd.f32 %v5115_v0, %v3636_v59  ;;  %5396 = vmatpush3.bf16.msra.mxu0 %v5916_v6  ;;  %v5955_v59 = vld [vmem:[%s7330_s1 + $0xb78] sm:$0xff]   ;;  %v43_v62 = vld [vmem:[%s7331_s0 + $0xb0] sm:$0xff]  ;;  %v4539_v4 = vcombine.low %v44_v3, %v44_v3  ;;  %v5963_v6 = vld [vmem:[%s7330_s1 + $0xc00] sm:$0xff]  }
 0x15c   :  { %5397 = vmatprep.subr.bf16.mxu0 %v5919_v9  ;;  %v4537_v63 = vcombine.low %v43_v62, %v43_v62  ;;  %v4538_v0 = vcombine.high %v43_v62, %v43_v62  ;;  %v5966_v9 = vld [vmem:[%s7330_s1 + $0xc18] sm:$0xff]  }
 0x15d   :  { %5418 = vmatpush3.bf16.msra.mxu1 %v5918_v8  ;;  %v5965_v8 = vld [vmem:[%s7330_s1 + $0xc10] sm:$0xff]  }
 0x15e   :  { %5419 = vmatprep.subr.bf16.mxu1 %v5921_v11 }
 0x15f   :  { %5398 = vmatpush3.bf16.msra.mxu0 %v5920_v10  ;;  %v5967_v10 = vld [vmem:[%s7330_s1 + $0xc20] sm:$0xff]  }
 0x160   :  { %5427 = vmatprep.subr.bf16.mxu0 %v5925_v16  ;;  %v5968_v16 = vld [vmem:[%s7330_s1 + $0xc28] sm:$0xff]  }
 0x161   :  { %5420 = vmatpush3.bf16.msra.mxu1 %v5924_v15 }
 0x162   :  { %4194 = vmatmul.mubr.bf16.vlgmr.msra.gmra.mrb[40].mxu0 %v4533_v13  ;;  %5449 = vmatprep.subr.bf16.mxu1 %v5929_v21 }
 0x163   :  { %5428 = vmatpush3.bf16.msra.mxu0 %v5928_v20  ;;  %4273 = vmatprep.mubr.bf16.mxu0 %v4538_v0 }
 0x164   :  { %4234 = vmatmul.mubr.bf16.vlgmr.msra.gmra.mrb[40].mxu1 %v4535_v18  ;;  %5429 = vmatprep.subr.bf16.mxu0 %v5931_v23 }
 0x165   :  { %5450 = vmatpush3.bf16.msra.mxu1 %v5930_v22 }
 0x166   :  { %5451 = vmatprep.subr.bf16.mxu1 %v5933_v25  ;;  %v5970_v25 = vld [vmem:[%s7330_s1 + $0xc38] sm:$0xff]  }
 0x167   :  { %5430 = vmatpush3.bf16.msra.mxu0 %v5932_v24  ;;  %v5969_v24 = vld [vmem:[%s7330_s1 + $0xc30] sm:$0xff]  }
 0x168   :  { %5431 = vmatprep.subr.bf16.mxu0 %v5935_v27 }
 0x169   :  { %5452 = vmatpush3.bf16.msra.mxu1 %v5934_v26  ;;  %v5971_v26 = vld [vmem:[%s7331_s0 + $0xc0] ss:$0 sps:$4 sm:$0xff]  }
 0x16a   :  { %5453 = vmatprep.subr.bf16.mxu1 %v5937_v29 }
 0x16b   :  { %5432 = vmatpush3.bf16.msra.mxu0 %v5936_v28 }
 0x16c   :  { %5433 = vmatprep.subr.bf16.mxu0 %v5939_v31 }
 0x16d   :  { %5454 = vmatpush3.bf16.msra.mxu1 %v5938_v30 }
 0x16e   :  { %5455 = vmatprep.subr.bf16.mxu1 %v5941_v33 }
 0x16f   :  { %5434 = vmatpush3.bf16.msra.mxu0 %v5940_v32 }
 0x170   :  { %5435 = vmatprep.subr.bf16.mxu0 %v5943_v35 }
 0x171   :  { %5456 = vmatpush3.bf16.msra.mxu1 %v5942_v34 }
 0x172   :  { %5457 = vmatprep.subr.bf16.mxu1 %v5945_v39 }
 0x173   :  { %5436 = vmatpush3.bf16.msra.mxu0 %v5944_v37 }
 0x174   :  { %5437 = vmatprep.subr.bf16.mxu0 %v5947_v45 }
 0x175   :  { %v5135_v36 = vpop.f32.mrb[16].mxu0  ;;  %5458 = vmatpush3.bf16.msra.mxu1 %v5946_v42 }
 0x176   :  { %v5136_v38 = vpop.f32.mrb[17].mxu0  ;;  %5459 = vmatprep.subr.bf16.mxu1 %v5949_v50 }
 0x177   :  { %v5137_v40 = vadd.f32 %v5136_v38, %v5135_v36  ;;  %v5138_v41 = vpop.f32.mrb[18].mxu0  ;;  %v5157_v43 = vpop.f32.mrb[16].mxu1  ;;  %5438 = vmatpush3.bf16.msra.mxu0 %v5948_v47 }
 0x178   :  { %v5139_v46 = vpop.f32.mrb[19].mxu0  ;;  %v5158_v48 = vpop.f32.mrb[17].mxu1  ;;  %5439 = vmatprep.subr.bf16.mxu0 %v5951_v55  ;;  %v5976_v55 = vld [vmem:[%s7333_s3 + $0x20] sm:$0xff]  }
 0x179   :  { %v3716_v44 = vadd.f32 %v5137_v40, %v7123_v5  ;;  %v5159_v49 = vadd.f32 %v5158_v48, %v5157_v43  ;;  %v5160_v51 = vpop.f32.mrb[18].mxu1  ;;  %5460 = vmatpush3.bf16.msra.mxu1 %v5950_v52  ;;  %v4540_v5 = vcombine.high %v44_v3, %v44_v3  ;;  %v5973_v52 = vld [vmem:[%s7333_s3 + $0x8] sm:$0xff]   ;;  %v5979_v3 = vld [vmem:[%s7333_s3 + $0x38] sm:$0xff]  }
 0x17a   :  { %v5161_v53 = vpop.f32.mrb[19].mxu1  ;;  %5461 = vmatprep.subr.bf16.mxu1 %v5953_v57  ;;  %v5972_v51 = vld [vmem:[%s7333_s3] sm:$0xff]  }
 0x17b   :  { %v3756_v54 = vadd.f32 %v5159_v49, %v3716_v44  ;;  %5440 = vmatpush3.bf16.msra.mxu0 %v5952_v56  ;;  %4313 = vmatprep.mubr.bf16.mxu1 %v4540_v5  ;;  %v5974_v53 = vld [vmem:[%s7333_s3 + $0x10] sm:$0xff]   ;;  %v5977_v56 = vld [vmem:[%s7333_s3 + $0x28] sm:$0xff]  }
 0x17c   :  { %5441 = vmatprep.subr.bf16.mxu0 %v5955_v59 }
 0x17d   :  { %5462 = vmatpush3.bf16.msra.mxu1 %v5954_v58  ;;  %v5978_v58 = vld [vmem:[%s7333_s3 + $0x30] sm:$0xff]  }
 0x17e   :  { %5463 = vmatprep.subr.bf16.mxu1 %v5957_v61 }
 0x17f   :  { %5442 = vmatpush3.bf16.msra.mxu0 %v5956_v60 }
 0x180   :  { %5489 = vmatprep.subr.bf16.mxu0 %v5984_v2 }
 0x181   :  { %5464 = vmatpush3.bf16.msra.mxu1 %v5960_v1 }
 0x182   :  { %4274 = vmatmul.mubr.bf16.vlgmr.msra.gmra.mrb[44].mxu0 %v4537_v63  ;;  %5509 = vmatprep.subr.bf16.mxu1 %v5984_v2 }
 0x183   :  { %5490 = vmatpush3.bf16.msra.mxu0 %v5963_v6  ;;  %5505 = vmatprep.mubr.msk.bf16.mxu0 %vm5985_vm0, %v5984_v2 }
 0x184   :  { %4314 = vmatmul.mubr.bf16.vlgmr.msra.gmra.mrb[44].mxu1 %v4539_v4  ;;  %5491 = vmatprep.subr.bf16.mxu0 %v5984_v2 }
 0x185   :  { %5525 = vmatprep.mubr.msk.bf16.mxu1 %vm5985_vm0, %v5984_v2  ;;  %5510 = vmatpush3.bf16.msra.mxu1 %v5972_v51 }
 0x186   :  { %5511 = vmatprep.subr.bf16.mxu1 %v5984_v2 }
 0x187   :  { %5492 = vmatpush3.bf16.msra.mxu0 %v5964_v7 }
 0x188   :  { %5493 = vmatprep.subr.bf16.mxu0 %v5984_v2 }
 0x189   :  { %5512 = vmatpush3.bf16.msra.mxu1 %v5973_v52  ;;  %v4934_v52 = vld [vmem:[%s7334_s4] ss:$0 sm:$0xff] }
 0x18a   :  { %5513 = vmatprep.subr.bf16.mxu1 %v5984_v2 }
 0x18b   :  { %5494 = vmatpush3.bf16.msra.mxu0 %v5965_v8 }
 0x18c   :  { %5495 = vmatprep.subr.bf16.mxu0 %v5984_v2 }
 0x18d   :  { %5514 = vmatpush3.bf16.msra.mxu1 %v5974_v53 }
 0x18e   :  { %5515 = vmatprep.subr.bf16.mxu1 %v5984_v2 }
 0x18f   :  { %5496 = vmatpush3.bf16.msra.mxu0 %v5966_v9 }
 0x190   :  { %5497 = vmatprep.subr.bf16.mxu0 %v5984_v2 }
 0x193   :  { %5498 = vmatpush3.bf16.msra.mxu0 %v5967_v10 }
 0x194   :  { %5499 = vmatprep.subr.bf16.mxu0 %v5984_v2 }
 0x195   :  { %v5179_v11 = vpop.f32.mrb[20].mxu0 }
 0x196   :  { %v5180_v12 = vpop.f32.mrb[21].mxu0 }
 0x197   :  { %v5181_v13 = vadd.f32 %v5180_v12, %v5179_v11  ;;  %v5182_v14 = vpop.f32.mrb[22].mxu0  ;;  %v5201_v15 = vpop.f32.mrb[20].mxu1  ;;  %5500 = vmatpush3.bf16.msra.mxu0 %v5968_v16 }
 0x198   :  { %v5183_v17 = vpop.f32.mrb[23].mxu0  ;;  %v5202_v18 = vpop.f32.mrb[21].mxu1  ;;  %5501 = vmatprep.subr.bf16.mxu0 %v5984_v2 }
 0x199   :  { %v3796_v19 = vadd.f32 %v5181_v13, %v3756_v54  ;;  %v5203_v20 = vadd.f32 %v5202_v18, %v5201_v15  ;;  %v5204_v21 = vpop.f32.mrb[22].mxu1  ;;  %v5975_v54 = vld [vmem:[%s7333_s3 + $0x18] sm:$0xff]  }
 0x19a   :  { %v5205_v22 = vpop.f32.mrb[23].mxu1  ;;  %5516 = vmatpush3.bf16.msra.mxu1 %v5975_v54 }
 0x19b   :  { %v3836_v23 = vadd.f32 %v5203_v20, %v3796_v19  ;;  %5502 = vmatpush3.bf16.msra.mxu0 %v5969_v24  ;;  %5517 = vmatprep.subr.bf16.mxu1 %v5984_v2 }
 0x19c   :  { %5503 = vmatprep.subr.bf16.mxu0 %v5984_v2 }
 0x19e   :  { %5518 = vmatpush3.bf16.msra.mxu1 %v5976_v55 }
 0x19f   :  { %5504 = vmatpush3.bf16.msra.mxu0 %v5970_v25  ;;  %5519 = vmatprep.subr.bf16.mxu1 %v5984_v2 }
 0x1a2   :  { %5506 = vmatmul.mubr.bf16.vlgmr.msra.gmra.mrb[48].mxu0 %v5971_v26  ;;  %5520 = vmatpush3.bf16.msra.mxu1 %v5977_v56 }
 0x1a3   :  { %5521 = vmatprep.subr.bf16.mxu1 %v5984_v2 }
 0x1a6   :  { %5522 = vmatpush3.bf16.msra.mxu1 %v5978_v58 }
 0x1a7   :  { %5523 = vmatprep.subr.bf16.mxu1 %v5984_v2 }
 0x1aa   :  { %5524 = vmatpush3.bf16.msra.mxu1 %v5979_v3 }
 0x1b5   :  { %v5223_v27 = vpop.f32.mrb[24].mxu0 }
 0x1b6   :  { %v5224_v28 = vpop.f32.mrb[25].mxu0 }
 0x1b7   :  { %v5225_v29 = vadd.f32 %v5224_v28, %v5223_v27  ;;  %v5226_v30 = vpop.f32.mrb[26].mxu0  ;;  %v5245_v31 = vpop.f32.mrb[24].mxu1 }
 0x1b8   :  { %v5227_v32 = vpop.f32.mrb[27].mxu0  ;;  %v5246_v33 = vpop.f32.mrb[25].mxu1 }
 0x1b9   :  { %v3876_v34 = vadd.f32 %v5225_v29, %v3836_v23  ;;  %v5247_v35 = vadd.f32 %v5246_v33, %v5245_v31  ;;  %v5248_v36 = vpop.f32.mrb[26].mxu1 }
 0x1ba   :  { %v5249_v37 = vpop.f32.mrb[27].mxu1 }
 0x1bb   :  { %v3916_v38 = vadd.f32 %v5247_v35, %v3876_v34 }
 0x1d5   :  { %v5267_v39 = vpop.f32.mrb[28].mxu0 }
 0x1d6   :  { %v5268_v40 = vpop.f32.mrb[29].mxu0 }
 0x1d7   :  { %v5269_v41 = vadd.f32 %v5268_v40, %v5267_v39  ;;  %v5270_v42 = vpop.f32.mrb[30].mxu0  ;;  %v5289_v43 = vpop.f32.mrb[28].mxu1 }
 0x1d8   :  { %v5271_v44 = vpop.f32.mrb[31].mxu0  ;;  %v5290_v45 = vpop.f32.mrb[29].mxu1 }
 0x1d9   :  { %v3956_v46 = vadd.f32 %v5269_v41, %v3916_v38  ;;  %v5291_v47 = vadd.f32 %v5290_v45, %v5289_v43  ;;  %v5292_v48 = vpop.f32.mrb[30].mxu1 }
 0x1da   :  { %v5293_v49 = vpop.f32.mrb[31].mxu1 }
 0x1db   :  { %v3996_v50 = vadd.f32 %v5291_v47, %v3956_v46 }
 0x1f5   :  { %v5311_v57 = vpop.f32.mrb[32].mxu0 }
 0x1f6   :  { %v5312_v59 = vpop.f32.mrb[33].mxu0 }
 0x1f7   :  { %v5313_v60 = vadd.f32 %v5312_v59, %v5311_v57  ;;  %v5314_v61 = vpop.f32.mrb[34].mxu0  ;;  %v5333_v62 = vpop.f32.mrb[32].mxu1 }
 0x1f8   :  { %v5315_v63 = vpop.f32.mrb[35].mxu0  ;;  %v5334_v1 = vpop.f32.mrb[33].mxu1 }
 0x1f9   :  { %v4036_v0 = vadd.f32 %v5313_v60, %v3996_v50  ;;  %v5335_v4 = vadd.f32 %v5334_v1, %v5333_v62  ;;  %v5336_v5 = vpop.f32.mrb[34].mxu1  ;;  %v4474_v50 = vlaneseq }
 0x1fa   :  { %v5337_v6 = vpop.f32.mrb[35].mxu1 }
 0x1fb   :  { %v4076_v7 = vadd.f32 %v5335_v4, %v4036_v0  ;;  %v4475_v51 = vand.u32 127, %v4474_v50 }
 0x1fd   :  { %vm4476_vm1 = vcmp.lt.s32.totalorder %v4475_v51, 10 }
 0x215   :  { %v5355_v8 = vpop.f32.mrb[36].mxu0 }
 0x216   :  { %v5356_v9 = vpop.f32.mrb[37].mxu0 }
 0x217   :  { %v5357_v10 = vadd.f32 %v5356_v9, %v5355_v8  ;;  %v5358_v11 = vpop.f32.mrb[38].mxu0  ;;  %v5377_v12 = vpop.f32.mrb[36].mxu1 }
 0x218   :  { %v5359_v13 = vpop.f32.mrb[39].mxu0  ;;  %v5378_v14 = vpop.f32.mrb[37].mxu1 }
 0x219   :  { %v4116_v15 = vadd.f32 %v5357_v10, %v4076_v7  ;;  %v5379_v2 = vadd.f32 %v5378_v14, %v5377_v12  ;;  %v5380_v16 = vpop.f32.mrb[38].mxu1 }
 0x21a   :  { %v5381_v17 = vpop.f32.mrb[39].mxu1 }
 0x21b   :  { %v4156_v18 = vadd.f32 %v5379_v2, %v4116_v15 }
 0x235   :  { %v5399_v19 = vpop.f32.mrb[40].mxu0 }
 0x236   :  { %v5400_v20 = vpop.f32.mrb[41].mxu0 }
 0x237   :  { %v5401_v21 = vadd.f32 %v5400_v20, %v5399_v19  ;;  %v5402_v22 = vpop.f32.mrb[42].mxu0  ;;  %v5421_v23 = vpop.f32.mrb[40].mxu1 }
 0x238   :  { %v5403_v24 = vpop.f32.mrb[43].mxu0  ;;  %v5422_v25 = vpop.f32.mrb[41].mxu1 }
 0x239   :  { %v4196_v26 = vadd.f32 %v5401_v21, %v4156_v18  ;;  %v5423_v27 = vadd.f32 %v5422_v25, %v5421_v23  ;;  %v5424_v28 = vpop.f32.mrb[42].mxu1 }
 0x23a   :  { %v5425_v29 = vpop.f32.mrb[43].mxu1 }
 0x23b   :  { %v4236_v30 = vadd.f32 %v5423_v27, %v4196_v26 }
 0x255   :  { %v5443_v31 = vpop.f32.mrb[44].mxu0 }
 0x256   :  { %v5444_v32 = vpop.f32.mrb[45].mxu0 }
 0x257   :  { %v5445_v33 = vadd.f32 %v5444_v32, %v5443_v31  ;;  %v5446_v34 = vpop.f32.mrb[46].mxu0  ;;  %v5465_v35 = vpop.f32.mrb[44].mxu1 }
 0x258   :  { %v5447_v36 = vpop.f32.mrb[47].mxu0  ;;  %v5466_v37 = vpop.f32.mrb[45].mxu1 }
 0x259   :  { %v4276_v38 = vadd.f32 %v5445_v33, %v4236_v30  ;;  %v5467_v39 = vadd.f32 %v5466_v37, %v5465_v35  ;;  %v5468_v40 = vpop.f32.mrb[46].mxu1 }
 0x25a   :  { %v5469_v41 = vpop.f32.mrb[47].mxu1 }
 0x25b   :  { %v4316_v42 = vadd.f32 %v5467_v39, %v4276_v38 }
 0x275   :  { %v4355_v43 = vpop.f32.mrb[48].mxu0 }
 0x276   :  { %v4356_v44 = vadd.f32 %v4355_v43, %v4316_v42  ;;  %v5507_v45 = vpop.f32.mrb[49].mxu0 }
 0x277   :  { %v4358_v46 = vpop.f32.mrb[50].mxu0 }
 0x278   :  { %v4361_v47 = vmax.f32 %v4356_v44, 0.0  ;;  %v5508_v48 = vpop.f32.mrb[51].mxu0 }
 0x27a   :  { %v4362_v49 = vpack.c.bf16 %v4361_v47, %v4361_v47 }
 0x27c   :  { %5526 = vmatmul.mubr.bf16.vlgmr.msra.gmra.mrb[48].mxu1 %v4362_v49 }
 0x34f   :  { %v4468_v53 = vpop.f32.mrb[48].mxu1 }
 0x350   :  { %v4469_v54 = vadd.f32 %v4934_v52, %v4468_v53  ;;  %v5527_v55 = vpop.f32.mrb[49].mxu1 }
 0x351   :  { %v4471_v56 = vpop.f32.mrb[50].mxu1 }
 0x352   :  { %v5528_v57 = vpop.f32.mrb[51].mxu1  ;;  %v4477_v58 = vsel %vm4476_vm1, %v4469_v54, -1e+30 }
 0x353   :  { %4478 = vmax.xlane.f32.xlu0 %v4477_v58 }
 0x3e0   :  { %v4479_v59 = vpop.xlane.xlu0 %4478 }
 0x3e1   :  { %v4480_v60 = vsub.f32 %v4477_v58, %v4479_v59 }
 0x3e3   :  { %v4481_v61 = vmul.f32 1.442695, %v4480_v60 }
 0x3e5   :  { %5980 = vpow2.f32 %v4481_v61 }
 0x3ef   :  { %v5981_v62 = vpop.eup %5980 }
 0x3f0   :  { %4483 = vadd.xlane.f32.xlu0 %v5981_v62 }
 0x47d   :  { %v4484_v63 = vpop.xlane.xlu0 %4483 }
 0x47e   :  { %5982 = vrcp.f32 %v4484_v63 }
 0x488   :  { %v5983_v0 = vpop.eup %5982 }
 0x489   :  { %v4486_v1 = vmul.f32 %v5983_v0, %v5981_v62 }
 0x48b   :  { %4487 = vst [vmem:[%s7335_s5] sm:$0xff] %v4486_v1 }

</bundles_post_ra>
